<compile_context>
chip_gen: v6e
topology: v6e:2x2x1
jax: 0.10.0
libtpu: 0.0.40
codegen_flags: <defaults>
</compile_context>

<pallas_src>
import functools

import jax
import jax.numpy as jnp
import numpy as np
from jax.experimental import pallas as pl
from jax.experimental.pallas import tpu as pltpu

LN_EPS = 1e-5
_INV_SQRT2 = np.float32(0.7071067811865476)


# ----------------------------- in-kernel math -----------------------------

def _ln(x, g, b):
    mu = jnp.mean(x, axis=-1, keepdims=True)
    var = jnp.mean((x - mu) ** 2, axis=-1, keepdims=True)
    return (x - mu) * jax.lax.rsqrt(var + LN_EPS) * g + b


def _gelu(x):  # exact (erf) GELU, matching torch.nn.GELU default
    return 0.5 * x * (1.0 + jax.lax.erf(x * _INV_SQRT2))


# ----------------------------- fused kernel -----------------------------

def ktformer_kernel(x_ref, we_ref, add_ref, wqkv_ref, wproj_ref,
                    w1_ref, w2_ref, bias_ref, o_ref,
                    *, num_layers, num_heads, num_batches, tokens, dim, hidden):
    # x_ref:    (B*N, E)
    # we_ref:   (E, D)
    # add_ref:  (N, D)          = pos_t + pos_j + embed_bias (un-tiled)
    # wqkv_ref: (L, D, 3*D)     Q columns pre-scaled by 1/sqrt(hd)
    # wproj_ref:(L, D, D)
    # w1_ref:   (L, D, Hm)      w2_ref: (L, Hm, D)
    # bias_ref: (L, 8, W)       rows: [bqkv(3D), bb1(Hm), g1, b1, bproj, g2, b2, bb2] lane-padded
    N = tokens
    H = num_heads
    D = dim
    hd = D // H

    # patch embed + positional embeddings (+ embed bias folded into add_ref)
    addv = add_ref[...]
    if num_batches > 1:
        addv = jnp.concatenate([addv] * num_batches, axis=0)          # (B*N, D)
    x = jnp.dot(x_ref[...], we_ref[...], preferred_element_type=jnp.float32) + addv

    for l in range(num_layers):
        bv = bias_ref[l]                       # (8, W)
        bqkv = bv[0:1, 0:3 * D]
        bb1 = bv[1:2, 0:hidden]
        g1 = bv[2:3, 0:D]
        b1 = bv[3:4, 0:D]
        bproj = bv[4:5, 0:D]
        g2 = bv[5:6, 0:D]
        b2 = bv[6:7, 0:D]
        bb2 = bv[7:8, 0:D]

        # --- attention ---
        xn = _ln(x, g1, b1)
        # one fused, lane-dense QKV matmul per layer
        qkv = jnp.dot(xn, wqkv_ref[l], preferred_element_type=jnp.float32) + bqkv   # (B*N, 3D)

        ctx_batches = []
        for b in range(num_batches):
            rows = slice(b * N, (b + 1) * N)                 # static, 24-row aligned
            ctx_heads = []
            for h in range(H):
                q = qkv[rows, h * hd:(h + 1) * hd]           # (N, hd), scale pre-folded
                k = qkv[rows, D + h * hd:D + (h + 1) * hd]
                v = qkv[rows, 2 * D + h * hd:2 * D + (h + 1) * hd]
                s = jax.lax.dot_general(q, k, (((1,), (1,)), ((), ())),
                                        preferred_element_type=jnp.float32)         # (N, N)
                s = s - jnp.max(s, axis=-1, keepdims=True)
                p = jnp.exp(s)
                p = p * pl.reciprocal(jnp.sum(p, axis=-1, keepdims=True), approx=True)
                ctx_heads.append(jnp.dot(p, v, preferred_element_type=jnp.float32))  # (N, hd)
            ctx_batches.append(jnp.concatenate(ctx_heads, axis=-1))                  # (N, D)
        ctx = ctx_batches[0] if num_batches == 1 else jnp.concatenate(ctx_batches, axis=0)

        # single full-width output projection per layer
        attn = jnp.dot(ctx, wproj_ref[l], preferred_element_type=jnp.float32) + bproj
        x = x + attn

        # --- MLP ---
        xn2 = _ln(x, g2, b2)
        h1 = jnp.dot(xn2, w1_ref[l], preferred_element_type=jnp.float32) + bb1
        h1 = _gelu(h1)
        x = x + jnp.dot(h1, w2_ref[l], preferred_element_type=jnp.float32) + bb2

    o_ref[...] = x


# ----------------------------- param prep (wrapper side, runs once) -----------------------------

def _prep_params(params, num_heads):
    embed_w = params["embed_w"]                 # (E, D)
    D = embed_w.shape[1]
    hd = D // num_heads
    scale = np.float32(hd) ** np.float32(-0.5)
    hidden = params["blocks"][0]["w1"].shape[1]

    pos = (params["pos_t"] + params["pos_j"]).reshape(-1, D)          # (N, D)
    add = pos + params["embed_b"]                                     # (N, D), not batch-tiled

    # lane-padded packed bias slab width
    W = max(3 * D, hidden, 128)
    W = ((W + 127) // 128) * 128

    def pad_row(v):
        k = v.shape[-1]
        return jnp.pad(v, ((0, 0), (0, W - k)))

    # fold 1/sqrt(hd) into the Q columns of the fused QKV weight/bias
    qscale = jnp.concatenate([jnp.full((D,), scale, jnp.float32),
                              jnp.ones((2 * D,), jnp.float32)])

    wqkv, wproj, w1, w2, bias = [], [], [], [], []
    for blk in params["blocks"]:
        wqkv.append(blk["wqkv"] * qscale[None, :])          # (D, 3D)
        wproj.append(blk["wproj"])                          # (D, D)
        w1.append(blk["w1"])                                # (D, Hm)
        w2.append(blk["w2"])                                # (Hm, D)
        bias.append(jnp.concatenate([
            pad_row(blk["bqkv"] * qscale[None, :]),
            pad_row(blk["bb1"]),
            pad_row(blk["g1"]), pad_row(blk["b1"]), pad_row(blk["bproj"]),
            pad_row(blk["g2"]), pad_row(blk["b2"]), pad_row(blk["bb2"]),
        ], axis=0))                                          # (8, W)

    return dict(
        embed_w=embed_w,
        add=add,
        wqkv=jnp.stack(wqkv, axis=0),        # (L, D, 3D)
        wproj=jnp.stack(wproj, axis=0),      # (L, D, D)
        w1=jnp.stack(w1, axis=0),            # (L, D, Hm)
        w2=jnp.stack(w2, axis=0),            # (L, Hm, D)
        bias=jnp.stack(bias, axis=0),        # (L, 8, W)
    )


def ktformer_pallas(feat_joint, params, num_heads):
    B, T, J, E = feat_joint.shape
    D = params["embed_w"].shape[1]
    L = len(params["blocks"])
    hidden = params["blocks"][0]["w1"].shape[1]
    N = T * J
    assert D % num_heads == 0
    # N = T*J is a multiple of 8 here (24); other shapes stay correct but lose sublane alignment.

    prep = _prep_params(params, num_heads)
    x_flat = feat_joint.reshape(B * N, E)

    kernel = functools.partial(ktformer_kernel, num_layers=L, num_heads=num_heads,
                               num_batches=B, tokens=N, dim=D, hidden=hidden)
    vmem = pl.BlockSpec(memory_space=pltpu.MemorySpace.VMEM)

    out = pl.pallas_call(
        kernel,
        out_shape=jax.ShapeDtypeStruct((B * N, D), jnp.float32),
        in_specs=[vmem] * 8,
        out_specs=vmem,
    )(x_flat, prep["embed_w"], prep["add"], prep["wqkv"], prep["wproj"],
      prep["w1"], prep["w2"], prep["bias"])
    return out.reshape(B, T, J, D)


# ----------------------------- pure-JAX reference -----------------------------

def _ref_block_2d(x, blk, num_heads):
    D = x.shape[-1]
    hd = D // num_heads
    xn = _ln(x, blk["g1"], blk["b1"])
    qkv = xn @ blk["wqkv"] + blk["bqkv"]
    q, k, v = qkv[:, :D], qkv[:, D:2 * D], qkv[:, 2 * D:]
    outs = []
    for h in range(num_heads):
        sl = slice(h * hd, (h + 1) * hd)
        s = (q[:, sl] @ k[:, sl].T) * (hd ** -0.5)
        p = jax.nn.softmax(s, axis=-1)
        outs.append(p @ v[:, sl])
    attn = jnp.concatenate(outs, axis=-1) @ blk["wproj"] + blk["bproj"]
    x = x + attn
    xn2 = _ln(x, blk["g2"], blk["b2"])
    h1 = _gelu(xn2 @ blk["w1"] + blk["bb1"])
    return x + (h1 @ blk["w2"] + blk["bb2"])


def ktformer_ref(feat_joint, params, num_heads):
    B, T, J, E = feat_joint.shape
    D = params["embed_w"].shape[1]
    pos = (params["pos_t"] + params["pos_j"]).reshape(1, T * J, D)
    x = feat_joint.reshape(B, T * J, E) @ params["embed_w"] + params["embed_b"] + pos
    for blk in params["blocks"]:
        x = jax.vmap(lambda xb: _ref_block_2d(xb, blk, num_heads))(x)
    return x.reshape(B, T, J, D)


# ----------------------------- params -----------------------------

def init_params(key, in_chans, embed_dim, num_blocks, num_joints, mlp_ratio):
    hidden = int(embed_dim * mlp_ratio)
    keys = jax.random.split(key, 4 + num_blocks)
    p = {
        "embed_w": 0.02 * jax.random.normal(keys[0], (in_chans, embed_dim), jnp.float32),
        "embed_b": jnp.zeros((1, embed_dim), jnp.float32),
        "pos_t": jax.random.normal(keys[1], (1, 3, 1, embed_dim), jnp.float32),
        "pos_j": jax.random.normal(keys[2], (1, 1, num_joints, embed_dim), jnp.float32),
        "blocks": [],
    }
    for bi in range(num_blocks):
        bk = jax.random.split(keys[4 + bi], 4)
        p["blocks"].append({
            "g1": jnp.ones((1, embed_dim), jnp.float32),
            "b1": jnp.zeros((1, embed_dim), jnp.float32),
            "wqkv": 0.02 * jax.random.normal(bk[0], (embed_dim, 3 * embed_dim), jnp.float32),
            "bqkv": jnp.zeros((1, 3 * embed_dim), jnp.float32),
            "wproj": 0.02 * jax.random.normal(bk[1], (embed_dim, embed_dim), jnp.float32),
            "bproj": jnp.zeros((1, embed_dim), jnp.float32),
            "g2": jnp.ones((1, embed_dim), jnp.float32),
            "b2": jnp.zeros((1, embed_dim), jnp.float32),
            "w1": 0.02 * jax.random.normal(bk[2], (embed_dim, hidden), jnp.float32),
            "bb1": jnp.zeros((1, hidden), jnp.float32),
            "w2": 0.02 * jax.random.normal(bk[3], (hidden, embed_dim), jnp.float32),
            "bb2": jnp.zeros((1, embed_dim), jnp.float32),
        })
    return p


# ----------------------------- main -----------------------------

if __name__ == "__main__":
    B, T, J = 2, 3, 8            # T must be 3 (pos_embed_t has temporal size 3)
    in_chans = 32
    embed_dim = 32
    num_blocks = 4
    num_heads = 4
    mlp_ratio = 4.0

    key = jax.random.PRNGKey(0)
    kx, kp = jax.random.split(key)
    feat_joint = jax.random.normal(kx, (B, T, J, in_chans), jnp.float32)
    params = init_params(kp, in_chans, embed_dim, num_blocks, J, mlp_ratio)

    out = ktformer_pallas(feat_joint, params, num_heads)
    out = jax.block_until_ready(out)

    ref = ktformer_ref(feat_joint, params, num_heads)
    assert out.shape == (B, T, J, embed_dim), out.shape
    np.testing.assert_allclose(np.asarray(out), np.asarray(ref), rtol=5e-2, atol=5e-2)

    print("KERNEL_OK")
</pallas_src>

<mosaic_0001>
module attributes {stable_mosaic.version = 11 : i64} {
  func.func @ktformer_kernel(%arg0: memref<48x32xf32, #tpu.memory_space<vmem>>, %arg1: memref<32x32xf32, #tpu.memory_space<vmem>>, %arg2: memref<24x32xf32, #tpu.memory_space<vmem>>, %arg3: memref<4x32x96xf32, #tpu.memory_space<vmem>>, %arg4: memref<4x32x32xf32, #tpu.memory_space<vmem>>, %arg5: memref<4x32x128xf32, #tpu.memory_space<vmem>>, %arg6: memref<4x128x32xf32, #tpu.memory_space<vmem>>, %arg7: memref<4x8x128xf32, #tpu.memory_space<vmem>>, %arg8: memref<48x32xf32, #tpu.memory_space<vmem>>) attributes {dimension_semantics = [], scalar_prefetch = 0 : i64, scratch_operands = 0 : i64, tpu.core_type = #tpu.core_type<tc>} {
    %c0 = arith.constant 0 : index
    %c0_0 = arith.constant 0 : index
    %0 = vector.load %arg2[%c0, %c0_0] : memref<24x32xf32, #tpu.memory_space<vmem>>, vector<24x32xf32>
    %1 = tpu.concatenate %0, %0 in 0 : vector<24x32xf32>, vector<24x32xf32> -> vector<48x32xf32>
    %c0_1 = arith.constant 0 : index
    %c0_2 = arith.constant 0 : index
    %2 = vector.load %arg0[%c0_1, %c0_2] : memref<48x32xf32, #tpu.memory_space<vmem>>, vector<48x32xf32>
    %c0_3 = arith.constant 0 : index
    %c0_4 = arith.constant 0 : index
    %3 = vector.load %arg1[%c0_3, %c0_4] : memref<32x32xf32, #tpu.memory_space<vmem>>, vector<32x32xf32>
    %cst = arith.constant dense<0.000000e+00> : vector<48x32xf32>
    %4 = tpu.matmul %2, %3, %cst {dimension_numbers = #tpu.dot_dimension_numbers<[1], [0], [0], [1], [0, 0, 1, 1], [], []>} : vector<48x32xf32>, vector<32x32xf32>, vector<48x32xf32> -> vector<48x32xf32>
    %5 = arith.addf %4, %1 : vector<48x32xf32>
    %c0_5 = arith.constant 0 : index
    %c0_6 = arith.constant 0 : index
    %c0_7 = arith.constant 0 : index
    %6 = vector.load %arg7[%c0_5, %c0_6, %c0_7] : memref<4x8x128xf32, #tpu.memory_space<vmem>>, vector<1x8x128xf32>
    %7 = vector.shape_cast %6 : vector<1x8x128xf32> to vector<8x128xf32>
    %8 = vector.extract_strided_slice %7 {offsets = [0, 0], sizes = [1, 96], strides = [1, 1]} : vector<8x128xf32> to vector<1x96xf32>
    %9 = vector.extract_strided_slice %7 {offsets = [1, 0], sizes = [1, 128], strides = [1, 1]} : vector<8x128xf32> to vector<1x128xf32>
    %10 = vector.extract_strided_slice %7 {offsets = [2, 0], sizes = [1, 32], strides = [1, 1]} : vector<8x128xf32> to vector<1x32xf32>
    %11 = vector.extract_strided_slice %7 {offsets = [3, 0], sizes = [1, 32], strides = [1, 1]} : vector<8x128xf32> to vector<1x32xf32>
    %12 = vector.extract_strided_slice %7 {offsets = [4, 0], sizes = [1, 32], strides = [1, 1]} : vector<8x128xf32> to vector<1x32xf32>
    %13 = vector.extract_strided_slice %7 {offsets = [5, 0], sizes = [1, 32], strides = [1, 1]} : vector<8x128xf32> to vector<1x32xf32>
    %14 = vector.extract_strided_slice %7 {offsets = [6, 0], sizes = [1, 32], strides = [1, 1]} : vector<8x128xf32> to vector<1x32xf32>
    %15 = vector.extract_strided_slice %7 {offsets = [7, 0], sizes = [1, 32], strides = [1, 1]} : vector<8x128xf32> to vector<1x32xf32>
    %cst_8 = arith.constant dense<0.000000e+00> : vector<48xf32>
    %16 = vector.multi_reduction <add>, %5, %cst_8 [1] : vector<48x32xf32> to vector<48xf32>
    %17 = vector.shape_cast %16 : vector<48xf32> to vector<48x1xf32>
    %cst_9 = arith.constant 3.200000e+01 : f32
    %18 = vector.broadcast %cst_9 : f32 to vector<48x1xf32>
    %19 = arith.divf %17, %18 : vector<48x1xf32>
    %20 = vector.broadcast %19 : vector<48x1xf32> to vector<48x32xf32>
    %21 = arith.subf %5, %20 : vector<48x32xf32>
    %22 = arith.mulf %21, %21 : vector<48x32xf32>
    %cst_10 = arith.constant dense<0.000000e+00> : vector<48xf32>
    %23 = vector.multi_reduction <add>, %22, %cst_10 [1] : vector<48x32xf32> to vector<48xf32>
    %24 = vector.shape_cast %23 : vector<48xf32> to vector<48x1xf32>
    %cst_11 = arith.constant 3.200000e+01 : f32
    %25 = vector.broadcast %cst_11 : f32 to vector<48x1xf32>
    %26 = arith.divf %24, %25 : vector<48x1xf32>
    %27 = vector.broadcast %19 : vector<48x1xf32> to vector<48x32xf32>
    %28 = arith.subf %5, %27 : vector<48x32xf32>
    %cst_12 = arith.constant 9.99999974E-6 : f32
    %29 = vector.broadcast %cst_12 : f32 to vector<48x1xf32>
    %30 = arith.addf %26, %29 : vector<48x1xf32>
    %31 = math.rsqrt %30 : vector<48x1xf32>
    %32 = vector.broadcast %31 : vector<48x1xf32> to vector<48x32xf32>
    %33 = arith.mulf %28, %32 : vector<48x32xf32>
    %34 = vector.broadcast %10 : vector<1x32xf32> to vector<48x32xf32>
    %35 = arith.mulf %33, %34 : vector<48x32xf32>
    %36 = vector.broadcast %11 : vector<1x32xf32> to vector<48x32xf32>
    %37 = arith.addf %35, %36 : vector<48x32xf32>
    %c0_13 = arith.constant 0 : index
    %c0_14 = arith.constant 0 : index
    %c0_15 = arith.constant 0 : index
    %38 = vector.load %arg3[%c0_13, %c0_14, %c0_15] : memref<4x32x96xf32, #tpu.memory_space<vmem>>, vector<1x32x96xf32>
    %39 = vector.shape_cast %38 : vector<1x32x96xf32> to vector<32x96xf32>
    %cst_16 = arith.constant dense<0.000000e+00> : vector<48x96xf32>
    %40 = tpu.matmul %37, %39, %cst_16 {dimension_numbers = #tpu.dot_dimension_numbers<[1], [0], [0], [1], [0, 0, 1, 1], [], []>} : vector<48x32xf32>, vector<32x96xf32>, vector<48x96xf32> -> vector<48x96xf32>
    %41 = vector.broadcast %8 : vector<1x96xf32> to vector<48x96xf32>
    %42 = arith.addf %40, %41 : vector<48x96xf32>
    %43 = vector.extract_strided_slice %42 {offsets = [0, 0], sizes = [24, 8], strides = [1, 1]} : vector<48x96xf32> to vector<24x8xf32>
    %44 = vector.extract_strided_slice %42 {offsets = [0, 32], sizes = [24, 8], strides = [1, 1]} : vector<48x96xf32> to vector<24x8xf32>
    %45 = vector.extract_strided_slice %42 {offsets = [0, 64], sizes = [24, 8], strides = [1, 1]} : vector<48x96xf32> to vector<24x8xf32>
    %cst_17 = arith.constant dense<0.000000e+00> : vector<24x24xf32>
    %46 = tpu.matmul %43, %44, %cst_17 {dimension_numbers = #tpu.dot_dimension_numbers<[1], [1], [0], [0], [0, 0, 1, 0], [], []>} : vector<24x8xf32>, vector<24x8xf32>, vector<24x24xf32> -> vector<24x24xf32>
    %cst_18 = arith.constant dense<0xFF800000> : vector<24xf32>
    %47 = vector.multi_reduction <maximumf>, %46, %cst_18 [1] : vector<24x24xf32> to vector<24xf32>
    %48 = vector.shape_cast %47 : vector<24xf32> to vector<24x1xf32>
    %49 = vector.broadcast %48 : vector<24x1xf32> to vector<24x24xf32>
    %50 = arith.subf %46, %49 : vector<24x24xf32>
    %51 = math.exp %50 : vector<24x24xf32>
    %cst_19 = arith.constant dense<0.000000e+00> : vector<24xf32>
    %52 = vector.multi_reduction <add>, %51, %cst_19 [1] : vector<24x24xf32> to vector<24xf32>
    %53 = vector.shape_cast %52 : vector<24xf32> to vector<24x1xf32>
    %54 = tpu.reciprocal %53 {approx = true} : vector<24x1xf32> -> vector<24x1xf32>
    %55 = vector.broadcast %54 : vector<24x1xf32> to vector<24x24xf32>
    %56 = arith.mulf %51, %55 : vector<24x24xf32>
    %cst_20 = arith.constant dense<0.000000e+00> : vector<24x8xf32>
    %57 = tpu.matmul %56, %45, %cst_20 {dimension_numbers = #tpu.dot_dimension_numbers<[1], [0], [0], [1], [0, 0, 1, 1], [], []>} : vector<24x24xf32>, vector<24x8xf32>, vector<24x8xf32> -> vector<24x8xf32>
    %58 = vector.extract_strided_slice %42 {offsets = [0, 8], sizes = [24, 8], strides = [1, 1]} : vector<48x96xf32> to vector<24x8xf32>
    %59 = vector.extract_strided_slice %42 {offsets = [0, 40], sizes = [24, 8], strides = [1, 1]} : vector<48x96xf32> to vector<24x8xf32>
    %60 = vector.extract_strided_slice %42 {offsets = [0, 72], sizes = [24, 8], strides = [1, 1]} : vector<48x96xf32> to vector<24x8xf32>
    %cst_21 = arith.constant dense<0.000000e+00> : vector<24x24xf32>
    %61 = tpu.matmul %58, %59, %cst_21 {dimension_numbers = #tpu.dot_dimension_numbers<[1], [1], [0], [0], [0, 0, 1, 0], [], []>} : vector<24x8xf32>, vector<24x8xf32>, vector<24x24xf32> -> vector<24x24xf32>
    %cst_22 = arith.constant dense<0xFF800000> : vector<24xf32>
    %62 = vector.multi_reduction <maximumf>, %61, %cst_22 [1] : vector<24x24xf32> to vector<24xf32>
    %63 = vector.shape_cast %62 : vector<24xf32> to vector<24x1xf32>
    %64 = vector.broadcast %63 : vector<24x1xf32> to vector<24x24xf32>
    %65 = arith.subf %61, %64 : vector<24x24xf32>
    %66 = math.exp %65 : vector<24x24xf32>
    %cst_23 = arith.constant dense<0.000000e+00> : vector<24xf32>
    %67 = vector.multi_reduction <add>, %66, %cst_23 [1] : vector<24x24xf32> to vector<24xf32>
    %68 = vector.shape_cast %67 : vector<24xf32> to vector<24x1xf32>
    %69 = tpu.reciprocal %68 {approx = true} : vector<24x1xf32> -> vector<24x1xf32>
    %70 = vector.broadcast %69 : vector<24x1xf32> to vector<24x24xf32>
    %71 = arith.mulf %66, %70 : vector<24x24xf32>
    %cst_24 = arith.constant dense<0.000000e+00> : vector<24x8xf32>
    %72 = tpu.matmul %71, %60, %cst_24 {dimension_numbers = #tpu.dot_dimension_numbers<[1], [0], [0], [1], [0, 0, 1, 1], [], []>} : vector<24x24xf32>, vector<24x8xf32>, vector<24x8xf32> -> vector<24x8xf32>
    %73 = vector.extract_strided_slice %42 {offsets = [0, 16], sizes = [24, 8], strides = [1, 1]} : vector<48x96xf32> to vector<24x8xf32>
    %74 = vector.extract_strided_slice %42 {offsets = [0, 48], sizes = [24, 8], strides = [1, 1]} : vector<48x96xf32> to vector<24x8xf32>
    %75 = vector.extract_strided_slice %42 {offsets = [0, 80], sizes = [24, 8], strides = [1, 1]} : vector<48x96xf32> to vector<24x8xf32>
    %cst_25 = arith.constant dense<0.000000e+00> : vector<24x24xf32>
    %76 = tpu.matmul %73, %74, %cst_25 {dimension_numbers = #tpu.dot_dimension_numbers<[1], [1], [0], [0], [0, 0, 1, 0], [], []>} : vector<24x8xf32>, vector<24x8xf32>, vector<24x24xf32> -> vector<24x24xf32>
    %cst_26 = arith.constant dense<0xFF800000> : vector<24xf32>
    %77 = vector.multi_reduction <maximumf>, %76, %cst_26 [1] : vector<24x24xf32> to vector<24xf32>
    %78 = vector.shape_cast %77 : vector<24xf32> to vector<24x1xf32>
    %79 = vector.broadcast %78 : vector<24x1xf32> to vector<24x24xf32>
    %80 = arith.subf %76, %79 : vector<24x24xf32>
    %81 = math.exp %80 : vector<24x24xf32>
    %cst_27 = arith.constant dense<0.000000e+00> : vector<24xf32>
    %82 = vector.multi_reduction <add>, %81, %cst_27 [1] : vector<24x24xf32> to vector<24xf32>
    %83 = vector.shape_cast %82 : vector<24xf32> to vector<24x1xf32>
    %84 = tpu.reciprocal %83 {approx = true} : vector<24x1xf32> -> vector<24x1xf32>
    %85 = vector.broadcast %84 : vector<24x1xf32> to vector<24x24xf32>
    %86 = arith.mulf %81, %85 : vector<24x24xf32>
    %cst_28 = arith.constant dense<0.000000e+00> : vector<24x8xf32>
    %87 = tpu.matmul %86, %75, %cst_28 {dimension_numbers = #tpu.dot_dimension_numbers<[1], [0], [0], [1], [0, 0, 1, 1], [], []>} : vector<24x24xf32>, vector<24x8xf32>, vector<24x8xf32> -> vector<24x8xf32>
    %88 = vector.extract_strided_slice %42 {offsets = [0, 24], sizes = [24, 8], strides = [1, 1]} : vector<48x96xf32> to vector<24x8xf32>
    %89 = vector.extract_strided_slice %42 {offsets = [0, 56], sizes = [24, 8], strides = [1, 1]} : vector<48x96xf32> to vector<24x8xf32>
    %90 = vector.extract_strided_slice %42 {offsets = [0, 88], sizes = [24, 8], strides = [1, 1]} : vector<48x96xf32> to vector<24x8xf32>
    %cst_29 = arith.constant dense<0.000000e+00> : vector<24x24xf32>
    %91 = tpu.matmul %88, %89, %cst_29 {dimension_numbers = #tpu.dot_dimension_numbers<[1], [1], [0], [0], [0, 0, 1, 0], [], []>} : vector<24x8xf32>, vector<24x8xf32>, vector<24x24xf32> -> vector<24x24xf32>
    %cst_30 = arith.constant dense<0xFF800000> : vector<24xf32>
    %92 = vector.multi_reduction <maximumf>, %91, %cst_30 [1] : vector<24x24xf32> to vector<24xf32>
    %93 = vector.shape_cast %92 : vector<24xf32> to vector<24x1xf32>
    %94 = vector.broadcast %93 : vector<24x1xf32> to vector<24x24xf32>
    %95 = arith.subf %91, %94 : vector<24x24xf32>
    %96 = math.exp %95 : vector<24x24xf32>
    %cst_31 = arith.constant dense<0.000000e+00> : vector<24xf32>
    %97 = vector.multi_reduction <add>, %96, %cst_31 [1] : vector<24x24xf32> to vector<24xf32>
    %98 = vector.shape_cast %97 : vector<24xf32> to vector<24x1xf32>
    %99 = tpu.reciprocal %98 {approx = true} : vector<24x1xf32> -> vector<24x1xf32>
    %100 = vector.broadcast %99 : vector<24x1xf32> to vector<24x24xf32>
    %101 = arith.mulf %96, %100 : vector<24x24xf32>
    %cst_32 = arith.constant dense<0.000000e+00> : vector<24x8xf32>
    %102 = tpu.matmul %101, %90, %cst_32 {dimension_numbers = #tpu.dot_dimension_numbers<[1], [0], [0], [1], [0, 0, 1, 1], [], []>} : vector<24x24xf32>, vector<24x8xf32>, vector<24x8xf32> -> vector<24x8xf32>
    %103 = tpu.concatenate %57, %72, %87, %102 in 1 : vector<24x8xf32>, vector<24x8xf32>, vector<24x8xf32>, vector<24x8xf32> -> vector<24x32xf32>
    %104 = vector.extract_strided_slice %42 {offsets = [24, 0], sizes = [24, 8], strides = [1, 1]} : vector<48x96xf32> to vector<24x8xf32>
    %105 = vector.extract_strided_slice %42 {offsets = [24, 32], sizes = [24, 8], strides = [1, 1]} : vector<48x96xf32> to vector<24x8xf32>
    %106 = vector.extract_strided_slice %42 {offsets = [24, 64], sizes = [24, 8], strides = [1, 1]} : vector<48x96xf32> to vector<24x8xf32>
    %cst_33 = arith.constant dense<0.000000e+00> : vector<24x24xf32>
    %107 = tpu.matmul %104, %105, %cst_33 {dimension_numbers = #tpu.dot_dimension_numbers<[1], [1], [0], [0], [0, 0, 1, 0], [], []>} : vector<24x8xf32>, vector<24x8xf32>, vector<24x24xf32> -> vector<24x24xf32>
    %cst_34 = arith.constant dense<0xFF800000> : vector<24xf32>
    %108 = vector.multi_reduction <maximumf>, %107, %cst_34 [1] : vector<24x24xf32> to vector<24xf32>
    %109 = vector.shape_cast %108 : vector<24xf32> to vector<24x1xf32>
    %110 = vector.broadcast %109 : vector<24x1xf32> to vector<24x24xf32>
    %111 = arith.subf %107, %110 : vector<24x24xf32>
    %112 = math.exp %111 : vector<24x24xf32>
    %cst_35 = arith.constant dense<0.000000e+00> : vector<24xf32>
    %113 = vector.multi_reduction <add>, %112, %cst_35 [1] : vector<24x24xf32> to vector<24xf32>
    %114 = vector.shape_cast %113 : vector<24xf32> to vector<24x1xf32>
    %115 = tpu.reciprocal %114 {approx = true} : vector<24x1xf32> -> vector<24x1xf32>
    %116 = vector.broadcast %115 : vector<24x1xf32> to vector<24x24xf32>
    %117 = arith.mulf %112, %116 : vector<24x24xf32>
    %cst_36 = arith.constant dense<0.000000e+00> : vector<24x8xf32>
    %118 = tpu.matmul %117, %106, %cst_36 {dimension_numbers = #tpu.dot_dimension_numbers<[1], [0], [0], [1], [0, 0, 1, 1], [], []>} : vector<24x24xf32>, vector<24x8xf32>, vector<24x8xf32> -> vector<24x8xf32>
    %119 = vector.extract_strided_slice %42 {offsets = [24, 8], sizes = [24, 8], strides = [1, 1]} : vector<48x96xf32> to vector<24x8xf32>
    %120 = vector.extract_strided_slice %42 {offsets = [24, 40], sizes = [24, 8], strides = [1, 1]} : vector<48x96xf32> to vector<24x8xf32>
    %121 = vector.extract_strided_slice %42 {offsets = [24, 72], sizes = [24, 8], strides = [1, 1]} : vector<48x96xf32> to vector<24x8xf32>
    %cst_37 = arith.constant dense<0.000000e+00> : vector<24x24xf32>
    %122 = tpu.matmul %119, %120, %cst_37 {dimension_numbers = #tpu.dot_dimension_numbers<[1], [1], [0], [0], [0, 0, 1, 0], [], []>} : vector<24x8xf32>, vector<24x8xf32>, vector<24x24xf32> -> vector<24x24xf32>
    %cst_38 = arith.constant dense<0xFF800000> : vector<24xf32>
    %123 = vector.multi_reduction <maximumf>, %122, %cst_38 [1] : vector<24x24xf32> to vector<24xf32>
    %124 = vector.shape_cast %123 : vector<24xf32> to vector<24x1xf32>
    %125 = vector.broadcast %124 : vector<24x1xf32> to vector<24x24xf32>
    %126 = arith.subf %122, %125 : vector<24x24xf32>
    %127 = math.exp %126 : vector<24x24xf32>
    %cst_39 = arith.constant dense<0.000000e+00> : vector<24xf32>
    %128 = vector.multi_reduction <add>, %127, %cst_39 [1] : vector<24x24xf32> to vector<24xf32>
    %129 = vector.shape_cast %128 : vector<24xf32> to vector<24x1xf32>
    %130 = tpu.reciprocal %129 {approx = true} : vector<24x1xf32> -> vector<24x1xf32>
    %131 = vector.broadcast %130 : vector<24x1xf32> to vector<24x24xf32>
    %132 = arith.mulf %127, %131 : vector<24x24xf32>
    %cst_40 = arith.constant dense<0.000000e+00> : vector<24x8xf32>
    %133 = tpu.matmul %132, %121, %cst_40 {dimension_numbers = #tpu.dot_dimension_numbers<[1], [0], [0], [1], [0, 0, 1, 1], [], []>} : vector<24x24xf32>, vector<24x8xf32>, vector<24x8xf32> -> vector<24x8xf32>
    %134 = vector.extract_strided_slice %42 {offsets = [24, 16], sizes = [24, 8], strides = [1, 1]} : vector<48x96xf32> to vector<24x8xf32>
    %135 = vector.extract_strided_slice %42 {offsets = [24, 48], sizes = [24, 8], strides = [1, 1]} : vector<48x96xf32> to vector<24x8xf32>
    %136 = vector.extract_strided_slice %42 {offsets = [24, 80], sizes = [24, 8], strides = [1, 1]} : vector<48x96xf32> to vector<24x8xf32>
    %cst_41 = arith.constant dense<0.000000e+00> : vector<24x24xf32>
    %137 = tpu.matmul %134, %135, %cst_41 {dimension_numbers = #tpu.dot_dimension_numbers<[1], [1], [0], [0], [0, 0, 1, 0], [], []>} : vector<24x8xf32>, vector<24x8xf32>, vector<24x24xf32> -> vector<24x24xf32>
    %cst_42 = arith.constant dense<0xFF800000> : vector<24xf32>
    %138 = vector.multi_reduction <maximumf>, %137, %cst_42 [1] : vector<24x24xf32> to vector<24xf32>
    %139 = vector.shape_cast %138 : vector<24xf32> to vector<24x1xf32>
    %140 = vector.broadcast %139 : vector<24x1xf32> to vector<24x24xf32>
    %141 = arith.subf %137, %140 : vector<24x24xf32>
    %142 = math.exp %141 : vector<24x24xf32>
    %cst_43 = arith.constant dense<0.000000e+00> : vector<24xf32>
    %143 = vector.multi_reduction <add>, %142, %cst_43 [1] : vector<24x24xf32> to vector<24xf32>
    %144 = vector.shape_cast %143 : vector<24xf32> to vector<24x1xf32>
    %145 = tpu.reciprocal %144 {approx = true} : vector<24x1xf32> -> vector<24x1xf32>
    %146 = vector.broadcast %145 : vector<24x1xf32> to vector<24x24xf32>
    %147 = arith.mulf %142, %146 : vector<24x24xf32>
    %cst_44 = arith.constant dense<0.000000e+00> : vector<24x8xf32>
    %148 = tpu.matmul %147, %136, %cst_44 {dimension_numbers = #tpu.dot_dimension_numbers<[1], [0], [0], [1], [0, 0, 1, 1], [], []>} : vector<24x24xf32>, vector<24x8xf32>, vector<24x8xf32> -> vector<24x8xf32>
    %149 = vector.extract_strided_slice %42 {offsets = [24, 24], sizes = [24, 8], strides = [1, 1]} : vector<48x96xf32> to vector<24x8xf32>
    %150 = vector.extract_strided_slice %42 {offsets = [24, 56], sizes = [24, 8], strides = [1, 1]} : vector<48x96xf32> to vector<24x8xf32>
    %151 = vector.extract_strided_slice %42 {offsets = [24, 88], sizes = [24, 8], strides = [1, 1]} : vector<48x96xf32> to vector<24x8xf32>
    %cst_45 = arith.constant dense<0.000000e+00> : vector<24x24xf32>
    %152 = tpu.matmul %149, %150, %cst_45 {dimension_numbers = #tpu.dot_dimension_numbers<[1], [1], [0], [0], [0, 0, 1, 0], [], []>} : vector<24x8xf32>, vector<24x8xf32>, vector<24x24xf32> -> vector<24x24xf32>
    %cst_46 = arith.constant dense<0xFF800000> : vector<24xf32>
    %153 = vector.multi_reduction <maximumf>, %152, %cst_46 [1] : vector<24x24xf32> to vector<24xf32>
    %154 = vector.shape_cast %153 : vector<24xf32> to vector<24x1xf32>
    %155 = vector.broadcast %154 : vector<24x1xf32> to vector<24x24xf32>
    %156 = arith.subf %152, %155 : vector<24x24xf32>
    %157 = math.exp %156 : vector<24x24xf32>
    %cst_47 = arith.constant dense<0.000000e+00> : vector<24xf32>
    %158 = vector.multi_reduction <add>, %157, %cst_47 [1] : vector<24x24xf32> to vector<24xf32>
    %159 = vector.shape_cast %158 : vector<24xf32> to vector<24x1xf32>
    %160 = tpu.reciprocal %159 {approx = true} : vector<24x1xf32> -> vector<24x1xf32>
    %161 = vector.broadcast %160 : vector<24x1xf32> to vector<24x24xf32>
    %162 = arith.mulf %157, %161 : vector<24x24xf32>
    %cst_48 = arith.constant dense<0.000000e+00> : vector<24x8xf32>
    %163 = tpu.matmul %162, %151, %cst_48 {dimension_numbers = #tpu.dot_dimension_numbers<[1], [0], [0], [1], [0, 0, 1, 1], [], []>} : vector<24x24xf32>, vector<24x8xf32>, vector<24x8xf32> -> vector<24x8xf32>
    %164 = tpu.concatenate %118, %133, %148, %163 in 1 : vector<24x8xf32>, vector<24x8xf32>, vector<24x8xf32>, vector<24x8xf32> -> vector<24x32xf32>
    %165 = tpu.concatenate %103, %164 in 0 : vector<24x32xf32>, vector<24x32xf32> -> vector<48x32xf32>
    %c0_49 = arith.constant 0 : index
    %c0_50 = arith.constant 0 : index
    %c0_51 = arith.constant 0 : index
    %166 = vector.load %arg4[%c0_49, %c0_50, %c0_51] : memref<4x32x32xf32, #tpu.memory_space<vmem>>, vector<1x32x32xf32>
    %167 = vector.shape_cast %166 : vector<1x32x32xf32> to vector<32x32xf32>
    %cst_52 = arith.constant dense<0.000000e+00> : vector<48x32xf32>
    %168 = tpu.matmul %165, %167, %cst_52 {dimension_numbers = #tpu.dot_dimension_numbers<[1], [0], [0], [1], [0, 0, 1, 1], [], []>} : vector<48x32xf32>, vector<32x32xf32>, vector<48x32xf32> -> vector<48x32xf32>
    %169 = vector.broadcast %12 : vector<1x32xf32> to vector<48x32xf32>
    %170 = arith.addf %168, %169 : vector<48x32xf32>
    %171 = arith.addf %5, %170 : vector<48x32xf32>
    %cst_53 = arith.constant dense<0.000000e+00> : vector<48xf32>
    %172 = vector.multi_reduction <add>, %171, %cst_53 [1] : vector<48x32xf32> to vector<48xf32>
    %173 = vector.shape_cast %172 : vector<48xf32> to vector<48x1xf32>
    %cst_54 = arith.constant 3.200000e+01 : f32
    %174 = vector.broadcast %cst_54 : f32 to vector<48x1xf32>
    %175 = arith.divf %173, %174 : vector<48x1xf32>
    %176 = vector.broadcast %175 : vector<48x1xf32> to vector<48x32xf32>
    %177 = arith.subf %171, %176 : vector<48x32xf32>
    %178 = arith.mulf %177, %177 : vector<48x32xf32>
    %cst_55 = arith.constant dense<0.000000e+00> : vector<48xf32>
    %179 = vector.multi_reduction <add>, %178, %cst_55 [1] : vector<48x32xf32> to vector<48xf32>
    %180 = vector.shape_cast %179 : vector<48xf32> to vector<48x1xf32>
    %cst_56 = arith.constant 3.200000e+01 : f32
    %181 = vector.broadcast %cst_56 : f32 to vector<48x1xf32>
    %182 = arith.divf %180, %181 : vector<48x1xf32>
    %183 = vector.broadcast %175 : vector<48x1xf32> to vector<48x32xf32>
    %184 = arith.subf %171, %183 : vector<48x32xf32>
    %cst_57 = arith.constant 9.99999974E-6 : f32
    %185 = vector.broadcast %cst_57 : f32 to vector<48x1xf32>
    %186 = arith.addf %182, %185 : vector<48x1xf32>
    %187 = math.rsqrt %186 : vector<48x1xf32>
    %188 = vector.broadcast %187 : vector<48x1xf32> to vector<48x32xf32>
    %189 = arith.mulf %184, %188 : vector<48x32xf32>
    %190 = vector.broadcast %13 : vector<1x32xf32> to vector<48x32xf32>
    %191 = arith.mulf %189, %190 : vector<48x32xf32>
    %192 = vector.broadcast %14 : vector<1x32xf32> to vector<48x32xf32>
    %193 = arith.addf %191, %192 : vector<48x32xf32>
    %c0_58 = arith.constant 0 : index
    %c0_59 = arith.constant 0 : index
    %c0_60 = arith.constant 0 : index
    %194 = vector.load %arg5[%c0_58, %c0_59, %c0_60] : memref<4x32x128xf32, #tpu.memory_space<vmem>>, vector<1x32x128xf32>
    %195 = vector.shape_cast %194 : vector<1x32x128xf32> to vector<32x128xf32>
    %cst_61 = arith.constant dense<0.000000e+00> : vector<48x128xf32>
    %196 = tpu.matmul %193, %195, %cst_61 {dimension_numbers = #tpu.dot_dimension_numbers<[1], [0], [0], [1], [0, 0, 1, 1], [], []>} : vector<48x32xf32>, vector<32x128xf32>, vector<48x128xf32> -> vector<48x128xf32>
    %197 = vector.broadcast %9 : vector<1x128xf32> to vector<48x128xf32>
    %198 = arith.addf %196, %197 : vector<48x128xf32>
    %cst_62 = arith.constant 5.000000e-01 : f32
    %199 = vector.broadcast %cst_62 : f32 to vector<48x128xf32>
    %200 = arith.mulf %199, %198 : vector<48x128xf32>
    %cst_63 = arith.constant 0.707106769 : f32
    %201 = vector.broadcast %cst_63 : f32 to vector<48x128xf32>
    %202 = arith.mulf %198, %201 : vector<48x128xf32>
    %203 = math.erf %202 : vector<48x128xf32>
    %cst_64 = arith.constant 1.000000e+00 : f32
    %204 = vector.broadcast %cst_64 : f32 to vector<48x128xf32>
    %205 = arith.addf %204, %203 : vector<48x128xf32>
    %206 = arith.mulf %200, %205 : vector<48x128xf32>
    %c0_65 = arith.constant 0 : index
    %c0_66 = arith.constant 0 : index
    %c0_67 = arith.constant 0 : index
    %207 = vector.load %arg6[%c0_65, %c0_66, %c0_67] : memref<4x128x32xf32, #tpu.memory_space<vmem>>, vector<1x128x32xf32>
    %208 = vector.shape_cast %207 : vector<1x128x32xf32> to vector<128x32xf32>
    %cst_68 = arith.constant dense<0.000000e+00> : vector<48x32xf32>
    %209 = tpu.matmul %206, %208, %cst_68 {dimension_numbers = #tpu.dot_dimension_numbers<[1], [0], [0], [1], [0, 0, 1, 1], [], []>} : vector<48x128xf32>, vector<128x32xf32>, vector<48x32xf32> -> vector<48x32xf32>
    %210 = arith.addf %171, %209 : vector<48x32xf32>
    %211 = vector.broadcast %15 : vector<1x32xf32> to vector<48x32xf32>
    %212 = arith.addf %210, %211 : vector<48x32xf32>
    %c1 = arith.constant 1 : index
    %c0_69 = arith.constant 0 : index
    %c0_70 = arith.constant 0 : index
    %213 = vector.load %arg7[%c1, %c0_69, %c0_70] : memref<4x8x128xf32, #tpu.memory_space<vmem>>, vector<1x8x128xf32>
    %214 = vector.shape_cast %213 : vector<1x8x128xf32> to vector<8x128xf32>
    %215 = vector.extract_strided_slice %214 {offsets = [0, 0], sizes = [1, 96], strides = [1, 1]} : vector<8x128xf32> to vector<1x96xf32>
    %216 = vector.extract_strided_slice %214 {offsets = [1, 0], sizes = [1, 128], strides = [1, 1]} : vector<8x128xf32> to vector<1x128xf32>
    %217 = vector.extract_strided_slice %214 {offsets = [2, 0], sizes = [1, 32], strides = [1, 1]} : vector<8x128xf32> to vector<1x32xf32>
    %218 = vector.extract_strided_slice %214 {offsets = [3, 0], sizes = [1, 32], strides = [1, 1]} : vector<8x128xf32> to vector<1x32xf32>
    %219 = vector.extract_strided_slice %214 {offsets = [4, 0], sizes = [1, 32], strides = [1, 1]} : vector<8x128xf32> to vector<1x32xf32>
    %220 = vector.extract_strided_slice %214 {offsets = [5, 0], sizes = [1, 32], strides = [1, 1]} : vector<8x128xf32> to vector<1x32xf32>
    %221 = vector.extract_strided_slice %214 {offsets = [6, 0], sizes = [1, 32], strides = [1, 1]} : vector<8x128xf32> to vector<1x32xf32>
    %222 = vector.extract_strided_slice %214 {offsets = [7, 0], sizes = [1, 32], strides = [1, 1]} : vector<8x128xf32> to vector<1x32xf32>
    %cst_71 = arith.constant dense<0.000000e+00> : vector<48xf32>
    %223 = vector.multi_reduction <add>, %212, %cst_71 [1] : vector<48x32xf32> to vector<48xf32>
    %224 = vector.shape_cast %223 : vector<48xf32> to vector<48x1xf32>
    %cst_72 = arith.constant 3.200000e+01 : f32
    %225 = vector.broadcast %cst_72 : f32 to vector<48x1xf32>
    %226 = arith.divf %224, %225 : vector<48x1xf32>
    %227 = vector.broadcast %226 : vector<48x1xf32> to vector<48x32xf32>
    %228 = arith.subf %212, %227 : vector<48x32xf32>
    %229 = arith.mulf %228, %228 : vector<48x32xf32>
    %cst_73 = arith.constant dense<0.000000e+00> : vector<48xf32>
    %230 = vector.multi_reduction <add>, %229, %cst_73 [1] : vector<48x32xf32> to vector<48xf32>
    %231 = vector.shape_cast %230 : vector<48xf32> to vector<48x1xf32>
    %cst_74 = arith.constant 3.200000e+01 : f32
    %232 = vector.broadcast %cst_74 : f32 to vector<48x1xf32>
    %233 = arith.divf %231, %232 : vector<48x1xf32>
    %234 = vector.broadcast %226 : vector<48x1xf32> to vector<48x32xf32>
    %235 = arith.subf %212, %234 : vector<48x32xf32>
    %cst_75 = arith.constant 9.99999974E-6 : f32
    %236 = vector.broadcast %cst_75 : f32 to vector<48x1xf32>
    %237 = arith.addf %233, %236 : vector<48x1xf32>
    %238 = math.rsqrt %237 : vector<48x1xf32>
    %239 = vector.broadcast %238 : vector<48x1xf32> to vector<48x32xf32>
    %240 = arith.mulf %235, %239 : vector<48x32xf32>
    %241 = vector.broadcast %217 : vector<1x32xf32> to vector<48x32xf32>
    %242 = arith.mulf %240, %241 : vector<48x32xf32>
    %243 = vector.broadcast %218 : vector<1x32xf32> to vector<48x32xf32>
    %244 = arith.addf %242, %243 : vector<48x32xf32>
    %c1_76 = arith.constant 1 : index
    %c0_77 = arith.constant 0 : index
    %c0_78 = arith.constant 0 : index
    %245 = vector.load %arg3[%c1_76, %c0_77, %c0_78] : memref<4x32x96xf32, #tpu.memory_space<vmem>>, vector<1x32x96xf32>
    %246 = vector.shape_cast %245 : vector<1x32x96xf32> to vector<32x96xf32>
    %cst_79 = arith.constant dense<0.000000e+00> : vector<48x96xf32>
    %247 = tpu.matmul %244, %246, %cst_79 {dimension_numbers = #tpu.dot_dimension_numbers<[1], [0], [0], [1], [0, 0, 1, 1], [], []>} : vector<48x32xf32>, vector<32x96xf32>, vector<48x96xf32> -> vector<48x96xf32>
    %248 = vector.broadcast %215 : vector<1x96xf32> to vector<48x96xf32>
    %249 = arith.addf %247, %248 : vector<48x96xf32>
    %250 = vector.extract_strided_slice %249 {offsets = [0, 0], sizes = [24, 8], strides = [1, 1]} : vector<48x96xf32> to vector<24x8xf32>
    %251 = vector.extract_strided_slice %249 {offsets = [0, 32], sizes = [24, 8], strides = [1, 1]} : vector<48x96xf32> to vector<24x8xf32>
    %252 = vector.extract_strided_slice %249 {offsets = [0, 64], sizes = [24, 8], strides = [1, 1]} : vector<48x96xf32> to vector<24x8xf32>
    %cst_80 = arith.constant dense<0.000000e+00> : vector<24x24xf32>
    %253 = tpu.matmul %250, %251, %cst_80 {dimension_numbers = #tpu.dot_dimension_numbers<[1], [1], [0], [0], [0, 0, 1, 0], [], []>} : vector<24x8xf32>, vector<24x8xf32>, vector<24x24xf32> -> vector<24x24xf32>
    %cst_81 = arith.constant dense<0xFF800000> : vector<24xf32>
    %254 = vector.multi_reduction <maximumf>, %253, %cst_81 [1] : vector<24x24xf32> to vector<24xf32>
    %255 = vector.shape_cast %254 : vector<24xf32> to vector<24x1xf32>
    %256 = vector.broadcast %255 : vector<24x1xf32> to vector<24x24xf32>
    %257 = arith.subf %253, %256 : vector<24x24xf32>
    %258 = math.exp %257 : vector<24x24xf32>
    %cst_82 = arith.constant dense<0.000000e+00> : vector<24xf32>
    %259 = vector.multi_reduction <add>, %258, %cst_82 [1] : vector<24x24xf32> to vector<24xf32>
    %260 = vector.shape_cast %259 : vector<24xf32> to vector<24x1xf32>
    %261 = tpu.reciprocal %260 {approx = true} : vector<24x1xf32> -> vector<24x1xf32>
    %262 = vector.broadcast %261 : vector<24x1xf32> to vector<24x24xf32>
    %263 = arith.mulf %258, %262 : vector<24x24xf32>
    %cst_83 = arith.constant dense<0.000000e+00> : vector<24x8xf32>
    %264 = tpu.matmul %263, %252, %cst_83 {dimension_numbers = #tpu.dot_dimension_numbers<[1], [0], [0], [1], [0, 0, 1, 1], [], []>} : vector<24x24xf32>, vector<24x8xf32>, vector<24x8xf32> -> vector<24x8xf32>
    %265 = vector.extract_strided_slice %249 {offsets = [0, 8], sizes = [24, 8], strides = [1, 1]} : vector<48x96xf32> to vector<24x8xf32>
    %266 = vector.extract_strided_slice %249 {offsets = [0, 40], sizes = [24, 8], strides = [1, 1]} : vector<48x96xf32> to vector<24x8xf32>
    %267 = vector.extract_strided_slice %249 {offsets = [0, 72], sizes = [24, 8], strides = [1, 1]} : vector<48x96xf32> to vector<24x8xf32>
    %cst_84 = arith.constant dense<0.000000e+00> : vector<24x24xf32>
    %268 = tpu.matmul %265, %266, %cst_84 {dimension_numbers = #tpu.dot_dimension_numbers<[1], [1], [0], [0], [0, 0, 1, 0], [], []>} : vector<24x8xf32>, vector<24x8xf32>, vector<24x24xf32> -> vector<24x24xf32>
    %cst_85 = arith.constant dense<0xFF800000> : vector<24xf32>
    %269 = vector.multi_reduction <maximumf>, %268, %cst_85 [1] : vector<24x24xf32> to vector<24xf32>
    %270 = vector.shape_cast %269 : vector<24xf32> to vector<24x1xf32>
    %271 = vector.broadcast %270 : vector<24x1xf32> to vector<24x24xf32>
    %272 = arith.subf %268, %271 : vector<24x24xf32>
    %273 = math.exp %272 : vector<24x24xf32>
    %cst_86 = arith.constant dense<0.000000e+00> : vector<24xf32>
    %274 = vector.multi_reduction <add>, %273, %cst_86 [1] : vector<24x24xf32> to vector<24xf32>
    %275 = vector.shape_cast %274 : vector<24xf32> to vector<24x1xf32>
    %276 = tpu.reciprocal %275 {approx = true} : vector<24x1xf32> -> vector<24x1xf32>
    %277 = vector.broadcast %276 : vector<24x1xf32> to vector<24x24xf32>
    %278 = arith.mulf %273, %277 : vector<24x24xf32>
    %cst_87 = arith.constant dense<0.000000e+00> : vector<24x8xf32>
    %279 = tpu.matmul %278, %267, %cst_87 {dimension_numbers = #tpu.dot_dimension_numbers<[1], [0], [0], [1], [0, 0, 1, 1], [], []>} : vector<24x24xf32>, vector<24x8xf32>, vector<24x8xf32> -> vector<24x8xf32>
    %280 = vector.extract_strided_slice %249 {offsets = [0, 16], sizes = [24, 8], strides = [1, 1]} : vector<48x96xf32> to vector<24x8xf32>
    %281 = vector.extract_strided_slice %249 {offsets = [0, 48], sizes = [24, 8], strides = [1, 1]} : vector<48x96xf32> to vector<24x8xf32>
    %282 = vector.extract_strided_slice %249 {offsets = [0, 80], sizes = [24, 8], strides = [1, 1]} : vector<48x96xf32> to vector<24x8xf32>
    %cst_88 = arith.constant dense<0.000000e+00> : vector<24x24xf32>
    %283 = tpu.matmul %280, %281, %cst_88 {dimension_numbers = #tpu.dot_dimension_numbers<[1], [1], [0], [0], [0, 0, 1, 0], [], []>} : vector<24x8xf32>, vector<24x8xf32>, vector<24x24xf32> -> vector<24x24xf32>
    %cst_89 = arith.constant dense<0xFF800000> : vector<24xf32>
    %284 = vector.multi_reduction <maximumf>, %283, %cst_89 [1] : vector<24x24xf32> to vector<24xf32>
    %285 = vector.shape_cast %284 : vector<24xf32> to vector<24x1xf32>
    %286 = vector.broadcast %285 : vector<24x1xf32> to vector<24x24xf32>
    %287 = arith.subf %283, %286 : vector<24x24xf32>
    %288 = math.exp %287 : vector<24x24xf32>
    %cst_90 = arith.constant dense<0.000000e+00> : vector<24xf32>
    %289 = vector.multi_reduction <add>, %288, %cst_90 [1] : vector<24x24xf32> to vector<24xf32>
    %290 = vector.shape_cast %289 : vector<24xf32> to vector<24x1xf32>
    %291 = tpu.reciprocal %290 {approx = true} : vector<24x1xf32> -> vector<24x1xf32>
    %292 = vector.broadcast %291 : vector<24x1xf32> to vector<24x24xf32>
    %293 = arith.mulf %288, %292 : vector<24x24xf32>
    %cst_91 = arith.constant dense<0.000000e+00> : vector<24x8xf32>
    %294 = tpu.matmul %293, %282, %cst_91 {dimension_numbers = #tpu.dot_dimension_numbers<[1], [0], [0], [1], [0, 0, 1, 1], [], []>} : vector<24x24xf32>, vector<24x8xf32>, vector<24x8xf32> -> vector<24x8xf32>
    %295 = vector.extract_strided_slice %249 {offsets = [0, 24], sizes = [24, 8], strides = [1, 1]} : vector<48x96xf32> to vector<24x8xf32>
    %296 = vector.extract_strided_slice %249 {offsets = [0, 56], sizes = [24, 8], strides = [1, 1]} : vector<48x96xf32> to vector<24x8xf32>
    %297 = vector.extract_strided_slice %249 {offsets = [0, 88], sizes = [24, 8], strides = [1, 1]} : vector<48x96xf32> to vector<24x8xf32>
    %cst_92 = arith.constant dense<0.000000e+00> : vector<24x24xf32>
    %298 = tpu.matmul %295, %296, %cst_92 {dimension_numbers = #tpu.dot_dimension_numbers<[1], [1], [0], [0], [0, 0, 1, 0], [], []>} : vector<24x8xf32>, vector<24x8xf32>, vector<24x24xf32> -> vector<24x24xf32>
    %cst_93 = arith.constant dense<0xFF800000> : vector<24xf32>
    %299 = vector.multi_reduction <maximumf>, %298, %cst_93 [1] : vector<24x24xf32> to vector<24xf32>
    %300 = vector.shape_cast %299 : vector<24xf32> to vector<24x1xf32>
    %301 = vector.broadcast %300 : vector<24x1xf32> to vector<24x24xf32>
    %302 = arith.subf %298, %301 : vector<24x24xf32>
    %303 = math.exp %302 : vector<24x24xf32>
    %cst_94 = arith.constant dense<0.000000e+00> : vector<24xf32>
    %304 = vector.multi_reduction <add>, %303, %cst_94 [1] : vector<24x24xf32> to vector<24xf32>
    %305 = vector.shape_cast %304 : vector<24xf32> to vector<24x1xf32>
    %306 = tpu.reciprocal %305 {approx = true} : vector<24x1xf32> -> vector<24x1xf32>
    %307 = vector.broadcast %306 : vector<24x1xf32> to vector<24x24xf32>
    %308 = arith.mulf %303, %307 : vector<24x24xf32>
    %cst_95 = arith.constant dense<0.000000e+00> : vector<24x8xf32>
    %309 = tpu.matmul %308, %297, %cst_95 {dimension_numbers = #tpu.dot_dimension_numbers<[1], [0], [0], [1], [0, 0, 1, 1], [], []>} : vector<24x24xf32>, vector<24x8xf32>, vector<24x8xf32> -> vector<24x8xf32>
    %310 = tpu.concatenate %264, %279, %294, %309 in 1 : vector<24x8xf32>, vector<24x8xf32>, vector<24x8xf32>, vector<24x8xf32> -> vector<24x32xf32>
    %311 = vector.extract_strided_slice %249 {offsets = [24, 0], sizes = [24, 8], strides = [1, 1]} : vector<48x96xf32> to vector<24x8xf32>
    %312 = vector.extract_strided_slice %249 {offsets = [24, 32], sizes = [24, 8], strides = [1, 1]} : vector<48x96xf32> to vector<24x8xf32>
    %313 = vector.extract_strided_slice %249 {offsets = [24, 64], sizes = [24, 8], strides = [1, 1]} : vector<48x96xf32> to vector<24x8xf32>
    %cst_96 = arith.constant dense<0.000000e+00> : vector<24x24xf32>
    %314 = tpu.matmul %311, %312, %cst_96 {dimension_numbers = #tpu.dot_dimension_numbers<[1], [1], [0], [0], [0, 0, 1, 0], [], []>} : vector<24x8xf32>, vector<24x8xf32>, vector<24x24xf32> -> vector<24x24xf32>
    %cst_97 = arith.constant dense<0xFF800000> : vector<24xf32>
    %315 = vector.multi_reduction <maximumf>, %314, %cst_97 [1] : vector<24x24xf32> to vector<24xf32>
    %316 = vector.shape_cast %315 : vector<24xf32> to vector<24x1xf32>
    %317 = vector.broadcast %316 : vector<24x1xf32> to vector<24x24xf32>
    %318 = arith.subf %314, %317 : vector<24x24xf32>
    %319 = math.exp %318 : vector<24x24xf32>
    %cst_98 = arith.constant dense<0.000000e+00> : vector<24xf32>
    %320 = vector.multi_reduction <add>, %319, %cst_98 [1] : vector<24x24xf32> to vector<24xf32>
    %321 = vector.shape_cast %320 : vector<24xf32> to vector<24x1xf32>
    %322 = tpu.reciprocal %321 {approx = true} : vector<24x1xf32> -> vector<24x1xf32>
    %323 = vector.broadcast %322 : vector<24x1xf32> to vector<24x24xf32>
    %324 = arith.mulf %319, %323 : vector<24x24xf32>
    %cst_99 = arith.constant dense<0.000000e+00> : vector<24x8xf32>
    %325 = tpu.matmul %324, %313, %cst_99 {dimension_numbers = #tpu.dot_dimension_numbers<[1], [0], [0], [1], [0, 0, 1, 1], [], []>} : vector<24x24xf32>, vector<24x8xf32>, vector<24x8xf32> -> vector<24x8xf32>
    %326 = vector.extract_strided_slice %249 {offsets = [24, 8], sizes = [24, 8], strides = [1, 1]} : vector<48x96xf32> to vector<24x8xf32>
    %327 = vector.extract_strided_slice %249 {offsets = [24, 40], sizes = [24, 8], strides = [1, 1]} : vector<48x96xf32> to vector<24x8xf32>
    %328 = vector.extract_strided_slice %249 {offsets = [24, 72], sizes = [24, 8], strides = [1, 1]} : vector<48x96xf32> to vector<24x8xf32>
    %cst_100 = arith.constant dense<0.000000e+00> : vector<24x24xf32>
    %329 = tpu.matmul %326, %327, %cst_100 {dimension_numbers = #tpu.dot_dimension_numbers<[1], [1], [0], [0], [0, 0, 1, 0], [], []>} : vector<24x8xf32>, vector<24x8xf32>, vector<24x24xf32> -> vector<24x24xf32>
    %cst_101 = arith.constant dense<0xFF800000> : vector<24xf32>
    %330 = vector.multi_reduction <maximumf>, %329, %cst_101 [1] : vector<24x24xf32> to vector<24xf32>
    %331 = vector.shape_cast %330 : vector<24xf32> to vector<24x1xf32>
    %332 = vector.broadcast %331 : vector<24x1xf32> to vector<24x24xf32>
    %333 = arith.subf %329, %332 : vector<24x24xf32>
    %334 = math.exp %333 : vector<24x24xf32>
    %cst_102 = arith.constant dense<0.000000e+00> : vector<24xf32>
    %335 = vector.multi_reduction <add>, %334, %cst_102 [1] : vector<24x24xf32> to vector<24xf32>
    %336 = vector.shape_cast %335 : vector<24xf32> to vector<24x1xf32>
    %337 = tpu.reciprocal %336 {approx = true} : vector<24x1xf32> -> vector<24x1xf32>
    %338 = vector.broadcast %337 : vector<24x1xf32> to vector<24x24xf32>
    %339 = arith.mulf %334, %338 : vector<24x24xf32>
    %cst_103 = arith.constant dense<0.000000e+00> : vector<24x8xf32>
    %340 = tpu.matmul %339, %328, %cst_103 {dimension_numbers = #tpu.dot_dimension_numbers<[1], [0], [0], [1], [0, 0, 1, 1], [], []>} : vector<24x24xf32>, vector<24x8xf32>, vector<24x8xf32> -> vector<24x8xf32>
    %341 = vector.extract_strided_slice %249 {offsets = [24, 16], sizes = [24, 8], strides = [1, 1]} : vector<48x96xf32> to vector<24x8xf32>
    %342 = vector.extract_strided_slice %249 {offsets = [24, 48], sizes = [24, 8], strides = [1, 1]} : vector<48x96xf32> to vector<24x8xf32>
    %343 = vector.extract_strided_slice %249 {offsets = [24, 80], sizes = [24, 8], strides = [1, 1]} : vector<48x96xf32> to vector<24x8xf32>
    %cst_104 = arith.constant dense<0.000000e+00> : vector<24x24xf32>
    %344 = tpu.matmul %341, %342, %cst_104 {dimension_numbers = #tpu.dot_dimension_numbers<[1], [1], [0], [0], [0, 0, 1, 0], [], []>} : vector<24x8xf32>, vector<24x8xf32>, vector<24x24xf32> -> vector<24x24xf32>
    %cst_105 = arith.constant dense<0xFF800000> : vector<24xf32>
    %345 = vector.multi_reduction <maximumf>, %344, %cst_105 [1] : vector<24x24xf32> to vector<24xf32>
    %346 = vector.shape_cast %345 : vector<24xf32> to vector<24x1xf32>
    %347 = vector.broadcast %346 : vector<24x1xf32> to vector<24x24xf32>
    %348 = arith.subf %344, %347 : vector<24x24xf32>
    %349 = math.exp %348 : vector<24x24xf32>
    %cst_106 = arith.constant dense<0.000000e+00> : vector<24xf32>
    %350 = vector.multi_reduction <add>, %349, %cst_106 [1] : vector<24x24xf32> to vector<24xf32>
    %351 = vector.shape_cast %350 : vector<24xf32> to vector<24x1xf32>
    %352 = tpu.reciprocal %351 {approx = true} : vector<24x1xf32> -> vector<24x1xf32>
    %353 = vector.broadcast %352 : vector<24x1xf32> to vector<24x24xf32>
    %354 = arith.mulf %349, %353 : vector<24x24xf32>
    %cst_107 = arith.constant dense<0.000000e+00> : vector<24x8xf32>
    %355 = tpu.matmul %354, %343, %cst_107 {dimension_numbers = #tpu.dot_dimension_numbers<[1], [0], [0], [1], [0, 0, 1, 1], [], []>} : vector<24x24xf32>, vector<24x8xf32>, vector<24x8xf32> -> vector<24x8xf32>
    %356 = vector.extract_strided_slice %249 {offsets = [24, 24], sizes = [24, 8], strides = [1, 1]} : vector<48x96xf32> to vector<24x8xf32>
    %357 = vector.extract_strided_slice %249 {offsets = [24, 56], sizes = [24, 8], strides = [1, 1]} : vector<48x96xf32> to vector<24x8xf32>
    %358 = vector.extract_strided_slice %249 {offsets = [24, 88], sizes = [24, 8], strides = [1, 1]} : vector<48x96xf32> to vector<24x8xf32>
    %cst_108 = arith.constant dense<0.000000e+00> : vector<24x24xf32>
    %359 = tpu.matmul %356, %357, %cst_108 {dimension_numbers = #tpu.dot_dimension_numbers<[1], [1], [0], [0], [0, 0, 1, 0], [], []>} : vector<24x8xf32>, vector<24x8xf32>, vector<24x24xf32> -> vector<24x24xf32>
    %cst_109 = arith.constant dense<0xFF800000> : vector<24xf32>
    %360 = vector.multi_reduction <maximumf>, %359, %cst_109 [1] : vector<24x24xf32> to vector<24xf32>
    %361 = vector.shape_cast %360 : vector<24xf32> to vector<24x1xf32>
    %362 = vector.broadcast %361 : vector<24x1xf32> to vector<24x24xf32>
    %363 = arith.subf %359, %362 : vector<24x24xf32>
    %364 = math.exp %363 : vector<24x24xf32>
    %cst_110 = arith.constant dense<0.000000e+00> : vector<24xf32>
    %365 = vector.multi_reduction <add>, %364, %cst_110 [1] : vector<24x24xf32> to vector<24xf32>
    %366 = vector.shape_cast %365 : vector<24xf32> to vector<24x1xf32>
    %367 = tpu.reciprocal %366 {approx = true} : vector<24x1xf32> -> vector<24x1xf32>
    %368 = vector.broadcast %367 : vector<24x1xf32> to vector<24x24xf32>
    %369 = arith.mulf %364, %368 : vector<24x24xf32>
    %cst_111 = arith.constant dense<0.000000e+00> : vector<24x8xf32>
    %370 = tpu.matmul %369, %358, %cst_111 {dimension_numbers = #tpu.dot_dimension_numbers<[1], [0], [0], [1], [0, 0, 1, 1], [], []>} : vector<24x24xf32>, vector<24x8xf32>, vector<24x8xf32> -> vector<24x8xf32>
    %371 = tpu.concatenate %325, %340, %355, %370 in 1 : vector<24x8xf32>, vector<24x8xf32>, vector<24x8xf32>, vector<24x8xf32> -> vector<24x32xf32>
    %372 = tpu.concatenate %310, %371 in 0 : vector<24x32xf32>, vector<24x32xf32> -> vector<48x32xf32>
    %c1_112 = arith.constant 1 : index
    %c0_113 = arith.constant 0 : index
    %c0_114 = arith.constant 0 : index
    %373 = vector.load %arg4[%c1_112, %c0_113, %c0_114] : memref<4x32x32xf32, #tpu.memory_space<vmem>>, vector<1x32x32xf32>
    %374 = vector.shape_cast %373 : vector<1x32x32xf32> to vector<32x32xf32>
    %cst_115 = arith.constant dense<0.000000e+00> : vector<48x32xf32>
    %375 = tpu.matmul %372, %374, %cst_115 {dimension_numbers = #tpu.dot_dimension_numbers<[1], [0], [0], [1], [0, 0, 1, 1], [], []>} : vector<48x32xf32>, vector<32x32xf32>, vector<48x32xf32> -> vector<48x32xf32>
    %376 = vector.broadcast %219 : vector<1x32xf32> to vector<48x32xf32>
    %377 = arith.addf %375, %376 : vector<48x32xf32>
    %378 = arith.addf %212, %377 : vector<48x32xf32>
    %cst_116 = arith.constant dense<0.000000e+00> : vector<48xf32>
    %379 = vector.multi_reduction <add>, %378, %cst_116 [1] : vector<48x32xf32> to vector<48xf32>
    %380 = vector.shape_cast %379 : vector<48xf32> to vector<48x1xf32>
    %cst_117 = arith.constant 3.200000e+01 : f32
    %381 = vector.broadcast %cst_117 : f32 to vector<48x1xf32>
    %382 = arith.divf %380, %381 : vector<48x1xf32>
    %383 = vector.broadcast %382 : vector<48x1xf32> to vector<48x32xf32>
    %384 = arith.subf %378, %383 : vector<48x32xf32>
    %385 = arith.mulf %384, %384 : vector<48x32xf32>
    %cst_118 = arith.constant dense<0.000000e+00> : vector<48xf32>
    %386 = vector.multi_reduction <add>, %385, %cst_118 [1] : vector<48x32xf32> to vector<48xf32>
    %387 = vector.shape_cast %386 : vector<48xf32> to vector<48x1xf32>
    %cst_119 = arith.constant 3.200000e+01 : f32
    %388 = vector.broadcast %cst_119 : f32 to vector<48x1xf32>
    %389 = arith.divf %387, %388 : vector<48x1xf32>
    %390 = vector.broadcast %382 : vector<48x1xf32> to vector<48x32xf32>
    %391 = arith.subf %378, %390 : vector<48x32xf32>
    %cst_120 = arith.constant 9.99999974E-6 : f32
    %392 = vector.broadcast %cst_120 : f32 to vector<48x1xf32>
    %393 = arith.addf %389, %392 : vector<48x1xf32>
    %394 = math.rsqrt %393 : vector<48x1xf32>
    %395 = vector.broadcast %394 : vector<48x1xf32> to vector<48x32xf32>
    %396 = arith.mulf %391, %395 : vector<48x32xf32>
    %397 = vector.broadcast %220 : vector<1x32xf32> to vector<48x32xf32>
    %398 = arith.mulf %396, %397 : vector<48x32xf32>
    %399 = vector.broadcast %221 : vector<1x32xf32> to vector<48x32xf32>
    %400 = arith.addf %398, %399 : vector<48x32xf32>
    %c1_121 = arith.constant 1 : index
    %c0_122 = arith.constant 0 : index
    %c0_123 = arith.constant 0 : index
    %401 = vector.load %arg5[%c1_121, %c0_122, %c0_123] : memref<4x32x128xf32, #tpu.memory_space<vmem>>, vector<1x32x128xf32>
    %402 = vector.shape_cast %401 : vector<1x32x128xf32> to vector<32x128xf32>
    %cst_124 = arith.constant dense<0.000000e+00> : vector<48x128xf32>
    %403 = tpu.matmul %400, %402, %cst_124 {dimension_numbers = #tpu.dot_dimension_numbers<[1], [0], [0], [1], [0, 0, 1, 1], [], []>} : vector<48x32xf32>, vector<32x128xf32>, vector<48x128xf32> -> vector<48x128xf32>
    %404 = vector.broadcast %216 : vector<1x128xf32> to vector<48x128xf32>
    %405 = arith.addf %403, %404 : vector<48x128xf32>
    %cst_125 = arith.constant 5.000000e-01 : f32
    %406 = vector.broadcast %cst_125 : f32 to vector<48x128xf32>
    %407 = arith.mulf %406, %405 : vector<48x128xf32>
    %cst_126 = arith.constant 0.707106769 : f32
    %408 = vector.broadcast %cst_126 : f32 to vector<48x128xf32>
    %409 = arith.mulf %405, %408 : vector<48x128xf32>
    %410 = math.erf %409 : vector<48x128xf32>
    %cst_127 = arith.constant 1.000000e+00 : f32
    %411 = vector.broadcast %cst_127 : f32 to vector<48x128xf32>
    %412 = arith.addf %411, %410 : vector<48x128xf32>
    %413 = arith.mulf %407, %412 : vector<48x128xf32>
    %c1_128 = arith.constant 1 : index
    %c0_129 = arith.constant 0 : index
    %c0_130 = arith.constant 0 : index
    %414 = vector.load %arg6[%c1_128, %c0_129, %c0_130] : memref<4x128x32xf32, #tpu.memory_space<vmem>>, vector<1x128x32xf32>
    %415 = vector.shape_cast %414 : vector<1x128x32xf32> to vector<128x32xf32>
    %cst_131 = arith.constant dense<0.000000e+00> : vector<48x32xf32>
    %416 = tpu.matmul %413, %415, %cst_131 {dimension_numbers = #tpu.dot_dimension_numbers<[1], [0], [0], [1], [0, 0, 1, 1], [], []>} : vector<48x128xf32>, vector<128x32xf32>, vector<48x32xf32> -> vector<48x32xf32>
    %417 = arith.addf %378, %416 : vector<48x32xf32>
    %418 = vector.broadcast %222 : vector<1x32xf32> to vector<48x32xf32>
    %419 = arith.addf %417, %418 : vector<48x32xf32>
    %c2 = arith.constant 2 : index
    %c0_132 = arith.constant 0 : index
    %c0_133 = arith.constant 0 : index
    %420 = vector.load %arg7[%c2, %c0_132, %c0_133] : memref<4x8x128xf32, #tpu.memory_space<vmem>>, vector<1x8x128xf32>
    %421 = vector.shape_cast %420 : vector<1x8x128xf32> to vector<8x128xf32>
    %422 = vector.extract_strided_slice %421 {offsets = [0, 0], sizes = [1, 96], strides = [1, 1]} : vector<8x128xf32> to vector<1x96xf32>
    %423 = vector.extract_strided_slice %421 {offsets = [1, 0], sizes = [1, 128], strides = [1, 1]} : vector<8x128xf32> to vector<1x128xf32>
    %424 = vector.extract_strided_slice %421 {offsets = [2, 0], sizes = [1, 32], strides = [1, 1]} : vector<8x128xf32> to vector<1x32xf32>
    %425 = vector.extract_strided_slice %421 {offsets = [3, 0], sizes = [1, 32], strides = [1, 1]} : vector<8x128xf32> to vector<1x32xf32>
    %426 = vector.extract_strided_slice %421 {offsets = [4, 0], sizes = [1, 32], strides = [1, 1]} : vector<8x128xf32> to vector<1x32xf32>
    %427 = vector.extract_strided_slice %421 {offsets = [5, 0], sizes = [1, 32], strides = [1, 1]} : vector<8x128xf32> to vector<1x32xf32>
    %428 = vector.extract_strided_slice %421 {offsets = [6, 0], sizes = [1, 32], strides = [1, 1]} : vector<8x128xf32> to vector<1x32xf32>
    %429 = vector.extract_strided_slice %421 {offsets = [7, 0], sizes = [1, 32], strides = [1, 1]} : vector<8x128xf32> to vector<1x32xf32>
    %cst_134 = arith.constant dense<0.000000e+00> : vector<48xf32>
    %430 = vector.multi_reduction <add>, %419, %cst_134 [1] : vector<48x32xf32> to vector<48xf32>
    %431 = vector.shape_cast %430 : vector<48xf32> to vector<48x1xf32>
    %cst_135 = arith.constant 3.200000e+01 : f32
    %432 = vector.broadcast %cst_135 : f32 to vector<48x1xf32>
    %433 = arith.divf %431, %432 : vector<48x1xf32>
    %434 = vector.broadcast %433 : vector<48x1xf32> to vector<48x32xf32>
    %435 = arith.subf %419, %434 : vector<48x32xf32>
    %436 = arith.mulf %435, %435 : vector<48x32xf32>
    %cst_136 = arith.constant dense<0.000000e+00> : vector<48xf32>
    %437 = vector.multi_reduction <add>, %436, %cst_136 [1] : vector<48x32xf32> to vector<48xf32>
    %438 = vector.shape_cast %437 : vector<48xf32> to vector<48x1xf32>
    %cst_137 = arith.constant 3.200000e+01 : f32
    %439 = vector.broadcast %cst_137 : f32 to vector<48x1xf32>
    %440 = arith.divf %438, %439 : vector<48x1xf32>
    %441 = vector.broadcast %433 : vector<48x1xf32> to vector<48x32xf32>
    %442 = arith.subf %419, %441 : vector<48x32xf32>
    %cst_138 = arith.constant 9.99999974E-6 : f32
    %443 = vector.broadcast %cst_138 : f32 to vector<48x1xf32>
    %444 = arith.addf %440, %443 : vector<48x1xf32>
    %445 = math.rsqrt %444 : vector<48x1xf32>
    %446 = vector.broadcast %445 : vector<48x1xf32> to vector<48x32xf32>
    %447 = arith.mulf %442, %446 : vector<48x32xf32>
    %448 = vector.broadcast %424 : vector<1x32xf32> to vector<48x32xf32>
    %449 = arith.mulf %447, %448 : vector<48x32xf32>
    %450 = vector.broadcast %425 : vector<1x32xf32> to vector<48x32xf32>
    %451 = arith.addf %449, %450 : vector<48x32xf32>
    %c2_139 = arith.constant 2 : index
    %c0_140 = arith.constant 0 : index
    %c0_141 = arith.constant 0 : index
    %452 = vector.load %arg3[%c2_139, %c0_140, %c0_141] : memref<4x32x96xf32, #tpu.memory_space<vmem>>, vector<1x32x96xf32>
    %453 = vector.shape_cast %452 : vector<1x32x96xf32> to vector<32x96xf32>
    %cst_142 = arith.constant dense<0.000000e+00> : vector<48x96xf32>
    %454 = tpu.matmul %451, %453, %cst_142 {dimension_numbers = #tpu.dot_dimension_numbers<[1], [0], [0], [1], [0, 0, 1, 1], [], []>} : vector<48x32xf32>, vector<32x96xf32>, vector<48x96xf32> -> vector<48x96xf32>
    %455 = vector.broadcast %422 : vector<1x96xf32> to vector<48x96xf32>
    %456 = arith.addf %454, %455 : vector<48x96xf32>
    %457 = vector.extract_strided_slice %456 {offsets = [0, 0], sizes = [24, 8], strides = [1, 1]} : vector<48x96xf32> to vector<24x8xf32>
    %458 = vector.extract_strided_slice %456 {offsets = [0, 32], sizes = [24, 8], strides = [1, 1]} : vector<48x96xf32> to vector<24x8xf32>
    %459 = vector.extract_strided_slice %456 {offsets = [0, 64], sizes = [24, 8], strides = [1, 1]} : vector<48x96xf32> to vector<24x8xf32>
    %cst_143 = arith.constant dense<0.000000e+00> : vector<24x24xf32>
    %460 = tpu.matmul %457, %458, %cst_143 {dimension_numbers = #tpu.dot_dimension_numbers<[1], [1], [0], [0], [0, 0, 1, 0], [], []>} : vector<24x8xf32>, vector<24x8xf32>, vector<24x24xf32> -> vector<24x24xf32>
    %cst_144 = arith.constant dense<0xFF800000> : vector<24xf32>
    %461 = vector.multi_reduction <maximumf>, %460, %cst_144 [1] : vector<24x24xf32> to vector<24xf32>
    %462 = vector.shape_cast %461 : vector<24xf32> to vector<24x1xf32>
    %463 = vector.broadcast %462 : vector<24x1xf32> to vector<24x24xf32>
    %464 = arith.subf %460, %463 : vector<24x24xf32>
    %465 = math.exp %464 : vector<24x24xf32>
    %cst_145 = arith.constant dense<0.000000e+00> : vector<24xf32>
    %466 = vector.multi_reduction <add>, %465, %cst_145 [1] : vector<24x24xf32> to vector<24xf32>
    %467 = vector.shape_cast %466 : vector<24xf32> to vector<24x1xf32>
    %468 = tpu.reciprocal %467 {approx = true} : vector<24x1xf32> -> vector<24x1xf32>
    %469 = vector.broadcast %468 : vector<24x1xf32> to vector<24x24xf32>
    %470 = arith.mulf %465, %469 : vector<24x24xf32>
    %cst_146 = arith.constant dense<0.000000e+00> : vector<24x8xf32>
    %471 = tpu.matmul %470, %459, %cst_146 {dimension_numbers = #tpu.dot_dimension_numbers<[1], [0], [0], [1], [0, 0, 1, 1], [], []>} : vector<24x24xf32>, vector<24x8xf32>, vector<24x8xf32> -> vector<24x8xf32>
    %472 = vector.extract_strided_slice %456 {offsets = [0, 8], sizes = [24, 8], strides = [1, 1]} : vector<48x96xf32> to vector<24x8xf32>
    %473 = vector.extract_strided_slice %456 {offsets = [0, 40], sizes = [24, 8], strides = [1, 1]} : vector<48x96xf32> to vector<24x8xf32>
    %474 = vector.extract_strided_slice %456 {offsets = [0, 72], sizes = [24, 8], strides = [1, 1]} : vector<48x96xf32> to vector<24x8xf32>
    %cst_147 = arith.constant dense<0.000000e+00> : vector<24x24xf32>
    %475 = tpu.matmul %472, %473, %cst_147 {dimension_numbers = #tpu.dot_dimension_numbers<[1], [1], [0], [0], [0, 0, 1, 0], [], []>} : vector<24x8xf32>, vector<24x8xf32>, vector<24x24xf32> -> vector<24x24xf32>
    %cst_148 = arith.constant dense<0xFF800000> : vector<24xf32>
    %476 = vector.multi_reduction <maximumf>, %475, %cst_148 [1] : vector<24x24xf32> to vector<24xf32>
    %477 = vector.shape_cast %476 : vector<24xf32> to vector<24x1xf32>
    %478 = vector.broadcast %477 : vector<24x1xf32> to vector<24x24xf32>
    %479 = arith.subf %475, %478 : vector<24x24xf32>
    %480 = math.exp %479 : vector<24x24xf32>
    %cst_149 = arith.constant dense<0.000000e+00> : vector<24xf32>
    %481 = vector.multi_reduction <add>, %480, %cst_149 [1] : vector<24x24xf32> to vector<24xf32>
    %482 = vector.shape_cast %481 : vector<24xf32> to vector<24x1xf32>
    %483 = tpu.reciprocal %482 {approx = true} : vector<24x1xf32> -> vector<24x1xf32>
    %484 = vector.broadcast %483 : vector<24x1xf32> to vector<24x24xf32>
    %485 = arith.mulf %480, %484 : vector<24x24xf32>
    %cst_150 = arith.constant dense<0.000000e+00> : vector<24x8xf32>
    %486 = tpu.matmul %485, %474, %cst_150 {dimension_numbers = #tpu.dot_dimension_numbers<[1], [0], [0], [1], [0, 0, 1, 1], [], []>} : vector<24x24xf32>, vector<24x8xf32>, vector<24x8xf32> -> vector<24x8xf32>
    %487 = vector.extract_strided_slice %456 {offsets = [0, 16], sizes = [24, 8], strides = [1, 1]} : vector<48x96xf32> to vector<24x8xf32>
    %488 = vector.extract_strided_slice %456 {offsets = [0, 48], sizes = [24, 8], strides = [1, 1]} : vector<48x96xf32> to vector<24x8xf32>
    %489 = vector.extract_strided_slice %456 {offsets = [0, 80], sizes = [24, 8], strides = [1, 1]} : vector<48x96xf32> to vector<24x8xf32>
    %cst_151 = arith.constant dense<0.000000e+00> : vector<24x24xf32>
    %490 = tpu.matmul %487, %488, %cst_151 {dimension_numbers = #tpu.dot_dimension_numbers<[1], [1], [0], [0], [0, 0, 1, 0], [], []>} : vector<24x8xf32>, vector<24x8xf32>, vector<24x24xf32> -> vector<24x24xf32>
    %cst_152 = arith.constant dense<0xFF800000> : vector<24xf32>
    %491 = vector.multi_reduction <maximumf>, %490, %cst_152 [1] : vector<24x24xf32> to vector<24xf32>
    %492 = vector.shape_cast %491 : vector<24xf32> to vector<24x1xf32>
    %493 = vector.broadcast %492 : vector<24x1xf32> to vector<24x24xf32>
    %494 = arith.subf %490, %493 : vector<24x24xf32>
    %495 = math.exp %494 : vector<24x24xf32>
    %cst_153 = arith.constant dense<0.000000e+00> : vector<24xf32>
    %496 = vector.multi_reduction <add>, %495, %cst_153 [1] : vector<24x24xf32> to vector<24xf32>
    %497 = vector.shape_cast %496 : vector<24xf32> to vector<24x1xf32>
    %498 = tpu.reciprocal %497 {approx = true} : vector<24x1xf32> -> vector<24x1xf32>
    %499 = vector.broadcast %498 : vector<24x1xf32> to vector<24x24xf32>
    %500 = arith.mulf %495, %499 : vector<24x24xf32>
    %cst_154 = arith.constant dense<0.000000e+00> : vector<24x8xf32>
    %501 = tpu.matmul %500, %489, %cst_154 {dimension_numbers = #tpu.dot_dimension_numbers<[1], [0], [0], [1], [0, 0, 1, 1], [], []>} : vector<24x24xf32>, vector<24x8xf32>, vector<24x8xf32> -> vector<24x8xf32>
    %502 = vector.extract_strided_slice %456 {offsets = [0, 24], sizes = [24, 8], strides = [1, 1]} : vector<48x96xf32> to vector<24x8xf32>
    %503 = vector.extract_strided_slice %456 {offsets = [0, 56], sizes = [24, 8], strides = [1, 1]} : vector<48x96xf32> to vector<24x8xf32>
    %504 = vector.extract_strided_slice %456 {offsets = [0, 88], sizes = [24, 8], strides = [1, 1]} : vector<48x96xf32> to vector<24x8xf32>
    %cst_155 = arith.constant dense<0.000000e+00> : vector<24x24xf32>
    %505 = tpu.matmul %502, %503, %cst_155 {dimension_numbers = #tpu.dot_dimension_numbers<[1], [1], [0], [0], [0, 0, 1, 0], [], []>} : vector<24x8xf32>, vector<24x8xf32>, vector<24x24xf32> -> vector<24x24xf32>
    %cst_156 = arith.constant dense<0xFF800000> : vector<24xf32>
    %506 = vector.multi_reduction <maximumf>, %505, %cst_156 [1] : vector<24x24xf32> to vector<24xf32>
    %507 = vector.shape_cast %506 : vector<24xf32> to vector<24x1xf32>
    %508 = vector.broadcast %507 : vector<24x1xf32> to vector<24x24xf32>
    %509 = arith.subf %505, %508 : vector<24x24xf32>
    %510 = math.exp %509 : vector<24x24xf32>
    %cst_157 = arith.constant dense<0.000000e+00> : vector<24xf32>
    %511 = vector.multi_reduction <add>, %510, %cst_157 [1] : vector<24x24xf32> to vector<24xf32>
    %512 = vector.shape_cast %511 : vector<24xf32> to vector<24x1xf32>
    %513 = tpu.reciprocal %512 {approx = true} : vector<24x1xf32> -> vector<24x1xf32>
    %514 = vector.broadcast %513 : vector<24x1xf32> to vector<24x24xf32>
    %515 = arith.mulf %510, %514 : vector<24x24xf32>
    %cst_158 = arith.constant dense<0.000000e+00> : vector<24x8xf32>
    %516 = tpu.matmul %515, %504, %cst_158 {dimension_numbers = #tpu.dot_dimension_numbers<[1], [0], [0], [1], [0, 0, 1, 1], [], []>} : vector<24x24xf32>, vector<24x8xf32>, vector<24x8xf32> -> vector<24x8xf32>
    %517 = tpu.concatenate %471, %486, %501, %516 in 1 : vector<24x8xf32>, vector<24x8xf32>, vector<24x8xf32>, vector<24x8xf32> -> vector<24x32xf32>
    %518 = vector.extract_strided_slice %456 {offsets = [24, 0], sizes = [24, 8], strides = [1, 1]} : vector<48x96xf32> to vector<24x8xf32>
    %519 = vector.extract_strided_slice %456 {offsets = [24, 32], sizes = [24, 8], strides = [1, 1]} : vector<48x96xf32> to vector<24x8xf32>
    %520 = vector.extract_strided_slice %456 {offsets = [24, 64], sizes = [24, 8], strides = [1, 1]} : vector<48x96xf32> to vector<24x8xf32>
    %cst_159 = arith.constant dense<0.000000e+00> : vector<24x24xf32>
    %521 = tpu.matmul %518, %519, %cst_159 {dimension_numbers = #tpu.dot_dimension_numbers<[1], [1], [0], [0], [0, 0, 1, 0], [], []>} : vector<24x8xf32>, vector<24x8xf32>, vector<24x24xf32> -> vector<24x24xf32>
    %cst_160 = arith.constant dense<0xFF800000> : vector<24xf32>
    %522 = vector.multi_reduction <maximumf>, %521, %cst_160 [1] : vector<24x24xf32> to vector<24xf32>
    %523 = vector.shape_cast %522 : vector<24xf32> to vector<24x1xf32>
    %524 = vector.broadcast %523 : vector<24x1xf32> to vector<24x24xf32>
    %525 = arith.subf %521, %524 : vector<24x24xf32>
    %526 = math.exp %525 : vector<24x24xf32>
    %cst_161 = arith.constant dense<0.000000e+00> : vector<24xf32>
    %527 = vector.multi_reduction <add>, %526, %cst_161 [1] : vector<24x24xf32> to vector<24xf32>
    %528 = vector.shape_cast %527 : vector<24xf32> to vector<24x1xf32>
    %529 = tpu.reciprocal %528 {approx = true} : vector<24x1xf32> -> vector<24x1xf32>
    %530 = vector.broadcast %529 : vector<24x1xf32> to vector<24x24xf32>
    %531 = arith.mulf %526, %530 : vector<24x24xf32>
    %cst_162 = arith.constant dense<0.000000e+00> : vector<24x8xf32>
    %532 = tpu.matmul %531, %520, %cst_162 {dimension_numbers = #tpu.dot_dimension_numbers<[1], [0], [0], [1], [0, 0, 1, 1], [], []>} : vector<24x24xf32>, vector<24x8xf32>, vector<24x8xf32> -> vector<24x8xf32>
    %533 = vector.extract_strided_slice %456 {offsets = [24, 8], sizes = [24, 8], strides = [1, 1]} : vector<48x96xf32> to vector<24x8xf32>
    %534 = vector.extract_strided_slice %456 {offsets = [24, 40], sizes = [24, 8], strides = [1, 1]} : vector<48x96xf32> to vector<24x8xf32>
    %535 = vector.extract_strided_slice %456 {offsets = [24, 72], sizes = [24, 8], strides = [1, 1]} : vector<48x96xf32> to vector<24x8xf32>
    %cst_163 = arith.constant dense<0.000000e+00> : vector<24x24xf32>
    %536 = tpu.matmul %533, %534, %cst_163 {dimension_numbers = #tpu.dot_dimension_numbers<[1], [1], [0], [0], [0, 0, 1, 0], [], []>} : vector<24x8xf32>, vector<24x8xf32>, vector<24x24xf32> -> vector<24x24xf32>
    %cst_164 = arith.constant dense<0xFF800000> : vector<24xf32>
    %537 = vector.multi_reduction <maximumf>, %536, %cst_164 [1] : vector<24x24xf32> to vector<24xf32>
    %538 = vector.shape_cast %537 : vector<24xf32> to vector<24x1xf32>
    %539 = vector.broadcast %538 : vector<24x1xf32> to vector<24x24xf32>
    %540 = arith.subf %536, %539 : vector<24x24xf32>
    %541 = math.exp %540 : vector<24x24xf32>
    %cst_165 = arith.constant dense<0.000000e+00> : vector<24xf32>
    %542 = vector.multi_reduction <add>, %541, %cst_165 [1] : vector<24x24xf32> to vector<24xf32>
    %543 = vector.shape_cast %542 : vector<24xf32> to vector<24x1xf32>
    %544 = tpu.reciprocal %543 {approx = true} : vector<24x1xf32> -> vector<24x1xf32>
    %545 = vector.broadcast %544 : vector<24x1xf32> to vector<24x24xf32>
    %546 = arith.mulf %541, %545 : vector<24x24xf32>
    %cst_166 = arith.constant dense<0.000000e+00> : vector<24x8xf32>
    %547 = tpu.matmul %546, %535, %cst_166 {dimension_numbers = #tpu.dot_dimension_numbers<[1], [0], [0], [1], [0, 0, 1, 1], [], []>} : vector<24x24xf32>, vector<24x8xf32>, vector<24x8xf32> -> vector<24x8xf32>
    %548 = vector.extract_strided_slice %456 {offsets = [24, 16], sizes = [24, 8], strides = [1, 1]} : vector<48x96xf32> to vector<24x8xf32>
    %549 = vector.extract_strided_slice %456 {offsets = [24, 48], sizes = [24, 8], strides = [1, 1]} : vector<48x96xf32> to vector<24x8xf32>
    %550 = vector.extract_strided_slice %456 {offsets = [24, 80], sizes = [24, 8], strides = [1, 1]} : vector<48x96xf32> to vector<24x8xf32>
    %cst_167 = arith.constant dense<0.000000e+00> : vector<24x24xf32>
    %551 = tpu.matmul %548, %549, %cst_167 {dimension_numbers = #tpu.dot_dimension_numbers<[1], [1], [0], [0], [0, 0, 1, 0], [], []>} : vector<24x8xf32>, vector<24x8xf32>, vector<24x24xf32> -> vector<24x24xf32>
    %cst_168 = arith.constant dense<0xFF800000> : vector<24xf32>
    %552 = vector.multi_reduction <maximumf>, %551, %cst_168 [1] : vector<24x24xf32> to vector<24xf32>
    %553 = vector.shape_cast %552 : vector<24xf32> to vector<24x1xf32>
    %554 = vector.broadcast %553 : vector<24x1xf32> to vector<24x24xf32>
    %555 = arith.subf %551, %554 : vector<24x24xf32>
    %556 = math.exp %555 : vector<24x24xf32>
    %cst_169 = arith.constant dense<0.000000e+00> : vector<24xf32>
    %557 = vector.multi_reduction <add>, %556, %cst_169 [1] : vector<24x24xf32> to vector<24xf32>
    %558 = vector.shape_cast %557 : vector<24xf32> to vector<24x1xf32>
    %559 = tpu.reciprocal %558 {approx = true} : vector<24x1xf32> -> vector<24x1xf32>
    %560 = vector.broadcast %559 : vector<24x1xf32> to vector<24x24xf32>
    %561 = arith.mulf %556, %560 : vector<24x24xf32>
    %cst_170 = arith.constant dense<0.000000e+00> : vector<24x8xf32>
    %562 = tpu.matmul %561, %550, %cst_170 {dimension_numbers = #tpu.dot_dimension_numbers<[1], [0], [0], [1], [0, 0, 1, 1], [], []>} : vector<24x24xf32>, vector<24x8xf32>, vector<24x8xf32> -> vector<24x8xf32>
    %563 = vector.extract_strided_slice %456 {offsets = [24, 24], sizes = [24, 8], strides = [1, 1]} : vector<48x96xf32> to vector<24x8xf32>
    %564 = vector.extract_strided_slice %456 {offsets = [24, 56], sizes = [24, 8], strides = [1, 1]} : vector<48x96xf32> to vector<24x8xf32>
    %565 = vector.extract_strided_slice %456 {offsets = [24, 88], sizes = [24, 8], strides = [1, 1]} : vector<48x96xf32> to vector<24x8xf32>
    %cst_171 = arith.constant dense<0.000000e+00> : vector<24x24xf32>
    %566 = tpu.matmul %563, %564, %cst_171 {dimension_numbers = #tpu.dot_dimension_numbers<[1], [1], [0], [0], [0, 0, 1, 0], [], []>} : vector<24x8xf32>, vector<24x8xf32>, vector<24x24xf32> -> vector<24x24xf32>
    %cst_172 = arith.constant dense<0xFF800000> : vector<24xf32>
    %567 = vector.multi_reduction <maximumf>, %566, %cst_172 [1] : vector<24x24xf32> to vector<24xf32>
    %568 = vector.shape_cast %567 : vector<24xf32> to vector<24x1xf32>
    %569 = vector.broadcast %568 : vector<24x1xf32> to vector<24x24xf32>
    %570 = arith.subf %566, %569 : vector<24x24xf32>
    %571 = math.exp %570 : vector<24x24xf32>
    %cst_173 = arith.constant dense<0.000000e+00> : vector<24xf32>
    %572 = vector.multi_reduction <add>, %571, %cst_173 [1] : vector<24x24xf32> to vector<24xf32>
    %573 = vector.shape_cast %572 : vector<24xf32> to vector<24x1xf32>
    %574 = tpu.reciprocal %573 {approx = true} : vector<24x1xf32> -> vector<24x1xf32>
    %575 = vector.broadcast %574 : vector<24x1xf32> to vector<24x24xf32>
    %576 = arith.mulf %571, %575 : vector<24x24xf32>
    %cst_174 = arith.constant dense<0.000000e+00> : vector<24x8xf32>
    %577 = tpu.matmul %576, %565, %cst_174 {dimension_numbers = #tpu.dot_dimension_numbers<[1], [0], [0], [1], [0, 0, 1, 1], [], []>} : vector<24x24xf32>, vector<24x8xf32>, vector<24x8xf32> -> vector<24x8xf32>
    %578 = tpu.concatenate %532, %547, %562, %577 in 1 : vector<24x8xf32>, vector<24x8xf32>, vector<24x8xf32>, vector<24x8xf32> -> vector<24x32xf32>
    %579 = tpu.concatenate %517, %578 in 0 : vector<24x32xf32>, vector<24x32xf32> -> vector<48x32xf32>
    %c2_175 = arith.constant 2 : index
    %c0_176 = arith.constant 0 : index
    %c0_177 = arith.constant 0 : index
    %580 = vector.load %arg4[%c2_175, %c0_176, %c0_177] : memref<4x32x32xf32, #tpu.memory_space<vmem>>, vector<1x32x32xf32>
    %581 = vector.shape_cast %580 : vector<1x32x32xf32> to vector<32x32xf32>
    %cst_178 = arith.constant dense<0.000000e+00> : vector<48x32xf32>
    %582 = tpu.matmul %579, %581, %cst_178 {dimension_numbers = #tpu.dot_dimension_numbers<[1], [0], [0], [1], [0, 0, 1, 1], [], []>} : vector<48x32xf32>, vector<32x32xf32>, vector<48x32xf32> -> vector<48x32xf32>
    %583 = vector.broadcast %426 : vector<1x32xf32> to vector<48x32xf32>
    %584 = arith.addf %582, %583 : vector<48x32xf32>
    %585 = arith.addf %419, %584 : vector<48x32xf32>
    %cst_179 = arith.constant dense<0.000000e+00> : vector<48xf32>
    %586 = vector.multi_reduction <add>, %585, %cst_179 [1] : vector<48x32xf32> to vector<48xf32>
    %587 = vector.shape_cast %586 : vector<48xf32> to vector<48x1xf32>
    %cst_180 = arith.constant 3.200000e+01 : f32
    %588 = vector.broadcast %cst_180 : f32 to vector<48x1xf32>
    %589 = arith.divf %587, %588 : vector<48x1xf32>
    %590 = vector.broadcast %589 : vector<48x1xf32> to vector<48x32xf32>
    %591 = arith.subf %585, %590 : vector<48x32xf32>
    %592 = arith.mulf %591, %591 : vector<48x32xf32>
    %cst_181 = arith.constant dense<0.000000e+00> : vector<48xf32>
    %593 = vector.multi_reduction <add>, %592, %cst_181 [1] : vector<48x32xf32> to vector<48xf32>
    %594 = vector.shape_cast %593 : vector<48xf32> to vector<48x1xf32>
    %cst_182 = arith.constant 3.200000e+01 : f32
    %595 = vector.broadcast %cst_182 : f32 to vector<48x1xf32>
    %596 = arith.divf %594, %595 : vector<48x1xf32>
    %597 = vector.broadcast %589 : vector<48x1xf32> to vector<48x32xf32>
    %598 = arith.subf %585, %597 : vector<48x32xf32>
    %cst_183 = arith.constant 9.99999974E-6 : f32
    %599 = vector.broadcast %cst_183 : f32 to vector<48x1xf32>
    %600 = arith.addf %596, %599 : vector<48x1xf32>
    %601 = math.rsqrt %600 : vector<48x1xf32>
    %602 = vector.broadcast %601 : vector<48x1xf32> to vector<48x32xf32>
    %603 = arith.mulf %598, %602 : vector<48x32xf32>
    %604 = vector.broadcast %427 : vector<1x32xf32> to vector<48x32xf32>
    %605 = arith.mulf %603, %604 : vector<48x32xf32>
    %606 = vector.broadcast %428 : vector<1x32xf32> to vector<48x32xf32>
    %607 = arith.addf %605, %606 : vector<48x32xf32>
    %c2_184 = arith.constant 2 : index
    %c0_185 = arith.constant 0 : index
    %c0_186 = arith.constant 0 : index
    %608 = vector.load %arg5[%c2_184, %c0_185, %c0_186] : memref<4x32x128xf32, #tpu.memory_space<vmem>>, vector<1x32x128xf32>
    %609 = vector.shape_cast %608 : vector<1x32x128xf32> to vector<32x128xf32>
    %cst_187 = arith.constant dense<0.000000e+00> : vector<48x128xf32>
    %610 = tpu.matmul %607, %609, %cst_187 {dimension_numbers = #tpu.dot_dimension_numbers<[1], [0], [0], [1], [0, 0, 1, 1], [], []>} : vector<48x32xf32>, vector<32x128xf32>, vector<48x128xf32> -> vector<48x128xf32>
    %611 = vector.broadcast %423 : vector<1x128xf32> to vector<48x128xf32>
    %612 = arith.addf %610, %611 : vector<48x128xf32>
    %cst_188 = arith.constant 5.000000e-01 : f32
    %613 = vector.broadcast %cst_188 : f32 to vector<48x128xf32>
    %614 = arith.mulf %613, %612 : vector<48x128xf32>
    %cst_189 = arith.constant 0.707106769 : f32
    %615 = vector.broadcast %cst_189 : f32 to vector<48x128xf32>
    %616 = arith.mulf %612, %615 : vector<48x128xf32>
    %617 = math.erf %616 : vector<48x128xf32>
    %cst_190 = arith.constant 1.000000e+00 : f32
    %618 = vector.broadcast %cst_190 : f32 to vector<48x128xf32>
    %619 = arith.addf %618, %617 : vector<48x128xf32>
    %620 = arith.mulf %614, %619 : vector<48x128xf32>
    %c2_191 = arith.constant 2 : index
    %c0_192 = arith.constant 0 : index
    %c0_193 = arith.constant 0 : index
    %621 = vector.load %arg6[%c2_191, %c0_192, %c0_193] : memref<4x128x32xf32, #tpu.memory_space<vmem>>, vector<1x128x32xf32>
    %622 = vector.shape_cast %621 : vector<1x128x32xf32> to vector<128x32xf32>
    %cst_194 = arith.constant dense<0.000000e+00> : vector<48x32xf32>
    %623 = tpu.matmul %620, %622, %cst_194 {dimension_numbers = #tpu.dot_dimension_numbers<[1], [0], [0], [1], [0, 0, 1, 1], [], []>} : vector<48x128xf32>, vector<128x32xf32>, vector<48x32xf32> -> vector<48x32xf32>
    %624 = arith.addf %585, %623 : vector<48x32xf32>
    %625 = vector.broadcast %429 : vector<1x32xf32> to vector<48x32xf32>
    %626 = arith.addf %624, %625 : vector<48x32xf32>
    %c3 = arith.constant 3 : index
    %c0_195 = arith.constant 0 : index
    %c0_196 = arith.constant 0 : index
    %627 = vector.load %arg7[%c3, %c0_195, %c0_196] : memref<4x8x128xf32, #tpu.memory_space<vmem>>, vector<1x8x128xf32>
    %628 = vector.shape_cast %627 : vector<1x8x128xf32> to vector<8x128xf32>
    %629 = vector.extract_strided_slice %628 {offsets = [0, 0], sizes = [1, 96], strides = [1, 1]} : vector<8x128xf32> to vector<1x96xf32>
    %630 = vector.extract_strided_slice %628 {offsets = [1, 0], sizes = [1, 128], strides = [1, 1]} : vector<8x128xf32> to vector<1x128xf32>
    %631 = vector.extract_strided_slice %628 {offsets = [2, 0], sizes = [1, 32], strides = [1, 1]} : vector<8x128xf32> to vector<1x32xf32>
    %632 = vector.extract_strided_slice %628 {offsets = [3, 0], sizes = [1, 32], strides = [1, 1]} : vector<8x128xf32> to vector<1x32xf32>
    %633 = vector.extract_strided_slice %628 {offsets = [4, 0], sizes = [1, 32], strides = [1, 1]} : vector<8x128xf32> to vector<1x32xf32>
    %634 = vector.extract_strided_slice %628 {offsets = [5, 0], sizes = [1, 32], strides = [1, 1]} : vector<8x128xf32> to vector<1x32xf32>
    %635 = vector.extract_strided_slice %628 {offsets = [6, 0], sizes = [1, 32], strides = [1, 1]} : vector<8x128xf32> to vector<1x32xf32>
    %636 = vector.extract_strided_slice %628 {offsets = [7, 0], sizes = [1, 32], strides = [1, 1]} : vector<8x128xf32> to vector<1x32xf32>
    %cst_197 = arith.constant dense<0.000000e+00> : vector<48xf32>
    %637 = vector.multi_reduction <add>, %626, %cst_197 [1] : vector<48x32xf32> to vector<48xf32>
    %638 = vector.shape_cast %637 : vector<48xf32> to vector<48x1xf32>
    %cst_198 = arith.constant 3.200000e+01 : f32
    %639 = vector.broadcast %cst_198 : f32 to vector<48x1xf32>
    %640 = arith.divf %638, %639 : vector<48x1xf32>
    %641 = vector.broadcast %640 : vector<48x1xf32> to vector<48x32xf32>
    %642 = arith.subf %626, %641 : vector<48x32xf32>
    %643 = arith.mulf %642, %642 : vector<48x32xf32>
    %cst_199 = arith.constant dense<0.000000e+00> : vector<48xf32>
    %644 = vector.multi_reduction <add>, %643, %cst_199 [1] : vector<48x32xf32> to vector<48xf32>
    %645 = vector.shape_cast %644 : vector<48xf32> to vector<48x1xf32>
    %cst_200 = arith.constant 3.200000e+01 : f32
    %646 = vector.broadcast %cst_200 : f32 to vector<48x1xf32>
    %647 = arith.divf %645, %646 : vector<48x1xf32>
    %648 = vector.broadcast %640 : vector<48x1xf32> to vector<48x32xf32>
    %649 = arith.subf %626, %648 : vector<48x32xf32>
    %cst_201 = arith.constant 9.99999974E-6 : f32
    %650 = vector.broadcast %cst_201 : f32 to vector<48x1xf32>
    %651 = arith.addf %647, %650 : vector<48x1xf32>
    %652 = math.rsqrt %651 : vector<48x1xf32>
    %653 = vector.broadcast %652 : vector<48x1xf32> to vector<48x32xf32>
    %654 = arith.mulf %649, %653 : vector<48x32xf32>
    %655 = vector.broadcast %631 : vector<1x32xf32> to vector<48x32xf32>
    %656 = arith.mulf %654, %655 : vector<48x32xf32>
    %657 = vector.broadcast %632 : vector<1x32xf32> to vector<48x32xf32>
    %658 = arith.addf %656, %657 : vector<48x32xf32>
    %c3_202 = arith.constant 3 : index
    %c0_203 = arith.constant 0 : index
    %c0_204 = arith.constant 0 : index
    %659 = vector.load %arg3[%c3_202, %c0_203, %c0_204] : memref<4x32x96xf32, #tpu.memory_space<vmem>>, vector<1x32x96xf32>
    %660 = vector.shape_cast %659 : vector<1x32x96xf32> to vector<32x96xf32>
    %cst_205 = arith.constant dense<0.000000e+00> : vector<48x96xf32>
    %661 = tpu.matmul %658, %660, %cst_205 {dimension_numbers = #tpu.dot_dimension_numbers<[1], [0], [0], [1], [0, 0, 1, 1], [], []>} : vector<48x32xf32>, vector<32x96xf32>, vector<48x96xf32> -> vector<48x96xf32>
    %662 = vector.broadcast %629 : vector<1x96xf32> to vector<48x96xf32>
    %663 = arith.addf %661, %662 : vector<48x96xf32>
    %664 = vector.extract_strided_slice %663 {offsets = [0, 0], sizes = [24, 8], strides = [1, 1]} : vector<48x96xf32> to vector<24x8xf32>
    %665 = vector.extract_strided_slice %663 {offsets = [0, 32], sizes = [24, 8], strides = [1, 1]} : vector<48x96xf32> to vector<24x8xf32>
    %666 = vector.extract_strided_slice %663 {offsets = [0, 64], sizes = [24, 8], strides = [1, 1]} : vector<48x96xf32> to vector<24x8xf32>
    %cst_206 = arith.constant dense<0.000000e+00> : vector<24x24xf32>
    %667 = tpu.matmul %664, %665, %cst_206 {dimension_numbers = #tpu.dot_dimension_numbers<[1], [1], [0], [0], [0, 0, 1, 0], [], []>} : vector<24x8xf32>, vector<24x8xf32>, vector<24x24xf32> -> vector<24x24xf32>
    %cst_207 = arith.constant dense<0xFF800000> : vector<24xf32>
    %668 = vector.multi_reduction <maximumf>, %667, %cst_207 [1] : vector<24x24xf32> to vector<24xf32>
    %669 = vector.shape_cast %668 : vector<24xf32> to vector<24x1xf32>
    %670 = vector.broadcast %669 : vector<24x1xf32> to vector<24x24xf32>
    %671 = arith.subf %667, %670 : vector<24x24xf32>
    %672 = math.exp %671 : vector<24x24xf32>
    %cst_208 = arith.constant dense<0.000000e+00> : vector<24xf32>
    %673 = vector.multi_reduction <add>, %672, %cst_208 [1] : vector<24x24xf32> to vector<24xf32>
    %674 = vector.shape_cast %673 : vector<24xf32> to vector<24x1xf32>
    %675 = tpu.reciprocal %674 {approx = true} : vector<24x1xf32> -> vector<24x1xf32>
    %676 = vector.broadcast %675 : vector<24x1xf32> to vector<24x24xf32>
    %677 = arith.mulf %672, %676 : vector<24x24xf32>
    %cst_209 = arith.constant dense<0.000000e+00> : vector<24x8xf32>
    %678 = tpu.matmul %677, %666, %cst_209 {dimension_numbers = #tpu.dot_dimension_numbers<[1], [0], [0], [1], [0, 0, 1, 1], [], []>} : vector<24x24xf32>, vector<24x8xf32>, vector<24x8xf32> -> vector<24x8xf32>
    %679 = vector.extract_strided_slice %663 {offsets = [0, 8], sizes = [24, 8], strides = [1, 1]} : vector<48x96xf32> to vector<24x8xf32>
    %680 = vector.extract_strided_slice %663 {offsets = [0, 40], sizes = [24, 8], strides = [1, 1]} : vector<48x96xf32> to vector<24x8xf32>
    %681 = vector.extract_strided_slice %663 {offsets = [0, 72], sizes = [24, 8], strides = [1, 1]} : vector<48x96xf32> to vector<24x8xf32>
    %cst_210 = arith.constant dense<0.000000e+00> : vector<24x24xf32>
    %682 = tpu.matmul %679, %680, %cst_210 {dimension_numbers = #tpu.dot_dimension_numbers<[1], [1], [0], [0], [0, 0, 1, 0], [], []>} : vector<24x8xf32>, vector<24x8xf32>, vector<24x24xf32> -> vector<24x24xf32>
    %cst_211 = arith.constant dense<0xFF800000> : vector<24xf32>
    %683 = vector.multi_reduction <maximumf>, %682, %cst_211 [1] : vector<24x24xf32> to vector<24xf32>
    %684 = vector.shape_cast %683 : vector<24xf32> to vector<24x1xf32>
    %685 = vector.broadcast %684 : vector<24x1xf32> to vector<24x24xf32>
    %686 = arith.subf %682, %685 : vector<24x24xf32>
    %687 = math.exp %686 : vector<24x24xf32>
    %cst_212 = arith.constant dense<0.000000e+00> : vector<24xf32>
    %688 = vector.multi_reduction <add>, %687, %cst_212 [1] : vector<24x24xf32> to vector<24xf32>
    %689 = vector.shape_cast %688 : vector<24xf32> to vector<24x1xf32>
    %690 = tpu.reciprocal %689 {approx = true} : vector<24x1xf32> -> vector<24x1xf32>
    %691 = vector.broadcast %690 : vector<24x1xf32> to vector<24x24xf32>
    %692 = arith.mulf %687, %691 : vector<24x24xf32>
    %cst_213 = arith.constant dense<0.000000e+00> : vector<24x8xf32>
    %693 = tpu.matmul %692, %681, %cst_213 {dimension_numbers = #tpu.dot_dimension_numbers<[1], [0], [0], [1], [0, 0, 1, 1], [], []>} : vector<24x24xf32>, vector<24x8xf32>, vector<24x8xf32> -> vector<24x8xf32>
    %694 = vector.extract_strided_slice %663 {offsets = [0, 16], sizes = [24, 8], strides = [1, 1]} : vector<48x96xf32> to vector<24x8xf32>
    %695 = vector.extract_strided_slice %663 {offsets = [0, 48], sizes = [24, 8], strides = [1, 1]} : vector<48x96xf32> to vector<24x8xf32>
    %696 = vector.extract_strided_slice %663 {offsets = [0, 80], sizes = [24, 8], strides = [1, 1]} : vector<48x96xf32> to vector<24x8xf32>
    %cst_214 = arith.constant dense<0.000000e+00> : vector<24x24xf32>
    %697 = tpu.matmul %694, %695, %cst_214 {dimension_numbers = #tpu.dot_dimension_numbers<[1], [1], [0], [0], [0, 0, 1, 0], [], []>} : vector<24x8xf32>, vector<24x8xf32>, vector<24x24xf32> -> vector<24x24xf32>
    %cst_215 = arith.constant dense<0xFF800000> : vector<24xf32>
    %698 = vector.multi_reduction <maximumf>, %697, %cst_215 [1] : vector<24x24xf32> to vector<24xf32>
    %699 = vector.shape_cast %698 : vector<24xf32> to vector<24x1xf32>
    %700 = vector.broadcast %699 : vector<24x1xf32> to vector<24x24xf32>
    %701 = arith.subf %697, %700 : vector<24x24xf32>
    %702 = math.exp %701 : vector<24x24xf32>
    %cst_216 = arith.constant dense<0.000000e+00> : vector<24xf32>
    %703 = vector.multi_reduction <add>, %702, %cst_216 [1] : vector<24x24xf32> to vector<24xf32>
    %704 = vector.shape_cast %703 : vector<24xf32> to vector<24x1xf32>
    %705 = tpu.reciprocal %704 {approx = true} : vector<24x1xf32> -> vector<24x1xf32>
    %706 = vector.broadcast %705 : vector<24x1xf32> to vector<24x24xf32>
    %707 = arith.mulf %702, %706 : vector<24x24xf32>
    %cst_217 = arith.constant dense<0.000000e+00> : vector<24x8xf32>
    %708 = tpu.matmul %707, %696, %cst_217 {dimension_numbers = #tpu.dot_dimension_numbers<[1], [0], [0], [1], [0, 0, 1, 1], [], []>} : vector<24x24xf32>, vector<24x8xf32>, vector<24x8xf32> -> vector<24x8xf32>
    %709 = vector.extract_strided_slice %663 {offsets = [0, 24], sizes = [24, 8], strides = [1, 1]} : vector<48x96xf32> to vector<24x8xf32>
    %710 = vector.extract_strided_slice %663 {offsets = [0, 56], sizes = [24, 8], strides = [1, 1]} : vector<48x96xf32> to vector<24x8xf32>
    %711 = vector.extract_strided_slice %663 {offsets = [0, 88], sizes = [24, 8], strides = [1, 1]} : vector<48x96xf32> to vector<24x8xf32>
    %cst_218 = arith.constant dense<0.000000e+00> : vector<24x24xf32>
    %712 = tpu.matmul %709, %710, %cst_218 {dimension_numbers = #tpu.dot_dimension_numbers<[1], [1], [0], [0], [0, 0, 1, 0], [], []>} : vector<24x8xf32>, vector<24x8xf32>, vector<24x24xf32> -> vector<24x24xf32>
    %cst_219 = arith.constant dense<0xFF800000> : vector<24xf32>
    %713 = vector.multi_reduction <maximumf>, %712, %cst_219 [1] : vector<24x24xf32> to vector<24xf32>
    %714 = vector.shape_cast %713 : vector<24xf32> to vector<24x1xf32>
    %715 = vector.broadcast %714 : vector<24x1xf32> to vector<24x24xf32>
    %716 = arith.subf %712, %715 : vector<24x24xf32>
    %717 = math.exp %716 : vector<24x24xf32>
    %cst_220 = arith.constant dense<0.000000e+00> : vector<24xf32>
    %718 = vector.multi_reduction <add>, %717, %cst_220 [1] : vector<24x24xf32> to vector<24xf32>
    %719 = vector.shape_cast %718 : vector<24xf32> to vector<24x1xf32>
    %720 = tpu.reciprocal %719 {approx = true} : vector<24x1xf32> -> vector<24x1xf32>
    %721 = vector.broadcast %720 : vector<24x1xf32> to vector<24x24xf32>
    %722 = arith.mulf %717, %721 : vector<24x24xf32>
    %cst_221 = arith.constant dense<0.000000e+00> : vector<24x8xf32>
    %723 = tpu.matmul %722, %711, %cst_221 {dimension_numbers = #tpu.dot_dimension_numbers<[1], [0], [0], [1], [0, 0, 1, 1], [], []>} : vector<24x24xf32>, vector<24x8xf32>, vector<24x8xf32> -> vector<24x8xf32>
    %724 = tpu.concatenate %678, %693, %708, %723 in 1 : vector<24x8xf32>, vector<24x8xf32>, vector<24x8xf32>, vector<24x8xf32> -> vector<24x32xf32>
    %725 = vector.extract_strided_slice %663 {offsets = [24, 0], sizes = [24, 8], strides = [1, 1]} : vector<48x96xf32> to vector<24x8xf32>
    %726 = vector.extract_strided_slice %663 {offsets = [24, 32], sizes = [24, 8], strides = [1, 1]} : vector<48x96xf32> to vector<24x8xf32>
    %727 = vector.extract_strided_slice %663 {offsets = [24, 64], sizes = [24, 8], strides = [1, 1]} : vector<48x96xf32> to vector<24x8xf32>
    %cst_222 = arith.constant dense<0.000000e+00> : vector<24x24xf32>
    %728 = tpu.matmul %725, %726, %cst_222 {dimension_numbers = #tpu.dot_dimension_numbers<[1], [1], [0], [0], [0, 0, 1, 0], [], []>} : vector<24x8xf32>, vector<24x8xf32>, vector<24x24xf32> -> vector<24x24xf32>
    %cst_223 = arith.constant dense<0xFF800000> : vector<24xf32>
    %729 = vector.multi_reduction <maximumf>, %728, %cst_223 [1] : vector<24x24xf32> to vector<24xf32>
    %730 = vector.shape_cast %729 : vector<24xf32> to vector<24x1xf32>
    %731 = vector.broadcast %730 : vector<24x1xf32> to vector<24x24xf32>
    %732 = arith.subf %728, %731 : vector<24x24xf32>
    %733 = math.exp %732 : vector<24x24xf32>
    %cst_224 = arith.constant dense<0.000000e+00> : vector<24xf32>
    %734 = vector.multi_reduction <add>, %733, %cst_224 [1] : vector<24x24xf32> to vector<24xf32>
    %735 = vector.shape_cast %734 : vector<24xf32> to vector<24x1xf32>
    %736 = tpu.reciprocal %735 {approx = true} : vector<24x1xf32> -> vector<24x1xf32>
    %737 = vector.broadcast %736 : vector<24x1xf32> to vector<24x24xf32>
    %738 = arith.mulf %733, %737 : vector<24x24xf32>
    %cst_225 = arith.constant dense<0.000000e+00> : vector<24x8xf32>
    %739 = tpu.matmul %738, %727, %cst_225 {dimension_numbers = #tpu.dot_dimension_numbers<[1], [0], [0], [1], [0, 0, 1, 1], [], []>} : vector<24x24xf32>, vector<24x8xf32>, vector<24x8xf32> -> vector<24x8xf32>
    %740 = vector.extract_strided_slice %663 {offsets = [24, 8], sizes = [24, 8], strides = [1, 1]} : vector<48x96xf32> to vector<24x8xf32>
    %741 = vector.extract_strided_slice %663 {offsets = [24, 40], sizes = [24, 8], strides = [1, 1]} : vector<48x96xf32> to vector<24x8xf32>
    %742 = vector.extract_strided_slice %663 {offsets = [24, 72], sizes = [24, 8], strides = [1, 1]} : vector<48x96xf32> to vector<24x8xf32>
    %cst_226 = arith.constant dense<0.000000e+00> : vector<24x24xf32>
    %743 = tpu.matmul %740, %741, %cst_226 {dimension_numbers = #tpu.dot_dimension_numbers<[1], [1], [0], [0], [0, 0, 1, 0], [], []>} : vector<24x8xf32>, vector<24x8xf32>, vector<24x24xf32> -> vector<24x24xf32>
    %cst_227 = arith.constant dense<0xFF800000> : vector<24xf32>
    %744 = vector.multi_reduction <maximumf>, %743, %cst_227 [1] : vector<24x24xf32> to vector<24xf32>
    %745 = vector.shape_cast %744 : vector<24xf32> to vector<24x1xf32>
    %746 = vector.broadcast %745 : vector<24x1xf32> to vector<24x24xf32>
    %747 = arith.subf %743, %746 : vector<24x24xf32>
    %748 = math.exp %747 : vector<24x24xf32>
    %cst_228 = arith.constant dense<0.000000e+00> : vector<24xf32>
    %749 = vector.multi_reduction <add>, %748, %cst_228 [1] : vector<24x24xf32> to vector<24xf32>
    %750 = vector.shape_cast %749 : vector<24xf32> to vector<24x1xf32>
    %751 = tpu.reciprocal %750 {approx = true} : vector<24x1xf32> -> vector<24x1xf32>
    %752 = vector.broadcast %751 : vector<24x1xf32> to vector<24x24xf32>
    %753 = arith.mulf %748, %752 : vector<24x24xf32>
    %cst_229 = arith.constant dense<0.000000e+00> : vector<24x8xf32>
    %754 = tpu.matmul %753, %742, %cst_229 {dimension_numbers = #tpu.dot_dimension_numbers<[1], [0], [0], [1], [0, 0, 1, 1], [], []>} : vector<24x24xf32>, vector<24x8xf32>, vector<24x8xf32> -> vector<24x8xf32>
    %755 = vector.extract_strided_slice %663 {offsets = [24, 16], sizes = [24, 8], strides = [1, 1]} : vector<48x96xf32> to vector<24x8xf32>
    %756 = vector.extract_strided_slice %663 {offsets = [24, 48], sizes = [24, 8], strides = [1, 1]} : vector<48x96xf32> to vector<24x8xf32>
    %757 = vector.extract_strided_slice %663 {offsets = [24, 80], sizes = [24, 8], strides = [1, 1]} : vector<48x96xf32> to vector<24x8xf32>
    %cst_230 = arith.constant dense<0.000000e+00> : vector<24x24xf32>
    %758 = tpu.matmul %755, %756, %cst_230 {dimension_numbers = #tpu.dot_dimension_numbers<[1], [1], [0], [0], [0, 0, 1, 0], [], []>} : vector<24x8xf32>, vector<24x8xf32>, vector<24x24xf32> -> vector<24x24xf32>
    %cst_231 = arith.constant dense<0xFF800000> : vector<24xf32>
    %759 = vector.multi_reduction <maximumf>, %758, %cst_231 [1] : vector<24x24xf32> to vector<24xf32>
    %760 = vector.shape_cast %759 : vector<24xf32> to vector<24x1xf32>
    %761 = vector.broadcast %760 : vector<24x1xf32> to vector<24x24xf32>
    %762 = arith.subf %758, %761 : vector<24x24xf32>
    %763 = math.exp %762 : vector<24x24xf32>
    %cst_232 = arith.constant dense<0.000000e+00> : vector<24xf32>
    %764 = vector.multi_reduction <add>, %763, %cst_232 [1] : vector<24x24xf32> to vector<24xf32>
    %765 = vector.shape_cast %764 : vector<24xf32> to vector<24x1xf32>
    %766 = tpu.reciprocal %765 {approx = true} : vector<24x1xf32> -> vector<24x1xf32>
    %767 = vector.broadcast %766 : vector<24x1xf32> to vector<24x24xf32>
    %768 = arith.mulf %763, %767 : vector<24x24xf32>
    %cst_233 = arith.constant dense<0.000000e+00> : vector<24x8xf32>
    %769 = tpu.matmul %768, %757, %cst_233 {dimension_numbers = #tpu.dot_dimension_numbers<[1], [0], [0], [1], [0, 0, 1, 1], [], []>} : vector<24x24xf32>, vector<24x8xf32>, vector<24x8xf32> -> vector<24x8xf32>
    %770 = vector.extract_strided_slice %663 {offsets = [24, 24], sizes = [24, 8], strides = [1, 1]} : vector<48x96xf32> to vector<24x8xf32>
    %771 = vector.extract_strided_slice %663 {offsets = [24, 56], sizes = [24, 8], strides = [1, 1]} : vector<48x96xf32> to vector<24x8xf32>
    %772 = vector.extract_strided_slice %663 {offsets = [24, 88], sizes = [24, 8], strides = [1, 1]} : vector<48x96xf32> to vector<24x8xf32>
    %cst_234 = arith.constant dense<0.000000e+00> : vector<24x24xf32>
    %773 = tpu.matmul %770, %771, %cst_234 {dimension_numbers = #tpu.dot_dimension_numbers<[1], [1], [0], [0], [0, 0, 1, 0], [], []>} : vector<24x8xf32>, vector<24x8xf32>, vector<24x24xf32> -> vector<24x24xf32>
    %cst_235 = arith.constant dense<0xFF800000> : vector<24xf32>
    %774 = vector.multi_reduction <maximumf>, %773, %cst_235 [1] : vector<24x24xf32> to vector<24xf32>
    %775 = vector.shape_cast %774 : vector<24xf32> to vector<24x1xf32>
    %776 = vector.broadcast %775 : vector<24x1xf32> to vector<24x24xf32>
    %777 = arith.subf %773, %776 : vector<24x24xf32>
    %778 = math.exp %777 : vector<24x24xf32>
    %cst_236 = arith.constant dense<0.000000e+00> : vector<24xf32>
    %779 = vector.multi_reduction <add>, %778, %cst_236 [1] : vector<24x24xf32> to vector<24xf32>
    %780 = vector.shape_cast %779 : vector<24xf32> to vector<24x1xf32>
    %781 = tpu.reciprocal %780 {approx = true} : vector<24x1xf32> -> vector<24x1xf32>
    %782 = vector.broadcast %781 : vector<24x1xf32> to vector<24x24xf32>
    %783 = arith.mulf %778, %782 : vector<24x24xf32>
    %cst_237 = arith.constant dense<0.000000e+00> : vector<24x8xf32>
    %784 = tpu.matmul %783, %772, %cst_237 {dimension_numbers = #tpu.dot_dimension_numbers<[1], [0], [0], [1], [0, 0, 1, 1], [], []>} : vector<24x24xf32>, vector<24x8xf32>, vector<24x8xf32> -> vector<24x8xf32>
    %785 = tpu.concatenate %739, %754, %769, %784 in 1 : vector<24x8xf32>, vector<24x8xf32>, vector<24x8xf32>, vector<24x8xf32> -> vector<24x32xf32>
    %786 = tpu.concatenate %724, %785 in 0 : vector<24x32xf32>, vector<24x32xf32> -> vector<48x32xf32>
    %c3_238 = arith.constant 3 : index
    %c0_239 = arith.constant 0 : index
    %c0_240 = arith.constant 0 : index
    %787 = vector.load %arg4[%c3_238, %c0_239, %c0_240] : memref<4x32x32xf32, #tpu.memory_space<vmem>>, vector<1x32x32xf32>
    %788 = vector.shape_cast %787 : vector<1x32x32xf32> to vector<32x32xf32>
    %cst_241 = arith.constant dense<0.000000e+00> : vector<48x32xf32>
    %789 = tpu.matmul %786, %788, %cst_241 {dimension_numbers = #tpu.dot_dimension_numbers<[1], [0], [0], [1], [0, 0, 1, 1], [], []>} : vector<48x32xf32>, vector<32x32xf32>, vector<48x32xf32> -> vector<48x32xf32>
    %790 = vector.broadcast %633 : vector<1x32xf32> to vector<48x32xf32>
    %791 = arith.addf %789, %790 : vector<48x32xf32>
    %792 = arith.addf %626, %791 : vector<48x32xf32>
    %cst_242 = arith.constant dense<0.000000e+00> : vector<48xf32>
    %793 = vector.multi_reduction <add>, %792, %cst_242 [1] : vector<48x32xf32> to vector<48xf32>
    %794 = vector.shape_cast %793 : vector<48xf32> to vector<48x1xf32>
    %cst_243 = arith.constant 3.200000e+01 : f32
    %795 = vector.broadcast %cst_243 : f32 to vector<48x1xf32>
    %796 = arith.divf %794, %795 : vector<48x1xf32>
    %797 = vector.broadcast %796 : vector<48x1xf32> to vector<48x32xf32>
    %798 = arith.subf %792, %797 : vector<48x32xf32>
    %799 = arith.mulf %798, %798 : vector<48x32xf32>
    %cst_244 = arith.constant dense<0.000000e+00> : vector<48xf32>
    %800 = vector.multi_reduction <add>, %799, %cst_244 [1] : vector<48x32xf32> to vector<48xf32>
    %801 = vector.shape_cast %800 : vector<48xf32> to vector<48x1xf32>
    %cst_245 = arith.constant 3.200000e+01 : f32
    %802 = vector.broadcast %cst_245 : f32 to vector<48x1xf32>
    %803 = arith.divf %801, %802 : vector<48x1xf32>
    %804 = vector.broadcast %796 : vector<48x1xf32> to vector<48x32xf32>
    %805 = arith.subf %792, %804 : vector<48x32xf32>
    %cst_246 = arith.constant 9.99999974E-6 : f32
    %806 = vector.broadcast %cst_246 : f32 to vector<48x1xf32>
    %807 = arith.addf %803, %806 : vector<48x1xf32>
    %808 = math.rsqrt %807 : vector<48x1xf32>
    %809 = vector.broadcast %808 : vector<48x1xf32> to vector<48x32xf32>
    %810 = arith.mulf %805, %809 : vector<48x32xf32>
    %811 = vector.broadcast %634 : vector<1x32xf32> to vector<48x32xf32>
    %812 = arith.mulf %810, %811 : vector<48x32xf32>
    %813 = vector.broadcast %635 : vector<1x32xf32> to vector<48x32xf32>
    %814 = arith.addf %812, %813 : vector<48x32xf32>
    %c3_247 = arith.constant 3 : index
    %c0_248 = arith.constant 0 : index
    %c0_249 = arith.constant 0 : index
    %815 = vector.load %arg5[%c3_247, %c0_248, %c0_249] : memref<4x32x128xf32, #tpu.memory_space<vmem>>, vector<1x32x128xf32>
    %816 = vector.shape_cast %815 : vector<1x32x128xf32> to vector<32x128xf32>
    %cst_250 = arith.constant dense<0.000000e+00> : vector<48x128xf32>
    %817 = tpu.matmul %814, %816, %cst_250 {dimension_numbers = #tpu.dot_dimension_numbers<[1], [0], [0], [1], [0, 0, 1, 1], [], []>} : vector<48x32xf32>, vector<32x128xf32>, vector<48x128xf32> -> vector<48x128xf32>
    %818 = vector.broadcast %630 : vector<1x128xf32> to vector<48x128xf32>
    %819 = arith.addf %817, %818 : vector<48x128xf32>
    %cst_251 = arith.constant 5.000000e-01 : f32
    %820 = vector.broadcast %cst_251 : f32 to vector<48x128xf32>
    %821 = arith.mulf %820, %819 : vector<48x128xf32>
    %cst_252 = arith.constant 0.707106769 : f32
    %822 = vector.broadcast %cst_252 : f32 to vector<48x128xf32>
    %823 = arith.mulf %819, %822 : vector<48x128xf32>
    %824 = math.erf %823 : vector<48x128xf32>
    %cst_253 = arith.constant 1.000000e+00 : f32
    %825 = vector.broadcast %cst_253 : f32 to vector<48x128xf32>
    %826 = arith.addf %825, %824 : vector<48x128xf32>
    %827 = arith.mulf %821, %826 : vector<48x128xf32>
    %c3_254 = arith.constant 3 : index
    %c0_255 = arith.constant 0 : index
    %c0_256 = arith.constant 0 : index
    %828 = vector.load %arg6[%c3_254, %c0_255, %c0_256] : memref<4x128x32xf32, #tpu.memory_space<vmem>>, vector<1x128x32xf32>
    %829 = vector.shape_cast %828 : vector<1x128x32xf32> to vector<128x32xf32>
    %cst_257 = arith.constant dense<0.000000e+00> : vector<48x32xf32>
    %830 = tpu.matmul %827, %829, %cst_257 {dimension_numbers = #tpu.dot_dimension_numbers<[1], [0], [0], [1], [0, 0, 1, 1], [], []>} : vector<48x128xf32>, vector<128x32xf32>, vector<48x32xf32> -> vector<48x32xf32>
    %831 = arith.addf %792, %830 : vector<48x32xf32>
    %832 = vector.broadcast %636 : vector<1x32xf32> to vector<48x32xf32>
    %833 = arith.addf %831, %832 : vector<48x32xf32>
    %c0_258 = arith.constant 0 : index
    %c0_259 = arith.constant 0 : index
    %834 = vector.load %arg8[%c0_258, %c0_259] : memref<48x32xf32, #tpu.memory_space<vmem>>, vector<48x32xf32>
    tpu.vector_store %arg8[%c0_258, %c0_259], %833 {strides = array<i32>} : memref<48x32xf32, #tpu.memory_space<vmem>>, vector<48x32xf32>,
    return
  }
}

</mosaic_0001>

<bundles_post_ra>
// kernel: tpu_custom_call.1
= control target key start
LH: loop header
LB: loop body
LE: loop exit
PB: predicated region body
PF: predicated region fallthrough
CT: control target
= control target key end

     0   :  { %vm42_vm0 = vcmask 261120   ;;  %s13882_s16 = smov 96   ;;  %vm13883_vm1 = vmmov 0   ;;  %s13884_s17 = smov 88   ;;  %vm386_vm2 = vcmask 64512   ;;  %vm479_vm3 = vcmask 195584   ;;  %s17886_s1 = inlined_call_operand.vmem [shape: f32[32,32], index: 1, kind: input, shape index: {}]   ;;  %s17887_s0 = inlined_call_operand.vmem [shape: f32[48,32], index: 0, kind: input, shape index: {}]   ;;  %s17888_s2 = inlined_call_operand.vmem [shape: f32[24,32], index: 2, kind: input, shape index: {}]   ;;  %s17889_s3 = inlined_call_operand.vmem [shape: f32[4,32,96], index: 3, kind: input, shape index: {}]   ;;  %s17890_s7 = inlined_call_operand.vmem [shape: f32[4,8,128], index: 7, kind: input, shape index: {}]   ;;  %s17891_s4 = inlined_call_operand.vmem [shape: f32[4,32,32], index: 4, kind: input, shape index: {}]   ;;  %s17892_s5 = inlined_call_operand.vmem [shape: f32[4,32,128], index: 5, kind: input, shape index: {}]   ;;  %s17893_s6 = inlined_call_operand.vmem [shape: f32[4,128,32], index: 6, kind: input, shape index: {}]   ;;  %s17894_s8 = inlined_call_operand.vmem [shape: f32[48,32], index: 8, kind: output, shape index: {}]  }
   0x1   :  { %v41_v0 = vld [vmem:[%s17886_s1 + $0x18] sm:$0xff]  ;;  %v40_v1 = vld [vmem:[%s17886_s1 + $0x10] sm:$0xff]  ;;  %v32_v2 = vld [vmem:[%s17887_s0] sm:$0xff]  ;;  %s13885_s18 = smov 120   ;;  %s13886_s19 = smov 80   ;;  %vm1355_vm4 = vcmask 130048  }
   0x2   :  { %11988 = vmatprep.subr.mxu0 %v41_v0  ;;  %v39_v3 = vld [vmem:[%s17886_s1 + $0x8] sm:$0xff]  ;;  %11996 = vmatprep.mubr.msk.f32.mxu0 %vm42_vm0, %v32_v2  ;;  %v38_v4 = vld [vmem:[%s17886_s1] sm:$0xff]  ;;  %v34_v6 = vld [vmem:[%s17887_s0 + $0x10] sm:$0xff]  ;;  %s13887_s20 = smov 112   ;;  %s13888_s1 = smov 72  }
   0x3   :  { %11989 = vmatpush3.msra.mxu0 %v41_v0  ;;  %v33_v5 = vld [vmem:[%s17887_s0 + $0x8] sm:$0xff]  ;;  %v35_v7 = vld [vmem:[%s17887_s0 + $0x18] sm:$0xff]  ;;  %v36_v8 = vld [vmem:[%s17887_s0 + $0x20] sm:$0xff]  ;;  %s13889_s21 = smov 104   ;;  %s13890_s22 = smov 64  }
   0x4   :  { %11990 = vmatprep.subr.mxu0 %v40_v1  ;;  %v37_v9 = vld [vmem:[%s17887_s0 + $0x28] sm:$0xff]  ;;  %v29_v11 = vld [vmem:[%s17888_s2] sm:$0xff]  ;;  %v31_v16 = vld [vmem:[%s17888_s2 + $0x10] sm:$0xff]  ;;  %s13891_s23 = smov 56   ;;  %s13892_s24 = smov 48  }
   0x5   :  { %11991 = vmatpush3.msra.mxu0 %v40_v1  ;;  %v30_v12 = vld [vmem:[%s17888_s2 + $0x8] sm:$0xff]  ;;  %v259_v61 = vld [vmem:[%s17889_s3 + $0x18] sm:$0xff]  ;;  %v258_v62 = vld [vmem:[%s17889_s3 + $0x10] sm:$0xff]  ;;  %s13893_s25 = smov 40   ;;  %s13894_s26 = smov 8  }
   0x6   :  { %11992 = vmatprep.subr.mxu0 %v39_v3  ;;  %v257_v63 = vld [vmem:[%s17889_s3 + $0x8] sm:$0xff]  ;;  %v256_v0 = vld [vmem:[%s17889_s3] sm:$0xff]  ;;  %s13895_s9 = smov 16   ;;  %s13896_s12 = smov 24  }
   0x7   :  { %11993 = vmatpush3.msra.mxu0 %v39_v3 }
   0x8   :  { %11994 = vmatprep.subr.mxu0 %v38_v4 }
   0x9   :  { %11995 = vmatpush3.msra.mxu0 %v38_v4 }
   0xa   :  { %11997 = vmatmul.mubr.msk.f32.vlgmr.msra.gmra.mxu0 %vm42_vm0, %v33_v5  ;;  %12005 = vmatprep.subr.mxu0 %v259_v61 }
   0xb   :  { %11999 = vmatprep.mubr.msk.f32.mxu0 %vm42_vm0, %v34_v6  ;;  %12006 = vmatpush3.msra.mxu0 %v259_v61  ;;  %v236_v6 = vlaneseq }
   0xc   :  { %12007 = vmatprep.subr.mxu0 %v258_v62 }
   0xd   :  { %12008 = vmatpush3.msra.mxu0 %v258_v62 }
   0xe   :  { %12000 = vmatmul.mubr.msk.f32.gmra.mxu0 %vm42_vm0, %v35_v7  ;;  %12009 = vmatprep.subr.mxu0 %v257_v63 }
   0xf   :  { %12002 = vmatprep.mubr.msk.f32.mxu0 %vm42_vm0, %v36_v8  ;;  %12010 = vmatpush3.msra.mxu0 %v257_v63 }
  0x10   :  { %12011 = vmatprep.subr.mxu0 %v256_v0 }
  0x11   :  { %12012 = vmatpush3.msra.mxu0 %v256_v0 }
  0x12   :  { %12003 = vmatmul.mubr.msk.f32.gmra.mxu0 %vm42_vm0, %v37_v9 }
  0xca   :  { %v11998_v10 = vpop.f32.mrf.mxu0 }
  0xcb   :  { %v13989_v17 = vadd.f32 %v11998_v10, %v30_v12 }
  0xcc   :  { %v127_v13 = vpop.f32.mrf.mxu0 }
  0xcd   :  { %v13984_v14 = vadd.f32 %v127_v13, %v29_v11  ;;  %v160_v24 = vsel %vm42_vm0, %v13989_v17, 0.0  ;;  %v14059_v13 = vshrl.u32 %v236_v6, 7 }
  0xce   :  { %v12001_v15 = vpop.f32.mrf.mxu0 }
  0xcf   :  { %v157_v18 = vsel %vm42_vm0, %v13984_v14, 0.0  ;;  %v13995_v22 = vadd.f32 %v12001_v15, %v29_v11 }
  0xd0   :  { %v137_v19 = vpop.f32.mrf.mxu0  ;;  %158 = vadd.xlane.f32.xlu0 %v157_v18 }
  0xd1   :  { %v13993_v20 = vadd.f32 %v137_v19, %v31_v16  ;;  %v166_v28 = vsel %vm42_vm0, %v13995_v22, 0.0 }
  0xd2   :  { %v12004_v21 = vpop.f32.mrf.mxu0 }
  0xd3   :  { %v163_v23 = vsel %vm42_vm0, %v13993_v20, 0.0  ;;  %v14001_v26 = vadd.f32 %v12004_v21, %v31_v16 }
  0xd4   :  { %v147_v25 = vpop.f32.mrf.mxu0  ;;  %164 = vadd.xlane.f32.xlu1 %v163_v23  ;;  %161 = vadd.xlane.f32.xlu0 %v160_v24  ;;  %v14062_v23 = vsub.s32 2, %v14059_v13 }
  0xd5   :  { %v14003_v27 = vadd.f32 %v147_v25, %v30_v12  ;;  %v172_v30 = vsel %vm42_vm0, %v14001_v26, 0.0  ;;  %v156_v25 = vld [vmem:[%s17890_s7] sm:$0xff] }
  0xd6   :  { %17917 = vst [vmem:[#allocation3_spill] sm:$0xff] %v14062_v23 }
  0xd7   :  { %17916 = vst [vmem:[#allocation2_spill] sm:$0xff] %v14003_v27  ;;  %v169_v29 = vsel %vm42_vm0, %v14003_v27, 0.0 }
  0xd8   :  { %167 = vadd.xlane.f32.xlu1 %v166_v28  ;;  %170 = vadd.xlane.f32.xlu0 %v169_v29  ;;  %v14068_v29 = vsub.s32 3, %v14059_v13 }
  0xda   :  { %17918 = vst [vmem:[#allocation4_spill] sm:$0xff] %v14068_v29 }
  0xdc   :  { %173 = vadd.xlane.f32.xlu1 %v172_v30  ;;  %v239_v30 = vrot.slane %v156_v25, %v14062_v23 }
 0x159   :  { %v159_v31 = vpop.xlane.xlu0 %158 }
 0x15a   :  { %v176_v32 = vmul.f32 0.03125, %v159_v31 }
 0x15c   :  { %v14012_v33 = vsub.f32 %v13984_v14, %v176_v32 }
 0x15d   :  { %v165_v34 = vpop.xlane.xlu1 %164  ;;  %v162_v35 = vpop.xlane.xlu0 %161 }
 0x15e   :  { %v178_v36 = vmul.f32 0.03125, %v165_v34  ;;  %v177_v37 = vmul.f32 0.03125, %v162_v35  ;;  %v188_v38 = vmul.f32 %v14012_v33, %v14012_v33  ;;  %v249_v34 = vrot.slane %v156_v25, %v14068_v29 }
 0x160   :  { %v14017_v39 = vsub.f32 %v13993_v20, %v178_v36  ;;  %v14020_v40 = vsub.f32 %v13989_v17, %v177_v37  ;;  %v194_v41 = vsel %vm42_vm0, %v188_v38, 0.0 }
 0x161   :  { %v168_v42 = vpop.xlane.xlu1 %167  ;;  %195 = vadd.xlane.f32.xlu0 %v194_v41  ;;  %v171_v43 = vpop.xlane.xlu0 %170 }
 0x162   :  { %v179_v44 = vmul.f32 0.03125, %v168_v42  ;;  %v180_v45 = vmul.f32 0.03125, %v171_v43  ;;  %v190_v46 = vmul.f32 %v14017_v39, %v14017_v39  ;;  %v189_v47 = vmul.f32 %v14020_v40, %v14020_v40 }
 0x164   :  { %v14028_v48 = vsub.f32 %v13995_v22, %v179_v44  ;;  %v14031_v49 = vsub.f32 %v14003_v27, %v180_v45  ;;  %v200_v50 = vsel %vm42_vm0, %v190_v46, 0.0  ;;  %v197_v51 = vsel %vm42_vm0, %v189_v47, 0.0 }
 0x165   :  { %v174_v52 = vpop.xlane.xlu1 %173  ;;  %201 = vadd.xlane.f32.xlu0 %v200_v50  ;;  %198 = vadd.xlane.f32.xlu1 %v197_v51 }
 0x166   :  { %v181_v53 = vmul.f32 0.03125, %v174_v52  ;;  %v191_v54 = vmul.f32 %v14028_v48, %v14028_v48  ;;  %v192_v55 = vmul.f32 %v14031_v49, %v14031_v49 }
 0x168   :  { %v14040_v56 = vsub.f32 %v14001_v26, %v181_v53  ;;  %v203_v57 = vsel %vm42_vm0, %v191_v54, 0.0  ;;  %v206_v58 = vsel %vm42_vm0, %v192_v55, 0.0 }
 0x169   :  { %204 = vadd.xlane.f32.xlu1 %v203_v57  ;;  %207 = vadd.xlane.f32.xlu0 %v206_v58  ;;  %v17895_v58 = vmov 0.0  }
 0x16a   :  { %v193_v59 = vmul.f32 %v14040_v56, %v14040_v56  ;;  %12022 = vmatprep.subr.mxu0 %v17895_v58  ;;  %12037 = vmatprep.subr.mxu1 %v17895_v58 }
 0x16b   :  { %12043 = vmatprep.mubr.msk.f32.mxu1 %vm13883_vm1, %v17895_v58 }
 0x16c   :  { %v209_v60 = vsel %vm42_vm0, %v193_v59, 0.0 }
 0x16d   :  { %210 = vadd.xlane.f32.xlu1 %v209_v60 }
 0x1ea   :  { %v196_v1 = vpop.xlane.xlu0 %195 }
 0x1eb   :  { %v212_v2 = vmul.f32 0.03125, %v196_v1 }
 0x1ed   :  { %v218_v3 = vadd.f32 1e-05, %v212_v2 }
 0x1ee   :  { %v199_v4 = vpop.xlane.xlu1 %198  ;;  %v202_v5 = vpop.xlane.xlu0 %201 }
 0x1ef   :  { %13349 = vrsqrt.f32 %v218_v3  ;;  %v213_v7 = vmul.f32 0.03125, %v199_v4  ;;  %v214_v8 = vmul.f32 0.03125, %v202_v5 }
 0x1f1   :  { %v219_v9 = vadd.f32 1e-05, %v213_v7  ;;  %v220_v10 = vadd.f32 1e-05, %v214_v8 }
 0x1f2   :  { %v205_v11 = vpop.xlane.xlu1 %204  ;;  %v208_v12 = vpop.xlane.xlu0 %207 }
 0x1f3   :  { %13351 = vrsqrt.f32 %v219_v9  ;;  %v215_v15 = vmul.f32 0.03125, %v205_v11  ;;  %v216_v16 = vmul.f32 0.03125, %v208_v12 }
 0x1f4   :  { %13353 = vrsqrt.f32 %v220_v10 }
 0x1f5   :  { %v221_v18 = vadd.f32 1e-05, %v215_v15  ;;  %v222_v19 = vadd.f32 1e-05, %v216_v16 }
 0x1f6   :  { %v211_v21 = vpop.xlane.xlu1 %210 }
 0x1f7   :  { %13355 = vrsqrt.f32 %v221_v18  ;;  %v217_v24 = vmul.f32 0.03125, %v211_v21 }
 0x1f8   :  { %13357 = vrsqrt.f32 %v222_v19 }
 0x1f9   :  { %v223_v28 = vadd.f32 1e-05, %v217_v24 }
 0x1fb   :  { %13359 = vrsqrt.f32 %v223_v28 }
 0x1fc   :  { %v13350_v31 = vpop.eup %13349 }
 0x1fd   :  { %v230_v32 = vmul.f32 %v13350_v31, %v14012_v33 }
 0x1ff   :  { %v240_v35 = vmul.f32 %v239_v30, %v230_v32 }
 0x200   :  { %v13352_v36 = vpop.eup %13351 }
 0x201   :  { %v13354_v37 = vpop.eup %13353  ;;  %v231_v38 = vmul.f32 %v13352_v36, %v14020_v40  ;;  %v250_v41 = vadd.f32 %v249_v34, %v240_v35 }
 0x202   :  { %v232_v42 = vmul.f32 %v13354_v37, %v14017_v39 }
 0x203   :  { %v241_v43 = vmul.f32 %v239_v30, %v231_v38  ;;  %12013 = vmatprep.mubr.msk.f32.mxu0 %vm42_vm0, %v250_v41 }
 0x204   :  { %v13356_v44 = vpop.eup %13355  ;;  %v242_v45 = vmul.f32 %v239_v30, %v232_v42 }
 0x205   :  { %v13358_v46 = vpop.eup %13357  ;;  %v251_v47 = vadd.f32 %v249_v34, %v241_v43  ;;  %v233_v50 = vmul.f32 %v13356_v44, %v14028_v48 }
 0x206   :  { %v252_v33 = vadd.f32 %v249_v34, %v242_v45  ;;  %v234_v51 = vmul.f32 %v13358_v46, %v14031_v49  ;;  %v14085_v49 = vsub.s32 0, %v14059_v13 }
 0x207   :  { %12014 = vmatmul.mubr.msk.f32.vlgmr.msra.gmra.mxu0 %vm42_vm0, %v251_v47  ;;  %v243_v52 = vmul.f32 %v239_v30, %v233_v50 }
 0x208   :  { %v13360_v53 = vpop.eup %13359  ;;  %12016 = vmatprep.mubr.msk.f32.mxu0 %vm42_vm0, %v252_v33  ;;  %v244_v40 = vmul.f32 %v239_v30, %v234_v51  ;;  %17919 = vst [vmem:[#allocation5_spill] sm:$0xff] %v14085_v49  ;;  %v263_v59 = vrot.slane %v156_v25, %v14085_v49 }
 0x209   :  { %v253_v39 = vadd.f32 %v249_v34, %v243_v52  ;;  %v235_v54 = vmul.f32 %v13360_v53, %v14040_v56 }
 0x20a   :  { %v254_v55 = vadd.f32 %v249_v34, %v244_v40 }
 0x20b   :  { %12017 = vmatmul.mubr.msk.f32.gmra.mxu0 %vm42_vm0, %v253_v39  ;;  %v245_v57 = vmul.f32 %v239_v30, %v235_v54 }
 0x20c   :  { %12019 = vmatprep.mubr.msk.f32.mxu0 %vm42_vm0, %v254_v55 }
 0x20d   :  { %v255_v48 = vadd.f32 %v249_v34, %v245_v57 }
 0x20f   :  { %12020 = vmatmul.mubr.msk.f32.gmra.mxu0 %vm42_vm0, %v255_v48 }
 0x210   :  { %12028 = vmatprep.mubr.msk.f32.mxu0 %vm13883_vm1, %v17895_v58 }
 0x2c7   :  { %v12015_v56 = vpop.f32.mrf.mxu0 }
 0x2c8   :  { %v14090_v60 = vadd.f32 %v12015_v56, %v263_v59 }
 0x2c9   :  { %v348_v61 = vpop.f32.mrf.mxu0 }
 0x2ca   :  { %382 = vrot.lane.b32.xlu1 %v14090_v60, %s13882_s16  ;;  %v14094_v63 = vadd.f32 %v348_v61, %v263_v59 }
 0x2cb   :  { %v12018_v62 = vpop.f32.mrf.mxu0 }
 0x2cc   :  { %v14148_v6 = vadd.f32 %v12018_v62, %v263_v59 }
 0x2cd   :  { %v358_v0 = vpop.f32.mrf.mxu0 }
 0x2ce   :  { %v14100_v1 = vadd.f32 %v358_v0, %v263_v59  ;;  %380 = vrot.lane.b32.xlu1 %v14094_v63, %s13882_s16 }
 0x2cf   :  { %v12021_v2 = vpop.f32.mrf.mxu0 }
 0x2d0   :  { %384 = vrot.lane.b32.xlu0 %v14100_v1, %s13882_s16  ;;  %v14136_v3 = vadd.f32 %v12021_v2, %v263_v59 }
 0x2d1   :  { %v368_v4 = vpop.f32.mrf.mxu0 }
 0x2d2   :  { %621 = vrot.lane.b32.xlu1 %v14100_v1, %s13884_s17  ;;  %v14142_v5 = vadd.f32 %v368_v4, %v263_v59 }
 0x2d4   :  { %619 = vrot.lane.b32.xlu0 %v14090_v60, %s13884_s17 }
 0x2d6   :  { %617 = vrot.lane.b32.xlu1 %v14094_v63, %s13884_s17 }
 0x2d8   :  { %611 = vrot.lane.b32.xlu0 %v14094_v63, %s13885_s18 }
 0x2da   :  { %856 = vrot.lane.b32.xlu1 %v14100_v1, %s13886_s19 }
 0x2dc   :  { %613 = vrot.lane.b32.xlu0 %v14090_v60, %s13885_s18 }
 0x2de   :  { %854 = vrot.lane.b32.xlu1 %v14090_v60, %s13886_s19 }
 0x2e0   :  { %615 = vrot.lane.b32.xlu0 %v14100_v1, %s13885_s18 }
 0x2e2   :  { %852 = vrot.lane.b32.xlu1 %v14094_v63, %s13886_s19 }
 0x2e4   :  { %846 = vrot.lane.b32.xlu0 %v14094_v63, %s13887_s20 }
 0x2e6   :  { %1091 = vrot.lane.b32.xlu1 %v14100_v1, %s13888_s1 }
 0x2e8   :  { %848 = vrot.lane.b32.xlu0 %v14090_v60, %s13887_s20 }
 0x2ea   :  { %1089 = vrot.lane.b32.xlu1 %v14090_v60, %s13888_s1 }
 0x2ec   :  { %850 = vrot.lane.b32.xlu0 %v14100_v1, %s13887_s20 }
 0x2ee   :  { %1087 = vrot.lane.b32.xlu1 %v14094_v63, %s13888_s1 }
 0x2f0   :  { %1081 = vrot.lane.b32.xlu0 %v14094_v63, %s13889_s21 }
 0x2f2   :  { %1369 = vrot.lane.b32.xlu1 %v14136_v3, %s13882_s16 }
 0x2f4   :  { %1083 = vrot.lane.b32.xlu0 %v14090_v60, %s13889_s21 }
 0x2f6   :  { %1367 = vrot.lane.b32.xlu1 %v14142_v5, %s13882_s16 }
 0x2f8   :  { %1085 = vrot.lane.b32.xlu0 %v14100_v1, %s13889_s21 }
 0x2fa   :  { %1365 = vrot.lane.b32.xlu1 %v14148_v6, %s13882_s16 }
 0x2fc   :  { %1604 = vrot.lane.b32.xlu0 %v14136_v3, %s13884_s17 }
 0x2fe   :  { %1602 = vrot.lane.b32.xlu1 %v14142_v5, %s13884_s17 }
 0x300   :  { %1600 = vrot.lane.b32.xlu0 %v14148_v6, %s13884_s17 }
 0x302   :  { %1594 = vrot.lane.b32.xlu1 %v14148_v6, %s13885_s18 }
 0x304   :  { %1839 = vrot.lane.b32.xlu0 %v14136_v3, %s13886_s19 }
 0x306   :  { %1596 = vrot.lane.b32.xlu1 %v14142_v5, %s13885_s18 }
 0x308   :  { %1837 = vrot.lane.b32.xlu0 %v14142_v5, %s13886_s19 }
 0x30a   :  { %1598 = vrot.lane.b32.xlu1 %v14136_v3, %s13885_s18 }
 0x30c   :  { %1835 = vrot.lane.b32.xlu0 %v14148_v6, %s13886_s19 }
 0x30e   :  { %1829 = vrot.lane.b32.xlu1 %v14148_v6, %s13887_s20 }
 0x310   :  { %2074 = vrot.lane.b32.xlu0 %v14136_v3, %s13888_s1 }
 0x312   :  { %1831 = vrot.lane.b32.xlu1 %v14142_v5, %s13887_s20 }
 0x314   :  { %2072 = vrot.lane.b32.xlu0 %v14142_v5, %s13888_s1 }
 0x316   :  { %1833 = vrot.lane.b32.xlu1 %v14136_v3, %s13887_s20 }
 0x318   :  { %2070 = vrot.lane.b32.xlu0 %v14148_v6, %s13888_s1 }
 0x31a   :  { %2064 = vrot.lane.b32.xlu1 %v14148_v6, %s13889_s21 }
 0x31c   :  { %2066 = vrot.lane.b32.xlu0 %v14142_v5, %s13889_s21 }
 0x31e   :  { %2068 = vrot.lane.b32.xlu1 %v14136_v3, %s13889_s21 }
 0x320   :  { %517 = vrot.lane.b32.xlu0 %v14100_v1, %s13890_s22 }
 0x322   :  { %515 = vrot.lane.b32.xlu1 %v14090_v60, %s13890_s22 }
 0x324   :  { %752 = vrot.lane.b32.xlu0 %v14100_v1, %s13891_s23 }
 0x326   :  { %513 = vrot.lane.b32.xlu1 %v14094_v63, %s13890_s22 }
 0x328   :  { %748 = vrot.lane.b32.xlu0 %v14094_v63, %s13891_s23 }
 0x32a   :  { %750 = vrot.lane.b32.xlu1 %v14090_v60, %s13891_s23 }
 0x32c   :  { %987 = vrot.lane.b32.xlu0 %v14100_v1, %s13892_s24 }
 0x32e   :  { %985 = vrot.lane.b32.xlu1 %v14090_v60, %s13892_s24 }
 0x330   :  { %1222 = vrot.lane.b32.xlu0 %v14100_v1, %s13893_s25 }
 0x332   :  { %983 = vrot.lane.b32.xlu1 %v14094_v63, %s13892_s24 }
 0x334   :  { %1218 = vrot.lane.b32.xlu0 %v14094_v63, %s13893_s25 }
 0x336   :  { %1220 = vrot.lane.b32.xlu1 %v14090_v60, %s13893_s25 }
 0x338   :  { %1500 = vrot.lane.b32.xlu0 %v14136_v3, %s13890_s22 }
 0x33a   :  { %1498 = vrot.lane.b32.xlu1 %v14142_v5, %s13890_s22 }
 0x33c   :  { %v383_v7 = vpop.permute.xlu1 %382  ;;  %1496 = vrot.lane.b32.xlu0 %v14148_v6, %s13890_s22 }
 0x33e   :  { %1733 = vrot.lane.b32.xlu1 %v14142_v5, %s13891_s23 }
 0x340   :  { %v381_v8 = vpop.permute.xlu1 %380  ;;  %1735 = vrot.lane.b32.xlu0 %v14136_v3, %s13891_s23 }
 0x342   :  { %v385_v9 = vpop.permute.xlu0 %384 }
 0x343   :  { %12023 = vmatpush3.xpose.msk.msra.mxu0 %vm386_vm2, %v385_v9 }
 0x344   :  { %v622_v10 = vpop.permute.xlu1 %621  ;;  %12024 = vmatprep.subr.mxu0 %v17895_v58 }
 0x346   :  { %v620_v11 = vpop.permute.xlu0 %619 }
 0x347   :  { %12025 = vmatpush3.xpose.msk.msra.mxu0 %vm386_vm2, %v383_v7 }
 0x348   :  { %v618_v12 = vpop.permute.xlu1 %617  ;;  %12026 = vmatprep.subr.mxu0 %v17895_v58 }
 0x34a   :  { %v612_v15 = vpop.permute.xlu0 %611 }
 0x34b   :  { %12027 = vmatpush3.xpose.msk.msra.mxu0 %vm386_vm2, %v381_v8 }
 0x34c   :  { %v857_v16 = vpop.permute.xlu1 %856  ;;  %12052 = vmatprep.subr.mxu0 %v17895_v58 }
 0x34e   :  { %12029 = vmatmul.mubr.msk.f32.vlgmr.msra.gmra.mxu0 %vm386_vm2, %v14094_v63  ;;  %v614_v18 = vpop.permute.xlu0 %613 }
 0x34f   :  { %12053 = vmatpush3.xpose.msk.msra.mxu0 %vm386_vm2, %v622_v10  ;;  %12031 = vmatprep.mubr.msk.f32.mxu0 %vm13883_vm1, %v17895_v58 }
 0x350   :  { %v855_v19 = vpop.permute.xlu1 %854  ;;  %12054 = vmatprep.subr.mxu0 %v17895_v58 }
 0x352   :  { %12032 = vmatmul.mubr.msk.f32.gmra.mxu0 %vm386_vm2, %v14090_v60  ;;  %v616_v21 = vpop.permute.xlu0 %615 }
 0x353   :  { %12055 = vmatpush3.xpose.msk.msra.mxu0 %vm386_vm2, %v620_v11  ;;  %12034 = vmatprep.mubr.msk.f32.mxu0 %vm13883_vm1, %v17895_v58 }
 0x354   :  { %v853_v24 = vpop.permute.xlu1 %852  ;;  %12056 = vmatprep.subr.mxu0 %v17895_v58 }
 0x356   :  { %12035 = vmatmul.mubr.msk.f32.gmra.mxu0 %vm386_vm2, %v14100_v1  ;;  %v847_v25 = vpop.permute.xlu0 %846 }
 0x357   :  { %12057 = vmatpush3.xpose.msk.msra.mxu0 %vm386_vm2, %v618_v12  ;;  %12058 = vmatprep.mubr.msk.f32.mxu0 %vm13883_vm1, %v17895_v58 }
 0x358   :  { %v1092_v28 = vpop.permute.xlu1 %1091  ;;  %12082 = vmatprep.subr.mxu0 %v17895_v58 }
 0x35a   :  { %12059 = vmatmul.mubr.msk.f32.vlgmr.msra.gmra.mxu0 %vm386_vm2, %v612_v15  ;;  %v849_v30 = vpop.permute.xlu0 %848 }
 0x35b   :  { %12083 = vmatpush3.xpose.msk.msra.mxu0 %vm386_vm2, %v857_v16  ;;  %12061 = vmatprep.mubr.msk.f32.mxu0 %vm13883_vm1, %v17895_v58 }
 0x35c   :  { %v1090_v31 = vpop.permute.xlu1 %1089  ;;  %12084 = vmatprep.subr.mxu0 %v17895_v58 }
 0x35e   :  { %12062 = vmatmul.mubr.msk.f32.gmra.mxu0 %vm386_vm2, %v614_v18  ;;  %v851_v32 = vpop.permute.xlu0 %850 }
 0x35f   :  { %12085 = vmatpush3.xpose.msk.msra.mxu0 %vm386_vm2, %v855_v19  ;;  %12064 = vmatprep.mubr.msk.f32.mxu0 %vm13883_vm1, %v17895_v58 }
 0x360   :  { %v1088_v34 = vpop.permute.xlu1 %1087  ;;  %12086 = vmatprep.subr.mxu0 %v17895_v58 }
 0x362   :  { %12065 = vmatmul.mubr.msk.f32.gmra.mxu0 %vm386_vm2, %v616_v21  ;;  %v1082_v35 = vpop.permute.xlu0 %1081 }
 0x363   :  { %12087 = vmatpush3.xpose.msk.msra.mxu0 %vm386_vm2, %v853_v24  ;;  %12088 = vmatprep.mubr.msk.f32.mxu0 %vm13883_vm1, %v17895_v58 }
 0x364   :  { %v1370_v36 = vpop.permute.xlu1 %1369  ;;  %12112 = vmatprep.subr.mxu0 %v17895_v58 }
 0x366   :  { %12089 = vmatmul.mubr.msk.f32.vlgmr.msra.gmra.mxu0 %vm386_vm2, %v847_v25  ;;  %v1084_v37 = vpop.permute.xlu0 %1083 }
 0x367   :  { %12113 = vmatpush3.xpose.msk.msra.mxu0 %vm386_vm2, %v1092_v28  ;;  %12091 = vmatprep.mubr.msk.f32.mxu0 %vm13883_vm1, %v17895_v58 }
 0x368   :  { %v1368_v38 = vpop.permute.xlu1 %1367  ;;  %12114 = vmatprep.subr.mxu0 %v17895_v58 }
 0x36a   :  { %12092 = vmatmul.mubr.msk.f32.gmra.mxu0 %vm386_vm2, %v849_v30  ;;  %v1086_v41 = vpop.permute.xlu0 %1085 }
 0x36b   :  { %12115 = vmatpush3.xpose.msk.msra.mxu0 %vm386_vm2, %v1090_v31  ;;  %12094 = vmatprep.mubr.msk.f32.mxu0 %vm13883_vm1, %v17895_v58 }
 0x36c   :  { %v1366_v42 = vpop.permute.xlu1 %1365  ;;  %12116 = vmatprep.subr.mxu0 %v17895_v58 }
 0x36e   :  { %12095 = vmatmul.mubr.msk.f32.gmra.mxu0 %vm386_vm2, %v851_v32  ;;  %v1605_v43 = vpop.permute.xlu0 %1604 }
 0x36f   :  { %12117 = vmatpush3.xpose.msk.msra.mxu0 %vm386_vm2, %v1088_v34  ;;  %12118 = vmatprep.mubr.msk.f32.mxu0 %vm13883_vm1, %v17895_v58 }
 0x370   :  { %v1603_v44 = vpop.permute.xlu1 %1602  ;;  %12142 = vmatprep.subr.mxu0 %v17895_v58 }
 0x372   :  { %12119 = vmatmul.mubr.msk.f32.vlgmr.msra.gmra.mxu0 %vm386_vm2, %v1082_v35  ;;  %v1601_v45 = vpop.permute.xlu0 %1600 }
 0x373   :  { %12143 = vmatpush3.xpose.msk.msra.mxu0 %vm386_vm2, %v1370_v36  ;;  %12121 = vmatprep.mubr.msk.f32.mxu0 %vm13883_vm1, %v17895_v58 }
 0x374   :  { %v1595_v46 = vpop.permute.xlu1 %1594  ;;  %12144 = vmatprep.subr.mxu0 %v17895_v58 }
 0x376   :  { %12122 = vmatmul.mubr.msk.f32.gmra.mxu0 %vm386_vm2, %v1084_v37  ;;  %v1840_v47 = vpop.permute.xlu0 %1839 }
 0x377   :  { %12145 = vmatpush3.xpose.msk.msra.mxu0 %vm386_vm2, %v1368_v38  ;;  %12124 = vmatprep.mubr.msk.f32.mxu0 %vm13883_vm1, %v17895_v58 }
 0x378   :  { %v1597_v50 = vpop.permute.xlu1 %1596  ;;  %12146 = vmatprep.subr.mxu0 %v17895_v58 }
 0x37a   :  { %12125 = vmatmul.mubr.msk.f32.gmra.mxu0 %vm386_vm2, %v1086_v41  ;;  %v1838_v33 = vpop.permute.xlu0 %1837 }
 0x37b   :  { %12147 = vmatpush3.xpose.msk.msra.mxu0 %vm386_vm2, %v1366_v42  ;;  %12148 = vmatprep.mubr.msk.f32.mxu0 %vm13883_vm1, %v17895_v58 }
 0x37c   :  { %v1599_v51 = vpop.permute.xlu1 %1598  ;;  %12172 = vmatprep.subr.mxu0 %v17895_v58 }
 0x37e   :  { %12149 = vmatmul.mubr.msk.f32.vlgmr.msra.gmra.mxu0 %vm386_vm2, %v14148_v6  ;;  %v1836_v52 = vpop.permute.xlu0 %1835 }
 0x37f   :  { %12173 = vmatpush3.xpose.msk.msra.mxu0 %vm386_vm2, %v1605_v43  ;;  %12151 = vmatprep.mubr.msk.f32.mxu0 %vm13883_vm1, %v17895_v58 }
 0x380   :  { %v1830_v53 = vpop.permute.xlu1 %1829  ;;  %12174 = vmatprep.subr.mxu0 %v17895_v58 }
 0x382   :  { %12152 = vmatmul.mubr.msk.f32.gmra.mxu0 %vm386_vm2, %v14142_v5  ;;  %v2075_v40 = vpop.permute.xlu0 %2074 }
 0x383   :  { %12175 = vmatpush3.xpose.msk.msra.mxu0 %vm386_vm2, %v1603_v44  ;;  %12154 = vmatprep.mubr.msk.f32.mxu0 %vm13883_vm1, %v17895_v58 }
 0x384   :  { %v1832_v39 = vpop.permute.xlu1 %1831  ;;  %12176 = vmatprep.subr.mxu0 %v17895_v58 }
 0x386   :  { %12155 = vmatmul.mubr.msk.f32.gmra.mxu0 %vm386_vm2, %v14136_v3  ;;  %v2073_v54 = vpop.permute.xlu0 %2072 }
 0x387   :  { %12177 = vmatpush3.xpose.msk.msra.mxu0 %vm386_vm2, %v1601_v45  ;;  %12178 = vmatprep.mubr.msk.f32.mxu0 %vm13883_vm1, %v17895_v58 }
 0x388   :  { %v1834_v55 = vpop.permute.xlu1 %1833  ;;  %12202 = vmatprep.subr.mxu0 %v17895_v58 }
 0x38a   :  { %12179 = vmatmul.mubr.msk.f32.vlgmr.msra.gmra.mxu0 %vm386_vm2, %v1595_v46  ;;  %v2071_v57 = vpop.permute.xlu0 %2070 }
 0x38b   :  { %12203 = vmatpush3.xpose.msk.msra.mxu0 %vm386_vm2, %v1840_v47  ;;  %12181 = vmatprep.mubr.msk.f32.mxu0 %vm13883_vm1, %v17895_v58 }
 0x38c   :  { %v2065_v48 = vpop.permute.xlu1 %2064  ;;  %12204 = vmatprep.subr.mxu0 %v17895_v58 }
 0x38e   :  { %12182 = vmatmul.mubr.msk.f32.gmra.mxu0 %vm386_vm2, %v1597_v50  ;;  %v2067_v59 = vpop.permute.xlu0 %2066 }
 0x38f   :  { %12205 = vmatpush3.xpose.msk.msra.mxu0 %vm386_vm2, %v1838_v33  ;;  %12184 = vmatprep.mubr.msk.f32.mxu0 %vm13883_vm1, %v17895_v58 }
 0x390   :  { %v2069_v56 = vpop.permute.xlu1 %2068  ;;  %12206 = vmatprep.subr.mxu0 %v17895_v58 }
 0x392   :  { %12185 = vmatmul.mubr.msk.f32.gmra.mxu0 %vm386_vm2, %v1599_v51  ;;  %v518_v60 = vpop.permute.xlu0 %517 }
 0x393   :  { %12038 = vmatpush3.msra.mxu1 %v518_v60  ;;  %12207 = vmatpush3.xpose.msk.msra.mxu0 %vm386_vm2, %v1836_v52 }
 0x394   :  { %v516_v61 = vpop.permute.xlu1 %515  ;;  %12039 = vmatprep.subr.mxu1 %v17895_v58  ;;  %12208 = vmatprep.mubr.msk.f32.mxu0 %vm13883_vm1, %v17895_v58 }
 0x395   :  { %12040 = vmatpush3.msra.mxu1 %v516_v61  ;;  %12232 = vmatprep.subr.mxu0 %v17895_v58 }
 0x396   :  { %12209 = vmatmul.mubr.msk.f32.vlgmr.msra.gmra.mxu0 %vm386_vm2, %v1830_v53  ;;  %12041 = vmatprep.subr.mxu1 %v17895_v58 }
 0x397   :  { %12233 = vmatpush3.xpose.msk.msra.mxu0 %vm386_vm2, %v2075_v40  ;;  %12211 = vmatprep.mubr.msk.f32.mxu0 %vm13883_vm1, %v17895_v58 }
 0x398   :  { %v514_v62 = vpop.permute.xlu1 %513  ;;  %12234 = vmatprep.subr.mxu0 %v17895_v58 }
 0x399   :  { %12042 = vmatpush3.msra.mxu1 %v514_v62 }
 0x39a   :  { %12212 = vmatmul.mubr.msk.f32.gmra.mxu0 %vm386_vm2, %v1832_v39  ;;  %12067 = vmatprep.subr.mxu1 %v17895_v58 }
 0x39b   :  { %12235 = vmatpush3.xpose.msk.msra.mxu0 %vm386_vm2, %v2073_v54  ;;  %12214 = vmatprep.mubr.msk.f32.mxu0 %vm13883_vm1, %v17895_v58 }
 0x39c   :  { %12236 = vmatprep.subr.mxu0 %v17895_v58 }
 0x39e   :  { %12215 = vmatmul.mubr.msk.f32.gmra.mxu0 %vm386_vm2, %v1834_v55 }
 0x39f   :  { %12237 = vmatpush3.xpose.msk.msra.mxu0 %vm386_vm2, %v2071_v57  ;;  %12238 = vmatprep.mubr.msk.f32.mxu0 %vm13883_vm1, %v17895_v58 }
 0x3a2   :  { %12239 = vmatmul.mubr.msk.f32.vlgmr.msra.gmra.mxu0 %vm386_vm2, %v2065_v48 }
 0x3a3   :  { %12241 = vmatprep.mubr.msk.f32.mxu0 %vm13883_vm1, %v17895_v58 }
 0x3a6   :  { %12242 = vmatmul.mubr.msk.f32.gmra.mxu0 %vm386_vm2, %v2067_v59 }
 0x3a7   :  { %12244 = vmatprep.mubr.msk.f32.mxu0 %vm13883_vm1, %v17895_v58 }
 0x3aa   :  { %12245 = vmatmul.mubr.msk.f32.gmra.mxu0 %vm386_vm2, %v2069_v56 }
 0x40e   :  { %v14350_v63 = vpop.f32.mrf.mxu0 }
 0x40f   :  { %v480_v0 = vsel %vm479_vm3, %v14350_v63, -inf }
 0x410   :  { %481 = vmax.xlane.f32.xlu0 %v480_v0  ;;  %v12030_v1 = vpop.f32.mrf.mxu0 }
 0x412   :  { %v14354_v2 = vpop.f32.mrf.mxu0 }
 0x413   :  { %v483_v4 = vsel %vm479_vm3, %v14354_v2, -inf }
 0x414   :  { %484 = vmax.xlane.f32.xlu1 %v483_v4  ;;  %v12033_v7 = vpop.f32.mrf.mxu0 }
 0x416   :  { %v14358_v8 = vpop.f32.mrf.mxu0 }
 0x417   :  { %v486_v9 = vsel %vm479_vm3, %v14358_v8, -inf }
 0x418   :  { %487 = vmax.xlane.f32.xlu0 %v486_v9  ;;  %v12036_v10 = vpop.f32.mrf.mxu0 }
 0x41a   :  { %v14362_v11 = vpop.f32.mrf.mxu0 }
 0x41b   :  { %v715_v12 = vsel %vm479_vm3, %v14362_v11, -inf }
 0x41c   :  { %716 = vmax.xlane.f32.xlu0 %v715_v12  ;;  %v12060_v15 = vpop.f32.mrf.mxu0 }
 0x41e   :  { %v14366_v16 = vpop.f32.mrf.mxu0 }
 0x41f   :  { %v718_v18 = vsel %vm479_vm3, %v14366_v16, -inf }
 0x420   :  { %719 = vmax.xlane.f32.xlu0 %v718_v18  ;;  %v12063_v19 = vpop.f32.mrf.mxu0 }
 0x422   :  { %v14370_v21 = vpop.f32.mrf.mxu0 }
 0x423   :  { %v721_v24 = vsel %vm479_vm3, %v14370_v21, -inf }
 0x424   :  { %722 = vmax.xlane.f32.xlu1 %v721_v24  ;;  %v12066_v25 = vpop.f32.mrf.mxu0 }
 0x426   :  { %v14374_v28 = vpop.f32.mrf.mxu0 }
 0x427   :  { %v950_v30 = vsel %vm479_vm3, %v14374_v28, -inf }
 0x428   :  { %951 = vmax.xlane.f32.xlu0 %v950_v30  ;;  %v12090_v31 = vpop.f32.mrf.mxu0 }
 0x42a   :  { %v14378_v32 = vpop.f32.mrf.mxu0 }
 0x42b   :  { %v953_v34 = vsel %vm479_vm3, %v14378_v32, -inf }
 0x42c   :  { %954 = vmax.xlane.f32.xlu1 %v953_v34  ;;  %v12093_v35 = vpop.f32.mrf.mxu0 }
 0x42e   :  { %v14382_v36 = vpop.f32.mrf.mxu0 }
 0x42f   :  { %v956_v37 = vsel %vm479_vm3, %v14382_v36, -inf }
 0x430   :  { %957 = vmax.xlane.f32.xlu0 %v956_v37  ;;  %v12096_v38 = vpop.f32.mrf.mxu0  ;;  %v14438_v37 = vpop.permute.xlu0 %752 }
 0x432   :  { %v14386_v41 = vpop.f32.mrf.mxu0 }
 0x433   :  { %v1185_v42 = vsel %vm479_vm3, %v14386_v41, -inf }
 0x434   :  { %1186 = vmax.xlane.f32.xlu1 %v1185_v42  ;;  %v12120_v43 = vpop.f32.mrf.mxu0  ;;  %v14440_v42 = vpop.permute.xlu0 %748 }
 0x436   :  { %v14390_v44 = vpop.f32.mrf.mxu0 }
 0x437   :  { %v1188_v45 = vsel %vm479_vm3, %v14390_v44, -inf }
 0x438   :  { %1189 = vmax.xlane.f32.xlu0 %v1188_v45  ;;  %v12123_v46 = vpop.f32.mrf.mxu0  ;;  %v14444_v45 = vpop.permute.xlu0 %987 }
 0x43a   :  { %v14394_v47 = vpop.f32.mrf.mxu0 }
 0x43b   :  { %v1191_v50 = vsel %vm479_vm3, %v14394_v47, -inf }
 0x43c   :  { %1192 = vmax.xlane.f32.xlu1 %v1191_v50  ;;  %v12126_v33 = vpop.f32.mrf.mxu0  ;;  %v14448_v50 = vpop.permute.xlu1 %750 }
 0x43e   :  { %v14398_v51 = vpop.f32.mrf.mxu0 }
 0x43f   :  { %v1463_v52 = vsel %vm479_vm3, %v14398_v51, -inf }
 0x440   :  { %1464 = vmax.xlane.f32.xlu0 %v1463_v52  ;;  %v12150_v53 = vpop.f32.mrf.mxu0  ;;  %v14452_v52 = vpop.permute.xlu0 %1222 }
 0x442   :  { %v14402_v40 = vpop.f32.mrf.mxu0 }
 0x443   :  { %v1466_v39 = vsel %vm479_vm3, %v14402_v40, -inf }
 0x444   :  { %1467 = vmax.xlane.f32.xlu1 %v1466_v39  ;;  %v12153_v54 = vpop.f32.mrf.mxu0  ;;  %v14456_v39 = vpop.permute.xlu1 %985 }
 0x445   :  { %v14458_v54 = vpop.permute.xlu0 %1218 }
 0x446   :  { %v14406_v55 = vpop.f32.mrf.mxu0 }
 0x447   :  { %v1469_v43 = vsel %vm479_vm3, %v14406_v55, -inf }
 0x448   :  { %v12156_v57 = vpop.f32.mrf.mxu0 }
 0x44a   :  { %v14408_v48 = vpop.f32.mrf.mxu0 }
 0x44b   :  { %v1698_v59 = vsel %vm479_vm3, %v14408_v48, -inf }
 0x44c   :  { %1699 = vmax.xlane.f32.xlu1 %v1698_v59  ;;  %v12180_v56 = vpop.f32.mrf.mxu0  ;;  %v14462_v59 = vpop.permute.xlu1 %983 }
 0x44d   :  { %v14464_v56 = vpop.permute.xlu0 %1500 }
 0x44e   :  { %v14412_v60 = vpop.f32.mrf.mxu0 }
 0x44f   :  { %v1701_v46 = vsel %vm479_vm3, %v14412_v60, -inf }
 0x450   :  { %v12183_v61 = vpop.f32.mrf.mxu0 }
 0x451   :  { %v14466_v61 = vpop.permute.xlu1 %1220 }
 0x452   :  { %v14414_v62 = vpop.f32.mrf.mxu0 }
 0x453   :  { %v1704_v0 = vsel %vm479_vm3, %v14414_v62, -inf }
 0x454   :  { %1705 = vmax.xlane.f32.xlu1 %v1704_v0  ;;  %v12186_v1 = vpop.f32.mrf.mxu0  ;;  %v14468_v0 = vpop.permute.xlu0 %1496 }
 0x455   :  { %v14470_v1 = vpop.permute.xlu1 %1498 }
 0x456   :  { %1731 = vrot.lane.b32.xlu0 %v14148_v6, %s13891_s23  ;;  %v14420_v4 = vpop.f32.mrf.mxu0 }
 0x457   :  { %v1933_v33 = vsel %vm479_vm3, %v14420_v4, -inf }
 0x458   :  { %v12210_v7 = vpop.f32.mrf.mxu0 }
 0x459   :  { %v14472_v7 = vpop.permute.xlu0 %1735 }
 0x45a   :  { %v14422_v9 = vpop.f32.mrf.mxu0 }
 0x45b   :  { %v1936_v10 = vsel %vm479_vm3, %v14422_v9, -inf }
 0x45c   :  { %1937 = vmax.xlane.f32.xlu1 %v1936_v10  ;;  %v12213_v12 = vpop.f32.mrf.mxu0  ;;  %v14474_v10 = vpop.permute.xlu1 %1733 }
 0x45e   :  { %v14426_v15 = vpop.f32.mrf.mxu0 }
 0x45f   :  { %v1939_v53 = vsel %vm479_vm3, %v14426_v15, -inf }
 0x460   :  { %v12216_v18 = vpop.f32.mrf.mxu0 }
 0x462   :  { %v14428_v19 = vpop.f32.mrf.mxu0 }
 0x463   :  { %v2168_v24 = vsel %vm479_vm3, %v14428_v19, -inf }
 0x464   :  { %2169 = vmax.xlane.f32.xlu1 %v2168_v24  ;;  %v12240_v25 = vpop.f32.mrf.mxu0 }
 0x466   :  { %v14432_v30 = vpop.f32.mrf.mxu0 }
 0x467   :  { %v2171_v31 = vsel %vm479_vm3, %v14432_v30, -inf }
 0x468   :  { %2172 = vmax.xlane.f32.xlu1 %v2171_v31  ;;  %v12243_v34 = vpop.f32.mrf.mxu0 }
 0x46a   :  { %v14436_v35 = vpop.f32.mrf.mxu0 }
 0x46b   :  { %v2174_v57 = vsel %vm479_vm3, %v14436_v35, -inf }
 0x46c   :  { %v12246_v38 = vpop.f32.mrf.mxu0 }
 0x475   :  { %1470 = vmax.xlane.f32.xlu0 %v1469_v43 }
 0x479   :  { %1702 = vmax.xlane.f32.xlu0 %v1701_v46 }
 0x47d   :  { %1934 = vmax.xlane.f32.xlu0 %v1933_v33 }
 0x481   :  { %1940 = vmax.xlane.f32.xlu0 %v1939_v53 }
 0x485   :  { %2175 = vmax.xlane.f32.xlu0 %v2174_v57 }
 0x499   :  { %v482_v12 = vpop.xlane.xlu0 %481 }
 0x49a   :  { %v489_v18 = vsub.f32 %v14350_v63, %v482_v12 }
 0x49c   :  { %v492_v24 = vmul.f32 1.442695, %v489_v18 }
 0x49d   :  { %v485_v25 = vpop.xlane.xlu1 %484 }
 0x49e   :  { %13361 = vpow2.f32 %v492_v24  ;;  %v490_v31 = vsub.f32 %v14354_v2, %v485_v25 }
 0x4a0   :  { %v494_v34 = vmul.f32 1.442695, %v490_v31 }
 0x4a1   :  { %v488_v38 = vpop.xlane.xlu0 %487 }
 0x4a2   :  { %13363 = vpow2.f32 %v494_v34  ;;  %v491_v43 = vsub.f32 %v14358_v8, %v488_v38 }
 0x4a4   :  { %v496_v46 = vmul.f32 1.442695, %v491_v43 }
 0x4a5   :  { %v717_v33 = vpop.xlane.xlu0 %716 }
 0x4a6   :  { %13365 = vpow2.f32 %v496_v46  ;;  %v724_v53 = vsub.f32 %v14362_v11, %v717_v33 }
 0x4a8   :  { %v727_v57 = vmul.f32 1.442695, %v724_v53 }
 0x4a9   :  { %v720_v58 = vpop.xlane.xlu0 %719 }
 0x4aa   :  { %13367 = vpow2.f32 %v727_v57  ;;  %v725_v63 = vsub.f32 %v14366_v16, %v720_v58 }
 0x4ab   :  { %v14481_v12 = vpop.eup %13361 }
 0x4ac   :  { %v729_v18 = vmul.f32 1.442695, %v725_v63  ;;  %v498_v2 = vsel %vm479_vm3, %v14481_v12, 0.0 }
 0x4ad   :  { %v723_v24 = vpop.xlane.xlu1 %722  ;;  %499 = vadd.xlane.f32.xlu0 %v498_v2 }
 0x4ae   :  { %13369 = vpow2.f32 %v729_v18  ;;  %v726_v8 = vsub.f32 %v14370_v21, %v723_v24 }
 0x4af   :  { %v14486_v25 = vpop.eup %13363 }
 0x4b0   :  { %v731_v31 = vmul.f32 1.442695, %v726_v8  ;;  %v501_v11 = vsel %vm479_vm3, %v14486_v25, 0.0 }
 0x4b1   :  { %502 = vadd.xlane.f32.xlu1 %v501_v11  ;;  %v952_v34 = vpop.xlane.xlu0 %951 }
 0x4b2   :  { %13371 = vpow2.f32 %v731_v31  ;;  %v959_v58 = vsub.f32 %v14374_v28, %v952_v34 }
 0x4b3   :  { %v14491_v16 = vpop.eup %13365 }
 0x4b4   :  { %v962_v38 = vmul.f32 1.442695, %v959_v58  ;;  %v504_v43 = vsel %vm479_vm3, %v14491_v16, 0.0 }
 0x4b5   :  { %v955_v46 = vpop.xlane.xlu1 %954  ;;  %505 = vadd.xlane.f32.xlu0 %v504_v43 }
 0x4b6   :  { %13373 = vpow2.f32 %v962_v38  ;;  %v960_v21 = vsub.f32 %v14378_v32, %v955_v46 }
 0x4b7   :  { %v14496_v33 = vpop.eup %13367 }
 0x4b8   :  { %v964_v53 = vmul.f32 1.442695, %v960_v21  ;;  %v733_v57 = vsel %vm479_vm3, %v14496_v33, 0.0 }
 0x4b9   :  { %734 = vadd.xlane.f32.xlu1 %v733_v57  ;;  %v958_v63 = vpop.xlane.xlu0 %957 }
 0x4ba   :  { %13375 = vpow2.f32 %v964_v53  ;;  %v961_v28 = vsub.f32 %v14382_v36, %v958_v63 }
 0x4bb   :  { %v14501_v18 = vpop.eup %13369 }
 0x4bc   :  { %v966_v2 = vmul.f32 1.442695, %v961_v28  ;;  %v736_v24 = vsel %vm479_vm3, %v14501_v18, 0.0 }
 0x4bd   :  { %v1187_v8 = vpop.xlane.xlu1 %1186  ;;  %737 = vadd.xlane.f32.xlu0 %v736_v24 }
 0x4be   :  { %13377 = vpow2.f32 %v966_v2  ;;  %v1194_v32 = vsub.f32 %v14386_v41, %v1187_v8 }
 0x4bf   :  { %v14506_v31 = vpop.eup %13371 }
 0x4c0   :  { %v1197_v11 = vmul.f32 1.442695, %v1194_v32  ;;  %v739_v34 = vsel %vm479_vm3, %v14506_v31, 0.0 }
 0x4c1   :  { %740 = vadd.xlane.f32.xlu1 %v739_v34  ;;  %v1190_v58 = vpop.xlane.xlu0 %1189 }
 0x4c2   :  { %13379 = vpow2.f32 %v1197_v11  ;;  %v1195_v36 = vsub.f32 %v14390_v44, %v1190_v58 }
 0x4c3   :  { %v14511_v38 = vpop.eup %13373 }
 0x4c4   :  { %v1199_v43 = vmul.f32 1.442695, %v1195_v36  ;;  %v968_v46 = vsel %vm479_vm3, %v14511_v38, 0.0 }
 0x4c5   :  { %v1193_v21 = vpop.xlane.xlu1 %1192  ;;  %969 = vadd.xlane.f32.xlu1 %v968_v46 }
 0x4c6   :  { %13381 = vpow2.f32 %v1199_v43  ;;  %v1196_v41 = vsub.f32 %v14394_v47, %v1193_v21 }
 0x4c7   :  { %v14516_v53 = vpop.eup %13375 }
 0x4c8   :  { %v1201_v57 = vmul.f32 1.442695, %v1196_v41  ;;  %v971_v63 = vsel %vm479_vm3, %v14516_v53, 0.0 }
 0x4c9   :  { %972 = vadd.xlane.f32.xlu0 %v971_v63  ;;  %v1465_v28 = vpop.xlane.xlu0 %1464 }
 0x4ca   :  { %13383 = vpow2.f32 %v1201_v57  ;;  %v1472_v44 = vsub.f32 %v14398_v51, %v1465_v28 }
 0x4cb   :  { %v14521_v2 = vpop.eup %13377 }
 0x4cc   :  { %v1475_v24 = vmul.f32 1.442695, %v1472_v44  ;;  %v974_v8 = vsel %vm479_vm3, %v14521_v2, 0.0 }
 0x4cd   :  { %v1468_v32 = vpop.xlane.xlu1 %1467  ;;  %975 = vadd.xlane.f32.xlu1 %v974_v8  ;;  %v14550_v28 = vpop.permute.xlu0 %1731 }
 0x4ce   :  { %13385 = vpow2.f32 %v1475_v24  ;;  %v1473_v47 = vsub.f32 %v14402_v40, %v1468_v32 }
 0x4cf   :  { %v14526_v11 = vpop.eup %13379 }
 0x4d0   :  { %v1477_v34 = vmul.f32 1.442695, %v1473_v47  ;;  %v1203_v58 = vsel %vm479_vm3, %v14526_v11, 0.0 }
 0x4d1   :  { %1204 = vadd.xlane.f32.xlu1 %v1203_v58 }
 0x4d2   :  { %13387 = vpow2.f32 %v1477_v34 }
 0x4d3   :  { %v14530_v51 = vpop.eup %13381 }
 0x4d4   :  { %v1206_v36 = vsel %vm479_vm3, %v14530_v51, 0.0 }
 0x4d5   :  { %1207 = vadd.xlane.f32.xlu0 %v1206_v36  ;;  %v1700_v63 = vpop.xlane.xlu1 %1699 }
 0x4d6   :  { %v1707_v24 = vsub.f32 %v14408_v48, %v1700_v63 }
 0x4d7   :  { %v14534_v43 = vpop.eup %13383 }
 0x4d8   :  { %v1209_v46 = vsel %vm479_vm3, %v14534_v43, 0.0  ;;  %v1710_v58 = vmul.f32 1.442695, %v1707_v24 }
 0x4d9   :  { %1210 = vadd.xlane.f32.xlu0 %v1209_v46 }
 0x4db   :  { %v14538_v40 = vpop.eup %13385 }
 0x4dc   :  { %v1481_v21 = vsel %vm479_vm3, %v14538_v40, 0.0 }
 0x4dd   :  { %1482 = vadd.xlane.f32.xlu1 %v1481_v21  ;;  %v1706_v44 = vpop.xlane.xlu1 %1705 }
 0x4de   :  { %v1709_v34 = vsub.f32 %v14414_v62, %v1706_v44 }
 0x4df   :  { %v14542_v41 = vpop.eup %13387 }
 0x4e0   :  { %v1484_v57 = vsel %vm479_vm3, %v14542_v41, 0.0  ;;  %v1714_v49 = vmul.f32 1.442695, %v1709_v34 }
 0x4e1   :  { %1485 = vadd.xlane.f32.xlu0 %v1484_v57 }
 0x4e5   :  { %v1938_v8 = vpop.xlane.xlu1 %1937 }
 0x4e6   :  { %v1943_v36 = vsub.f32 %v14422_v9, %v1938_v8 }
 0x4e8   :  { %v1947_v29 = vmul.f32 1.442695, %v1943_v36 }
 0x4ee   :  { %1968 = vrot.lane.b32.xlu1 %v14142_v5, %s13892_s24 }
 0x4f7   :  { %1970 = vrot.lane.b32.xlu0 %v14136_v3, %s13892_s24 }
 0x4fe   :  { %v1471_v32 = vpop.xlane.xlu0 %1470 }
 0x4ff   :  { %v1474_v47 = vsub.f32 %v14406_v55, %v1471_v32 }
 0x501   :  { %v1479_v46 = vmul.f32 1.442695, %v1474_v47  ;;  %v2170_v47 = vpop.xlane.xlu1 %2169 }
 0x502   :  { %v1703_v21 = vpop.xlane.xlu0 %1702 }
 0x503   :  { %13389 = vpow2.f32 %v1479_v46  ;;  %v1708_v57 = vsub.f32 %v14412_v60, %v1703_v21 }
 0x504   :  { %13391 = vpow2.f32 %v1710_v58 }
 0x505   :  { %v1712_v23 = vmul.f32 1.442695, %v1708_v57  ;;  %v2173_v58 = vpop.xlane.xlu1 %2172 }
 0x506   :  { %v1935_v27 = vpop.xlane.xlu0 %1934  ;;  %v2178_v46 = vsub.f32 %v14432_v30, %v2173_v58 }
 0x507   :  { %13393 = vpow2.f32 %v1712_v23  ;;  %v1942_v48 = vsub.f32 %v14420_v4, %v1935_v27 }
 0x508   :  { %13395 = vpow2.f32 %v1714_v49 }
 0x509   :  { %13397 = vpow2.f32 %v1947_v29  ;;  %v1945_v55 = vmul.f32 1.442695, %v1942_v48  ;;  %v2182_v48 = vmul.f32 1.442695, %v2178_v46 }
 0x50a   :  { %v1941_v32 = vpop.xlane.xlu0 %1940 }
 0x50b   :  { %13399 = vpow2.f32 %v1945_v55  ;;  %v1944_v21 = vsub.f32 %v14426_v15, %v1941_v32 }
 0x50d   :  { %v1949_v55 = vmul.f32 1.442695, %v1944_v21 }
 0x50e   :  { %v14586_v34 = vpop.xlane.xlu0 %2175 }
 0x510   :  { %v14558_v62 = vpop.eup %13389 }
 0x511   :  { %v1487_v9 = vsel %vm479_vm3, %v14558_v62, 0.0  ;;  %v14562_v63 = vpop.eup %13391 }
 0x512   :  { %1488 = vadd.xlane.f32.xlu1 %v1487_v9  ;;  %v1716_v23 = vsel %vm479_vm3, %v14562_v63, 0.0 }
 0x514   :  { %v14564_v60 = vpop.eup %13393 }
 0x515   :  { %v14566_v44 = vpop.eup %13395  ;;  %v1719_v27 = vsel %vm479_vm3, %v14564_v60, 0.0 }
 0x516   :  { %v14572_v29 = vpop.eup %13397  ;;  %1717 = vadd.xlane.f32.xlu1 %v1716_v23  ;;  %1720 = vadd.xlane.f32.xlu0 %v1719_v27  ;;  %v1722_v49 = vsel %vm479_vm3, %v14566_v44, 0.0 }
 0x517   :  { %v1954_v4 = vsel %vm479_vm3, %v14572_v29, 0.0 }
 0x518   :  { %v14578_v24 = vpop.eup %13399 }
 0x519   :  { %v1951_v8 = vsel %vm479_vm3, %v14578_v24, 0.0 }
 0x51a   :  { %1723 = vadd.xlane.f32.xlu1 %v1722_v49  ;;  %1955 = vadd.xlane.f32.xlu0 %v1954_v4 }
 0x51e   :  { %1952 = vadd.xlane.f32.xlu1 %v1951_v8 }
 0x52f   :  { %2205 = vrot.lane.b32.xlu1 %v14136_v3, %s13893_s25  ;;  %v2177_v3 = vsub.f32 %v14428_v19, %v2170_v47  ;;  %v17920_v19 = vmov 0.0  }
 0x530   :  { %1966 = vrot.lane.b32.xlu0 %v14148_v6, %s13892_s24 }
 0x531   :  { %v2180_v23 = vmul.f32 1.442695, %v2177_v3 }
 0x534   :  { %2203 = vrot.lane.b32.xlu0 %v14142_v5, %s13893_s25 }
 0x536   :  { %v500_v36 = vpop.xlane.xlu0 %499 }
 0x537   :  { %13401 = vrcp.f32 %v500_v36 }
 0x53a   :  { %v503_v57 = vpop.xlane.xlu1 %502 }
 0x53b   :  { %13403 = vrcp.f32 %v503_v57 }
 0x53e   :  { %v506_v9 = vpop.xlane.xlu0 %505 }
 0x53f   :  { %13405 = vrcp.f32 %v506_v9 }
 0x540   :  { %13407 = vpow2.f32 %v2182_v48 }
 0x541   :  { %13409 = vpow2.f32 %v1949_v55 }
 0x542   :  { %v735_v27 = vpop.xlane.xlu1 %734 }
 0x543   :  { %13411 = vrcp.f32 %v735_v27 }
 0x544   :  { %v13402_v5 = vpop.eup %13401  ;;  %13413 = vpow2.f32 %v2180_v23 }
 0x545   :  { %v510_v49 = vmul.f32 %v13402_v5, %v14481_v12 }
 0x546   :  { %v738_v30 = vpop.xlane.xlu0 %737 }
 0x547   :  { %13415 = vrcp.f32 %v738_v30  ;;  %12044 = vmatmul.mubr.msk.f32.vlgmr.msra.gmra.mxu1 %vm479_vm3, %v510_v49 }
 0x548   :  { %v13404_v15 = vpop.eup %13403  ;;  %12068 = vmatpush3.msra.mxu1 %v14438_v37  ;;  %12046 = vmatprep.mubr.msk.f32.mxu1 %vm13883_vm1, %v17920_v19 }
 0x549   :  { %12069 = vmatprep.subr.mxu1 %v17920_v19  ;;  %v511_v4 = vmul.f32 %v13404_v15, %v14486_v25 }
 0x54a   :  { %12070 = vmatpush3.msra.mxu1 %v14448_v50  ;;  %v741_v8 = vpop.xlane.xlu1 %740 }
 0x54b   :  { %13417 = vrcp.f32 %v741_v8  ;;  %12071 = vmatprep.subr.mxu1 %v17920_v19  ;;  %12047 = vmatmul.mubr.msk.f32.gmra.mxu1 %vm479_vm3, %v511_v4 }
 0x54c   :  { %v13406_v12 = vpop.eup %13405  ;;  %12072 = vmatpush3.msra.mxu1 %v14440_v42  ;;  %12049 = vmatprep.mubr.msk.f32.mxu1 %vm13883_vm1, %v17920_v19 }
 0x54d   :  { %v512_v37 = vmul.f32 %v13406_v12, %v14491_v16  ;;  %12097 = vmatprep.subr.mxu1 %v17920_v19  ;;  %v14608_v32 = vpop.eup %13407 }
 0x54e   :  { %v970_v25 = vpop.xlane.xlu1 %969  ;;  %v14610_v50 = vpop.eup %13409  ;;  %v2189_v16 = vsel %vm479_vm3, %v14608_v32, 0.0 }
 0x54f   :  { %13419 = vrcp.f32 %v970_v25  ;;  %12050 = vmatmul.mubr.msk.f32.gmra.mxu1 %vm479_vm3, %v512_v37  ;;  %v1957_v36 = vsel %vm479_vm3, %v14610_v50, 0.0 }
 0x550   :  { %v13412_v47 = vpop.eup %13411  ;;  %12073 = vmatprep.mubr.msk.f32.mxu1 %vm13883_vm1, %v17920_v19 }
 0x551   :  { %v745_v42 = vmul.f32 %v13412_v47, %v14496_v33  ;;  %v14620_v46 = vpop.eup %13413 }
 0x552   :  { %v973_v58 = vpop.xlane.xlu0 %972  ;;  %v2186_v48 = vsel %vm479_vm3, %v14620_v46, 0.0 }
 0x553   :  { %13421 = vrcp.f32 %v973_v58  ;;  %2190 = vadd.xlane.f32.xlu0 %v2189_v16  ;;  %1958 = vadd.xlane.f32.xlu1 %v1957_v36 }
 0x554   :  { %v13416_v21 = vpop.eup %13415  ;;  %12074 = vmatmul.mubr.msk.f32.vlgmr.msra.gmra.mxu1 %vm479_vm3, %v745_v42 }
 0x555   :  { %12098 = vmatpush3.msra.mxu1 %v14444_v45  ;;  %12076 = vmatprep.mubr.msk.f32.mxu1 %vm13883_vm1, %v17920_v19  ;;  %v746_v33 = vmul.f32 %v13416_v21, %v14501_v18 }
 0x556   :  { %12099 = vmatprep.subr.mxu1 %v17920_v19  ;;  %v976_v57 = vpop.xlane.xlu1 %975 }
 0x557   :  { %12100 = vmatpush3.msra.mxu1 %v14456_v39  ;;  %13423 = vrcp.f32 %v976_v57  ;;  %2187 = vadd.xlane.f32.xlu1 %v2186_v48 }
 0x558   :  { %v13418_v3 = vpop.eup %13417  ;;  %12101 = vmatprep.subr.mxu1 %v17920_v19  ;;  %12077 = vmatmul.mubr.msk.f32.gmra.mxu1 %vm479_vm3, %v746_v33 }
 0x559   :  { %12102 = vmatpush3.msra.mxu1 %v14462_v59  ;;  %12079 = vmatprep.mubr.msk.f32.mxu1 %vm13883_vm1, %v17920_v19  ;;  %v747_v45 = vmul.f32 %v13418_v3, %v14506_v31 }
 0x55a   :  { %v1205_v18 = vpop.xlane.xlu1 %1204  ;;  %12127 = vmatprep.subr.mxu1 %v17920_v19 }
 0x55b   :  { %13425 = vrcp.f32 %v1205_v18 }
 0x55c   :  { %v13420_v55 = vpop.eup %13419  ;;  %12080 = vmatmul.mubr.msk.f32.gmra.mxu1 %vm479_vm3, %v747_v45 }
 0x55d   :  { %v980_v39 = vmul.f32 %v13420_v55, %v14511_v38  ;;  %12103 = vmatprep.mubr.msk.f32.mxu1 %vm13883_vm1, %v17920_v19 }
 0x55e   :  { %v1208_v9 = vpop.xlane.xlu0 %1207 }
 0x55f   :  { %13427 = vrcp.f32 %v1208_v9 }
 0x560   :  { %v13422_v59 = vpop.eup %13421  ;;  %12104 = vmatmul.mubr.msk.f32.vlgmr.msra.gmra.mxu1 %vm479_vm3, %v980_v39 }
 0x561   :  { %12128 = vmatpush3.msra.mxu1 %v14452_v52  ;;  %12106 = vmatprep.mubr.msk.f32.mxu1 %vm13883_vm1, %v17920_v19  ;;  %v981_v31 = vmul.f32 %v13422_v59, %v14516_v53 }
 0x562   :  { %12129 = vmatprep.subr.mxu1 %v17920_v19  ;;  %v1211_v23 = vpop.xlane.xlu0 %1210 }
 0x563   :  { %12130 = vmatpush3.msra.mxu1 %v14466_v61  ;;  %13429 = vrcp.f32 %v1211_v23 }
 0x564   :  { %v13424_v38 = vpop.eup %13423  ;;  %12131 = vmatprep.subr.mxu1 %v17920_v19  ;;  %12107 = vmatmul.mubr.msk.f32.gmra.mxu1 %vm479_vm3, %v981_v31 }
 0x565   :  { %12132 = vmatpush3.msra.mxu1 %v14458_v54  ;;  %12109 = vmatprep.mubr.msk.f32.mxu1 %vm13883_vm1, %v17920_v19  ;;  %v982_v52 = vmul.f32 %v13424_v38, %v14521_v2 }
 0x566   :  { %v1483_v27 = vpop.xlane.xlu1 %1482  ;;  %12157 = vmatprep.subr.mxu1 %v17920_v19 }
 0x567   :  { %13431 = vrcp.f32 %v1483_v27 }
 0x568   :  { %v13426_v53 = vpop.eup %13425  ;;  %12110 = vmatmul.mubr.msk.f32.gmra.mxu1 %vm479_vm3, %v982_v52  ;;  %2201 = vrot.lane.b32.xlu1 %v14148_v6, %s13893_s25 }
 0x569   :  { %v1215_v61 = vmul.f32 %v13426_v53, %v14526_v11  ;;  %12133 = vmatprep.mubr.msk.f32.mxu1 %vm13883_vm1, %v17920_v19  ;;  %v2179_v11 = vsub.f32 %v14436_v35, %v14586_v34 }
 0x56a   :  { %v1486_v54 = vpop.xlane.xlu0 %1485 }
 0x56b   :  { %13433 = vrcp.f32 %v1486_v54  ;;  %v2184_v49 = vmul.f32 1.442695, %v2179_v11  ;;  %v2345_v11 = vld [vmem:[%s17891_s4 + $0x8] sm:$0xff] }
 0x56c   :  { %v13428_v5 = vpop.eup %13427  ;;  %12134 = vmatmul.mubr.msk.f32.vlgmr.msra.gmra.mxu1 %vm479_vm3, %v1215_v61 }
 0x56d   :  { %12158 = vmatpush3.msra.mxu1 %v14464_v56  ;;  %12136 = vmatprep.mubr.msk.f32.mxu1 %vm13883_vm1, %v17920_v19  ;;  %v1216_v2 = vmul.f32 %v13428_v5, %v14530_v51  ;;  %13435 = vpow2.f32 %v2184_v49  ;;  %v2347_v5 = vld [vmem:[%s17891_s4 + $0x18] sm:$0xff] }
 0x56e   :  { %12159 = vmatprep.subr.mxu1 %v17920_v19  ;;  %12262 = vmatprep.subr.mxu0 %v2347_v5 }
 0x56f   :  { %12160 = vmatpush3.msra.mxu1 %v14470_v1  ;;  %12263 = vmatpush3.msra.mxu0 %v2347_v5 }
 0x570   :  { %v13430_v6 = vpop.eup %13429  ;;  %12161 = vmatprep.subr.mxu1 %v17920_v19  ;;  %12137 = vmatmul.mubr.msk.f32.gmra.mxu1 %vm479_vm3, %v1216_v2  ;;  %v2346_v2 = vld [vmem:[%s17891_s4 + $0x10] sm:$0xff] }
 0x571   :  { %12162 = vmatpush3.msra.mxu1 %v14468_v0  ;;  %12139 = vmatprep.mubr.msk.f32.mxu1 %vm13883_vm1, %v17920_v19  ;;  %v1217_v56 = vmul.f32 %v13430_v6, %v14534_v43 }
 0x572   :  { %12187 = vmatprep.subr.mxu1 %v17920_v19  ;;  %12264 = vmatprep.subr.mxu0 %v2346_v2 }
 0x573   :  { %12265 = vmatpush3.msra.mxu0 %v2346_v2 }
 0x574   :  { %v13432_v51 = vpop.eup %13431  ;;  %12140 = vmatmul.mubr.msk.f32.gmra.mxu1 %vm479_vm3, %v1217_v56  ;;  %12266 = vmatprep.subr.mxu0 %v2345_v11 }
 0x575   :  { %v1493_v1 = vmul.f32 %v13432_v51, %v14538_v40  ;;  %12163 = vmatprep.mubr.msk.f32.mxu1 %vm13883_vm1, %v17920_v19  ;;  %v1969_v40 = vpop.permute.xlu1 %1968  ;;  %v2344_v51 = vld [vmem:[%s17891_s4] sm:$0xff]  ;;  %12267 = vmatpush3.msra.mxu0 %v2345_v11 }
 0x576   :  { %12268 = vmatprep.subr.mxu0 %v2344_v51 }
 0x577   :  { %12269 = vmatpush3.msra.mxu0 %v2344_v51 }
 0x578   :  { %v13434_v0 = vpop.eup %13433  ;;  %12164 = vmatmul.mubr.msk.f32.vlgmr.msra.gmra.mxu1 %vm479_vm3, %v1493_v1 }
 0x579   :  { %12188 = vmatpush3.msra.mxu1 %v14472_v7  ;;  %12166 = vmatprep.mubr.msk.f32.mxu1 %vm13883_vm1, %v17920_v19  ;;  %v1494_v43 = vmul.f32 %v13434_v0, %v14542_v41  ;;  %v1971_v41 = vpop.permute.xlu0 %1970 }
 0x57a   :  { %12189 = vmatprep.subr.mxu1 %v17920_v19  ;;  %v14695_v35 = vpop.eup %13435 }
 0x57b   :  { %12190 = vmatpush3.msra.mxu1 %v14474_v10  ;;  %v2192_v7 = vsel %vm479_vm3, %v14695_v35, 0.0 }
 0x57c   :  { %12191 = vmatprep.subr.mxu1 %v17920_v19  ;;  %12167 = vmatmul.mubr.msk.f32.gmra.mxu1 %vm479_vm3, %v1494_v43 }
 0x57d   :  { %12192 = vmatpush3.msra.mxu1 %v14550_v28  ;;  %12169 = vmatprep.mubr.msk.f32.mxu1 %vm13883_vm1, %v17920_v19 }
 0x57e   :  { %12217 = vmatprep.subr.mxu1 %v17920_v19 }
 0x58c   :  { %2193 = vadd.xlane.f32.xlu1 %v2192_v7 }
 0x59b   :  { %v1489_v10 = vpop.xlane.xlu1 %1488 }
 0x59c   :  { %13437 = vrcp.f32 %v1489_v10 }
 0x59f   :  { %v1718_v34 = vpop.xlane.xlu1 %1717  ;;  %v1721_v30 = vpop.xlane.xlu0 %1720 }
 0x5a0   :  { %13439 = vrcp.f32 %v1718_v34 }
 0x5a1   :  { %13441 = vrcp.f32 %v1721_v30 }
 0x5a3   :  { %v1724_v28 = vpop.xlane.xlu1 %1723  ;;  %v1956_v12 = vpop.xlane.xlu0 %1955 }
 0x5a4   :  { %13443 = vrcp.f32 %v1724_v28 }
 0x5a7   :  { %v1953_v15 = vpop.xlane.xlu1 %1952  ;;  %v1967_v58 = vpop.permute.xlu0 %1966 }
 0x5a8   :  { %13445 = vrcp.f32 %v1953_v15 }
 0x5a9   :  { %v13438_v4 = vpop.eup %13437  ;;  %13447 = vrcp.f32 %v1956_v12 }
 0x5aa   :  { %v1495_v8 = vmul.f32 %v13438_v4, %v14558_v62 }
 0x5ab   :  { %v2206_v21 = vpop.permute.xlu1 %2205  ;;  %v2204_v33 = vpop.permute.xlu0 %2203 }
 0x5ac   :  { %12170 = vmatmul.mubr.msk.f32.gmra.mxu1 %vm479_vm3, %v1495_v8 }
 0x5ad   :  { %v13440_v37 = vpop.eup %13439  ;;  %12193 = vmatprep.mubr.msk.f32.mxu1 %vm13883_vm1, %v17920_v19 }
 0x5ae   :  { %v1728_v25 = vmul.f32 %v13440_v37, %v14562_v63  ;;  %v13442_v47 = vpop.eup %13441 }
 0x5af   :  { %v1729_v62 = vmul.f32 %v13442_v47, %v14564_v60 }
 0x5b0   :  { %12194 = vmatmul.mubr.msk.f32.vlgmr.msra.gmra.mxu1 %vm479_vm3, %v1728_v25 }
 0x5b1   :  { %12218 = vmatpush3.msra.mxu1 %v1971_v41  ;;  %12196 = vmatprep.mubr.msk.f32.mxu1 %vm13883_vm1, %v17920_v19  ;;  %v13444_v42 = vpop.eup %13443 }
 0x5b2   :  { %12219 = vmatprep.subr.mxu1 %v17920_v19  ;;  %v1730_v63 = vmul.f32 %v13444_v42, %v14566_v44 }
 0x5b3   :  { %12220 = vmatpush3.msra.mxu1 %v1969_v40 }
 0x5b4   :  { %12221 = vmatprep.subr.mxu1 %v17920_v19  ;;  %12197 = vmatmul.mubr.msk.f32.gmra.mxu1 %vm479_vm3, %v1729_v62 }
 0x5b5   :  { %12222 = vmatpush3.msra.mxu1 %v1967_v58  ;;  %12199 = vmatprep.mubr.msk.f32.mxu1 %vm13883_vm1, %v17920_v19  ;;  %v13446_v16 = vpop.eup %13445 }
 0x5b6   :  { %12247 = vmatprep.subr.mxu1 %v17920_v19  ;;  %v1963_v60 = vmul.f32 %v13446_v16, %v14578_v24  ;;  %v13448_v36 = vpop.eup %13447 }
 0x5b7   :  { %v1964_v44 = vmul.f32 %v13448_v36, %v14572_v29 }
 0x5b8   :  { %12200 = vmatmul.mubr.msk.f32.gmra.mxu1 %vm479_vm3, %v1730_v63 }
 0x5b9   :  { %12223 = vmatprep.mubr.msk.f32.mxu1 %vm13883_vm1, %v17920_v19 }
 0x5bc   :  { %12224 = vmatmul.mubr.msk.f32.vlgmr.msra.gmra.mxu1 %vm479_vm3, %v1963_v60 }
 0x5bd   :  { %12248 = vmatpush3.msra.mxu1 %v2206_v21  ;;  %12226 = vmatprep.mubr.msk.f32.mxu1 %vm13883_vm1, %v17920_v19 }
 0x5be   :  { %12249 = vmatprep.subr.mxu1 %v17920_v19 }
 0x5bf   :  { %12250 = vmatpush3.msra.mxu1 %v2204_v33 }
 0x5c0   :  { %12227 = vmatmul.mubr.msk.f32.gmra.mxu1 %vm479_vm3, %v1964_v44  ;;  %12251 = vmatprep.subr.mxu1 %v17920_v19 }
 0x5c1   :  { %12229 = vmatprep.mubr.msk.f32.mxu1 %vm13883_vm1, %v17920_v19 }
 0x5dc   :  { %v1959_v24 = vpop.xlane.xlu1 %1958  ;;  %v2191_v57 = vpop.xlane.xlu0 %2190 }
 0x5dd   :  { %13449 = vrcp.f32 %v1959_v24 }
 0x5e0   :  { %v2188_v48 = vpop.xlane.xlu1 %2187 }
 0x5e1   :  { %13451 = vrcp.f32 %v2188_v48 }
 0x5e2   :  { %13453 = vrcp.f32 %v2191_v57 }
 0x5e4   :  { %v2202_v3 = vpop.permute.xlu1 %2201 }
 0x5e5   :  { %12252 = vmatpush3.msra.mxu1 %v2202_v3 }
 0x5ea   :  { %v13450_v45 = vpop.eup %13449 }
 0x5eb   :  { %v1965_v18 = vmul.f32 %v13450_v45, %v14610_v50 }
 0x5ed   :  { %12230 = vmatmul.mubr.msk.f32.gmra.mxu1 %vm479_vm3, %v1965_v18 }
 0x5ee   :  { %v13452_v29 = vpop.eup %13451  ;;  %12253 = vmatprep.mubr.msk.f32.mxu1 %vm13883_vm1, %v17920_v19 }
 0x5ef   :  { %v2198_v55 = vmul.f32 %v13452_v29, %v14620_v46  ;;  %v13454_v39 = vpop.eup %13453 }
 0x5f0   :  { %v2199_v9 = vmul.f32 %v13454_v39, %v14608_v32 }
 0x5f1   :  { %12254 = vmatmul.mubr.msk.f32.vlgmr.msra.gmra.mxu1 %vm479_vm3, %v2198_v55 }
 0x5f2   :  { %12256 = vmatprep.mubr.msk.f32.mxu1 %vm13883_vm1, %v17920_v19 }
 0x5f5   :  { %12257 = vmatmul.mubr.msk.f32.gmra.mxu1 %vm479_vm3, %v2199_v9 }
 0x5f6   :  { %12259 = vmatprep.mubr.msk.f32.mxu1 %vm13883_vm1, %v17920_v19 }
 0x607   :  { %v14740_v50 = vpop.f32.mrf.mxu1 }
 0x609   :  { %v12045_v59 = vpop.f32.mrf.mxu1 }
 0x60b   :  { %v14742_v31 = vpop.f32.mrf.mxu1 }
 0x60d   :  { %v12048_v23 = vpop.f32.mrf.mxu1 }
 0x60f   :  { %v14744_v46 = vpop.f32.mrf.mxu1 }
 0x611   :  { %v12051_v38 = vpop.f32.mrf.mxu1 }
 0x614   :  { %v832_v52 = vpop.f32.mrf.mxu1 }
 0x615   :  { %1319 = vrot.lane.b32.xlu0 %v832_v52, %s13894_s26  ;;  %v2194_v27 = vpop.xlane.xlu1 %2193 }
 0x616   :  { %13455 = vrcp.f32 %v2194_v27  ;;  %v12075_v32 = vpop.f32.mrf.mxu1 }
 0x618   :  { %v837_v53 = vpop.f32.mrf.mxu1 }
 0x619   :  { %1321 = vrot.lane.b32.xlu1 %v837_v53, %s13894_s26 }
 0x61a   :  { %v12078_v61 = vpop.f32.mrf.mxu1 }
 0x61c   :  { %v842_v54 = vpop.f32.mrf.mxu1 }
 0x61d   :  { %1323 = vrot.lane.b32.xlu0 %v842_v54, %s13894_s26 }
 0x61e   :  { %v12081_v6 = vpop.f32.mrf.mxu1 }
 0x620   :  { %v1067_v56 = vpop.f32.mrf.mxu1 }
 0x621   :  { %1331 = vrot.lane.b32.xlu0 %v1067_v56, %s13895_s9 }
 0x622   :  { %v12105_v1 = vpop.f32.mrf.mxu1 }
 0x623   :  { %v13456_v49 = vpop.eup %13455 }
 0x624   :  { %v1072_v0 = vpop.f32.mrf.mxu1  ;;  %v2200_v43 = vmul.f32 %v13456_v49, %v14695_v35 }
 0x625   :  { %1333 = vrot.lane.b32.xlu1 %v1072_v0, %s13895_s9 }
 0x626   :  { %v12108_v7 = vpop.f32.mrf.mxu1  ;;  %12260 = vmatmul.mubr.msk.f32.gmra.mxu1 %vm479_vm3, %v2200_v43 }
 0x628   :  { %v1077_v40 = vpop.f32.mrf.mxu1 }
 0x629   :  { %1335 = vrot.lane.b32.xlu1 %v1077_v40, %s13895_s9 }
 0x62a   :  { %v12111_v41 = vpop.f32.mrf.mxu1 }
 0x62c   :  { %v1302_v10 = vpop.f32.mrf.mxu1 }
 0x62d   :  { %1343 = vrot.lane.b32.xlu0 %v1302_v10, %s13896_s12 }
 0x62e   :  { %v12135_v34 = vpop.f32.mrf.mxu1 }
 0x630   :  { %v1307_v30 = vpop.f32.mrf.mxu1 }
 0x631   :  { %1345 = vrot.lane.b32.xlu1 %v1307_v30, %s13896_s12 }
 0x632   :  { %v12138_v35 = vpop.f32.mrf.mxu1 }
 0x634   :  { %v1312_v28 = vpop.f32.mrf.mxu1 }
 0x635   :  { %1347 = vrot.lane.b32.xlu1 %v1312_v28, %s13896_s12 }
 0x636   :  { %v12141_v15 = vpop.f32.mrf.mxu1 }
 0x638   :  { %v1580_v4 = vpop.f32.mrf.mxu1 }
 0x63a   :  { %v12165_v8 = vpop.f32.mrf.mxu1 }
 0x63c   :  { %v14769_v12 = vpop.f32.mrf.mxu1 }
 0x63e   :  { %v12168_v37 = vpop.f32.mrf.mxu1 }
 0x66c   :  { %v14771_v25 = vpop.f32.mrf.mxu1 }
 0x66e   :  { %v12171_v47 = vpop.f32.mrf.mxu1 }
 0x66f   :  { %v14817_v47 = vld [vmem:[%s17890_s7] sm:$0xff] }
 0x670   :  { %v1815_v62 = vpop.f32.mrf.mxu1 }
 0x671   :  { %2302 = vrot.lane.b32.xlu0 %v1815_v62, %s13894_s26 }
 0x672   :  { %v12195_v42 = vpop.f32.mrf.mxu1 }
 0x674   :  { %v1820_v58 = vpop.f32.mrf.mxu1 }
 0x676   :  { %v12198_v63 = vpop.f32.mrf.mxu1 }
 0x678   :  { %v1825_v16 = vpop.f32.mrf.mxu1 }
 0x67a   :  { %v12201_v60 = vpop.f32.mrf.mxu1 }
 0x67c   :  { %v2050_v36 = vpop.f32.mrf.mxu1 }
 0x67d   :  { %2314 = vrot.lane.b32.xlu0 %v2050_v36, %s13895_s9 }
 0x67e   :  { %v12225_v21 = vpop.f32.mrf.mxu1 }
 0x680   :  { %v2055_v33 = vpop.f32.mrf.mxu1 }
 0x681   :  { %2304 = vrot.lane.b32.xlu0 %v1820_v58, %s13894_s26 }
 0x682   :  { %v12228_v44 = vpop.f32.mrf.mxu1 }
 0x685   :  { %2316 = vrot.lane.b32.xlu0 %v2055_v33, %s13895_s9 }
 0x687   :  { %v1320_v24 = vpop.permute.xlu0 %1319 }
 0x688   :  { %v1352_v18 = vsel %vm386_vm2, %v14740_v50, %v1320_v24 }
 0x68b   :  { %v1322_v57 = vpop.permute.xlu1 %1321 }
 0x68c   :  { %v1353_v59 = vsel %vm386_vm2, %v14742_v31, %v1322_v57 }
 0x68f   :  { %v1324_v48 = vpop.permute.xlu0 %1323 }
 0x690   :  { %v1354_v50 = vsel %vm386_vm2, %v14744_v46, %v1324_v48 }
 0x693   :  { %v1332_v45 = vpop.permute.xlu0 %1331 }
 0x694   :  { %v1356_v29 = vsel %vm1355_vm4, %v1352_v18, %v1332_v45 }
 0x697   :  { %v1334_v3 = vpop.permute.xlu1 %1333 }
 0x698   :  { %v1357_v23 = vsel %vm1355_vm4, %v1353_v59, %v1334_v3 }
 0x69b   :  { %v1336_v55 = vpop.permute.xlu1 %1335 }
 0x69c   :  { %v1358_v27 = vsel %vm1355_vm4, %v1354_v50, %v1336_v55 }
 0x69f   :  { %v1344_v39 = vpop.permute.xlu0 %1343 }
 0x6a0   :  { %v1359_v9 = vsel %vm479_vm3, %v1356_v29, %v1344_v39 }
 0x6a1   :  { %12270 = vmatprep.mubr.msk.f32.mxu0 %vm42_vm0, %v1359_v9 }
 0x6a3   :  { %v1346_v38 = vpop.permute.xlu1 %1345 }
 0x6a4   :  { %v1360_v52 = vsel %vm479_vm3, %v1357_v23, %v1346_v38 }
 0x6a5   :  { %12271 = vmatmul.mubr.msk.f32.vlgmr.msra.gmra.mxu0 %vm42_vm0, %v1360_v52  ;;  %v17921_v52 = vld [vmem:[#allocation2_spill] sm:$0xff] }
 0x6a7   :  { %v1348_v32 = vpop.permute.xlu1 %1347 }
 0x6a8   :  { %v1361_v53 = vsel %vm479_vm3, %v1358_v27, %v1348_v32 }
 0x6a9   :  { %12273 = vmatprep.mubr.msk.f32.mxu0 %vm42_vm0, %v1361_v53 }
 0x6ad   :  { %v2060_v61 = vpop.f32.mrf.mxu1 }
 0x6af   :  { %v12231_v54 = vpop.f32.mrf.mxu1 }
 0x6b1   :  { %v2285_v31 = vpop.f32.mrf.mxu1 }
 0x6b2   :  { %2326 = vrot.lane.b32.xlu1 %v2285_v31, %s13896_s12  ;;  %v2572_v31 = vld [vmem:[%s17892_s5 + $0x18] sm:$0xff] }
 0x6b3   :  { %v12255_v5 = vpop.f32.mrf.mxu1  ;;  %12279 = vmatprep.subr.mxu1 %v2572_v31 }
 0x6b4   :  { %v2571_v5 = vld [vmem:[%s17892_s5 + $0x10] sm:$0xff]  ;;  %12280 = vmatpush3.msra.mxu1 %v2572_v31  ;;  %v2729_v31 = vld [vmem:[%s17893_s6 + $0x48] sm:$0xff] }
 0x6b5   :  { %v2290_v2 = vpop.f32.mrf.mxu1  ;;  %12281 = vmatprep.subr.mxu1 %v2571_v5 }
 0x6b6   :  { %2306 = vrot.lane.b32.xlu1 %v1825_v16, %s13894_s26  ;;  %2328 = vrot.lane.b32.xlu0 %v2290_v2, %s13896_s12  ;;  %v2570_v2 = vld [vmem:[%s17892_s5 + $0x8] sm:$0xff] }
 0x6b7   :  { %v12258_v6 = vpop.f32.mrf.mxu1  ;;  %12282 = vmatpush3.msra.mxu1 %v2571_v5  ;;  %v2728_v5 = vld [vmem:[%s17893_s6 + $0x40] sm:$0xff] }
 0x6b8   :  { %v2569_v6 = vld [vmem:[%s17892_s5] sm:$0xff]  ;;  %12283 = vmatprep.subr.mxu1 %v2570_v2 }
 0x6b9   :  { %12284 = vmatpush3.msra.mxu1 %v2570_v2  ;;  %v2727_v2 = vld [vmem:[%s17893_s6 + $0x38] sm:$0xff] }
 0x6ba   :  { %2318 = vrot.lane.b32.xlu1 %v2060_v61, %s13895_s9  ;;  %12285 = vmatprep.subr.mxu1 %v2569_v6 }
 0x6bb   :  { %12286 = vmatpush3.msra.mxu1 %v2569_v6  ;;  %v2726_v6 = vld [vmem:[%s17893_s6 + $0x30] sm:$0xff] }
 0x6e3   :  { %v2303_v11 = vpop.permute.xlu0 %2302 }
 0x6e4   :  { %v2335_v49 = vsel %vm386_vm2, %v1580_v4, %v2303_v11 }
 0x6e6   :  { %v2295_v46 = vpop.f32.mrf.mxu1 }
 0x6e7   :  { %2330 = vrot.lane.b32.xlu1 %v2295_v46, %s13896_s12 }
 0x6e8   :  { %v12261_v56 = vpop.f32.mrf.mxu1 }
 0x6ef   :  { %v2315_v51 = vpop.permute.xlu0 %2314 }
 0x6f0   :  { %v2338_v0 = vsel %vm1355_vm4, %v2335_v49, %v2315_v51 }
 0x6f3   :  { %v2305_v1 = vpop.permute.xlu0 %2304 }
 0x6f4   :  { %v2336_v41 = vsel %vm386_vm2, %v14769_v12, %v2305_v1  ;;  %v14812_v12 = vsub.s32 4, %v14059_v13 }
 0x6f6   :  { %v2351_v62 = vrot.slane %v14817_v47, %v14812_v12 }
 0x6f7   :  { %v2317_v43 = vpop.permute.xlu0 %2316 }
 0x6f8   :  { %v2339_v10 = vsel %vm1355_vm4, %v2336_v41, %v2317_v43 }
 0x724   :  { %v2327_v7 = vpop.permute.xlu1 %2326 }
 0x725   :  { %v2341_v40 = vsel %vm479_vm3, %v2338_v0, %v2327_v7 }
 0x726   :  { %12274 = vmatmul.mubr.msk.f32.gmra.mxu0 %vm42_vm0, %v2341_v40 }
 0x728   :  { %v2329_v34 = vpop.permute.xlu0 %2328  ;;  %v2307_v35 = vpop.permute.xlu1 %2306 }
 0x729   :  { %v2342_v30 = vsel %vm479_vm3, %v2339_v10, %v2329_v34  ;;  %v2337_v15 = vsel %vm386_vm2, %v14771_v25, %v2307_v35 }
 0x72a   :  { %12276 = vmatprep.mubr.msk.f32.mxu0 %vm42_vm0, %v2342_v30 }
 0x72c   :  { %v2319_v28 = vpop.permute.xlu1 %2318 }
 0x72d   :  { %v2340_v4 = vsel %vm1355_vm4, %v2337_v15, %v2319_v28 }
 0x759   :  { %v2331_v8 = vpop.permute.xlu1 %2330 }
 0x75a   :  { %v2343_v37 = vsel %vm479_vm3, %v2340_v4, %v2331_v8 }
 0x75b   :  { %12277 = vmatmul.mubr.msk.f32.gmra.mxu0 %vm42_vm0, %v2343_v37 }
 0x765   :  { %v12272_v42 = vpop.f32.mrf.mxu0 }
 0x766   :  { %v2442_v25 = vadd.f32 %v12272_v42, %v2351_v62 }
 0x767   :  { %v2436_v58 = vpop.f32.mrf.mxu0 }
 0x768   :  { %v14822_v63 = vadd.f32 %v2442_v25, %v13989_v17  ;;  %v2437_v16 = vadd.f32 %v2436_v58, %v2351_v62 }
 0x76a   :  { %v14825_v60 = vadd.f32 %v2437_v16, %v13984_v14  ;;  %v2474_v36 = vsel %vm42_vm0, %v14822_v63, 0.0 }
 0x76b   :  { %2475 = vadd.xlane.f32.xlu1 %v2474_v36 }
 0x76c   :  { %v2471_v21 = vsel %vm42_vm0, %v14825_v60, 0.0 }
 0x76d   :  { %2472 = vadd.xlane.f32.xlu0 %v2471_v21  ;;  %v14900_v21 = vsub.s32 5, %v14059_v13 }
 0x76f   :  { %17922 = vst [vmem:[#allocation2_spill] sm:$0xff] %v14900_v21 }
 0x7e6   :  { %v12275_v33 = vpop.f32.mrf.mxu0 }
 0x7e7   :  { %v2452_v24 = vadd.f32 %v12275_v33, %v2351_v62 }
 0x7e8   :  { %v2446_v44 = vpop.f32.mrf.mxu0 }
 0x7e9   :  { %v2447_v57 = vadd.f32 %v2446_v44, %v2351_v62  ;;  %v14835_v17 = vadd.f32 %v2452_v24, %v13995_v22  ;;  %v14904_v44 = vrot.slane %v14817_v47, %v14900_v21  ;;  %v14907_v24 = vsub.s32 6, %v14059_v13 }
 0x7eb   :  { %v14832_v48 = vadd.f32 %v2447_v57, %v13993_v20  ;;  %v2480_v3 = vsel %vm42_vm0, %v14835_v17, 0.0  ;;  %17923 = vst [vmem:[#allocation6_spill] sm:$0xff] %v14907_v24 }
 0x7ed   :  { %v2477_v14 = vsel %vm42_vm0, %v14832_v48, 0.0 }
 0x7ee   :  { %2478 = vadd.xlane.f32.xlu0 %v2477_v14 }
 0x7f2   :  { %2481 = vadd.xlane.f32.xlu0 %v2480_v3 }
 0x7f4   :  { %v2476_v45 = vpop.xlane.xlu1 %2475 }
 0x7f5   :  { %v2490_v29 = vmul.f32 0.03125, %v2476_v45 }
 0x7f6   :  { %v2473_v18 = vpop.xlane.xlu0 %2472 }
 0x7f7   :  { %v2489_v55 = vmul.f32 0.03125, %v2473_v18  ;;  %v14842_v9 = vsub.f32 %v14822_v63, %v2490_v29  ;;  %v14914_v18 = vrot.slane %v14817_v47, %v14907_v24 }
 0x7f9   :  { %v14845_v22 = vsub.f32 %v14825_v60, %v2489_v55  ;;  %v2502_v32 = vmul.f32 %v14842_v9, %v14842_v9 }
 0x7fb   :  { %v2501_v61 = vmul.f32 %v14845_v22, %v14845_v22 }
 0x7fd   :  { %v2507_v54 = vsel %vm42_vm0, %v2501_v61, 0.0  ;;  %v2731_v61 = vld [vmem:[%s17893_s6 + $0x58] sm:$0xff] }
 0x81b   :  { %v12278_v39 = vpop.f32.mrf.mxu0 }
 0x81c   :  { %v2462_v20 = vadd.f32 %v12278_v39, %v2351_v62 }
 0x81d   :  { %v2456_v59 = vpop.f32.mrf.mxu0 }
 0x81e   :  { %v14848_v23 = vadd.f32 %v2462_v20, %v14001_v26  ;;  %v2457_v38 = vadd.f32 %v2456_v59, %v2351_v62  ;;  %v2510_v26 = vsel %vm42_vm0, %v2502_v32, 0.0  ;;  %v2734_v20 = vld [vmem:[%s17893_s6 + $0x70] sm:$0xff]  ;;  %v2733_v59 = vld [vmem:[%s17893_s6 + $0x68] sm:$0xff] }
 0x820   :  { %v14851_v50 = vadd.f32 %v2457_v38, %v17921_v52  ;;  %v2486_v27 = vsel %vm42_vm0, %v14848_v23, 0.0 }
 0x821   :  { %2487 = vadd.xlane.f32.xlu1 %v2486_v27  ;;  %v2732_v27 = vld [vmem:[%s17893_s6 + $0x60] sm:$0xff] }
 0x822   :  { %v2483_v53 = vsel %vm42_vm0, %v14851_v50, 0.0 }
 0x823   :  { %2484 = vadd.xlane.f32.xlu0 %v2483_v53 }
 0x825   :  { %2511 = vadd.xlane.f32.xlu1 %v2510_v26 }
 0x827   :  { %2508 = vadd.xlane.f32.xlu0 %v2507_v54  ;;  %v2730_v54 = vld [vmem:[%s17893_s6 + $0x50] sm:$0xff] }
 0x877   :  { %v2479_v46 = vpop.xlane.xlu0 %2478 }
 0x878   :  { %v2491_v56 = vmul.f32 0.03125, %v2479_v46  ;;  %v2725_v46 = vld [vmem:[%s17893_s6 + $0x28] sm:$0xff] }
 0x87a   :  { %v14876_v11 = vsub.f32 %v14832_v48, %v2491_v56 }
 0x87b   :  { %v2482_v51 = vpop.xlane.xlu0 %2481 }
 0x87c   :  { %v2492_v1 = vmul.f32 0.03125, %v2482_v51  ;;  %v2503_v49 = vmul.f32 %v14876_v11, %v14876_v11 }
 0x87e   :  { %v14881_v0 = vsub.f32 %v14835_v17, %v2492_v1  ;;  %v2513_v43 = vsel %vm42_vm0, %v2503_v49, 0.0  ;;  %v2724_v1 = vld [vmem:[%s17893_s6 + $0x20] sm:$0xff] }
 0x87f   :  { %2514 = vadd.xlane.f32.xlu0 %v2513_v43  ;;  %v2723_v43 = vld [vmem:[%s17893_s6 + $0x18] sm:$0xff] }
 0x880   :  { %v2504_v7 = vmul.f32 %v14881_v0, %v14881_v0 }
 0x882   :  { %v2516_v40 = vsel %vm42_vm0, %v2504_v7, 0.0 }
 0x883   :  { %2517 = vadd.xlane.f32.xlu1 %v2516_v40 }
 0x8aa   :  { %v2488_v41 = vpop.xlane.xlu1 %2487 }
 0x8ab   :  { %v2494_v10 = vmul.f32 0.03125, %v2488_v41 }
 0x8ac   :  { %v2485_v34 = vpop.xlane.xlu0 %2484 }
 0x8ad   :  { %v14888_v30 = vsub.f32 %v14848_v23, %v2494_v10  ;;  %v2493_v35 = vmul.f32 0.03125, %v2485_v34  ;;  %v2721_v10 = vld [vmem:[%s17893_s6 + $0x8] sm:$0xff] }
 0x8ae   :  { %v2512_v28 = vpop.xlane.xlu1 %2511 }
 0x8af   :  { %v14891_v15 = vsub.f32 %v14851_v50, %v2493_v35  ;;  %v2526_v4 = vmul.f32 0.03125, %v2512_v28  ;;  %v2506_v8 = vmul.f32 %v14888_v30, %v14888_v30  ;;  %v2720_v35 = vld [vmem:[%s17893_s6] sm:$0xff] }
 0x8b0   :  { %v2509_v37 = vpop.xlane.xlu0 %2508 }
 0x8b1   :  { %v2532_v62 = vadd.f32 1e-05, %v2526_v4  ;;  %v2525_v42 = vmul.f32 0.03125, %v2509_v37  ;;  %v2522_v25 = vsel %vm42_vm0, %v2506_v8, 0.0  ;;  %v2505_v58 = vmul.f32 %v14891_v15, %v14891_v15 }
 0x8b2   :  { %2523 = vadd.xlane.f32.xlu1 %v2522_v25 }
 0x8b3   :  { %13457 = vrsqrt.f32 %v2532_v62  ;;  %v2531_v16 = vadd.f32 1e-05, %v2525_v42  ;;  %v2519_v36 = vsel %vm42_vm0, %v2505_v58, 0.0 }
 0x8b4   :  { %2520 = vadd.xlane.f32.xlu0 %v2519_v36 }
 0x8b5   :  { %13459 = vrsqrt.f32 %v2531_v16 }
 0x8c0   :  { %v13458_v33 = vpop.eup %13457 }
 0x8c1   :  { %v2544_v57 = vmul.f32 %v13458_v33, %v14842_v9  ;;  %v2735_v9 = vld [vmem:[%s17893_s6 + $0x78] sm:$0xff] }
 0x8c2   :  { %v13460_v14 = vpop.eup %13459  ;;  %12296 = vmatprep.subr.mxu0 %v2735_v9 }
 0x8c3   :  { %v2543_v3 = vmul.f32 %v13460_v14, %v14845_v22  ;;  %v2554_v45 = vmul.f32 %v14904_v44, %v2544_v57  ;;  %12297 = vmatpush3.msra.mxu0 %v2735_v9 }
 0x8c4   :  { %12298 = vmatprep.subr.mxu0 %v2734_v20 }
 0x8c5   :  { %v2553_v29 = vmul.f32 %v14904_v44, %v2543_v3  ;;  %v2564_v39 = vadd.f32 %v14914_v18, %v2554_v45  ;;  %12299 = vmatpush3.msra.mxu0 %v2734_v20  ;;  %v14987_v45 = vsub.s32 1, %v14059_v13 }
 0x8c6   :  { %12300 = vmatprep.subr.mxu0 %v2733_v59 }
 0x8c7   :  { %v2563_v55 = vadd.f32 %v14914_v18, %v2553_v29  ;;  %12301 = vmatpush3.msra.mxu0 %v2733_v59  ;;  %17924 = vst [vmem:[#allocation7_spill] sm:$0xff] %v14987_v45 }
 0x8c8   :  { %12302 = vmatprep.subr.mxu0 %v2732_v27 }
 0x8c9   :  { %12287 = vmatprep.mubr.msk.f32.mxu1 %vm42_vm0, %v2563_v55  ;;  %12303 = vmatpush3.msra.mxu0 %v2732_v27 }
 0x8ca   :  { %12288 = vmatmul.mubr.msk.f32.vlgmr.msra.gmra.mxu1 %vm42_vm0, %v2564_v39  ;;  %12304 = vmatprep.subr.mxu0 %v2731_v61 }
 0x8cb   :  { %12305 = vmatpush3.msra.mxu0 %v2731_v61 }
 0x8cc   :  { %12306 = vmatprep.subr.mxu0 %v2730_v54 }
 0x8cd   :  { %12307 = vmatpush3.msra.mxu0 %v2730_v54 }
 0x8ce   :  { %12308 = vmatprep.subr.mxu0 %v2729_v31 }
 0x8cf   :  { %12309 = vmatpush3.msra.mxu0 %v2729_v31 }
 0x8d0   :  { %12310 = vmatprep.subr.mxu0 %v2728_v5 }
 0x8d1   :  { %12311 = vmatpush3.msra.mxu0 %v2728_v5 }
 0x8d2   :  { %12312 = vmatprep.subr.mxu0 %v2727_v2 }
 0x8d3   :  { %12313 = vmatpush3.msra.mxu0 %v2727_v2 }
 0x8d4   :  { %12314 = vmatprep.subr.mxu0 %v2726_v6 }
 0x8d5   :  { %12315 = vmatpush3.msra.mxu0 %v2726_v6 }
 0x8d6   :  { %12316 = vmatprep.subr.mxu0 %v2725_v46 }
 0x8d7   :  { %12317 = vmatpush3.msra.mxu0 %v2725_v46 }
 0x8d8   :  { %12318 = vmatprep.subr.mxu0 %v2724_v1 }
 0x8d9   :  { %12319 = vmatpush3.msra.mxu0 %v2724_v1 }
 0x8da   :  { %12320 = vmatprep.subr.mxu0 %v2723_v43 }
 0x8db   :  { %12321 = vmatpush3.msra.mxu0 %v2723_v43 }
 0x908   :  { %v2515_v22 = vpop.xlane.xlu0 %2514 }
 0x909   :  { %v2527_v38 = vmul.f32 0.03125, %v2515_v22 }
 0x90b   :  { %v2533_v52 = vadd.f32 1e-05, %v2527_v38 }
 0x90c   :  { %v2518_v32 = vpop.xlane.xlu1 %2517 }
 0x90d   :  { %13461 = vrsqrt.f32 %v2533_v52  ;;  %v2528_v53 = vmul.f32 0.03125, %v2518_v32 }
 0x90f   :  { %v2534_v26 = vadd.f32 1e-05, %v2528_v53 }
 0x911   :  { %13463 = vrsqrt.f32 %v2534_v26 }
 0x91a   :  { %v13462_v56 = vpop.eup %13461 }
 0x91b   :  { %v2545_v51 = vmul.f32 %v13462_v56, %v14876_v11  ;;  %v2722_v11 = vld [vmem:[%s17893_s6 + $0x10] sm:$0xff] }
 0x91c   :  { %12322 = vmatprep.subr.mxu0 %v2722_v11 }
 0x91d   :  { %v2555_v49 = vmul.f32 %v14904_v44, %v2545_v51  ;;  %12323 = vmatpush3.msra.mxu0 %v2722_v11 }
 0x91e   :  { %v13464_v7 = vpop.eup %13463  ;;  %12324 = vmatprep.subr.mxu0 %v2721_v10 }
 0x91f   :  { %v2565_v40 = vadd.f32 %v14914_v18, %v2555_v49  ;;  %v2546_v41 = vmul.f32 %v13464_v7, %v14881_v0  ;;  %12325 = vmatpush3.msra.mxu0 %v2721_v10 }
 0x920   :  { %12326 = vmatprep.subr.mxu0 %v2720_v35 }
 0x921   :  { %12290 = vmatprep.mubr.msk.f32.mxu1 %vm42_vm0, %v2565_v40  ;;  %v2556_v34 = vmul.f32 %v14904_v44, %v2546_v41  ;;  %12327 = vmatpush3.msra.mxu0 %v2720_v35 }
 0x922   :  { %12384 = vmatprep.subr.mxu0 %v17920_v19 }
 0x923   :  { %v2566_v0 = vadd.f32 %v14914_v18, %v2556_v34 }
 0x925   :  { %12291 = vmatmul.mubr.msk.f32.gmra.mxu1 %vm42_vm0, %v2566_v0 }
 0x93b   :  { %v2524_v28 = vpop.xlane.xlu1 %2523 }
 0x93c   :  { %v2530_v4 = vmul.f32 0.03125, %v2524_v28 }
 0x93d   :  { %v2521_v8 = vpop.xlane.xlu0 %2520 }
 0x93e   :  { %v2536_v37 = vadd.f32 1e-05, %v2530_v4  ;;  %v2529_v62 = vmul.f32 0.03125, %v2521_v8 }
 0x940   :  { %13465 = vrsqrt.f32 %v2536_v37  ;;  %v2535_v42 = vadd.f32 1e-05, %v2529_v62 }
 0x942   :  { %13467 = vrsqrt.f32 %v2535_v42 }
 0x94d   :  { %v13466_v25 = vpop.eup %13465 }
 0x94e   :  { %v2548_v58 = vmul.f32 %v13466_v25, %v14888_v30  ;;  %v2576_v30 = vrot.slane %v14817_v47, %v14987_v45  ;;  %v14994_v25 = vsub.s32 7, %v14059_v13 }
 0x94f   :  { %v13468_v16 = vpop.eup %13467 }
 0x950   :  { %v2547_v36 = vmul.f32 %v13468_v16, %v14891_v15  ;;  %v2558_v33 = vmul.f32 %v14904_v44, %v2548_v58  ;;  %17925 = vst [vmem:[#allocation8_spill] sm:$0xff] %v14994_v25  ;;  %v2840_v58 = vrot.slane %v14817_v47, %v14994_v25 }
 0x952   :  { %v2557_v57 = vmul.f32 %v14904_v44, %v2547_v36  ;;  %v2568_v3 = vadd.f32 %v14914_v18, %v2558_v33 }
 0x954   :  { %v2567_v14 = vadd.f32 %v14914_v18, %v2557_v57 }
 0x956   :  { %12293 = vmatprep.mubr.msk.f32.mxu1 %vm42_vm0, %v2567_v14 }
 0x957   :  { %12294 = vmatmul.mubr.msk.f32.gmra.mxu1 %vm42_vm0, %v2568_v3 }
 0x98a   :  { %v12289_v29 = vpop.f32.mrf.mxu1 }
 0x98b   :  { %v2667_v15 = vadd.f32 %v12289_v29, %v2576_v30 }
 0x98c   :  { %v2661_v55 = vpop.f32.mrf.mxu1 }
 0x98d   :  { %v2697_v39 = vmul.f32 0.70710677, %v2667_v15  ;;  %v2662_v9 = vadd.f32 %v2661_v55, %v2576_v30  ;;  %v2691_v52 = vmul.f32 0.5, %v2667_v15 }
 0x98f   :  { %13469 = verf.f32 %v2697_v39  ;;  %v2696_v44 = vmul.f32 0.70710677, %v2662_v9  ;;  %v2690_v22 = vmul.f32 0.5, %v2662_v9 }
 0x991   :  { %13471 = verf.f32 %v2696_v44 }
 0x99c   :  { %v13470_v20 = vpop.eup %13469 }
 0x99d   :  { %v2709_v59 = vadd.f32 1.0, %v13470_v20 }
 0x99e   :  { %v13472_v18 = vpop.eup %13471 }
 0x99f   :  { %v2708_v38 = vadd.f32 1.0, %v13472_v18  ;;  %v2715_v32 = vmul.f32 %v2709_v59, %v2691_v52 }
 0x9a1   :  { %v2714_v27 = vmul.f32 %v2708_v38, %v2690_v22 }
 0x9a3   :  { %12328 = vmatprep.mubr.f32.mxu0 %v2714_v27 }
 0x9a4   :  { %12329 = vmatmul.mubr.f32.vlgmr.msra.gmra.mxu0 %v2715_v32 }
 0x9e5   :  { %v12292_v53 = vpop.f32.mrf.mxu1 }
 0x9e6   :  { %v2677_v61 = vadd.f32 %v12292_v53, %v2576_v30 }
 0x9e7   :  { %v2671_v26 = vpop.f32.mrf.mxu1 }
 0x9e8   :  { %v2699_v54 = vmul.f32 0.70710677, %v2677_v61  ;;  %v2672_v31 = vadd.f32 %v2671_v26, %v2576_v30  ;;  %v2693_v1 = vmul.f32 0.5, %v2677_v61 }
 0x9ea   :  { %13473 = verf.f32 %v2699_v54  ;;  %v2698_v5 = vmul.f32 0.70710677, %v2672_v31  ;;  %v2692_v56 = vmul.f32 0.5, %v2672_v31 }
 0x9ec   :  { %13475 = verf.f32 %v2698_v5  ;;  %v11033_v5 = vld [vmem:[%s17889_s3 + $0x38] sm:$0xff] }
 0x9ed   :  { %12337 = vmatprep.subr.mxu1 %v11033_v5 }
 0x9ee   :  { %12338 = vmatpush3.msra.mxu1 %v11033_v5 }
 0x9f7   :  { %v13474_v2 = vpop.eup %13473 }
 0x9f8   :  { %v2711_v46 = vadd.f32 1.0, %v13474_v2  ;;  %v11032_v2 = vld [vmem:[%s17889_s3 + $0x30] sm:$0xff] }
 0x9f9   :  { %v13476_v6 = vpop.eup %13475  ;;  %12339 = vmatprep.subr.mxu1 %v11032_v2 }
 0x9fa   :  { %v2710_v51 = vadd.f32 1.0, %v13476_v6  ;;  %v2717_v43 = vmul.f32 %v2711_v46, %v2693_v1  ;;  %v11031_v6 = vld [vmem:[%s17889_s3 + $0x28] sm:$0xff]  ;;  %12340 = vmatpush3.msra.mxu1 %v11032_v2  ;;  %v11030_v46 = vld [vmem:[%s17889_s3 + $0x20] sm:$0xff] }
 0x9fb   :  { %12341 = vmatprep.subr.mxu1 %v11031_v6 }
 0x9fc   :  { %v2716_v49 = vmul.f32 %v2710_v51, %v2692_v56  ;;  %12342 = vmatpush3.msra.mxu1 %v11031_v6 }
 0x9fd   :  { %12343 = vmatprep.subr.mxu1 %v11030_v46 }
 0x9fe   :  { %12331 = vmatprep.mubr.f32.mxu0 %v2716_v49  ;;  %12344 = vmatpush3.msra.mxu1 %v11030_v46 }
 0x9ff   :  { %12332 = vmatmul.mubr.f32.gmra.mxu0 %v2717_v43  ;;  %12354 = vmatprep.subr.mxu1 %v17920_v19 }
 0xa17   :  { %v12295_v7 = vpop.f32.mrf.mxu1 }
 0xa18   :  { %v2687_v40 = vadd.f32 %v12295_v7, %v2576_v30 }
 0xa19   :  { %v2681_v41 = vpop.f32.mrf.mxu1 }
 0xa1a   :  { %v2701_v11 = vmul.f32 0.70710677, %v2687_v40  ;;  %v2682_v10 = vadd.f32 %v2681_v41, %v2576_v30  ;;  %v2695_v37 = vmul.f32 0.5, %v2687_v40 }
 0xa1c   :  { %13477 = verf.f32 %v2701_v11  ;;  %v2700_v34 = vmul.f32 0.70710677, %v2682_v10  ;;  %v2694_v4 = vmul.f32 0.5, %v2682_v10 }
 0xa1e   :  { %13479 = verf.f32 %v2700_v34 }
 0xa29   :  { %v13478_v35 = vpop.eup %13477 }
 0xa2a   :  { %v2713_v28 = vadd.f32 1.0, %v13478_v35 }
 0xa2b   :  { %v13480_v0 = vpop.eup %13479 }
 0xa2c   :  { %v2712_v8 = vadd.f32 1.0, %v13480_v0  ;;  %v2719_v42 = vmul.f32 %v2713_v28, %v2695_v37 }
 0xa2e   :  { %v2718_v62 = vmul.f32 %v2712_v8, %v2694_v4 }
 0xa30   :  { %12334 = vmatprep.mubr.f32.mxu0 %v2718_v62 }
 0xa31   :  { %12335 = vmatmul.mubr.f32.gmra.mxu0 %v2719_v42 }
 0xa32   :  { %12390 = vmatprep.mubr.msk.f32.mxu0 %vm13883_vm1, %v17920_v19 }
 0xa64   :  { %v12330_v16 = vpop.f32.mrf.mxu0 }
 0xa65   :  { %v2832_v36 = vadd.f32 %v12330_v16, %v14822_v63 }
 0xa66   :  { %v2802_v33 = vpop.f32.mrf.mxu0 }
 0xa67   :  { %v14999_v57 = vadd.f32 %v2840_v58, %v2832_v36  ;;  %v2831_v14 = vadd.f32 %v2802_v33, %v14825_v60 }
 0xa69   :  { %v15002_v3 = vadd.f32 %v2840_v58, %v2831_v14  ;;  %v2852_v30 = vsel %vm42_vm0, %v14999_v57, 0.0 }
 0xa6a   :  { %2853 = vadd.xlane.f32.xlu1 %v2852_v30 }
 0xa6b   :  { %v2849_v13 = vsel %vm42_vm0, %v15002_v3, 0.0 }
 0xa6c   :  { %2850 = vadd.xlane.f32.xlu0 %v2849_v13 }
 0xabf   :  { %v12333_v29 = vpop.f32.mrf.mxu0 }
 0xac0   :  { %v2834_v47 = vadd.f32 %v12333_v29, %v14835_v17  ;;  %v11029_v29 = vld [vmem:[%s17890_s7 + $0x8] sm:$0xff] }
 0xac1   :  { %v2812_v15 = vpop.f32.mrf.mxu0 }
 0xac2   :  { %v15009_v63 = vadd.f32 %v2840_v58, %v2834_v47  ;;  %v2833_v55 = vadd.f32 %v2812_v15, %v14832_v48  ;;  %v17928_v15 = vld [vmem:[#allocation3_spill] sm:$0xff] }
 0xac4   :  { %v15012_v39 = vadd.f32 %v2840_v58, %v2833_v55  ;;  %v2858_v60 = vsel %vm42_vm0, %v15009_v63, 0.0  ;;  %v2930_v55 = vrot.slane %v11029_v29, %v17928_v15 }
 0xac5   :  { %2859 = vadd.xlane.f32.xlu1 %v2858_v60 }
 0xac6   :  { %v2855_v9 = vsel %vm42_vm0, %v15012_v39, 0.0 }
 0xac7   :  { %2856 = vadd.xlane.f32.xlu0 %v2855_v9 }
 0xaf1   :  { %v12336_v44 = vpop.f32.mrf.mxu0 }
 0xaf2   :  { %v2836_v20 = vadd.f32 %v12336_v44, %v14848_v23 }
 0xaf3   :  { %v2854_v18 = vpop.xlane.xlu1 %2853  ;;  %v2822_v17 = vpop.f32.mrf.mxu0 }
 0xaf4   :  { %v15019_v59 = vadd.f32 %v2840_v58, %v2836_v20  ;;  %v2868_v22 = vmul.f32 0.03125, %v2854_v18  ;;  %v2835_v48 = vadd.f32 %v2822_v17, %v14851_v50  ;;  %v17929_v18 = vld [vmem:[#allocation4_spill] sm:$0xff] }
 0xaf5   :  { %v2851_v38 = vpop.xlane.xlu0 %2850  ;;  %v2940_v17 = vrot.slane %v11029_v29, %v17929_v18 }
 0xaf6   :  { %17926 = vst [vmem:[#allocation9_spill] sm:$0xff] %v15019_v59  ;;  %v2874_v52 = vsub.f32 %v14999_v57, %v2868_v22  ;;  %v15023_v27 = vadd.f32 %v2840_v58, %v2835_v48  ;;  %v2867_v32 = vmul.f32 0.03125, %v2851_v38  ;;  %v2864_v53 = vsel %vm42_vm0, %v15019_v59, 0.0 }
 0xaf7   :  { %2865 = vadd.xlane.f32.xlu1 %v2864_v53 }
 0xaf8   :  { %17927 = vst [vmem:[#allocation10_spill] sm:$0xff] %v15023_v27  ;;  %v2873_v61 = vsub.f32 %v15002_v3, %v2867_v32  ;;  %v2861_v23 = vsel %vm42_vm0, %v15023_v27, 0.0  ;;  %v2880_v26 = vmul.f32 %v2874_v52, %v2874_v52 }
 0xaf9   :  { %2862 = vadd.xlane.f32.xlu0 %v2861_v23 }
 0xafa   :  { %v2888_v54 = vsel %vm42_vm0, %v2880_v26, 0.0  ;;  %v2879_v50 = vmul.f32 %v2873_v61, %v2873_v61 }
 0xafb   :  { %2889 = vadd.xlane.f32.xlu1 %v2888_v54 }
 0xafc   :  { %v2885_v31 = vsel %vm42_vm0, %v2879_v50, 0.0 }
 0xafd   :  { %2886 = vadd.xlane.f32.xlu0 %v2885_v31 }
 0xb4e   :  { %v2860_v56 = vpop.xlane.xlu1 %2859 }
 0xb4f   :  { %v2870_v51 = vmul.f32 0.03125, %v2860_v56 }
 0xb50   :  { %v2857_v1 = vpop.xlane.xlu0 %2856 }
 0xb51   :  { %v2876_v49 = vsub.f32 %v15009_v63, %v2870_v51  ;;  %v2869_v43 = vmul.f32 0.03125, %v2857_v1 }
 0xb53   :  { %v2875_v7 = vsub.f32 %v15012_v39, %v2869_v43  ;;  %v2882_v40 = vmul.f32 %v2876_v49, %v2876_v49 }
 0xb55   :  { %v2894_v41 = vsel %vm42_vm0, %v2882_v40, 0.0  ;;  %v2881_v11 = vmul.f32 %v2875_v7, %v2875_v7 }
 0xb56   :  { %2895 = vadd.xlane.f32.xlu1 %v2894_v41 }
 0xb57   :  { %v2891_v10 = vsel %vm42_vm0, %v2881_v11, 0.0 }
 0xb58   :  { %2892 = vadd.xlane.f32.xlu0 %v2891_v10 }
 0xb80   :  { %v2866_v34 = vpop.xlane.xlu1 %2865 }
 0xb81   :  { %v2872_v35 = vmul.f32 0.03125, %v2866_v34 }
 0xb82   :  { %v2863_v0 = vpop.xlane.xlu0 %2862 }
 0xb83   :  { %v2878_v28 = vsub.f32 %v15019_v59, %v2872_v35  ;;  %v2871_v4 = vmul.f32 0.03125, %v2863_v0 }
 0xb84   :  { %v2890_v8 = vpop.xlane.xlu1 %2889 }
 0xb85   :  { %v2877_v37 = vsub.f32 %v15023_v27, %v2871_v4  ;;  %v2904_v62 = vmul.f32 0.03125, %v2890_v8  ;;  %v2884_v42 = vmul.f32 %v2878_v28, %v2878_v28 }
 0xb86   :  { %v2887_v58 = vpop.xlane.xlu0 %2886 }
 0xb87   :  { %v2910_v16 = vadd.f32 1e-05, %v2904_v62  ;;  %v2903_v36 = vmul.f32 0.03125, %v2887_v58  ;;  %v2900_v33 = vsel %vm42_vm0, %v2884_v42, 0.0  ;;  %v2883_v14 = vmul.f32 %v2877_v37, %v2877_v37  ;;  %v17930_v62 = vld [vmem:[#allocation5_spill] sm:$0xff] }
 0xb88   :  { %2901 = vadd.xlane.f32.xlu1 %v2900_v33  ;;  %v2955_v42 = vrot.slane %v11029_v29, %v17930_v62 }
 0xb89   :  { %13481 = vrsqrt.f32 %v2910_v16  ;;  %v2909_v30 = vadd.f32 1e-05, %v2903_v36  ;;  %v2897_v13 = vsel %vm42_vm0, %v2883_v14, 0.0 }
 0xb8a   :  { %2898 = vadd.xlane.f32.xlu0 %v2897_v13 }
 0xb8b   :  { %13483 = vrsqrt.f32 %v2909_v30 }
 0xb96   :  { %v13482_v47 = vpop.eup %13481 }
 0xb97   :  { %v2922_v60 = vmul.f32 %v13482_v47, %v2874_v52 }
 0xb98   :  { %v13484_v9 = vpop.eup %13483 }
 0xb99   :  { %v2921_v44 = vmul.f32 %v13484_v9, %v2873_v61  ;;  %v2932_v20 = vmul.f32 %v2930_v55, %v2922_v60 }
 0xb9b   :  { %v2931_v22 = vmul.f32 %v2930_v55, %v2921_v44  ;;  %v2942_v38 = vadd.f32 %v2940_v17, %v2932_v20 }
 0xb9d   :  { %v2941_v48 = vadd.f32 %v2940_v17, %v2931_v22 }
 0xb9f   :  { %12345 = vmatprep.mubr.msk.f32.mxu1 %vm42_vm0, %v2941_v48 }
 0xba0   :  { %12346 = vmatmul.mubr.msk.f32.vlgmr.msra.gmra.mxu1 %vm42_vm0, %v2942_v38 }
 0xbdf   :  { %v2896_v32 = vpop.xlane.xlu1 %2895 }
 0xbe0   :  { %v2906_v53 = vmul.f32 0.03125, %v2896_v32 }
 0xbe1   :  { %v2893_v23 = vpop.xlane.xlu0 %2892 }
 0xbe2   :  { %v2912_v26 = vadd.f32 1e-05, %v2906_v53  ;;  %v2905_v54 = vmul.f32 0.03125, %v2893_v23 }
 0xbe4   :  { %13485 = vrsqrt.f32 %v2912_v26  ;;  %v2911_v50 = vadd.f32 1e-05, %v2905_v54 }
 0xbe6   :  { %13487 = vrsqrt.f32 %v2911_v50 }
 0xbf1   :  { %v13486_v52 = vpop.eup %13485 }
 0xbf2   :  { %v2924_v61 = vmul.f32 %v13486_v52, %v2876_v49 }
 0xbf3   :  { %v13488_v31 = vpop.eup %13487 }
 0xbf4   :  { %v2923_v5 = vmul.f32 %v13488_v31, %v2875_v7  ;;  %v2934_v2 = vmul.f32 %v2930_v55, %v2924_v61 }
 0xbf6   :  { %v2933_v6 = vmul.f32 %v2930_v55, %v2923_v5  ;;  %v2944_v56 = vadd.f32 %v2940_v17, %v2934_v2 }
 0xbf8   :  { %v2943_v46 = vadd.f32 %v2940_v17, %v2933_v6 }
 0xbfa   :  { %12348 = vmatprep.mubr.msk.f32.mxu1 %vm42_vm0, %v2943_v46 }
 0xbfb   :  { %12349 = vmatmul.mubr.msk.f32.gmra.mxu1 %vm42_vm0, %v2944_v56 }
 0xc11   :  { %v2902_v51 = vpop.xlane.xlu1 %2901 }
 0xc12   :  { %v2908_v1 = vmul.f32 0.03125, %v2902_v51 }
 0xc13   :  { %v2899_v43 = vpop.xlane.xlu0 %2898 }
 0xc14   :  { %v2914_v40 = vadd.f32 1e-05, %v2908_v1  ;;  %v2907_v41 = vmul.f32 0.03125, %v2899_v43 }
 0xc16   :  { %13489 = vrsqrt.f32 %v2914_v40  ;;  %v2913_v11 = vadd.f32 1e-05, %v2907_v41 }
 0xc18   :  { %13491 = vrsqrt.f32 %v2913_v11 }
 0xc23   :  { %v13490_v10 = vpop.eup %13489 }
 0xc24   :  { %v2926_v49 = vmul.f32 %v13490_v10, %v2878_v28 }
 0xc25   :  { %v13492_v34 = vpop.eup %13491 }
 0xc26   :  { %v2925_v7 = vmul.f32 %v13492_v34, %v2877_v37  ;;  %v2936_v35 = vmul.f32 %v2930_v55, %v2926_v49 }
 0xc28   :  { %v2935_v0 = vmul.f32 %v2930_v55, %v2925_v7  ;;  %v2946_v8 = vadd.f32 %v2940_v17, %v2936_v35 }
 0xc2a   :  { %v2945_v4 = vadd.f32 %v2940_v17, %v2935_v0 }
 0xc2c   :  { %12351 = vmatprep.mubr.msk.f32.mxu1 %vm42_vm0, %v2945_v4 }
 0xc2d   :  { %12352 = vmatmul.mubr.msk.f32.gmra.mxu1 %vm42_vm0, %v2946_v8 }
 0xc2e   :  { %12360 = vmatprep.mubr.msk.f32.mxu1 %vm13883_vm1, %v17920_v19 }
 0xc60   :  { %v12347_v58 = vpop.f32.mrf.mxu1 }
 0xc61   :  { %v15067_v16 = vadd.f32 %v12347_v58, %v2955_v42 }
 0xc62   :  { %v3040_v36 = vpop.f32.mrf.mxu1 }
 0xc63   :  { %3074 = vrot.lane.b32.xlu1 %v15067_v16, %s13882_s16  ;;  %v15071_v28 = vadd.f32 %v3040_v36, %v2955_v42 }
 0xc67   :  { %3072 = vrot.lane.b32.xlu1 %v15071_v28, %s13882_s16 }
 0xcbb   :  { %v12350_v37 = vpop.f32.mrf.mxu1 }
 0xcbc   :  { %v15121_v47 = vadd.f32 %v12350_v37, %v2955_v42 }
 0xcbd   :  { %v3050_v33 = vpop.f32.mrf.mxu1 }
 0xcbe   :  { %v15075_v14 = vadd.f32 %v3050_v33, %v2955_v42 }
 0xcc0   :  { %3311 = vrot.lane.b32.xlu1 %v15075_v14, %s13884_s17  ;;  %3076 = vrot.lane.b32.xlu0 %v15075_v14, %s13882_s16 }
 0xcc4   :  { %3307 = vrot.lane.b32.xlu1 %v15071_v28, %s13884_s17  ;;  %3309 = vrot.lane.b32.xlu0 %v15067_v16, %s13884_s17 }
 0xcc8   :  { %3546 = vrot.lane.b32.xlu1 %v15075_v14, %s13886_s19  ;;  %3301 = vrot.lane.b32.xlu0 %v15071_v28, %s13885_s18 }
 0xccc   :  { %3544 = vrot.lane.b32.xlu1 %v15067_v16, %s13886_s19  ;;  %3303 = vrot.lane.b32.xlu0 %v15067_v16, %s13885_s18 }
 0xcd0   :  { %3542 = vrot.lane.b32.xlu1 %v15071_v28, %s13886_s19  ;;  %3305 = vrot.lane.b32.xlu0 %v15075_v14, %s13885_s18 }
 0xcd4   :  { %3781 = vrot.lane.b32.xlu1 %v15075_v14, %s13888_s1  ;;  %3536 = vrot.lane.b32.xlu0 %v15071_v28, %s13887_s20 }
 0xcd5   :  { %v3075_v60 = vpop.permute.xlu1 %3074 }
 0xcd8   :  { %3779 = vrot.lane.b32.xlu1 %v15067_v16, %s13888_s1  ;;  %3538 = vrot.lane.b32.xlu0 %v15067_v16, %s13887_s20 }
 0xcd9   :  { %v3073_v9 = vpop.permute.xlu1 %3072 }
 0xcdc   :  { %3777 = vrot.lane.b32.xlu1 %v15071_v28, %s13888_s1  ;;  %3540 = vrot.lane.b32.xlu0 %v15075_v14, %s13887_s20 }
 0xce0   :  { %3771 = vrot.lane.b32.xlu0 %v15071_v28, %s13889_s21 }
 0xce4   :  { %3773 = vrot.lane.b32.xlu0 %v15067_v16, %s13889_s21 }
 0xce8   :  { %3775 = vrot.lane.b32.xlu0 %v15075_v14, %s13889_s21 }
 0xced   :  { %v12353_v30 = vpop.f32.mrf.mxu1 }
 0xcee   :  { %v15115_v13 = vadd.f32 %v12353_v30, %v2955_v42 }
 0xcef   :  { %v3060_v29 = vpop.f32.mrf.mxu1 }
 0xcf0   :  { %4293 = vrot.lane.b32.xlu0 %v15115_v13, %s13884_s17  ;;  %4058 = vrot.lane.b32.xlu1 %v15115_v13, %s13882_s16  ;;  %v15123_v55 = vadd.f32 %v3060_v29, %v2955_v42 }
 0xcf4   :  { %4289 = vrot.lane.b32.xlu0 %v15121_v47, %s13884_s17  ;;  %4056 = vrot.lane.b32.xlu1 %v15123_v55, %s13882_s16 }
 0xcf8   :  { %4528 = vrot.lane.b32.xlu0 %v15115_v13, %s13886_s19  ;;  %4054 = vrot.lane.b32.xlu1 %v15121_v47, %s13882_s16 }
 0xcfc   :  { %4526 = vrot.lane.b32.xlu0 %v15123_v55, %s13886_s19  ;;  %4291 = vrot.lane.b32.xlu1 %v15123_v55, %s13884_s17 }
 0xd00   :  { %4524 = vrot.lane.b32.xlu0 %v15121_v47, %s13886_s19  ;;  %4283 = vrot.lane.b32.xlu1 %v15121_v47, %s13885_s18 }
 0xd04   :  { %4763 = vrot.lane.b32.xlu0 %v15115_v13, %s13888_s1  ;;  %4285 = vrot.lane.b32.xlu1 %v15123_v55, %s13885_s18 }
 0xd08   :  { %4761 = vrot.lane.b32.xlu0 %v15123_v55, %s13888_s1  ;;  %4287 = vrot.lane.b32.xlu1 %v15115_v13, %s13885_s18 }
 0xd0c   :  { %4759 = vrot.lane.b32.xlu0 %v15121_v47, %s13888_s1  ;;  %4518 = vrot.lane.b32.xlu1 %v15121_v47, %s13887_s20 }
 0xd10   :  { %4755 = vrot.lane.b32.xlu0 %v15123_v55, %s13889_s21  ;;  %4520 = vrot.lane.b32.xlu1 %v15123_v55, %s13887_s20 }
 0xd14   :  { %3207 = vrot.lane.b32.xlu0 %v15075_v14, %s13890_s22  ;;  %4522 = vrot.lane.b32.xlu1 %v15115_v13, %s13887_s20 }
 0xd18   :  { %3442 = vrot.lane.b32.xlu0 %v15075_v14, %s13891_s23  ;;  %4753 = vrot.lane.b32.xlu1 %v15121_v47, %s13889_s21 }
 0xd1c   :  { %3438 = vrot.lane.b32.xlu0 %v15071_v28, %s13891_s23  ;;  %4757 = vrot.lane.b32.xlu1 %v15115_v13, %s13889_s21 }
 0xd20   :  { %3677 = vrot.lane.b32.xlu0 %v15075_v14, %s13892_s24  ;;  %3205 = vrot.lane.b32.xlu1 %v15067_v16, %s13890_s22 }
 0xd24   :  { %3912 = vrot.lane.b32.xlu0 %v15075_v14, %s13893_s25  ;;  %3203 = vrot.lane.b32.xlu1 %v15071_v28, %s13890_s22 }
 0xd28   :  { %3908 = vrot.lane.b32.xlu0 %v15071_v28, %s13893_s25  ;;  %3440 = vrot.lane.b32.xlu1 %v15067_v16, %s13891_s23 }
 0xd2c   :  { %4189 = vrot.lane.b32.xlu0 %v15115_v13, %s13890_s22  ;;  %3675 = vrot.lane.b32.xlu1 %v15067_v16, %s13892_s24 }
 0xd30   :  { %4185 = vrot.lane.b32.xlu0 %v15121_v47, %s13890_s22  ;;  %3673 = vrot.lane.b32.xlu1 %v15071_v28, %s13892_s24 }
 0xd32   :  { %v3312_v44 = vpop.permute.xlu1 %3311  ;;  %v3077_v20 = vpop.permute.xlu0 %3076 }
 0xd33   :  { %12355 = vmatpush3.xpose.msk.msra.mxu1 %vm386_vm2, %v3077_v20  ;;  %12385 = vmatpush3.xpose.msk.msra.mxu0 %vm386_vm2, %v3312_v44 }
 0xd34   :  { %4424 = vrot.lane.b32.xlu0 %v15115_v13, %s13891_s23  ;;  %3910 = vrot.lane.b32.xlu1 %v15067_v16, %s13893_s25 }
 0xd35   :  { %12386 = vmatprep.subr.mxu0 %v17920_v19  ;;  %12356 = vmatprep.subr.mxu1 %v17920_v19 }
 0xd36   :  { %v3308_v17 = vpop.permute.xlu1 %3307  ;;  %v3310_v22 = vpop.permute.xlu0 %3309 }
 0xd37   :  { %12357 = vmatpush3.xpose.msk.msra.mxu1 %vm386_vm2, %v3075_v60  ;;  %12387 = vmatpush3.xpose.msk.msra.mxu0 %vm386_vm2, %v3310_v22 }
 0xd38   :  { %4187 = vrot.lane.b32.xlu1 %v15123_v55, %s13890_s22  ;;  %12358 = vmatprep.subr.mxu1 %v17920_v19 }
 0xd39   :  { %12388 = vmatprep.subr.mxu0 %v17920_v19 }
 0xd3a   :  { %v3547_v48 = vpop.permute.xlu1 %3546  ;;  %v3302_v38 = vpop.permute.xlu0 %3301 }
 0xd3b   :  { %12359 = vmatpush3.xpose.msk.msra.mxu1 %vm386_vm2, %v3073_v9  ;;  %12389 = vmatpush3.xpose.msk.msra.mxu0 %vm386_vm2, %v3308_v17 }
 0xd3c   :  { %4422 = vrot.lane.b32.xlu1 %v15123_v55, %s13891_s23  ;;  %12414 = vmatprep.subr.mxu0 %v17920_v19 }
 0xd3d   :  { %12369 = vmatprep.subr.mxu1 %v17920_v19 }
 0xd3e   :  { %v3545_v32 = vpop.permute.xlu1 %3544  ;;  %12361 = vmatmul.mubr.msk.f32.vlgmr.msra.gmra.mxu1 %vm386_vm2, %v15071_v28  ;;  %12391 = vmatmul.mubr.msk.f32.vlgmr.msra.gmra.mxu0 %vm386_vm2, %v3302_v38  ;;  %v3304_v53 = vpop.permute.xlu0 %3303 }
 0xd3f   :  { %12415 = vmatpush3.xpose.msk.msra.mxu0 %vm386_vm2, %v3547_v48  ;;  %12363 = vmatprep.mubr.msk.f32.mxu1 %vm13883_vm1, %v17920_v19 }
 0xd40   :  { %12393 = vmatprep.mubr.msk.f32.mxu0 %vm13883_vm1, %v17920_v19  ;;  %12416 = vmatprep.subr.mxu0 %v17920_v19 }
 0xd42   :  { %v3543_v23 = vpop.permute.xlu1 %3542  ;;  %12364 = vmatmul.mubr.msk.f32.gmra.mxu1 %vm386_vm2, %v15067_v16  ;;  %12394 = vmatmul.mubr.msk.f32.gmra.mxu0 %vm386_vm2, %v3304_v53  ;;  %v3306_v26 = vpop.permute.xlu0 %3305 }
 0xd43   :  { %12417 = vmatpush3.xpose.msk.msra.mxu0 %vm386_vm2, %v3545_v32  ;;  %12366 = vmatprep.mubr.msk.f32.mxu1 %vm13883_vm1, %v17920_v19 }
 0xd44   :  { %12396 = vmatprep.mubr.msk.f32.mxu0 %vm13883_vm1, %v17920_v19  ;;  %12418 = vmatprep.subr.mxu0 %v17920_v19 }
 0xd46   :  { %v3782_v54 = vpop.permute.xlu1 %3781  ;;  %12367 = vmatmul.mubr.msk.f32.gmra.mxu1 %vm386_vm2, %v15075_v14  ;;  %12397 = vmatmul.mubr.msk.f32.gmra.mxu0 %vm386_vm2, %v3306_v26  ;;  %v3537_v50 = vpop.permute.xlu0 %3536 }
 0xd47   :  { %12419 = vmatpush3.xpose.msk.msra.mxu0 %vm386_vm2, %v3543_v23  ;;  %12420 = vmatprep.mubr.msk.f32.mxu0 %vm13883_vm1, %v17920_v19 }
 0xd48   :  { %12444 = vmatprep.subr.mxu0 %v17920_v19  ;;  %12375 = vmatprep.mubr.msk.f32.mxu1 %vm13883_vm1, %v17920_v19 }
 0xd4a   :  { %12421 = vmatmul.mubr.msk.f32.vlgmr.msra.gmra.mxu0 %vm386_vm2, %v3537_v50  ;;  %v3539_v52 = vpop.permute.xlu0 %3538  ;;  %v3780_v61 = vpop.permute.xlu1 %3779 }
 0xd4b   :  { %12445 = vmatpush3.xpose.msk.msra.mxu0 %vm386_vm2, %v3782_v54  ;;  %12423 = vmatprep.mubr.msk.f32.mxu0 %vm13883_vm1, %v17920_v19 }
 0xd4c   :  { %12446 = vmatprep.subr.mxu0 %v17920_v19 }
 0xd4e   :  { %12424 = vmatmul.mubr.msk.f32.gmra.mxu0 %vm386_vm2, %v3539_v52  ;;  %v3541_v31 = vpop.permute.xlu0 %3540  ;;  %v3778_v5 = vpop.permute.xlu1 %3777 }
 0xd4f   :  { %12447 = vmatpush3.xpose.msk.msra.mxu0 %vm386_vm2, %v3780_v61  ;;  %12426 = vmatprep.mubr.msk.f32.mxu0 %vm13883_vm1, %v17920_v19 }
 0xd50   :  { %12448 = vmatprep.subr.mxu0 %v17920_v19 }
 0xd52   :  { %12427 = vmatmul.mubr.msk.f32.gmra.mxu0 %vm386_vm2, %v3541_v31  ;;  %v3772_v2 = vpop.permute.xlu0 %3771 }
 0xd53   :  { %12449 = vmatpush3.xpose.msk.msra.mxu0 %vm386_vm2, %v3778_v5  ;;  %12450 = vmatprep.mubr.msk.f32.mxu0 %vm13883_vm1, %v17920_v19 }
 0xd54   :  { %12474 = vmatprep.subr.mxu0 %v17920_v19 }
 0xd56   :  { %12451 = vmatmul.mubr.msk.f32.vlgmr.msra.gmra.mxu0 %vm386_vm2, %v3772_v2  ;;  %v3774_v6 = vpop.permute.xlu0 %3773 }
 0xd57   :  { %12453 = vmatprep.mubr.msk.f32.mxu0 %vm13883_vm1, %v17920_v19 }
 0xd5a   :  { %12454 = vmatmul.mubr.msk.f32.gmra.mxu0 %vm386_vm2, %v3774_v6  ;;  %v3776_v46 = vpop.permute.xlu0 %3775 }
 0xd5b   :  { %12456 = vmatprep.mubr.msk.f32.mxu0 %vm13883_vm1, %v17920_v19 }
 0xd5e   :  { %12457 = vmatmul.mubr.msk.f32.gmra.mxu0 %vm386_vm2, %v3776_v46 }
 0xd5f   :  { %12480 = vmatprep.mubr.msk.f32.mxu0 %vm13883_vm1, %v17920_v19 }
 0xd62   :  { %v4059_v56 = vpop.permute.xlu1 %4058  ;;  %v4294_v51 = vpop.permute.xlu0 %4293 }
 0xd63   :  { %12475 = vmatpush3.xpose.msk.msra.mxu0 %vm386_vm2, %v4059_v56 }
 0xd64   :  { %12476 = vmatprep.subr.mxu0 %v17920_v19 }
 0xd66   :  { %v4057_v1 = vpop.permute.xlu1 %4056  ;;  %v4290_v43 = vpop.permute.xlu0 %4289 }
 0xd67   :  { %12477 = vmatpush3.xpose.msk.msra.mxu0 %vm386_vm2, %v4057_v1 }
 0xd68   :  { %12478 = vmatprep.subr.mxu0 %v17920_v19 }
 0xd6a   :  { %v4055_v40 = vpop.permute.xlu1 %4054  ;;  %v4529_v41 = vpop.permute.xlu0 %4528 }
 0xd6b   :  { %12479 = vmatpush3.xpose.msk.msra.mxu0 %vm386_vm2, %v4055_v40 }
 0xd6c   :  { %12504 = vmatprep.subr.mxu0 %v17920_v19 }
 0xd6e   :  { %v4292_v11 = vpop.permute.xlu1 %4291  ;;  %12481 = vmatmul.mubr.msk.f32.vlgmr.msra.gmra.mxu0 %vm386_vm2, %v15121_v47  ;;  %v4527_v10 = vpop.permute.xlu0 %4526 }
 0xd6f   :  { %12505 = vmatpush3.xpose.msk.msra.mxu0 %vm386_vm2, %v4294_v51  ;;  %12483 = vmatprep.mubr.msk.f32.mxu0 %vm13883_vm1, %v17920_v19 }
 0xd70   :  { %12506 = vmatprep.subr.mxu0 %v17920_v19 }
 0xd72   :  { %v4284_v49 = vpop.permute.xlu1 %4283  ;;  %12484 = vmatmul.mubr.msk.f32.gmra.mxu0 %vm386_vm2, %v15123_v55  ;;  %v4525_v34 = vpop.permute.xlu0 %4524 }
 0xd73   :  { %12507 = vmatpush3.xpose.msk.msra.mxu0 %vm386_vm2, %v4292_v11  ;;  %12486 = vmatprep.mubr.msk.f32.mxu0 %vm13883_vm1, %v17920_v19 }
 0xd74   :  { %12508 = vmatprep.subr.mxu0 %v17920_v19 }
 0xd76   :  { %v4286_v7 = vpop.permute.xlu1 %4285  ;;  %12487 = vmatmul.mubr.msk.f32.gmra.mxu0 %vm386_vm2, %v15115_v13  ;;  %v4764_v35 = vpop.permute.xlu0 %4763 }
 0xd77   :  { %12509 = vmatpush3.xpose.msk.msra.mxu0 %vm386_vm2, %v4290_v43  ;;  %12510 = vmatprep.mubr.msk.f32.mxu0 %vm13883_vm1, %v17920_v19 }
 0xd78   :  { %12534 = vmatprep.subr.mxu0 %v17920_v19 }
 0xd7a   :  { %v4288_v0 = vpop.permute.xlu1 %4287  ;;  %12511 = vmatmul.mubr.msk.f32.vlgmr.msra.gmra.mxu0 %vm386_vm2, %v4284_v49  ;;  %v4762_v4 = vpop.permute.xlu0 %4761 }
 0xd7b   :  { %12535 = vmatpush3.xpose.msk.msra.mxu0 %vm386_vm2, %v4529_v41  ;;  %12513 = vmatprep.mubr.msk.f32.mxu0 %vm13883_vm1, %v17920_v19 }
 0xd7c   :  { %12536 = vmatprep.subr.mxu0 %v17920_v19 }
 0xd7e   :  { %v4519_v8 = vpop.permute.xlu1 %4518  ;;  %12514 = vmatmul.mubr.msk.f32.gmra.mxu0 %vm386_vm2, %v4286_v7  ;;  %v4760_v42 = vpop.permute.xlu0 %4759 }
 0xd7f   :  { %12537 = vmatpush3.xpose.msk.msra.mxu0 %vm386_vm2, %v4527_v10  ;;  %12516 = vmatprep.mubr.msk.f32.mxu0 %vm13883_vm1, %v17920_v19 }
 0xd80   :  { %12538 = vmatprep.subr.mxu0 %v17920_v19 }
 0xd82   :  { %v4521_v58 = vpop.permute.xlu1 %4520  ;;  %12517 = vmatmul.mubr.msk.f32.gmra.mxu0 %vm386_vm2, %v4288_v0  ;;  %v4756_v16 = vpop.permute.xlu0 %4755 }
 0xd83   :  { %12539 = vmatpush3.xpose.msk.msra.mxu0 %vm386_vm2, %v4525_v34  ;;  %12540 = vmatprep.mubr.msk.f32.mxu0 %vm13883_vm1, %v17920_v19 }
 0xd84   :  { %12564 = vmatprep.subr.mxu0 %v17920_v19 }
 0xd86   :  { %v4523_v36 = vpop.permute.xlu1 %4522  ;;  %12541 = vmatmul.mubr.msk.f32.vlgmr.msra.gmra.mxu0 %vm386_vm2, %v4519_v8  ;;  %v3208_v28 = vpop.permute.xlu0 %3207 }
 0xd87   :  { %12370 = vmatpush3.msra.mxu1 %v3208_v28  ;;  %12565 = vmatpush3.xpose.msk.msra.mxu0 %vm386_vm2, %v4764_v35 }
 0xd88   :  { %12543 = vmatprep.mubr.msk.f32.mxu0 %vm13883_vm1, %v17920_v19  ;;  %12566 = vmatprep.subr.mxu0 %v17920_v19 }
 0xd89   :  { %12371 = vmatprep.subr.mxu1 %v17920_v19 }
 0xd8a   :  { %v4754_v37 = vpop.permute.xlu1 %4753  ;;  %12544 = vmatmul.mubr.msk.f32.gmra.mxu0 %vm386_vm2, %v4521_v58 }
 0xd8b   :  { %12567 = vmatpush3.xpose.msk.msra.mxu0 %vm386_vm2, %v4762_v4  ;;  %12546 = vmatprep.mubr.msk.f32.mxu0 %vm13883_vm1, %v17920_v19 }
 0xd8c   :  { %12568 = vmatprep.subr.mxu0 %v17920_v19 }
 0xd8e   :  { %v4758_v33 = vpop.permute.xlu1 %4757  ;;  %12547 = vmatmul.mubr.msk.f32.gmra.mxu0 %vm386_vm2, %v4523_v36 }
 0xd8f   :  { %12569 = vmatpush3.xpose.msk.msra.mxu0 %vm386_vm2, %v4760_v42  ;;  %12570 = vmatprep.mubr.msk.f32.mxu0 %vm13883_vm1, %v17920_v19 }
 0xd92   :  { %v3206_v14 = vpop.permute.xlu1 %3205  ;;  %12571 = vmatmul.mubr.msk.f32.vlgmr.msra.gmra.mxu0 %vm386_vm2, %v4754_v37 }
 0xd93   :  { %12372 = vmatpush3.msra.mxu1 %v3206_v14  ;;  %12573 = vmatprep.mubr.msk.f32.mxu0 %vm13883_vm1, %v17920_v19 }
 0xd94   :  { %12373 = vmatprep.subr.mxu1 %v17920_v19 }
 0xd96   :  { %v3204_v30 = vpop.permute.xlu1 %3203  ;;  %12574 = vmatmul.mubr.msk.f32.gmra.mxu0 %vm386_vm2, %v4756_v16 }
 0xd97   :  { %12374 = vmatpush3.msra.mxu1 %v3204_v30  ;;  %12576 = vmatprep.mubr.msk.f32.mxu0 %vm13883_vm1, %v17920_v19 }
 0xd98   :  { %12399 = vmatprep.subr.mxu1 %v17920_v19 }
 0xd9a   :  { %12577 = vmatmul.mubr.msk.f32.gmra.mxu0 %vm386_vm2, %v4758_v33 }
 0xdfe   :  { %v15323_v29 = vpop.f32.mrf.mxu1  ;;  %v15325_v60 = vpop.f32.mrf.mxu0 }
 0xdff   :  { %v3170_v9 = vsel %vm479_vm3, %v15323_v29, -inf  ;;  %v3405_v38 = vsel %vm479_vm3, %v15325_v60, -inf }
 0xe00   :  { %3171 = vmax.xlane.f32.xlu0 %v3170_v9  ;;  %v12362_v44 = vpop.f32.mrf.mxu1  ;;  %v12392_v20 = vpop.f32.mrf.mxu0 }
 0xe02   :  { %v15329_v17 = vpop.f32.mrf.mxu1  ;;  %v15331_v22 = vpop.f32.mrf.mxu0 }
 0xe03   :  { %v3173_v48 = vsel %vm479_vm3, %v15329_v17, -inf  ;;  %v3408_v54 = vsel %vm479_vm3, %v15331_v22, -inf }
 0xe04   :  { %3174 = vmax.xlane.f32.xlu1 %v3173_v48  ;;  %v12365_v32 = vpop.f32.mrf.mxu1  ;;  %3406 = vmax.xlane.f32.xlu0 %v3405_v38  ;;  %v12395_v53 = vpop.f32.mrf.mxu0 }
 0xe06   :  { %v15337_v23 = vpop.f32.mrf.mxu1  ;;  %v15339_v26 = vpop.f32.mrf.mxu0 }
 0xe07   :  { %v3411_v50 = vsel %vm479_vm3, %v15339_v26, -inf  ;;  %v3176_v5 = vsel %vm479_vm3, %v15337_v23, -inf }
 0xe08   :  { %v12368_v52 = vpop.f32.mrf.mxu1  ;;  %3409 = vmax.xlane.f32.xlu0 %v3408_v54  ;;  %3412 = vmax.xlane.f32.xlu1 %v3411_v50  ;;  %v12398_v61 = vpop.f32.mrf.mxu0 }
 0xe0a   :  { %v15345_v31 = vpop.f32.mrf.mxu0 }
 0xe0b   :  { %v3640_v46 = vsel %vm479_vm3, %v15345_v31, -inf }
 0xe0c   :  { %3177 = vmax.xlane.f32.xlu0 %v3176_v5  ;;  %v12422_v2 = vpop.f32.mrf.mxu0 }
 0xe0e   :  { %v15349_v6 = vpop.f32.mrf.mxu0 }
 0xe0f   :  { %v3643_v56 = vsel %vm479_vm3, %v15349_v6, -inf }
 0xe10   :  { %3641 = vmax.xlane.f32.xlu0 %v3640_v46  ;;  %3644 = vmax.xlane.f32.xlu1 %v3643_v56  ;;  %v12425_v51 = vpop.f32.mrf.mxu0 }
 0xe12   :  { %v15355_v1 = vpop.f32.mrf.mxu0 }
 0xe13   :  { %v3646_v43 = vsel %vm479_vm3, %v15355_v1, -inf }
 0xe14   :  { %3647 = vmax.xlane.f32.xlu0 %v3646_v43  ;;  %v12428_v40 = vpop.f32.mrf.mxu0 }
 0xe16   :  { %v15359_v41 = vpop.f32.mrf.mxu0 }
 0xe17   :  { %v3875_v11 = vsel %vm479_vm3, %v15359_v41, -inf }
 0xe18   :  { %3876 = vmax.xlane.f32.xlu1 %v3875_v11  ;;  %v12452_v10 = vpop.f32.mrf.mxu0 }
 0xe1a   :  { %v15363_v49 = vpop.f32.mrf.mxu0 }
 0xe1b   :  { %v3878_v34 = vsel %vm479_vm3, %v15363_v49, -inf }
 0xe1c   :  { %3879 = vmax.xlane.f32.xlu0 %v3878_v34  ;;  %v12455_v7 = vpop.f32.mrf.mxu0  ;;  %v15411_v34 = vpop.permute.xlu0 %3442 }
 0xe1e   :  { %v15367_v35 = vpop.f32.mrf.mxu0 }
 0xe1f   :  { %v3881_v0 = vsel %vm479_vm3, %v15367_v35, -inf }
 0xe20   :  { %3882 = vmax.xlane.f32.xlu1 %v3881_v0  ;;  %v12458_v4 = vpop.f32.mrf.mxu0  ;;  %v15413_v0 = vpop.permute.xlu0 %3438 }
 0xe2e   :  { %v15371_v8 = vpop.f32.mrf.mxu0 }
 0xe2f   :  { %v4152_v42 = vsel %vm479_vm3, %v15371_v8, -inf }
 0xe30   :  { %4153 = vmax.xlane.f32.xlu0 %v4152_v42  ;;  %v12482_v58 = vpop.f32.mrf.mxu0  ;;  %v15417_v42 = vpop.permute.xlu0 %3677 }
 0xe32   :  { %v15375_v16 = vpop.f32.mrf.mxu0 }
 0xe33   :  { %v4155_v36 = vsel %vm479_vm3, %v15375_v16, -inf }
 0xe34   :  { %4156 = vmax.xlane.f32.xlu1 %v4155_v36  ;;  %v12485_v28 = vpop.f32.mrf.mxu0  ;;  %v15421_v36 = vpop.permute.xlu1 %3440 }
 0xe36   :  { %v15379_v37 = vpop.f32.mrf.mxu0 }
 0xe37   :  { %v4158_v4 = vsel %vm479_vm3, %v15379_v37, -inf }
 0xe38   :  { %v12488_v33 = vpop.f32.mrf.mxu0 }
 0xe39   :  { %v15425_v33 = vpop.permute.xlu0 %3912 }
 0xe3a   :  { %v15381_v14 = vpop.f32.mrf.mxu0 }
 0xe3b   :  { %v4387_v30 = vsel %vm479_vm3, %v15381_v14, -inf }
 0xe3c   :  { %4388 = vmax.xlane.f32.xlu1 %v4387_v30  ;;  %v12512_v9 = vpop.f32.mrf.mxu0 }
 0xe3d   :  { %v15429_v9 = vpop.permute.xlu1 %3675 }
 0xe3e   :  { %v15385_v44 = vpop.f32.mrf.mxu0 }
 0xe3f   :  { %v4390_v58 = vsel %vm479_vm3, %v15385_v44, -inf }
 0xe40   :  { %v12515_v20 = vpop.f32.mrf.mxu0 }
 0xe41   :  { %v15431_v20 = vpop.permute.xlu0 %3908 }
 0xe42   :  { %v15387_v48 = vpop.f32.mrf.mxu0 }
 0xe43   :  { %v4393_v38 = vsel %vm479_vm3, %v15387_v48, -inf }
 0xe44   :  { %4394 = vmax.xlane.f32.xlu1 %v4393_v38  ;;  %v12518_v32 = vpop.f32.mrf.mxu0 }
 0xe45   :  { %v15435_v32 = vpop.permute.xlu1 %3673 }
 0xe46   :  { %4420 = vrot.lane.b32.xlu0 %v15121_v47, %s13891_s23  ;;  %v15393_v53 = vpop.f32.mrf.mxu0 }
 0xe47   :  { %v4622_v28 = vsel %vm479_vm3, %v15393_v53, -inf }
 0xe48   :  { %v12542_v54 = vpop.f32.mrf.mxu0 }
 0xe49   :  { %v15437_v54 = vpop.permute.xlu0 %4189 }
 0xe4a   :  { %v15395_v50 = vpop.f32.mrf.mxu0 }
 0xe4b   :  { %v4625_v52 = vsel %vm479_vm3, %v15395_v50, -inf }
 0xe4c   :  { %4626 = vmax.xlane.f32.xlu1 %v4625_v52  ;;  %v12545_v61 = vpop.f32.mrf.mxu0  ;;  %v15439_v52 = vpop.permute.xlu1 %3910 }
 0xe4d   :  { %v15441_v61 = vpop.permute.xlu0 %4185 }
 0xe4e   :  { %v15399_v5 = vpop.f32.mrf.mxu0 }
 0xe4f   :  { %v4628_v30 = vsel %vm479_vm3, %v15399_v5, -inf }
 0xe50   :  { %v12548_v2 = vpop.f32.mrf.mxu0 }
 0xe51   :  { %v15443_v2 = vpop.permute.xlu1 %4187 }
 0xe52   :  { %v15401_v46 = vpop.f32.mrf.mxu0 }
 0xe53   :  { %v4857_v56 = vsel %vm479_vm3, %v15401_v46, -inf }
 0xe54   :  { %4858 = vmax.xlane.f32.xlu1 %v4857_v56  ;;  %v12572_v51 = vpop.f32.mrf.mxu0  ;;  %v15445_v56 = vpop.permute.xlu0 %4424 }
 0xe55   :  { %v15447_v51 = vpop.permute.xlu1 %4422 }
 0xe56   :  { %v15405_v43 = vpop.f32.mrf.mxu0 }
 0xe57   :  { %v4860_v40 = vsel %vm479_vm3, %v15405_v43, -inf }
 0xe58   :  { %4861 = vmax.xlane.f32.xlu1 %v4860_v40  ;;  %v12575_v11 = vpop.f32.mrf.mxu0 }
 0xe5a   :  { %v15409_v10 = vpop.f32.mrf.mxu0 }
 0xe5b   :  { %v4863_v38 = vsel %vm479_vm3, %v15409_v10, -inf }
 0xe5c   :  { %v12578_v7 = vpop.f32.mrf.mxu0 }
 0xe65   :  { %4159 = vmax.xlane.f32.xlu0 %v4158_v4 }
 0xe69   :  { %4391 = vmax.xlane.f32.xlu0 %v4390_v58 }
 0xe6d   :  { %4623 = vmax.xlane.f32.xlu0 %v4622_v28 }
 0xe71   :  { %4629 = vmax.xlane.f32.xlu0 %v4628_v30 }
 0xe75   :  { %4864 = vmax.xlane.f32.xlu0 %v4863_v38 }
 0xe89   :  { %v3172_v40 = vpop.xlane.xlu0 %3171 }
 0xe8a   :  { %v3179_v11 = vsub.f32 %v15323_v29, %v3172_v40 }
 0xe8c   :  { %v3182_v7 = vmul.f32 1.442695, %v3179_v11 }
 0xe8d   :  { %v3175_v4 = vpop.xlane.xlu1 %3174  ;;  %v3407_v58 = vpop.xlane.xlu0 %3406 }
 0xe8e   :  { %13493 = vpow2.f32 %v3182_v7  ;;  %v3180_v28 = vsub.f32 %v15329_v17, %v3175_v4  ;;  %v3414_v30 = vsub.f32 %v15325_v60, %v3407_v58 }
 0xe90   :  { %v3417_v38 = vmul.f32 1.442695, %v3414_v30  ;;  %v3184_v62 = vmul.f32 1.442695, %v3180_v28 }
 0xe91   :  { %v3413_v18 = vpop.xlane.xlu1 %3412  ;;  %v3410_v15 = vpop.xlane.xlu0 %3409 }
 0xe92   :  { %v3416_v25 = vsub.f32 %v15339_v26, %v3413_v18  ;;  %v3415_v45 = vsub.f32 %v15331_v22, %v3410_v15  ;;  %13495 = vpow2.f32 %v3417_v38 }
 0xe93   :  { %13497 = vpow2.f32 %v3184_v62 }
 0xe94   :  { %v3419_v24 = vmul.f32 1.442695, %v3415_v45  ;;  %v3421_v29 = vmul.f32 1.442695, %v3416_v25 }
 0xe95   :  { %v3178_v40 = vpop.xlane.xlu0 %3177 }
 0xe96   :  { %v3181_v11 = vsub.f32 %v15337_v23, %v3178_v40  ;;  %13499 = vpow2.f32 %v3419_v24 }
 0xe97   :  { %13501 = vpow2.f32 %v3421_v29 }
 0xe98   :  { %v3186_v7 = vmul.f32 1.442695, %v3181_v11 }
 0xe99   :  { %v3645_v17 = vpop.xlane.xlu1 %3644  ;;  %v3642_v60 = vpop.xlane.xlu0 %3641 }
 0xe9a   :  { %13503 = vpow2.f32 %v3186_v7  ;;  %v3650_v4 = vsub.f32 %v15349_v6, %v3645_v17  ;;  %v3649_v58 = vsub.f32 %v15345_v31, %v3642_v60 }
 0xe9b   :  { %v15457_v18 = vpop.eup %13493 }
 0xe9c   :  { %v3654_v15 = vmul.f32 1.442695, %v3650_v4  ;;  %v3652_v22 = vmul.f32 1.442695, %v3649_v58  ;;  %v3188_v45 = vsel %vm479_vm3, %v15457_v18, 0.0 }
 0xe9d   :  { %3189 = vadd.xlane.f32.xlu0 %v3188_v45  ;;  %v3648_v25 = vpop.xlane.xlu0 %3647 }
 0xe9e   :  { %13505 = vpow2.f32 %v3654_v15  ;;  %v3651_v24 = vsub.f32 %v15355_v1, %v3648_v25 }
 0xe9f   :  { %13507 = vpow2.f32 %v3652_v22  ;;  %v15462_v62 = vpop.eup %13495 }
 0xea0   :  { %v3656_v23 = vmul.f32 1.442695, %v3651_v24  ;;  %v3423_v31 = vsel %vm479_vm3, %v15462_v62, 0.0  ;;  %v15466_v6 = vpop.eup %13497 }
 0xea1   :  { %v3877_v26 = vpop.xlane.xlu1 %3876  ;;  %3424 = vadd.xlane.f32.xlu1 %v3423_v31  ;;  %v3191_v1 = vsel %vm479_vm3, %v15466_v6, 0.0 }
 0xea2   :  { %13509 = vpow2.f32 %v3656_v23  ;;  %v3884_v28 = vsub.f32 %v15359_v41, %v3877_v26 }
 0xea3   :  { %v15469_v30 = vpop.eup %13499 }
 0xea4   :  { %v3887_v38 = vmul.f32 1.442695, %v3884_v28  ;;  %v3426_v29 = vsel %vm479_vm3, %v15469_v30, 0.0  ;;  %v15475_v11 = vpop.eup %13501 }
 0xea5   :  { %v3880_v40 = vpop.xlane.xlu0 %3879  ;;  %3192 = vadd.xlane.f32.xlu1 %v3191_v1  ;;  %3427 = vadd.xlane.f32.xlu0 %v3426_v29  ;;  %v3429_v58 = vsel %vm479_vm3, %v15475_v11, 0.0 }
 0xea6   :  { %13511 = vpow2.f32 %v3887_v38  ;;  %v3885_v7 = vsub.f32 %v15363_v49, %v3880_v40 }
 0xea7   :  { %v15478_v17 = vpop.eup %13503 }
 0xea8   :  { %v3889_v41 = vmul.f32 1.442695, %v3885_v7  ;;  %v3194_v60 = vsel %vm479_vm3, %v15478_v17, 0.0 }
 0xea9   :  { %v3883_v4 = vpop.xlane.xlu1 %3882  ;;  %3430 = vadd.xlane.f32.xlu1 %v3429_v58  ;;  %3195 = vadd.xlane.f32.xlu0 %v3194_v60 }
 0xeaa   :  { %13513 = vpow2.f32 %v3889_v41  ;;  %v3886_v15 = vsub.f32 %v15367_v35, %v3883_v4 }
 0xeab   :  { %v15485_v22 = vpop.eup %13505 }
 0xeac   :  { %v15487_v45 = vpop.eup %13507  ;;  %v3891_v49 = vmul.f32 1.442695, %v3886_v15  ;;  %v3661_v25 = vsel %vm479_vm3, %v15485_v22, 0.0 }
 0xead   :  { %v3658_v24 = vsel %vm479_vm3, %v15487_v45, 0.0  ;;  %3662 = vadd.xlane.f32.xlu0 %v3661_v25 }
 0xeae   :  { %13515 = vpow2.f32 %v3891_v49  ;;  %3659 = vadd.xlane.f32.xlu1 %v3658_v24 }
 0xeaf   :  { %v15493_v23 = vpop.eup %13509 }
 0xeb0   :  { %v3664_v35 = vsel %vm479_vm3, %v15493_v23, 0.0 }
 0xeb2   :  { %3665 = vadd.xlane.f32.xlu1 %v3664_v35 }
 0xeb3   :  { %v15497_v26 = vpop.eup %13511 }
 0xeb4   :  { %v3893_v31 = vsel %vm479_vm3, %v15497_v26, 0.0 }
 0xeb6   :  { %3894 = vadd.xlane.f32.xlu1 %v3893_v31 }
 0xeb7   :  { %v15501_v28 = vpop.eup %13513 }
 0xeb8   :  { %v3896_v38 = vsel %vm479_vm3, %v15501_v28, 0.0 }
 0xeb9   :  { %3897 = vadd.xlane.f32.xlu0 %v3896_v38  ;;  %v4154_v1 = vpop.xlane.xlu0 %4153 }
 0xeba   :  { %v4161_v29 = vsub.f32 %v15371_v8, %v4154_v1 }
 0xebb   :  { %v15506_v40 = vpop.eup %13515 }
 0xebc   :  { %v4164_v7 = vmul.f32 1.442695, %v4161_v29  ;;  %v3899_v41 = vsel %vm479_vm3, %v15506_v40, 0.0 }
 0xebd   :  { %v4157_v60 = vpop.xlane.xlu1 %4156  ;;  %3900 = vadd.xlane.f32.xlu0 %v3899_v41 }
 0xebe   :  { %13517 = vpow2.f32 %v4164_v7  ;;  %v4162_v4 = vsub.f32 %v15375_v16, %v4157_v60  ;;  %v15523_v16 = vpop.permute.xlu0 %4420 }
 0xec0   :  { %v4166_v58 = vmul.f32 1.442695, %v4162_v4 }
 0xec2   :  { %13519 = vpow2.f32 %v4166_v58 }
 0xec5   :  { %v4389_v24 = vpop.xlane.xlu1 %4388 }
 0xec6   :  { %v4396_v31 = vsub.f32 %v15381_v14, %v4389_v24 }
 0xec8   :  { %v4399_v41 = vmul.f32 1.442695, %v4396_v31 }
 0xecb   :  { %v15511_v15 = vpop.eup %13517 }
 0xecc   :  { %v4170_v49 = vsel %vm479_vm3, %v15511_v15, 0.0 }
 0xecd   :  { %4171 = vadd.xlane.f32.xlu1 %v4170_v49  ;;  %v4395_v35 = vpop.xlane.xlu1 %4394 }
 0xece   :  { %v4398_v7 = vsub.f32 %v15387_v48, %v4395_v35 }
 0xecf   :  { %v15515_v8 = vpop.eup %13519 }
 0xed0   :  { %v4173_v25 = vsel %vm479_vm3, %v15515_v8, 0.0 }
 0xed1   :  { %4174 = vadd.xlane.f32.xlu0 %v4173_v25  ;;  %v4403_v25 = vmul.f32 1.442695, %v4398_v7 }
 0xed5   :  { %v4627_v38 = vpop.xlane.xlu1 %4626 }
 0xed6   :  { %v4632_v60 = vsub.f32 %v15395_v50, %v4627_v38 }
 0xed8   :  { %v4636_v21 = vmul.f32 1.442695, %v4632_v60 }
 0xedd   :  { %v4859_v7 = vpop.xlane.xlu1 %4858 }
 0xede   :  { %4657 = vrot.lane.b32.xlu1 %v15123_v55, %s13892_s24 }
 0xee1   :  { %v4862_v60 = vpop.xlane.xlu1 %4861 }
 0xee7   :  { %4659 = vrot.lane.b32.xlu0 %v15115_v13, %s13892_s24 }
 0xeee   :  { %v4160_v1 = vpop.xlane.xlu0 %4159 }
 0xeef   :  { %v4163_v29 = vsub.f32 %v15379_v37, %v4160_v1 }
 0xef1   :  { %v4168_v4 = vmul.f32 1.442695, %v4163_v29 }
 0xef2   :  { %v4392_v58 = vpop.xlane.xlu0 %4391 }
 0xef3   :  { %13521 = vpow2.f32 %v4168_v4  ;;  %v4397_v49 = vsub.f32 %v15385_v44, %v4392_v58  ;;  %v4867_v58 = vsub.f32 %v15405_v43, %v4862_v60 }
 0xef4   :  { %13523 = vpow2.f32 %v4399_v41 }
 0xef5   :  { %v4401_v27 = vmul.f32 1.442695, %v4397_v49 }
 0xef6   :  { %v4624_v59 = vpop.xlane.xlu0 %4623 }
 0xef7   :  { %13525 = vpow2.f32 %v4401_v27  ;;  %v4631_v14 = vsub.f32 %v15393_v53, %v4624_v59 }
 0xef8   :  { %13527 = vpow2.f32 %v4403_v25 }
 0xef9   :  { %13529 = vpow2.f32 %v4636_v21  ;;  %v4634_v37 = vmul.f32 1.442695, %v4631_v14  ;;  %v4871_v14 = vmul.f32 1.442695, %v4867_v58 }
 0xefa   :  { %v4630_v29 = vpop.xlane.xlu0 %4629 }
 0xefb   :  { %13531 = vpow2.f32 %v4634_v37  ;;  %v4633_v49 = vsub.f32 %v15399_v5, %v4630_v29 }
 0xefd   :  { %v4638_v37 = vmul.f32 1.442695, %v4633_v49 }
 0xefe   :  { %v15559_v41 = vpop.xlane.xlu0 %4864 }
 0xf00   :  { %v15531_v48 = vpop.eup %13521 }
 0xf01   :  { %v4176_v50 = vsel %vm479_vm3, %v15531_v48, 0.0  ;;  %v15535_v24 = vpop.eup %13523 }
 0xf02   :  { %4177 = vadd.xlane.f32.xlu1 %v4176_v50  ;;  %v4405_v27 = vsel %vm479_vm3, %v15535_v24, 0.0 }
 0xf04   :  { %v15537_v44 = vpop.eup %13525 }
 0xf05   :  { %v15539_v35 = vpop.eup %13527  ;;  %v4408_v21 = vsel %vm479_vm3, %v15537_v44, 0.0 }
 0xf06   :  { %v15545_v59 = vpop.eup %13529  ;;  %4406 = vadd.xlane.f32.xlu1 %v4405_v27  ;;  %4409 = vadd.xlane.f32.xlu0 %v4408_v21  ;;  %v4411_v53 = vsel %vm479_vm3, %v15539_v35, 0.0 }
 0xf07   :  { %v4643_v31 = vsel %vm479_vm3, %v15545_v59, 0.0 }
 0xf08   :  { %v15551_v38 = vpop.eup %13531 }
 0xf09   :  { %v4640_v1 = vsel %vm479_vm3, %v15551_v38, 0.0 }
 0xf0a   :  { %4412 = vadd.xlane.f32.xlu1 %v4411_v53  ;;  %4644 = vadd.xlane.f32.xlu0 %v4643_v31 }
 0xf0e   :  { %4641 = vadd.xlane.f32.xlu1 %v4640_v1 }
 0xf1f   :  { %4894 = vrot.lane.b32.xlu1 %v15115_v13, %s13893_s25  ;;  %v4866_v13 = vsub.f32 %v15401_v46, %v4859_v7 }
 0xf20   :  { %4655 = vrot.lane.b32.xlu0 %v15121_v47, %s13892_s24 }
 0xf21   :  { %v4869_v21 = vmul.f32 1.442695, %v4866_v13 }
 0xf24   :  { %4892 = vrot.lane.b32.xlu0 %v15123_v55, %s13893_s25 }
 0xf26   :  { %v3190_v4 = vpop.xlane.xlu0 %3189 }
 0xf27   :  { %13533 = vrcp.f32 %v3190_v4 }
 0xf2a   :  { %v3425_v25 = vpop.xlane.xlu1 %3424 }
 0xf2e   :  { %v3193_v50 = vpop.xlane.xlu1 %3192  ;;  %v3428_v27 = vpop.xlane.xlu0 %3427 }
 0xf2f   :  { %13535 = vrcp.f32 %v3193_v50 }
 0xf30   :  { %13537 = vpow2.f32 %v4871_v14 }
 0xf31   :  { %13539 = vpow2.f32 %v4638_v37 }
 0xf32   :  { %v3196_v53 = vpop.xlane.xlu0 %3195  ;;  %v3431_v5 = vpop.xlane.xlu1 %3430 }
 0xf33   :  { %13541 = vrcp.f32 %v3196_v53 }
 0xf34   :  { %v13534_v55 = vpop.eup %13533  ;;  %13543 = vpow2.f32 %v4869_v21 }
 0xf35   :  { %v3200_v31 = vmul.f32 %v13534_v55, %v15457_v18  ;;  %13545 = vrcp.f32 %v3425_v25 }
 0xf36   :  { %13547 = vrcp.f32 %v3428_v27  ;;  %v3663_v4 = vpop.xlane.xlu0 %3662 }
 0xf37   :  { %12376 = vmatmul.mubr.msk.f32.vlgmr.msra.gmra.mxu1 %vm479_vm3, %v3200_v31  ;;  %13549 = vrcp.f32 %v3431_v5  ;;  %v3660_v1 = vpop.xlane.xlu1 %3659 }
 0xf38   :  { %12400 = vmatpush3.msra.mxu1 %v15411_v34  ;;  %12378 = vmatprep.mubr.msk.f32.mxu1 %vm13883_vm1, %v17920_v19  ;;  %13551 = vrcp.f32 %v3660_v1 }
 0xf39   :  { %12401 = vmatprep.subr.mxu1 %v17920_v19  ;;  %13553 = vrcp.f32 %v3663_v4 }
 0xf3a   :  { %12402 = vmatpush3.msra.mxu1 %v15421_v36 }
 0xf3b   :  { %12403 = vmatprep.subr.mxu1 %v17920_v19  ;;  %v3666_v58 = vpop.xlane.xlu1 %3665 }
 0xf3c   :  { %12404 = vmatpush3.msra.mxu1 %v15413_v0  ;;  %v13536_v46 = vpop.eup %13535  ;;  %13555 = vrcp.f32 %v3666_v58 }
 0xf3d   :  { %12429 = vmatprep.subr.mxu1 %v17920_v19  ;;  %v15576_v43 = vpop.eup %13537  ;;  %v3201_v34 = vmul.f32 %v13536_v46, %v15466_v6 }
 0xf3e   :  { %v15579_v18 = vpop.eup %13539  ;;  %v4878_v0 = vsel %vm479_vm3, %v15576_v43, 0.0 }
 0xf3f   :  { %12379 = vmatmul.mubr.msk.f32.gmra.mxu1 %vm479_vm3, %v3201_v34  ;;  %v4646_v29 = vsel %vm479_vm3, %v15579_v18, 0.0  ;;  %v3895_v37 = vpop.xlane.xlu1 %3894 }
 0xf40   :  { %12381 = vmatprep.mubr.msk.f32.mxu1 %vm13883_vm1, %v17920_v19  ;;  %v13542_v36 = vpop.eup %13541  ;;  %13557 = vrcp.f32 %v3895_v37 }
 0xf41   :  { %v15588_v7 = vpop.eup %13543  ;;  %v3202_v6 = vmul.f32 %v13542_v36, %v15478_v17 }
 0xf42   :  { %v13546_v60 = vpop.eup %13545  ;;  %v4875_v49 = vsel %vm479_vm3, %v15588_v7, 0.0 }
 0xf43   :  { %4879 = vadd.xlane.f32.xlu0 %v4878_v0  ;;  %4647 = vadd.xlane.f32.xlu1 %v4646_v29  ;;  %v3435_v25 = vmul.f32 %v13546_v60, %v15462_v62  ;;  %v13548_v14 = vpop.eup %13547  ;;  %v3898_v62 = vpop.xlane.xlu0 %3897 }
 0xf44   :  { %12382 = vmatmul.mubr.msk.f32.gmra.mxu1 %vm479_vm3, %v3202_v6  ;;  %v3436_v17 = vmul.f32 %v13548_v14, %v15469_v30  ;;  %v13550_v13 = vpop.eup %13549  ;;  %13559 = vrcp.f32 %v3898_v62 }
 0xf45   :  { %12405 = vmatprep.mubr.msk.f32.mxu1 %vm13883_vm1, %v17920_v19  ;;  %v13552_v30 = vpop.eup %13551 }
 0xf46   :  { %v13554_v50 = vpop.eup %13553 }
 0xf47   :  { %4876 = vadd.xlane.f32.xlu1 %v4875_v49  ;;  %v3901_v27 = vpop.xlane.xlu0 %3900 }
 0xf48   :  { %12406 = vmatmul.mubr.msk.f32.vlgmr.msra.gmra.mxu1 %vm479_vm3, %v3435_v25  ;;  %13561 = vrcp.f32 %v3901_v27 }
 0xf49   :  { %12430 = vmatpush3.msra.mxu1 %v15417_v42  ;;  %12408 = vmatprep.mubr.msk.f32.mxu1 %vm13883_vm1, %v17920_v19  ;;  %v3437_v42 = vmul.f32 %v13550_v13, %v15475_v11  ;;  %v13556_v11 = vpop.eup %13555 }
 0xf4a   :  { %12431 = vmatprep.subr.mxu1 %v17920_v19 }
 0xf4b   :  { %12432 = vmatpush3.msra.mxu1 %v15429_v9  ;;  %v3670_v9 = vmul.f32 %v13552_v30, %v15487_v45 }
 0xf4c   :  { %12433 = vmatprep.subr.mxu1 %v17920_v19  ;;  %12409 = vmatmul.mubr.msk.f32.gmra.mxu1 %vm479_vm3, %v3436_v17 }
 0xf4d   :  { %12434 = vmatpush3.msra.mxu1 %v15435_v32  ;;  %12411 = vmatprep.mubr.msk.f32.mxu1 %vm13883_vm1, %v17920_v19  ;;  %v3671_v32 = vmul.f32 %v13554_v50, %v15485_v22  ;;  %v13558_v22 = vpop.eup %13557 }
 0xf4e   :  { %12459 = vmatprep.subr.mxu1 %v17920_v19 }
 0xf50   :  { %12412 = vmatmul.mubr.msk.f32.gmra.mxu1 %vm479_vm3, %v3437_v42 }
 0xf51   :  { %12435 = vmatprep.mubr.msk.f32.mxu1 %vm13883_vm1, %v17920_v19  ;;  %v13560_v45 = vpop.eup %13559 }
 0xf54   :  { %12436 = vmatmul.mubr.msk.f32.vlgmr.msra.gmra.mxu1 %vm479_vm3, %v3670_v9 }
 0xf55   :  { %12460 = vmatpush3.msra.mxu1 %v15425_v33  ;;  %12438 = vmatprep.mubr.msk.f32.mxu1 %vm13883_vm1, %v17920_v19  ;;  %v3672_v33 = vmul.f32 %v13556_v11, %v15493_v23  ;;  %v3906_v23 = vmul.f32 %v13560_v45, %v15501_v28  ;;  %v13562_v53 = vpop.eup %13561  ;;  %v11114_v45 = vld [vmem:[%s17891_s4 + $0x30] sm:$0xff] }
 0xf56   :  { %12461 = vmatprep.subr.mxu1 %v17920_v19  ;;  %v4172_v21 = vpop.xlane.xlu1 %4171 }
 0xf57   :  { %12462 = vmatpush3.msra.mxu1 %v15439_v52  ;;  %13563 = vrcp.f32 %v4172_v21 }
 0xf58   :  { %4890 = vrot.lane.b32.xlu1 %v15121_v47, %s13893_s25  ;;  %12463 = vmatprep.subr.mxu1 %v17920_v19  ;;  %v3905_v47 = vmul.f32 %v13558_v22, %v15497_v26  ;;  %v3907_v26 = vmul.f32 %v13562_v53, %v15506_v40 }
 0xf59   :  { %12439 = vmatmul.mubr.msk.f32.gmra.mxu1 %vm479_vm3, %v3671_v32 }
 0xf5a   :  { %12464 = vmatpush3.msra.mxu1 %v15431_v20  ;;  %12441 = vmatprep.mubr.msk.f32.mxu1 %vm13883_vm1, %v17920_v19  ;;  %v4175_v52 = vpop.xlane.xlu0 %4174  ;;  %v4868_v20 = vsub.f32 %v15409_v10, %v15559_v41 }
 0xf5b   :  { %12489 = vmatprep.subr.mxu1 %v17920_v19  ;;  %13565 = vrcp.f32 %v4175_v52 }
 0xf5d   :  { %12442 = vmatmul.mubr.msk.f32.gmra.mxu1 %vm479_vm3, %v3672_v33 }
 0xf5e   :  { %12465 = vmatprep.mubr.msk.f32.mxu1 %vm13883_vm1, %v17920_v19 }
 0xf61   :  { %12466 = vmatmul.mubr.msk.f32.vlgmr.msra.gmra.mxu1 %vm479_vm3, %v3905_v47  ;;  %v11115_v47 = vld [vmem:[%s17891_s4 + $0x38] sm:$0xff] }
 0xf62   :  { %12490 = vmatpush3.msra.mxu1 %v15437_v54  ;;  %12468 = vmatprep.mubr.msk.f32.mxu1 %vm13883_vm1, %v17920_v19  ;;  %v4873_v54 = vmul.f32 1.442695, %v4868_v20 }
 0xf63   :  { %12491 = vmatprep.subr.mxu1 %v17920_v19  ;;  %12594 = vmatprep.subr.mxu0 %v11115_v47 }
 0xf64   :  { %12492 = vmatpush3.msra.mxu1 %v15443_v2  ;;  %v13564_v10 = vpop.eup %13563  ;;  %13567 = vpow2.f32 %v4873_v54  ;;  %12595 = vmatpush3.msra.mxu0 %v11115_v47 }
 0xf65   :  { %12493 = vmatprep.subr.mxu1 %v17920_v19  ;;  %12469 = vmatmul.mubr.msk.f32.gmra.mxu1 %vm479_vm3, %v3906_v23  ;;  %v4182_v2 = vmul.f32 %v13564_v10, %v15511_v15  ;;  %v4658_v15 = vpop.permute.xlu1 %4657  ;;  %v11112_v10 = vld [vmem:[%s17891_s4 + $0x20] sm:$0xff] }
 0xf66   :  { %12494 = vmatpush3.msra.mxu1 %v15441_v61  ;;  %12471 = vmatprep.mubr.msk.f32.mxu1 %vm13883_vm1, %v17920_v19 }
 0xf67   :  { %12519 = vmatprep.subr.mxu1 %v17920_v19  ;;  %12596 = vmatprep.subr.mxu0 %v11114_v45 }
 0xf68   :  { %v13566_v28 = vpop.eup %13565  ;;  %12597 = vmatpush3.msra.mxu0 %v11114_v45 }
 0xf69   :  { %12472 = vmatmul.mubr.msk.f32.gmra.mxu1 %vm479_vm3, %v3907_v26  ;;  %v4183_v61 = vmul.f32 %v13566_v28, %v15515_v8  ;;  %v4660_v8 = vpop.permute.xlu0 %4659  ;;  %v11113_v26 = vld [vmem:[%s17891_s4 + $0x28] sm:$0xff] }
 0xf6a   :  { %12495 = vmatprep.mubr.msk.f32.mxu1 %vm13883_vm1, %v17920_v19  ;;  %12598 = vmatprep.subr.mxu0 %v11113_v26 }
 0xf6b   :  { %12599 = vmatpush3.msra.mxu0 %v11113_v26 }
 0xf6c   :  { %12600 = vmatprep.subr.mxu0 %v11112_v10 }
 0xf6d   :  { %12496 = vmatmul.mubr.msk.f32.vlgmr.msra.gmra.mxu1 %vm479_vm3, %v4182_v2  ;;  %12601 = vmatpush3.msra.mxu0 %v11112_v10 }
 0xf6e   :  { %12520 = vmatpush3.msra.mxu1 %v15445_v56  ;;  %12498 = vmatprep.mubr.msk.f32.mxu1 %vm13883_vm1, %v17920_v19 }
 0xf6f   :  { %12521 = vmatprep.subr.mxu1 %v17920_v19 }
 0xf70   :  { %12522 = vmatpush3.msra.mxu1 %v15447_v51 }
 0xf71   :  { %12523 = vmatprep.subr.mxu1 %v17920_v19  ;;  %12499 = vmatmul.mubr.msk.f32.gmra.mxu1 %vm479_vm3, %v4183_v61  ;;  %v15668_v56 = vpop.eup %13567 }
 0xf72   :  { %12524 = vmatpush3.msra.mxu1 %v15523_v16  ;;  %12501 = vmatprep.mubr.msk.f32.mxu1 %vm13883_vm1, %v17920_v19  ;;  %v4881_v40 = vsel %vm479_vm3, %v15668_v56, 0.0 }
 0xf73   :  { %12549 = vmatprep.subr.mxu1 %v17920_v19 }
 0xf7c   :  { %4882 = vadd.xlane.f32.xlu1 %v4881_v40 }
 0xf8b   :  { %v4178_v51 = vpop.xlane.xlu1 %4177 }
 0xf8c   :  { %13569 = vrcp.f32 %v4178_v51 }
 0xf8f   :  { %v4407_v41 = vpop.xlane.xlu1 %4406  ;;  %v4410_v55 = vpop.xlane.xlu0 %4409 }
 0xf90   :  { %13571 = vrcp.f32 %v4407_v41 }
 0xf91   :  { %13573 = vrcp.f32 %v4410_v55 }
 0xf93   :  { %v4413_v16 = vpop.xlane.xlu1 %4412  ;;  %v4645_v34 = vpop.xlane.xlu0 %4644 }
 0xf94   :  { %13575 = vrcp.f32 %v4413_v16 }
 0xf97   :  { %v4642_v31 = vpop.xlane.xlu1 %4641  ;;  %v4656_v6 = vpop.permute.xlu0 %4655 }
 0xf98   :  { %13577 = vrcp.f32 %v4642_v31 }
 0xf99   :  { %v13570_v5 = vpop.eup %13569  ;;  %13579 = vrcp.f32 %v4645_v34 }
 0xf9a   :  { %v4184_v46 = vmul.f32 %v13570_v5, %v15531_v48 }
 0xf9b   :  { %v4895_v58 = vpop.permute.xlu1 %4894  ;;  %v4893_v49 = vpop.permute.xlu0 %4892 }
 0xf9c   :  { %12502 = vmatmul.mubr.msk.f32.gmra.mxu1 %vm479_vm3, %v4184_v46 }
 0xf9d   :  { %v13572_v1 = vpop.eup %13571  ;;  %12525 = vmatprep.mubr.msk.f32.mxu1 %vm13883_vm1, %v17920_v19 }
 0xf9e   :  { %v4417_v36 = vmul.f32 %v13572_v1, %v15535_v24  ;;  %v13574_v0 = vpop.eup %13573 }
 0xf9f   :  { %v4418_v48 = vmul.f32 %v13574_v0, %v15537_v44 }
 0xfa0   :  { %12526 = vmatmul.mubr.msk.f32.vlgmr.msra.gmra.mxu1 %vm479_vm3, %v4417_v36 }
 0xfa1   :  { %12550 = vmatpush3.msra.mxu1 %v4660_v8  ;;  %12528 = vmatprep.mubr.msk.f32.mxu1 %vm13883_vm1, %v17920_v19  ;;  %v13576_v29 = vpop.eup %13575 }
 0xfa2   :  { %12551 = vmatprep.subr.mxu1 %v17920_v19  ;;  %v4419_v24 = vmul.f32 %v13576_v29, %v15539_v35 }
 0xfa3   :  { %12552 = vmatpush3.msra.mxu1 %v4658_v15 }
 0xfa4   :  { %12553 = vmatprep.subr.mxu1 %v17920_v19  ;;  %12529 = vmatmul.mubr.msk.f32.gmra.mxu1 %vm479_vm3, %v4418_v48 }
 0xfa5   :  { %12554 = vmatpush3.msra.mxu1 %v4656_v6  ;;  %12531 = vmatprep.mubr.msk.f32.mxu1 %vm13883_vm1, %v17920_v19  ;;  %v13578_v60 = vpop.eup %13577 }
 0xfa6   :  { %12579 = vmatprep.subr.mxu1 %v17920_v19  ;;  %v4652_v44 = vmul.f32 %v13578_v60, %v15551_v38  ;;  %v13580_v4 = vpop.eup %13579 }
 0xfa7   :  { %v4653_v35 = vmul.f32 %v13580_v4, %v15545_v59 }
 0xfa8   :  { %12532 = vmatmul.mubr.msk.f32.gmra.mxu1 %vm479_vm3, %v4419_v24 }
 0xfa9   :  { %12555 = vmatprep.mubr.msk.f32.mxu1 %vm13883_vm1, %v17920_v19 }
 0xfac   :  { %12556 = vmatmul.mubr.msk.f32.vlgmr.msra.gmra.mxu1 %vm479_vm3, %v4652_v44 }
 0xfad   :  { %12580 = vmatpush3.msra.mxu1 %v4895_v58  ;;  %12558 = vmatprep.mubr.msk.f32.mxu1 %vm13883_vm1, %v17920_v19 }
 0xfae   :  { %12581 = vmatprep.subr.mxu1 %v17920_v19 }
 0xfaf   :  { %12582 = vmatpush3.msra.mxu1 %v4893_v49 }
 0xfb0   :  { %12559 = vmatmul.mubr.msk.f32.gmra.mxu1 %vm479_vm3, %v4653_v35  ;;  %12583 = vmatprep.subr.mxu1 %v17920_v19 }
 0xfb1   :  { %12561 = vmatprep.mubr.msk.f32.mxu1 %vm13883_vm1, %v17920_v19 }
 0xfcc   :  { %v4648_v38 = vpop.xlane.xlu1 %4647  ;;  %v4880_v25 = vpop.xlane.xlu0 %4879 }
 0xfcd   :  { %13581 = vrcp.f32 %v4648_v38 }
 0xfd0   :  { %v4877_v14 = vpop.xlane.xlu1 %4876 }
 0xfd1   :  { %13583 = vrcp.f32 %v4877_v14 }
 0xfd2   :  { %13585 = vrcp.f32 %v4880_v25 }
 0xfd4   :  { %v4891_v17 = vpop.permute.xlu1 %4890 }
 0xfd5   :  { %12584 = vmatpush3.msra.mxu1 %v4891_v17 }
 0xfda   :  { %v13582_v13 = vpop.eup %13581 }
 0xfdb   :  { %v4654_v37 = vmul.f32 %v13582_v13, %v15579_v18 }
 0xfdd   :  { %12562 = vmatmul.mubr.msk.f32.gmra.mxu1 %vm479_vm3, %v4654_v37 }
 0xfde   :  { %v13584_v59 = vpop.eup %13583  ;;  %12585 = vmatprep.mubr.msk.f32.mxu1 %vm13883_vm1, %v17920_v19 }
 0xfdf   :  { %v4887_v62 = vmul.f32 %v13584_v59, %v15588_v7  ;;  %v13586_v42 = vpop.eup %13585 }
 0xfe0   :  { %v4888_v30 = vmul.f32 %v13586_v42, %v15576_v43 }
 0xfe1   :  { %12586 = vmatmul.mubr.msk.f32.vlgmr.msra.gmra.mxu1 %vm479_vm3, %v4887_v62 }
 0xfe2   :  { %12588 = vmatprep.mubr.msk.f32.mxu1 %vm13883_vm1, %v17920_v19 }
 0xfe5   :  { %12589 = vmatmul.mubr.msk.f32.gmra.mxu1 %vm479_vm3, %v4888_v30 }
 0xfe6   :  { %12591 = vmatprep.mubr.msk.f32.mxu1 %vm13883_vm1, %v17920_v19 }
 0xff7   :  { %v15713_v18 = vpop.f32.mrf.mxu1 }
 0xff9   :  { %v12377_v9 = vpop.f32.mrf.mxu1 }
 0xfff   :  { %v15715_v50 = vpop.f32.mrf.mxu1 }
0x1001   :  { %v12380_v27 = vpop.f32.mrf.mxu1 }
0x1004   :  { %v15717_v7 = vpop.f32.mrf.mxu1 }
0x1005   :  { %v4883_v32 = vpop.xlane.xlu1 %4882 }
0x1006   :  { %13587 = vrcp.f32 %v4883_v32  ;;  %v12383_v11 = vpop.f32.mrf.mxu1 }
0x1008   :  { %v3522_v21 = vpop.f32.mrf.mxu1 }
0x1009   :  { %4009 = vrot.lane.b32.xlu0 %v3522_v21, %s13894_s26 }
0x100a   :  { %v12407_v43 = vpop.f32.mrf.mxu1 }
0x100c   :  { %v3527_v33 = vpop.f32.mrf.mxu1 }
0x100d   :  { %4011 = vrot.lane.b32.xlu1 %v3527_v33, %s13894_s26 }
0x100e   :  { %v12410_v22 = vpop.f32.mrf.mxu1 }
0x1010   :  { %v3532_v52 = vpop.f32.mrf.mxu1 }
0x1011   :  { %4013 = vrot.lane.b32.xlu0 %v3532_v52, %s13894_s26 }
0x1012   :  { %v12413_v23 = vpop.f32.mrf.mxu1 }
0x1013   :  { %v13588_v20 = vpop.eup %13587 }
0x1014   :  { %v4889_v53 = vmul.f32 %v13588_v20, %v15668_v56  ;;  %v3757_v54 = vpop.f32.mrf.mxu1 }
0x1015   :  { %4021 = vrot.lane.b32.xlu0 %v3757_v54, %s13895_s9 }
0x1016   :  { %12592 = vmatmul.mubr.msk.f32.gmra.mxu1 %vm479_vm3, %v4889_v53  ;;  %v12437_v2 = vpop.f32.mrf.mxu1 }
0x1019   :  { %v3762_v28 = vpop.f32.mrf.mxu1 }
0x101a   :  { %4023 = vrot.lane.b32.xlu1 %v3762_v28, %s13895_s9 }
0x101b   :  { %v12440_v61 = vpop.f32.mrf.mxu1 }
0x101d   :  { %v3767_v56 = vpop.f32.mrf.mxu1 }
0x101e   :  { %4025 = vrot.lane.b32.xlu1 %v3767_v56, %s13895_s9 }
0x101f   :  { %v12443_v40 = vpop.f32.mrf.mxu1 }
0x1021   :  { %v3992_v15 = vpop.f32.mrf.mxu1 }
0x1022   :  { %4033 = vrot.lane.b32.xlu0 %v3992_v15, %s13896_s12 }
0x1023   :  { %v12467_v8 = vpop.f32.mrf.mxu1 }
0x1025   :  { %v3997_v51 = vpop.f32.mrf.mxu1 }
0x1026   :  { %4035 = vrot.lane.b32.xlu1 %v3997_v51, %s13896_s12 }
0x1027   :  { %v12470_v41 = vpop.f32.mrf.mxu1 }
0x1029   :  { %v4002_v55 = vpop.f32.mrf.mxu1 }
0x102a   :  { %4037 = vrot.lane.b32.xlu1 %v4002_v55, %s13896_s12 }
0x102b   :  { %v12473_v16 = vpop.f32.mrf.mxu1 }
0x102d   :  { %v4269_v31 = vpop.f32.mrf.mxu1 }
0x102f   :  { %v12497_v5 = vpop.f32.mrf.mxu1 }
0x1031   :  { %v4274_v46 = vpop.f32.mrf.mxu1 }
0x1033   :  { %v12500_v34 = vpop.f32.mrf.mxu1 }
0x105c   :  { %v15742_v1 = vpop.f32.mrf.mxu1 }
0x105e   :  { %v12503_v36 = vpop.f32.mrf.mxu1 }
0x1060   :  { %v4504_v0 = vpop.f32.mrf.mxu1 }
0x1061   :  { %4991 = vrot.lane.b32.xlu0 %v4504_v0, %s13894_s26 }
0x1062   :  { %v12527_v48 = vpop.f32.mrf.mxu1 }
0x1064   :  { %v4509_v29 = vpop.f32.mrf.mxu1 }
0x1066   :  { %v12530_v6 = vpop.f32.mrf.mxu1 }
0x1068   :  { %v4514_v24 = vpop.f32.mrf.mxu1 }
0x106a   :  { %v12533_v60 = vpop.f32.mrf.mxu1 }
0x106c   :  { %v4739_v44 = vpop.f32.mrf.mxu1 }
0x106d   :  { %5003 = vrot.lane.b32.xlu0 %v4739_v44, %s13895_s9 }
0x106e   :  { %v12557_v4 = vpop.f32.mrf.mxu1 }
0x1070   :  { %v4744_v58 = vpop.f32.mrf.mxu1 }
0x1071   :  { %4993 = vrot.lane.b32.xlu0 %v4509_v29, %s13894_s26 }
0x1072   :  { %v12560_v49 = vpop.f32.mrf.mxu1 }
0x1075   :  { %5005 = vrot.lane.b32.xlu0 %v4744_v58, %s13895_s9 }
0x107b   :  { %v4010_v35 = vpop.permute.xlu0 %4009 }
0x107c   :  { %v4042_v13 = vsel %vm386_vm2, %v15713_v18, %v4010_v35 }
0x107f   :  { %v4012_v38 = vpop.permute.xlu1 %4011 }
0x1080   :  { %v4043_v30 = vsel %vm386_vm2, %v15715_v50, %v4012_v38 }
0x1083   :  { %v4014_v25 = vpop.permute.xlu0 %4013 }
0x1084   :  { %v4044_v18 = vsel %vm386_vm2, %v15717_v7, %v4014_v25 }
0x1087   :  { %v4022_v17 = vpop.permute.xlu0 %4021 }
0x1088   :  { %v4045_v37 = vsel %vm1355_vm4, %v4042_v13, %v4022_v17 }
0x108c   :  { %v4024_v14 = vpop.permute.xlu1 %4023 }
0x108d   :  { %v4046_v9 = vsel %vm1355_vm4, %v4043_v30, %v4024_v14 }
0x1090   :  { %v4026_v59 = vpop.permute.xlu1 %4025 }
0x1091   :  { %v4047_v11 = vsel %vm1355_vm4, %v4044_v18, %v4026_v59 }
0x1094   :  { %v4034_v62 = vpop.permute.xlu0 %4033 }
0x1095   :  { %v4048_v42 = vsel %vm479_vm3, %v4045_v37, %v4034_v62 }
0x1096   :  { %12602 = vmatprep.mubr.msk.f32.mxu0 %vm42_vm0, %v4048_v42  ;;  %v17931_v42 = vld [vmem:[#allocation9_spill] sm:$0xff] }
0x1098   :  { %v4036_v27 = vpop.permute.xlu1 %4035 }
0x1099   :  { %v4049_v32 = vsel %vm479_vm3, %v4046_v9, %v4036_v27  ;;  %v17932_v27 = vld [vmem:[#allocation10_spill] sm:$0xff] }
0x109a   :  { %12603 = vmatmul.mubr.msk.f32.vlgmr.msra.gmra.mxu0 %vm42_vm0, %v4049_v32 }
0x109c   :  { %v4038_v21 = vpop.permute.xlu1 %4037 }
0x109d   :  { %v4050_v43 = vsel %vm479_vm3, %v4047_v11, %v4038_v21  ;;  %v4749_v33 = vpop.f32.mrf.mxu1 }
0x109e   :  { %12605 = vmatprep.mubr.msk.f32.mxu0 %vm42_vm0, %v4050_v43 }
0x109f   :  { %v12563_v22 = vpop.f32.mrf.mxu1 }
0x10a1   :  { %v4974_v50 = vpop.f32.mrf.mxu1 }
0x10a2   :  { %5015 = vrot.lane.b32.xlu1 %v4974_v50, %s13896_s12  ;;  %v11125_v50 = vld [vmem:[%s17892_s5 + $0x38] sm:$0xff] }
0x10a3   :  { %v12587_v52 = vpop.f32.mrf.mxu1  ;;  %12611 = vmatprep.subr.mxu1 %v11125_v50 }
0x10a4   :  { %v11124_v52 = vld [vmem:[%s17892_s5 + $0x30] sm:$0xff]  ;;  %12612 = vmatpush3.msra.mxu1 %v11125_v50  ;;  %v11140_v50 = vld [vmem:[%s17893_s6 + $0xc0] sm:$0xff] }
0x10a5   :  { %v4979_v47 = vpop.f32.mrf.mxu1  ;;  %12613 = vmatprep.subr.mxu1 %v11124_v52 }
0x10a6   :  { %4995 = vrot.lane.b32.xlu1 %v4514_v24, %s13894_s26  ;;  %5017 = vrot.lane.b32.xlu0 %v4979_v47, %s13896_s12  ;;  %v11123_v47 = vld [vmem:[%s17892_s5 + $0x28] sm:$0xff] }
0x10a7   :  { %v12590_v45 = vpop.f32.mrf.mxu1  ;;  %12614 = vmatpush3.msra.mxu1 %v11124_v52  ;;  %v11139_v52 = vld [vmem:[%s17893_s6 + $0xb8] sm:$0xff] }
0x10a8   :  { %v11122_v45 = vld [vmem:[%s17892_s5 + $0x20] sm:$0xff]  ;;  %12615 = vmatprep.subr.mxu1 %v11123_v47 }
0x10a9   :  { %12616 = vmatpush3.msra.mxu1 %v11123_v47  ;;  %v11138_v47 = vld [vmem:[%s17893_s6 + $0xb0] sm:$0xff] }
0x10aa   :  { %5007 = vrot.lane.b32.xlu1 %v4749_v33, %s13895_s9  ;;  %12617 = vmatprep.subr.mxu1 %v11122_v45 }
0x10ab   :  { %12618 = vmatpush3.msra.mxu1 %v11122_v45 }
0x10d3   :  { %v4992_v23 = vpop.permute.xlu0 %4991 }
0x10d4   :  { %v5024_v26 = vsel %vm386_vm2, %v4269_v31, %v4992_v23 }
0x10d6   :  { %v4984_v7 = vpop.f32.mrf.mxu1 }
0x10d7   :  { %5019 = vrot.lane.b32.xlu1 %v4984_v7, %s13896_s12 }
0x10d8   :  { %v12593_v20 = vpop.f32.mrf.mxu1 }
0x10df   :  { %v5004_v53 = vpop.permute.xlu0 %5003 }
0x10e0   :  { %v5027_v10 = vsel %vm1355_vm4, %v5024_v26, %v5004_v53 }
0x10e3   :  { %v4994_v54 = vpop.permute.xlu0 %4993 }
0x10e4   :  { %v5025_v56 = vsel %vm386_vm2, %v4274_v46, %v4994_v54  ;;  %v15784_v46 = vld [vmem:[%s17890_s7 + $0x8] sm:$0xff] }
0x10e5   :  { %v5041_v34 = vrot.slane %v15784_v46, %v14812_v12 }
0x10e7   :  { %v5006_v2 = vpop.permute.xlu0 %5005 }
0x10e8   :  { %v5028_v40 = vsel %vm1355_vm4, %v5025_v56, %v5006_v2 }
0x1114   :  { %v5016_v28 = vpop.permute.xlu1 %5015 }
0x1115   :  { %v5030_v61 = vsel %vm479_vm3, %v5027_v10, %v5016_v28 }
0x1116   :  { %12606 = vmatmul.mubr.msk.f32.gmra.mxu0 %vm42_vm0, %v5030_v61 }
0x1118   :  { %v5018_v15 = vpop.permute.xlu0 %5017  ;;  %v4996_v51 = vpop.permute.xlu1 %4995 }
0x1119   :  { %v5031_v8 = vsel %vm479_vm3, %v5028_v40, %v5018_v15  ;;  %v5026_v55 = vsel %vm386_vm2, %v15742_v1, %v4996_v51 }
0x111a   :  { %12608 = vmatprep.mubr.msk.f32.mxu0 %vm42_vm0, %v5031_v8 }
0x111c   :  { %v5008_v41 = vpop.permute.xlu1 %5007 }
0x111d   :  { %v5029_v16 = vsel %vm1355_vm4, %v5026_v55, %v5008_v41 }
0x1149   :  { %v5020_v31 = vpop.permute.xlu1 %5019 }
0x114a   :  { %v5032_v5 = vsel %vm479_vm3, %v5029_v16, %v5020_v31 }
0x114b   :  { %12609 = vmatmul.mubr.msk.f32.gmra.mxu0 %vm42_vm0, %v5032_v5 }
0x115a   :  { %v12604_v36 = vpop.f32.mrf.mxu0 }
0x115b   :  { %v5132_v0 = vadd.f32 %v12604_v36, %v5041_v34 }
0x115c   :  { %v5126_v48 = vpop.f32.mrf.mxu0 }
0x115d   :  { %v15789_v1 = vadd.f32 %v5132_v0, %v14999_v57  ;;  %v5127_v29 = vadd.f32 %v5126_v48, %v5041_v34 }
0x115f   :  { %v15792_v6 = vadd.f32 %v5127_v29, %v15002_v3  ;;  %v5164_v24 = vsel %vm42_vm0, %v15789_v1, 0.0 }
0x1160   :  { %5165 = vadd.xlane.f32.xlu1 %v5164_v24 }
0x1161   :  { %v5161_v60 = vsel %vm42_vm0, %v15792_v6, 0.0 }
0x1162   :  { %5162 = vadd.xlane.f32.xlu0 %v5161_v60 }
0x11d6   :  { %v12607_v44 = vpop.f32.mrf.mxu0 }
0x11d7   :  { %v5142_v58 = vadd.f32 %v12607_v44, %v5041_v34  ;;  %v17933_v44 = vld [vmem:[#allocation2_spill] sm:$0xff] }
0x11d8   :  { %v5136_v4 = vpop.f32.mrf.mxu0 }
0x11d9   :  { %v5137_v49 = vadd.f32 %v5136_v4, %v5041_v34  ;;  %v15802_v57 = vadd.f32 %v5142_v58, %v15009_v63  ;;  %v15864_v4 = vrot.slane %v15784_v46, %v17933_v44 }
0x11db   :  { %v15799_v35 = vadd.f32 %v5137_v49, %v15012_v39  ;;  %v5170_v38 = vsel %vm42_vm0, %v15802_v57, 0.0 }
0x11dd   :  { %v5167_v3 = vsel %vm42_vm0, %v15799_v35, 0.0 }
0x11de   :  { %5168 = vadd.xlane.f32.xlu0 %v5167_v3 }
0x11e2   :  { %5171 = vadd.xlane.f32.xlu0 %v5170_v38  ;;  %v17934_v38 = vld [vmem:[#allocation6_spill] sm:$0xff] }
0x11e9   :  { %v5166_v25 = vpop.xlane.xlu1 %5165 }
0x11ea   :  { %v5180_v17 = vmul.f32 0.03125, %v5166_v25  ;;  %v15869_v25 = vrot.slane %v15784_v46, %v17934_v38 }
0x11eb   :  { %v5163_v14 = vpop.xlane.xlu0 %5162 }
0x11ec   :  { %v5179_v13 = vmul.f32 0.03125, %v5163_v14  ;;  %v15809_v59 = vsub.f32 %v15789_v1, %v5180_v17 }
0x11ee   :  { %v5185_v63 = vsub.f32 %v15792_v6, %v5179_v13  ;;  %v5192_v11 = vmul.f32 %v15809_v59, %v15809_v59 }
0x11f0   :  { %v5191_v43 = vmul.f32 %v5185_v63, %v5185_v63  ;;  %v5200_v33 = vsel %vm42_vm0, %v5192_v11, 0.0 }
0x11f2   :  { %v5197_v22 = vsel %vm42_vm0, %v5191_v43, 0.0 }
0x120b   :  { %v12610_v37 = vpop.f32.mrf.mxu0 }
0x120c   :  { %v5152_v39 = vadd.f32 %v12610_v37, %v5041_v34 }
0x120d   :  { %v5146_v62 = vpop.f32.mrf.mxu0 }
0x120e   :  { %v15813_v30 = vadd.f32 %v5152_v39, %v17931_v42  ;;  %v5147_v9 = vadd.f32 %v5146_v62, %v5041_v34  ;;  %v11146_v39 = vld [vmem:[%s17893_s6 + $0xf0] sm:$0xff]  ;;  %v11145_v62 = vld [vmem:[%s17893_s6 + $0xe8] sm:$0xff] }
0x1210   :  { %v15816_v32 = vadd.f32 %v5147_v9, %v17932_v27  ;;  %v5176_v18 = vsel %vm42_vm0, %v15813_v30, 0.0 }
0x1211   :  { %5177 = vadd.xlane.f32.xlu1 %v5176_v18  ;;  %v11144_v18 = vld [vmem:[%s17893_s6 + $0xe0] sm:$0xff] }
0x1212   :  { %v5173_v21 = vsel %vm42_vm0, %v15816_v32, 0.0 }
0x1213   :  { %5174 = vadd.xlane.f32.xlu0 %v5173_v21  ;;  %v11143_v21 = vld [vmem:[%s17893_s6 + $0xd8] sm:$0xff] }
0x1215   :  { %5201 = vadd.xlane.f32.xlu1 %v5200_v33  ;;  %v11142_v33 = vld [vmem:[%s17893_s6 + $0xd0] sm:$0xff] }
0x1217   :  { %5198 = vadd.xlane.f32.xlu0 %v5197_v22  ;;  %v11141_v22 = vld [vmem:[%s17893_s6 + $0xc8] sm:$0xff] }
0x1267   :  { %v5169_v7 = vpop.xlane.xlu0 %5168 }
0x1268   :  { %v5181_v20 = vmul.f32 0.03125, %v5169_v7  ;;  %v11137_v7 = vld [vmem:[%s17893_s6 + $0xa8] sm:$0xff] }
0x126a   :  { %v15839_v23 = vsub.f32 %v15799_v35, %v5181_v20 }
0x126b   :  { %v5172_v53 = vpop.xlane.xlu0 %5171 }
0x126c   :  { %v5182_v54 = vmul.f32 0.03125, %v5172_v53  ;;  %v5193_v26 = vmul.f32 %v15839_v23, %v15839_v23  ;;  %v11136_v53 = vld [vmem:[%s17893_s6 + $0xa0] sm:$0xff] }
0x126e   :  { %v15844_v10 = vsub.f32 %v15802_v57, %v5182_v54  ;;  %v5203_v2 = vsel %vm42_vm0, %v5193_v26, 0.0 }
0x126f   :  { %5204 = vadd.xlane.f32.xlu0 %v5203_v2  ;;  %v11135_v2 = vld [vmem:[%s17893_s6 + $0x98] sm:$0xff] }
0x1270   :  { %v5194_v28 = vmul.f32 %v15844_v10, %v15844_v10 }
0x1272   :  { %v5206_v61 = vsel %vm42_vm0, %v5194_v28, 0.0 }
0x1273   :  { %5207 = vadd.xlane.f32.xlu1 %v5206_v61 }
0x129a   :  { %v5178_v56 = vpop.xlane.xlu1 %5177 }
0x129b   :  { %v5184_v40 = vmul.f32 0.03125, %v5178_v56  ;;  %v11133_v56 = vld [vmem:[%s17893_s6 + $0x88] sm:$0xff] }
0x129c   :  { %v5175_v15 = vpop.xlane.xlu0 %5174 }
0x129d   :  { %v15851_v8 = vsub.f32 %v15813_v30, %v5184_v40  ;;  %v5183_v51 = vmul.f32 0.03125, %v5175_v15 }
0x129e   :  { %v5202_v41 = vpop.xlane.xlu1 %5201 }
0x129f   :  { %v15854_v55 = vsub.f32 %v15816_v32, %v5183_v51  ;;  %v5216_v16 = vmul.f32 0.03125, %v5202_v41  ;;  %v5196_v31 = vmul.f32 %v15851_v8, %v15851_v8 }
0x12a0   :  { %v5199_v5 = vpop.xlane.xlu0 %5198 }
0x12a1   :  { %v5222_v34 = vadd.f32 1e-05, %v5216_v16  ;;  %v5215_v36 = vmul.f32 0.03125, %v5199_v5  ;;  %v5212_v0 = vsel %vm42_vm0, %v5196_v31, 0.0  ;;  %v5195_v48 = vmul.f32 %v15854_v55, %v15854_v55 }
0x12a2   :  { %5213 = vadd.xlane.f32.xlu1 %v5212_v0 }
0x12a3   :  { %13589 = vrsqrt.f32 %v5222_v34  ;;  %v5221_v29 = vadd.f32 1e-05, %v5215_v36  ;;  %v5209_v24 = vsel %vm42_vm0, %v5195_v48, 0.0 }
0x12a4   :  { %5210 = vadd.xlane.f32.xlu0 %v5209_v24 }
0x12a5   :  { %13591 = vrsqrt.f32 %v5221_v29 }
0x12b0   :  { %v13590_v60 = vpop.eup %13589 }
0x12b1   :  { %v5234_v58 = vmul.f32 %v13590_v60, %v15809_v59  ;;  %v11147_v59 = vld [vmem:[%s17893_s6 + $0xf8] sm:$0xff] }
0x12b2   :  { %v13592_v49 = vpop.eup %13591  ;;  %12628 = vmatprep.subr.mxu0 %v11147_v59 }
0x12b3   :  { %v5233_v3 = vmul.f32 %v13592_v49, %v5185_v63  ;;  %v5244_v14 = vmul.f32 %v15864_v4, %v5234_v58  ;;  %12629 = vmatpush3.msra.mxu0 %v11147_v59 }
0x12b4   :  { %12630 = vmatprep.subr.mxu0 %v11146_v39 }
0x12b5   :  { %v5243_v17 = vmul.f32 %v15864_v4, %v5233_v3  ;;  %v5254_v37 = vadd.f32 %v15869_v25, %v5244_v14  ;;  %12631 = vmatpush3.msra.mxu0 %v11146_v39  ;;  %v17935_v3 = vld [vmem:[#allocation7_spill] sm:$0xff] }
0x12b6   :  { %12632 = vmatprep.subr.mxu0 %v11145_v62  ;;  %v5267_v14 = vrot.slane %v15784_v46, %v17935_v3 }
0x12b7   :  { %v5253_v13 = vadd.f32 %v15869_v25, %v5243_v17  ;;  %12633 = vmatpush3.msra.mxu0 %v11145_v62 }
0x12b8   :  { %12634 = vmatprep.subr.mxu0 %v11144_v18 }
0x12b9   :  { %12619 = vmatprep.mubr.msk.f32.mxu1 %vm42_vm0, %v5253_v13  ;;  %12635 = vmatpush3.msra.mxu0 %v11144_v18 }
0x12ba   :  { %12620 = vmatmul.mubr.msk.f32.vlgmr.msra.gmra.mxu1 %vm42_vm0, %v5254_v37  ;;  %12636 = vmatprep.subr.mxu0 %v11143_v21 }
0x12bb   :  { %12637 = vmatpush3.msra.mxu0 %v11143_v21 }
0x12bc   :  { %12638 = vmatprep.subr.mxu0 %v11142_v33 }
0x12bd   :  { %12639 = vmatpush3.msra.mxu0 %v11142_v33 }
0x12be   :  { %12640 = vmatprep.subr.mxu0 %v11141_v22 }
0x12bf   :  { %12641 = vmatpush3.msra.mxu0 %v11141_v22 }
0x12c0   :  { %12642 = vmatprep.subr.mxu0 %v11140_v50 }
0x12c1   :  { %12643 = vmatpush3.msra.mxu0 %v11140_v50 }
0x12c2   :  { %12644 = vmatprep.subr.mxu0 %v11139_v52 }
0x12c3   :  { %12645 = vmatpush3.msra.mxu0 %v11139_v52 }
0x12c4   :  { %12646 = vmatprep.subr.mxu0 %v11138_v47 }
0x12c5   :  { %12647 = vmatpush3.msra.mxu0 %v11138_v47 }
0x12c6   :  { %12648 = vmatprep.subr.mxu0 %v11137_v7 }
0x12c7   :  { %12649 = vmatpush3.msra.mxu0 %v11137_v7 }
0x12c8   :  { %12650 = vmatprep.subr.mxu0 %v11136_v53 }
0x12c9   :  { %12651 = vmatpush3.msra.mxu0 %v11136_v53 }
0x12ca   :  { %12652 = vmatprep.subr.mxu0 %v11135_v2 }
0x12cb   :  { %12653 = vmatpush3.msra.mxu0 %v11135_v2 }
0x12f8   :  { %v5205_v63 = vpop.xlane.xlu0 %5204 }
0x12f9   :  { %v5217_v42 = vmul.f32 0.03125, %v5205_v63 }
0x12fb   :  { %v5223_v9 = vadd.f32 1e-05, %v5217_v42 }
0x12fc   :  { %v5208_v27 = vpop.xlane.xlu1 %5207 }
0x12fd   :  { %13593 = vrsqrt.f32 %v5223_v9  ;;  %v5218_v11 = vmul.f32 0.03125, %v5208_v27 }
0x12ff   :  { %v5224_v43 = vadd.f32 1e-05, %v5218_v11 }
0x1301   :  { %13595 = vrsqrt.f32 %v5224_v43 }
0x130a   :  { %v13594_v45 = vpop.eup %13593 }
0x130b   :  { %v5235_v20 = vmul.f32 %v13594_v45, %v15839_v23  ;;  %v11134_v23 = vld [vmem:[%s17893_s6 + $0x90] sm:$0xff] }
0x130c   :  { %12654 = vmatprep.subr.mxu0 %v11134_v23 }
0x130d   :  { %v5245_v54 = vmul.f32 %v15864_v4, %v5235_v20  ;;  %12655 = vmatpush3.msra.mxu0 %v11134_v23 }
0x130e   :  { %v13596_v26 = vpop.eup %13595  ;;  %12656 = vmatprep.subr.mxu0 %v11133_v56 }
0x130f   :  { %v5255_v28 = vadd.f32 %v15869_v25, %v5245_v54  ;;  %v5236_v61 = vmul.f32 %v13596_v26, %v15844_v10  ;;  %v11132_v10 = vld [vmem:[%s17893_s6 + $0x80] sm:$0xff]  ;;  %12657 = vmatpush3.msra.mxu0 %v11133_v56 }
0x1310   :  { %12658 = vmatprep.subr.mxu0 %v11132_v10 }
0x1311   :  { %12622 = vmatprep.mubr.msk.f32.mxu1 %vm42_vm0, %v5255_v28  ;;  %v5246_v40 = vmul.f32 %v15864_v4, %v5236_v61  ;;  %12659 = vmatpush3.msra.mxu0 %v11132_v10 }
0x1312   :  { %12716 = vmatprep.subr.mxu0 %v17920_v19 }
0x1313   :  { %v5256_v15 = vadd.f32 %v15869_v25, %v5246_v40 }
0x1315   :  { %12623 = vmatmul.mubr.msk.f32.gmra.mxu1 %vm42_vm0, %v5256_v15 }
0x132b   :  { %v5214_v51 = vpop.xlane.xlu1 %5213 }
0x132c   :  { %v5220_v41 = vmul.f32 0.03125, %v5214_v51 }
0x132d   :  { %v5211_v16 = vpop.xlane.xlu0 %5210 }
0x132e   :  { %v5226_v31 = vadd.f32 1e-05, %v5220_v41  ;;  %v5219_v5 = vmul.f32 0.03125, %v5211_v16 }
0x1330   :  { %13597 = vrsqrt.f32 %v5226_v31  ;;  %v5225_v34 = vadd.f32 1e-05, %v5219_v5 }
0x1332   :  { %13599 = vrsqrt.f32 %v5225_v34  ;;  %v17936_v34 = vld [vmem:[#allocation8_spill] sm:$0xff] }
0x133d   :  { %v13598_v36 = vpop.eup %13597 }
0x133e   :  { %v5238_v0 = vmul.f32 %v13598_v36, %v15851_v8  ;;  %v5532_v36 = vrot.slane %v15784_v46, %v17936_v34 }
0x133f   :  { %v13600_v48 = vpop.eup %13599 }
0x1340   :  { %v5237_v29 = vmul.f32 %v13600_v48, %v15854_v55  ;;  %v5248_v24 = vmul.f32 %v15864_v4, %v5238_v0 }
0x1342   :  { %v5247_v60 = vmul.f32 %v15864_v4, %v5237_v29  ;;  %v5258_v49 = vadd.f32 %v15869_v25, %v5248_v24 }
0x1344   :  { %v5257_v58 = vadd.f32 %v15869_v25, %v5247_v60 }
0x1346   :  { %12625 = vmatprep.mubr.msk.f32.mxu1 %vm42_vm0, %v5257_v58 }
0x1347   :  { %12626 = vmatmul.mubr.msk.f32.gmra.mxu1 %vm42_vm0, %v5258_v49 }
0x137a   :  { %v12621_v17 = vpop.f32.mrf.mxu1 }
0x137b   :  { %v5358_v8 = vadd.f32 %v12621_v17, %v5267_v14 }
0x137c   :  { %v5352_v13 = vpop.f32.mrf.mxu1 }
0x137d   :  { %v5388_v37 = vmul.f32 0.70710677, %v5358_v8  ;;  %v5353_v55 = vadd.f32 %v5352_v13, %v5267_v14  ;;  %v5382_v42 = vmul.f32 0.5, %v5358_v8 }
0x137f   :  { %13601 = verf.f32 %v5388_v37  ;;  %v5387_v59 = vmul.f32 0.70710677, %v5353_v55  ;;  %v5381_v63 = vmul.f32 0.5, %v5353_v55 }
0x1381   :  { %13603 = verf.f32 %v5387_v59 }
0x138c   :  { %v13602_v4 = vpop.eup %13601 }
0x138d   :  { %v5400_v62 = vadd.f32 1.0, %v13602_v4 }
0x138e   :  { %v13604_v39 = vpop.eup %13603 }
0x138f   :  { %v5399_v25 = vadd.f32 1.0, %v13604_v39  ;;  %v5406_v27 = vmul.f32 %v5400_v62, %v5382_v42 }
0x1391   :  { %v5405_v9 = vmul.f32 %v5399_v25, %v5381_v63 }
0x1393   :  { %12660 = vmatprep.mubr.f32.mxu0 %v5405_v9 }
0x1394   :  { %12661 = vmatmul.mubr.f32.vlgmr.msra.gmra.mxu0 %v5406_v27 }
0x13d5   :  { %v12624_v18 = vpop.f32.mrf.mxu1 }
0x13d6   :  { %v5368_v11 = vadd.f32 %v12624_v18, %v5267_v14 }
0x13d7   :  { %v5362_v21 = vpop.f32.mrf.mxu1 }
0x13d8   :  { %v5390_v43 = vmul.f32 0.70710677, %v5368_v11  ;;  %v5363_v33 = vadd.f32 %v5362_v21, %v5267_v14  ;;  %v5384_v20 = vmul.f32 0.5, %v5368_v11 }
0x13da   :  { %13605 = verf.f32 %v5390_v43  ;;  %v5389_v22 = vmul.f32 0.70710677, %v5363_v33  ;;  %v5383_v45 = vmul.f32 0.5, %v5363_v33 }
0x13dc   :  { %13607 = verf.f32 %v5389_v22  ;;  %v11152_v22 = vld [vmem:[%s17889_s3 + $0x58] sm:$0xff] }
0x13dd   :  { %12669 = vmatprep.subr.mxu1 %v11152_v22 }
0x13de   :  { %12670 = vmatpush3.msra.mxu1 %v11152_v22 }
0x13e7   :  { %v13606_v50 = vpop.eup %13605 }
0x13e8   :  { %v5402_v47 = vadd.f32 1.0, %v13606_v50  ;;  %v11151_v50 = vld [vmem:[%s17889_s3 + $0x50] sm:$0xff] }
0x13e9   :  { %v13608_v52 = vpop.eup %13607  ;;  %12671 = vmatprep.subr.mxu1 %v11151_v50 }
0x13ea   :  { %v5401_v7 = vadd.f32 1.0, %v13608_v52  ;;  %v5408_v54 = vmul.f32 %v5402_v47, %v5384_v20  ;;  %v11150_v52 = vld [vmem:[%s17889_s3 + $0x48] sm:$0xff]  ;;  %12672 = vmatpush3.msra.mxu1 %v11151_v50  ;;  %v11149_v47 = vld [vmem:[%s17889_s3 + $0x40] sm:$0xff] }
0x13eb   :  { %12673 = vmatprep.subr.mxu1 %v11150_v52 }
0x13ec   :  { %v5407_v53 = vmul.f32 %v5401_v7, %v5383_v45  ;;  %12674 = vmatpush3.msra.mxu1 %v11150_v52 }
0x13ed   :  { %12675 = vmatprep.subr.mxu1 %v11149_v47 }
0x13ee   :  { %12663 = vmatprep.mubr.f32.mxu0 %v5407_v53  ;;  %12676 = vmatpush3.msra.mxu1 %v11149_v47 }
0x13ef   :  { %12664 = vmatmul.mubr.f32.gmra.mxu0 %v5408_v54  ;;  %12686 = vmatprep.subr.mxu1 %v17920_v19 }
0x1407   :  { %v12627_v26 = vpop.f32.mrf.mxu1 }
0x1408   :  { %v5378_v2 = vadd.f32 %v12627_v26, %v5267_v14 }
0x1409   :  { %v5372_v28 = vpop.f32.mrf.mxu1 }
0x140a   :  { %v5392_v61 = vmul.f32 0.70710677, %v5378_v2  ;;  %v5373_v23 = vadd.f32 %v5372_v28, %v5267_v14  ;;  %v5386_v16 = vmul.f32 0.5, %v5378_v2 }
0x140c   :  { %13609 = verf.f32 %v5392_v61  ;;  %v5391_v56 = vmul.f32 0.70710677, %v5373_v23  ;;  %v5385_v51 = vmul.f32 0.5, %v5373_v23 }
0x140e   :  { %13611 = verf.f32 %v5391_v56 }
0x1419   :  { %v13610_v40 = vpop.eup %13609 }
0x141a   :  { %v5404_v15 = vadd.f32 1.0, %v13610_v40 }
0x141b   :  { %v13612_v10 = vpop.eup %13611 }
0x141c   :  { %v5403_v41 = vadd.f32 1.0, %v13612_v10  ;;  %v5410_v5 = vmul.f32 %v5404_v15, %v5386_v16 }
0x141e   :  { %v5409_v31 = vmul.f32 %v5403_v41, %v5385_v51 }
0x1420   :  { %12666 = vmatprep.mubr.f32.mxu0 %v5409_v31 }
0x1421   :  { %12667 = vmatmul.mubr.f32.gmra.mxu0 %v5410_v5 }
0x1422   :  { %12722 = vmatprep.mubr.msk.f32.mxu0 %vm13883_vm1, %v17920_v19 }
0x1454   :  { %v12662_v0 = vpop.f32.mrf.mxu0 }
0x1455   :  { %v5524_v48 = vadd.f32 %v12662_v0, %v15789_v1 }
0x1456   :  { %v5494_v29 = vpop.f32.mrf.mxu0 }
0x1457   :  { %v15949_v24 = vadd.f32 %v5532_v36, %v5524_v48  ;;  %v5523_v60 = vadd.f32 %v5494_v29, %v15792_v6 }
0x1459   :  { %v15952_v58 = vadd.f32 %v5532_v36, %v5523_v60  ;;  %v5544_v49 = vsel %vm42_vm0, %v15949_v24, 0.0 }
0x145a   :  { %5545 = vadd.xlane.f32.xlu1 %v5544_v49 }
0x145b   :  { %v5541_v14 = vsel %vm42_vm0, %v15952_v58, 0.0 }
0x145c   :  { %5542 = vadd.xlane.f32.xlu0 %v5541_v14 }
0x14af   :  { %v12665_v17 = vpop.f32.mrf.mxu0 }
0x14b0   :  { %v5526_v46 = vadd.f32 %v12665_v17, %v15802_v57  ;;  %v11148_v17 = vld [vmem:[%s17890_s7 + $0x10] sm:$0xff] }
0x14b1   :  { %v5504_v8 = vpop.f32.mrf.mxu0 }
0x14b2   :  { %v15959_v1 = vadd.f32 %v5532_v36, %v5526_v46  ;;  %v5525_v13 = vadd.f32 %v5504_v8, %v15799_v35  ;;  %v17939_v8 = vld [vmem:[#allocation3_spill] sm:$0xff] }
0x14b4   :  { %v15962_v37 = vadd.f32 %v5532_v36, %v5525_v13  ;;  %v5550_v6 = vsel %vm42_vm0, %v15959_v1, 0.0  ;;  %v5622_v13 = vrot.slane %v11148_v17, %v17939_v8 }
0x14b5   :  { %5551 = vadd.xlane.f32.xlu1 %v5550_v6 }
0x14b6   :  { %v5547_v55 = vsel %vm42_vm0, %v15962_v37, 0.0 }
0x14b7   :  { %5548 = vadd.xlane.f32.xlu0 %v5547_v55 }
0x14e1   :  { %v12668_v59 = vpop.f32.mrf.mxu0 }
0x14e2   :  { %v5528_v4 = vadd.f32 %v12668_v59, %v15813_v30 }
0x14e3   :  { %v5546_v39 = vpop.xlane.xlu1 %5545  ;;  %v5514_v57 = vpop.f32.mrf.mxu0 }
0x14e4   :  { %v15969_v62 = vadd.f32 %v5532_v36, %v5528_v4  ;;  %v5560_v63 = vmul.f32 0.03125, %v5546_v39  ;;  %v5527_v35 = vadd.f32 %v5514_v57, %v15816_v32  ;;  %v17940_v4 = vld [vmem:[#allocation4_spill] sm:$0xff] }
0x14e5   :  { %v5543_v25 = vpop.xlane.xlu0 %5542  ;;  %v5632_v39 = vrot.slane %v11148_v17, %v17940_v4 }
0x14e6   :  { %17937 = vst [vmem:[#allocation9_spill] sm:$0xff] %v15969_v62  ;;  %v5566_v42 = vsub.f32 %v15949_v24, %v5560_v63  ;;  %v15973_v9 = vadd.f32 %v5532_v36, %v5527_v35  ;;  %v5559_v27 = vmul.f32 0.03125, %v5543_v25  ;;  %v5556_v18 = vsel %vm42_vm0, %v15969_v62, 0.0 }
0x14e7   :  { %5557 = vadd.xlane.f32.xlu1 %v5556_v18 }
0x14e8   :  { %17938 = vst [vmem:[#allocation10_spill] sm:$0xff] %v15973_v9  ;;  %v5565_v11 = vsub.f32 %v15952_v58, %v5559_v27  ;;  %v5553_v30 = vsel %vm42_vm0, %v15973_v9, 0.0  ;;  %v5572_v21 = vmul.f32 %v5566_v42, %v5566_v42 }
0x14e9   :  { %5554 = vadd.xlane.f32.xlu0 %v5553_v30 }
0x14ea   :  { %v5580_v43 = vsel %vm42_vm0, %v5572_v21, 0.0  ;;  %v5571_v32 = vmul.f32 %v5565_v11, %v5565_v11 }
0x14eb   :  { %5581 = vadd.xlane.f32.xlu1 %v5580_v43 }
0x14ec   :  { %v5577_v33 = vsel %vm42_vm0, %v5571_v32, 0.0 }
0x14ed   :  { %5578 = vadd.xlane.f32.xlu0 %v5577_v33 }
0x153e   :  { %v5552_v45 = vpop.xlane.xlu1 %5551 }
0x153f   :  { %v5562_v7 = vmul.f32 0.03125, %v5552_v45 }
0x1540   :  { %v5549_v20 = vpop.xlane.xlu0 %5548 }
0x1541   :  { %v5568_v53 = vsub.f32 %v15959_v1, %v5562_v7  ;;  %v5561_v54 = vmul.f32 0.03125, %v5549_v20 }
0x1543   :  { %v5567_v26 = vsub.f32 %v15962_v37, %v5561_v54  ;;  %v5574_v2 = vmul.f32 %v5568_v53, %v5568_v53 }
0x1545   :  { %v5586_v28 = vsel %vm42_vm0, %v5574_v2, 0.0  ;;  %v5573_v61 = vmul.f32 %v5567_v26, %v5567_v26 }
0x1546   :  { %5587 = vadd.xlane.f32.xlu1 %v5586_v28 }
0x1547   :  { %v5583_v23 = vsel %vm42_vm0, %v5573_v61, 0.0 }
0x1548   :  { %5584 = vadd.xlane.f32.xlu0 %v5583_v23 }
0x1570   :  { %v5558_v56 = vpop.xlane.xlu1 %5557 }
0x1571   :  { %v5564_v40 = vmul.f32 0.03125, %v5558_v56 }
0x1572   :  { %v5555_v10 = vpop.xlane.xlu0 %5554 }
0x1573   :  { %v5570_v15 = vsub.f32 %v15969_v62, %v5564_v40  ;;  %v5563_v51 = vmul.f32 0.03125, %v5555_v10 }
0x1574   :  { %v5582_v41 = vpop.xlane.xlu1 %5581 }
0x1575   :  { %v5569_v16 = vsub.f32 %v15973_v9, %v5563_v51  ;;  %v5596_v31 = vmul.f32 0.03125, %v5582_v41  ;;  %v5576_v5 = vmul.f32 %v5570_v15, %v5570_v15 }
0x1576   :  { %v5579_v36 = vpop.xlane.xlu0 %5578 }
0x1577   :  { %v5602_v0 = vadd.f32 1e-05, %v5596_v31  ;;  %v5595_v48 = vmul.f32 0.03125, %v5579_v36  ;;  %v5592_v29 = vsel %vm42_vm0, %v5576_v5, 0.0  ;;  %v5575_v60 = vmul.f32 %v5569_v16, %v5569_v16  ;;  %v17941_v31 = vld [vmem:[#allocation5_spill] sm:$0xff] }
0x1578   :  { %5593 = vadd.xlane.f32.xlu1 %v5592_v29  ;;  %v5647_v5 = vrot.slane %v11148_v17, %v17941_v31 }
0x1579   :  { %13613 = vrsqrt.f32 %v5602_v0  ;;  %v5601_v49 = vadd.f32 1e-05, %v5595_v48  ;;  %v5589_v14 = vsel %vm42_vm0, %v5575_v60, 0.0 }
0x157a   :  { %5590 = vadd.xlane.f32.xlu0 %v5589_v14 }
0x157b   :  { %13615 = vrsqrt.f32 %v5601_v49 }
0x1586   :  { %v13614_v46 = vpop.eup %13613 }
0x1587   :  { %v5614_v6 = vmul.f32 %v13614_v46, %v5566_v42 }
0x1588   :  { %v13616_v55 = vpop.eup %13615 }
0x1589   :  { %v5613_v59 = vmul.f32 %v13616_v55, %v5565_v11  ;;  %v5624_v57 = vmul.f32 %v5622_v13, %v5614_v6 }
0x158b   :  { %v5623_v63 = vmul.f32 %v5622_v13, %v5613_v59  ;;  %v5634_v25 = vadd.f32 %v5632_v39, %v5624_v57 }
0x158d   :  { %v5633_v35 = vadd.f32 %v5632_v39, %v5623_v63 }
0x158f   :  { %12677 = vmatprep.mubr.msk.f32.mxu1 %vm42_vm0, %v5633_v35 }
0x1590   :  { %12678 = vmatmul.mubr.msk.f32.vlgmr.msra.gmra.mxu1 %vm42_vm0, %v5634_v25 }
0x15cf   :  { %v5588_v27 = vpop.xlane.xlu1 %5587 }
0x15d0   :  { %v5598_v18 = vmul.f32 0.03125, %v5588_v27 }
0x15d1   :  { %v5585_v30 = vpop.xlane.xlu0 %5584 }
0x15d2   :  { %v5604_v21 = vadd.f32 1e-05, %v5598_v18  ;;  %v5597_v43 = vmul.f32 0.03125, %v5585_v30 }
0x15d4   :  { %13617 = vrsqrt.f32 %v5604_v21  ;;  %v5603_v32 = vadd.f32 1e-05, %v5597_v43 }
0x15d6   :  { %13619 = vrsqrt.f32 %v5603_v32 }
0x15e1   :  { %v13618_v42 = vpop.eup %13617 }
0x15e2   :  { %v5616_v11 = vmul.f32 %v13618_v42, %v5568_v53 }
0x15e3   :  { %v13620_v33 = vpop.eup %13619 }
0x15e4   :  { %v5615_v22 = vmul.f32 %v13620_v33, %v5567_v26  ;;  %v5626_v50 = vmul.f32 %v5622_v13, %v5616_v11 }
0x15e6   :  { %v5625_v52 = vmul.f32 %v5622_v13, %v5615_v22  ;;  %v5636_v45 = vadd.f32 %v5632_v39, %v5626_v50 }
0x15e8   :  { %v5635_v47 = vadd.f32 %v5632_v39, %v5625_v52 }
0x15ea   :  { %12680 = vmatprep.mubr.msk.f32.mxu1 %vm42_vm0, %v5635_v47 }
0x15eb   :  { %12681 = vmatmul.mubr.msk.f32.gmra.mxu1 %vm42_vm0, %v5636_v45 }
0x1601   :  { %v5594_v7 = vpop.xlane.xlu1 %5593 }
0x1602   :  { %v5600_v20 = vmul.f32 0.03125, %v5594_v7 }
0x1603   :  { %v5591_v54 = vpop.xlane.xlu0 %5590 }
0x1604   :  { %v5606_v2 = vadd.f32 1e-05, %v5600_v20  ;;  %v5599_v28 = vmul.f32 0.03125, %v5591_v54 }
0x1606   :  { %13621 = vrsqrt.f32 %v5606_v2  ;;  %v5605_v61 = vadd.f32 1e-05, %v5599_v28 }
0x1608   :  { %13623 = vrsqrt.f32 %v5605_v61 }
0x1613   :  { %v13622_v23 = vpop.eup %13621 }
0x1614   :  { %v5618_v53 = vmul.f32 %v13622_v23, %v5570_v15 }
0x1615   :  { %v13624_v56 = vpop.eup %13623 }
0x1616   :  { %v5617_v26 = vmul.f32 %v13624_v56, %v5569_v16  ;;  %v5628_v40 = vmul.f32 %v5622_v13, %v5618_v53 }
0x1618   :  { %v5627_v10 = vmul.f32 %v5622_v13, %v5617_v26  ;;  %v5638_v41 = vadd.f32 %v5632_v39, %v5628_v40 }
0x161a   :  { %v5637_v51 = vadd.f32 %v5632_v39, %v5627_v10 }
0x161c   :  { %12683 = vmatprep.mubr.msk.f32.mxu1 %vm42_vm0, %v5637_v51 }
0x161d   :  { %12684 = vmatmul.mubr.msk.f32.gmra.mxu1 %vm42_vm0, %v5638_v41 }
0x161e   :  { %12692 = vmatprep.mubr.msk.f32.mxu1 %vm13883_vm1, %v17920_v19 }
0x1650   :  { %v12679_v36 = vpop.f32.mrf.mxu1 }
0x1651   :  { %v16017_v0 = vadd.f32 %v12679_v36, %v5647_v5 }
0x1652   :  { %v5732_v48 = vpop.f32.mrf.mxu1 }
0x1653   :  { %5766 = vrot.lane.b32.xlu1 %v16017_v0, %s13882_s16  ;;  %v16021_v15 = vadd.f32 %v5732_v48, %v5647_v5 }
0x1657   :  { %5764 = vrot.lane.b32.xlu1 %v16021_v15, %s13882_s16 }
0x16ab   :  { %v12682_v16 = vpop.f32.mrf.mxu1 }
0x16ac   :  { %v16071_v46 = vadd.f32 %v12682_v16, %v5647_v5 }
0x16ad   :  { %v5742_v29 = vpop.f32.mrf.mxu1 }
0x16ae   :  { %v16025_v60 = vadd.f32 %v5742_v29, %v5647_v5 }
0x16b0   :  { %6003 = vrot.lane.b32.xlu1 %v16025_v60, %s13884_s17  ;;  %5768 = vrot.lane.b32.xlu0 %v16025_v60, %s13882_s16 }
0x16b4   :  { %5999 = vrot.lane.b32.xlu1 %v16021_v15, %s13884_s17  ;;  %6001 = vrot.lane.b32.xlu0 %v16017_v0, %s13884_s17 }
0x16b8   :  { %6238 = vrot.lane.b32.xlu1 %v16025_v60, %s13886_s19  ;;  %5993 = vrot.lane.b32.xlu0 %v16021_v15, %s13885_s18 }
0x16bc   :  { %6236 = vrot.lane.b32.xlu1 %v16017_v0, %s13886_s19  ;;  %5995 = vrot.lane.b32.xlu0 %v16017_v0, %s13885_s18 }
0x16c0   :  { %6234 = vrot.lane.b32.xlu1 %v16021_v15, %s13886_s19  ;;  %5997 = vrot.lane.b32.xlu0 %v16025_v60, %s13885_s18 }
0x16c4   :  { %6473 = vrot.lane.b32.xlu1 %v16025_v60, %s13888_s1  ;;  %6228 = vrot.lane.b32.xlu0 %v16021_v15, %s13887_s20 }
0x16c5   :  { %v5767_v6 = vpop.permute.xlu1 %5766 }
0x16c8   :  { %6471 = vrot.lane.b32.xlu1 %v16017_v0, %s13888_s1  ;;  %6230 = vrot.lane.b32.xlu0 %v16017_v0, %s13887_s20 }
0x16c9   :  { %v5765_v55 = vpop.permute.xlu1 %5764 }
0x16cc   :  { %6469 = vrot.lane.b32.xlu1 %v16021_v15, %s13888_s1  ;;  %6232 = vrot.lane.b32.xlu0 %v16025_v60, %s13887_s20 }
0x16d0   :  { %6463 = vrot.lane.b32.xlu0 %v16021_v15, %s13889_s21 }
0x16d4   :  { %6465 = vrot.lane.b32.xlu0 %v16017_v0, %s13889_s21 }
0x16d8   :  { %6467 = vrot.lane.b32.xlu0 %v16025_v60, %s13889_s21 }
0x16dd   :  { %v12685_v49 = vpop.f32.mrf.mxu1 }
0x16de   :  { %v16065_v14 = vadd.f32 %v12685_v49, %v5647_v5 }
0x16df   :  { %v5752_v17 = vpop.f32.mrf.mxu1 }
0x16e0   :  { %6985 = vrot.lane.b32.xlu0 %v16065_v14, %s13884_s17  ;;  %6750 = vrot.lane.b32.xlu1 %v16065_v14, %s13882_s16  ;;  %v16073_v13 = vadd.f32 %v5752_v17, %v5647_v5 }
0x16e4   :  { %6981 = vrot.lane.b32.xlu0 %v16071_v46, %s13884_s17  ;;  %6748 = vrot.lane.b32.xlu1 %v16073_v13, %s13882_s16 }
0x16e8   :  { %7220 = vrot.lane.b32.xlu0 %v16065_v14, %s13886_s19  ;;  %6746 = vrot.lane.b32.xlu1 %v16071_v46, %s13882_s16 }
0x16ec   :  { %7218 = vrot.lane.b32.xlu0 %v16073_v13, %s13886_s19  ;;  %6983 = vrot.lane.b32.xlu1 %v16073_v13, %s13884_s17 }
0x16f0   :  { %7216 = vrot.lane.b32.xlu0 %v16071_v46, %s13886_s19  ;;  %6975 = vrot.lane.b32.xlu1 %v16071_v46, %s13885_s18 }
0x16f4   :  { %7455 = vrot.lane.b32.xlu0 %v16065_v14, %s13888_s1  ;;  %6977 = vrot.lane.b32.xlu1 %v16073_v13, %s13885_s18 }
0x16f8   :  { %7453 = vrot.lane.b32.xlu0 %v16073_v13, %s13888_s1  ;;  %6979 = vrot.lane.b32.xlu1 %v16065_v14, %s13885_s18 }
0x16fc   :  { %7451 = vrot.lane.b32.xlu0 %v16071_v46, %s13888_s1  ;;  %7210 = vrot.lane.b32.xlu1 %v16071_v46, %s13887_s20 }
0x1700   :  { %7447 = vrot.lane.b32.xlu0 %v16073_v13, %s13889_s21  ;;  %7212 = vrot.lane.b32.xlu1 %v16073_v13, %s13887_s20 }
0x1704   :  { %5899 = vrot.lane.b32.xlu0 %v16025_v60, %s13890_s22  ;;  %7214 = vrot.lane.b32.xlu1 %v16065_v14, %s13887_s20 }
0x1708   :  { %6134 = vrot.lane.b32.xlu0 %v16025_v60, %s13891_s23  ;;  %7445 = vrot.lane.b32.xlu1 %v16071_v46, %s13889_s21 }
0x170c   :  { %6130 = vrot.lane.b32.xlu0 %v16021_v15, %s13891_s23  ;;  %7449 = vrot.lane.b32.xlu1 %v16065_v14, %s13889_s21 }
0x1710   :  { %6369 = vrot.lane.b32.xlu0 %v16025_v60, %s13892_s24  ;;  %5897 = vrot.lane.b32.xlu1 %v16017_v0, %s13890_s22 }
0x1714   :  { %6604 = vrot.lane.b32.xlu0 %v16025_v60, %s13893_s25  ;;  %5895 = vrot.lane.b32.xlu1 %v16021_v15, %s13890_s22 }
0x1718   :  { %6600 = vrot.lane.b32.xlu0 %v16021_v15, %s13893_s25  ;;  %6132 = vrot.lane.b32.xlu1 %v16017_v0, %s13891_s23 }
0x171c   :  { %6881 = vrot.lane.b32.xlu0 %v16065_v14, %s13890_s22  ;;  %6367 = vrot.lane.b32.xlu1 %v16017_v0, %s13892_s24 }
0x1720   :  { %6877 = vrot.lane.b32.xlu0 %v16071_v46, %s13890_s22  ;;  %6365 = vrot.lane.b32.xlu1 %v16021_v15, %s13892_s24 }
0x1722   :  { %v6004_v59 = vpop.permute.xlu1 %6003  ;;  %v5769_v39 = vpop.permute.xlu0 %5768 }
0x1723   :  { %12687 = vmatpush3.xpose.msk.msra.mxu1 %vm386_vm2, %v5769_v39  ;;  %12717 = vmatpush3.xpose.msk.msra.mxu0 %vm386_vm2, %v6004_v59 }
0x1724   :  { %7116 = vrot.lane.b32.xlu0 %v16065_v14, %s13891_s23  ;;  %6602 = vrot.lane.b32.xlu1 %v16017_v0, %s13893_s25 }
0x1725   :  { %12718 = vmatprep.subr.mxu0 %v17920_v19  ;;  %12688 = vmatprep.subr.mxu1 %v17920_v19 }
0x1726   :  { %v6000_v57 = vpop.permute.xlu1 %5999  ;;  %v6002_v63 = vpop.permute.xlu0 %6001 }
0x1727   :  { %12689 = vmatpush3.xpose.msk.msra.mxu1 %vm386_vm2, %v5767_v6  ;;  %12719 = vmatpush3.xpose.msk.msra.mxu0 %vm386_vm2, %v6002_v63 }
0x1728   :  { %6879 = vrot.lane.b32.xlu1 %v16073_v13, %s13890_s22  ;;  %12690 = vmatprep.subr.mxu1 %v17920_v19 }
0x1729   :  { %12720 = vmatprep.subr.mxu0 %v17920_v19 }
0x172a   :  { %v6239_v35 = vpop.permute.xlu1 %6238  ;;  %v5994_v25 = vpop.permute.xlu0 %5993 }
0x172b   :  { %12691 = vmatpush3.xpose.msk.msra.mxu1 %vm386_vm2, %v5765_v55  ;;  %12721 = vmatpush3.xpose.msk.msra.mxu0 %vm386_vm2, %v6000_v57 }
0x172c   :  { %7114 = vrot.lane.b32.xlu1 %v16073_v13, %s13891_s23  ;;  %12746 = vmatprep.subr.mxu0 %v17920_v19 }
0x172d   :  { %12701 = vmatprep.subr.mxu1 %v17920_v19 }
0x172e   :  { %v6237_v27 = vpop.permute.xlu1 %6236  ;;  %12693 = vmatmul.mubr.msk.f32.vlgmr.msra.gmra.mxu1 %vm386_vm2, %v16021_v15  ;;  %12723 = vmatmul.mubr.msk.f32.vlgmr.msra.gmra.mxu0 %vm386_vm2, %v5994_v25  ;;  %v5996_v18 = vpop.permute.xlu0 %5995 }
0x172f   :  { %12747 = vmatpush3.xpose.msk.msra.mxu0 %vm386_vm2, %v6239_v35  ;;  %12695 = vmatprep.mubr.msk.f32.mxu1 %vm13883_vm1, %v17920_v19 }
0x1730   :  { %12725 = vmatprep.mubr.msk.f32.mxu0 %vm13883_vm1, %v17920_v19  ;;  %12748 = vmatprep.subr.mxu0 %v17920_v19 }
0x1732   :  { %v6235_v30 = vpop.permute.xlu1 %6234  ;;  %12696 = vmatmul.mubr.msk.f32.gmra.mxu1 %vm386_vm2, %v16017_v0  ;;  %12726 = vmatmul.mubr.msk.f32.gmra.mxu0 %vm386_vm2, %v5996_v18  ;;  %v5998_v21 = vpop.permute.xlu0 %5997 }
0x1733   :  { %12749 = vmatpush3.xpose.msk.msra.mxu0 %vm386_vm2, %v6237_v27  ;;  %12698 = vmatprep.mubr.msk.f32.mxu1 %vm13883_vm1, %v17920_v19 }
0x1734   :  { %12728 = vmatprep.mubr.msk.f32.mxu0 %vm13883_vm1, %v17920_v19  ;;  %12750 = vmatprep.subr.mxu0 %v17920_v19 }
0x1736   :  { %v6474_v43 = vpop.permute.xlu1 %6473  ;;  %12699 = vmatmul.mubr.msk.f32.gmra.mxu1 %vm386_vm2, %v16025_v60  ;;  %12729 = vmatmul.mubr.msk.f32.gmra.mxu0 %vm386_vm2, %v5998_v21  ;;  %v6229_v32 = vpop.permute.xlu0 %6228 }
0x1737   :  { %12751 = vmatpush3.xpose.msk.msra.mxu0 %vm386_vm2, %v6235_v30  ;;  %12752 = vmatprep.mubr.msk.f32.mxu0 %vm13883_vm1, %v17920_v19 }
0x1738   :  { %12776 = vmatprep.subr.mxu0 %v17920_v19  ;;  %12707 = vmatprep.mubr.msk.f32.mxu1 %vm13883_vm1, %v17920_v19 }
0x173a   :  { %12753 = vmatmul.mubr.msk.f32.vlgmr.msra.gmra.mxu0 %vm386_vm2, %v6229_v32  ;;  %v6231_v42 = vpop.permute.xlu0 %6230  ;;  %v6472_v11 = vpop.permute.xlu1 %6471 }
0x173b   :  { %12777 = vmatpush3.xpose.msk.msra.mxu0 %vm386_vm2, %v6474_v43  ;;  %12755 = vmatprep.mubr.msk.f32.mxu0 %vm13883_vm1, %v17920_v19 }
0x173c   :  { %12778 = vmatprep.subr.mxu0 %v17920_v19 }
0x173e   :  { %12756 = vmatmul.mubr.msk.f32.gmra.mxu0 %vm386_vm2, %v6231_v42  ;;  %v6233_v33 = vpop.permute.xlu0 %6232  ;;  %v6470_v22 = vpop.permute.xlu1 %6469 }
0x173f   :  { %12779 = vmatpush3.xpose.msk.msra.mxu0 %vm386_vm2, %v6472_v11  ;;  %12758 = vmatprep.mubr.msk.f32.mxu0 %vm13883_vm1, %v17920_v19 }
0x1740   :  { %12780 = vmatprep.subr.mxu0 %v17920_v19 }
0x1742   :  { %12759 = vmatmul.mubr.msk.f32.gmra.mxu0 %vm386_vm2, %v6233_v33  ;;  %v6464_v50 = vpop.permute.xlu0 %6463 }
0x1743   :  { %12781 = vmatpush3.xpose.msk.msra.mxu0 %vm386_vm2, %v6470_v22  ;;  %12782 = vmatprep.mubr.msk.f32.mxu0 %vm13883_vm1, %v17920_v19 }
0x1744   :  { %12806 = vmatprep.subr.mxu0 %v17920_v19 }
0x1746   :  { %12783 = vmatmul.mubr.msk.f32.vlgmr.msra.gmra.mxu0 %vm386_vm2, %v6464_v50  ;;  %v6466_v52 = vpop.permute.xlu0 %6465 }
0x1747   :  { %12785 = vmatprep.mubr.msk.f32.mxu0 %vm13883_vm1, %v17920_v19 }
0x174a   :  { %12786 = vmatmul.mubr.msk.f32.gmra.mxu0 %vm386_vm2, %v6466_v52  ;;  %v6468_v47 = vpop.permute.xlu0 %6467 }
0x174b   :  { %12788 = vmatprep.mubr.msk.f32.mxu0 %vm13883_vm1, %v17920_v19 }
0x174e   :  { %12789 = vmatmul.mubr.msk.f32.gmra.mxu0 %vm386_vm2, %v6468_v47 }
0x174f   :  { %12812 = vmatprep.mubr.msk.f32.mxu0 %vm13883_vm1, %v17920_v19 }
0x1752   :  { %v6751_v45 = vpop.permute.xlu1 %6750  ;;  %v6986_v7 = vpop.permute.xlu0 %6985 }
0x1753   :  { %12807 = vmatpush3.xpose.msk.msra.mxu0 %vm386_vm2, %v6751_v45 }
0x1754   :  { %12808 = vmatprep.subr.mxu0 %v17920_v19 }
0x1756   :  { %v6749_v20 = vpop.permute.xlu1 %6748  ;;  %v6982_v54 = vpop.permute.xlu0 %6981 }
0x1757   :  { %12809 = vmatpush3.xpose.msk.msra.mxu0 %vm386_vm2, %v6749_v20 }
0x1758   :  { %12810 = vmatprep.subr.mxu0 %v17920_v19 }
0x175a   :  { %v6747_v2 = vpop.permute.xlu1 %6746  ;;  %v7221_v28 = vpop.permute.xlu0 %7220 }
0x175b   :  { %12811 = vmatpush3.xpose.msk.msra.mxu0 %vm386_vm2, %v6747_v2 }
0x175c   :  { %12836 = vmatprep.subr.mxu0 %v17920_v19 }
0x175e   :  { %v6984_v61 = vpop.permute.xlu1 %6983  ;;  %12813 = vmatmul.mubr.msk.f32.vlgmr.msra.gmra.mxu0 %vm386_vm2, %v16071_v46  ;;  %v7219_v23 = vpop.permute.xlu0 %7218 }
0x175f   :  { %12837 = vmatpush3.xpose.msk.msra.mxu0 %vm386_vm2, %v6986_v7  ;;  %12815 = vmatprep.mubr.msk.f32.mxu0 %vm13883_vm1, %v17920_v19 }
0x1760   :  { %12838 = vmatprep.subr.mxu0 %v17920_v19 }
0x1762   :  { %v6976_v53 = vpop.permute.xlu1 %6975  ;;  %12816 = vmatmul.mubr.msk.f32.gmra.mxu0 %vm386_vm2, %v16073_v13  ;;  %v7217_v56 = vpop.permute.xlu0 %7216 }
0x1763   :  { %12839 = vmatpush3.xpose.msk.msra.mxu0 %vm386_vm2, %v6984_v61  ;;  %12818 = vmatprep.mubr.msk.f32.mxu0 %vm13883_vm1, %v17920_v19 }
0x1764   :  { %12840 = vmatprep.subr.mxu0 %v17920_v19 }
0x1766   :  { %v6978_v26 = vpop.permute.xlu1 %6977  ;;  %12819 = vmatmul.mubr.msk.f32.gmra.mxu0 %vm386_vm2, %v16065_v14  ;;  %v7456_v40 = vpop.permute.xlu0 %7455 }
0x1767   :  { %12841 = vmatpush3.xpose.msk.msra.mxu0 %vm386_vm2, %v6982_v54  ;;  %12842 = vmatprep.mubr.msk.f32.mxu0 %vm13883_vm1, %v17920_v19 }
0x1768   :  { %12866 = vmatprep.subr.mxu0 %v17920_v19 }
0x176a   :  { %v6980_v10 = vpop.permute.xlu1 %6979  ;;  %12843 = vmatmul.mubr.msk.f32.vlgmr.msra.gmra.mxu0 %vm386_vm2, %v6976_v53  ;;  %v7454_v51 = vpop.permute.xlu0 %7453 }
0x176b   :  { %12867 = vmatpush3.xpose.msk.msra.mxu0 %vm386_vm2, %v7221_v28  ;;  %12845 = vmatprep.mubr.msk.f32.mxu0 %vm13883_vm1, %v17920_v19 }
0x176c   :  { %12868 = vmatprep.subr.mxu0 %v17920_v19 }
0x176e   :  { %v7211_v41 = vpop.permute.xlu1 %7210  ;;  %12846 = vmatmul.mubr.msk.f32.gmra.mxu0 %vm386_vm2, %v6978_v26  ;;  %v7452_v5 = vpop.permute.xlu0 %7451 }
0x176f   :  { %12869 = vmatpush3.xpose.msk.msra.mxu0 %vm386_vm2, %v7219_v23  ;;  %12848 = vmatprep.mubr.msk.f32.mxu0 %vm13883_vm1, %v17920_v19 }
0x1770   :  { %12870 = vmatprep.subr.mxu0 %v17920_v19 }
0x1772   :  { %v7213_v36 = vpop.permute.xlu1 %7212  ;;  %12849 = vmatmul.mubr.msk.f32.gmra.mxu0 %vm386_vm2, %v6980_v10  ;;  %v7448_v0 = vpop.permute.xlu0 %7447 }
0x1773   :  { %12871 = vmatpush3.xpose.msk.msra.mxu0 %vm386_vm2, %v7217_v56  ;;  %12872 = vmatprep.mubr.msk.f32.mxu0 %vm13883_vm1, %v17920_v19 }
0x1774   :  { %12896 = vmatprep.subr.mxu0 %v17920_v19 }
0x1776   :  { %v7215_v48 = vpop.permute.xlu1 %7214  ;;  %12873 = vmatmul.mubr.msk.f32.vlgmr.msra.gmra.mxu0 %vm386_vm2, %v7211_v41  ;;  %v5900_v15 = vpop.permute.xlu0 %5899 }
0x1777   :  { %12702 = vmatpush3.msra.mxu1 %v5900_v15  ;;  %12897 = vmatpush3.xpose.msk.msra.mxu0 %vm386_vm2, %v7456_v40 }
0x1778   :  { %12875 = vmatprep.mubr.msk.f32.mxu0 %vm13883_vm1, %v17920_v19  ;;  %12898 = vmatprep.subr.mxu0 %v17920_v19 }
0x1779   :  { %12703 = vmatprep.subr.mxu1 %v17920_v19 }
0x177a   :  { %v7446_v16 = vpop.permute.xlu1 %7445  ;;  %12876 = vmatmul.mubr.msk.f32.gmra.mxu0 %vm386_vm2, %v7213_v36 }
0x177b   :  { %12899 = vmatpush3.xpose.msk.msra.mxu0 %vm386_vm2, %v7454_v51  ;;  %12878 = vmatprep.mubr.msk.f32.mxu0 %vm13883_vm1, %v17920_v19 }
0x177c   :  { %12900 = vmatprep.subr.mxu0 %v17920_v19 }
0x177e   :  { %v7450_v29 = vpop.permute.xlu1 %7449  ;;  %12879 = vmatmul.mubr.msk.f32.gmra.mxu0 %vm386_vm2, %v7215_v48 }
0x177f   :  { %12901 = vmatpush3.xpose.msk.msra.mxu0 %vm386_vm2, %v7452_v5  ;;  %12902 = vmatprep.mubr.msk.f32.mxu0 %vm13883_vm1, %v17920_v19 }
0x1782   :  { %v5898_v60 = vpop.permute.xlu1 %5897  ;;  %12903 = vmatmul.mubr.msk.f32.vlgmr.msra.gmra.mxu0 %vm386_vm2, %v7446_v16 }
0x1783   :  { %12704 = vmatpush3.msra.mxu1 %v5898_v60  ;;  %12905 = vmatprep.mubr.msk.f32.mxu0 %vm13883_vm1, %v17920_v19 }
0x1784   :  { %12705 = vmatprep.subr.mxu1 %v17920_v19 }
0x1786   :  { %v5896_v49 = vpop.permute.xlu1 %5895  ;;  %12906 = vmatmul.mubr.msk.f32.gmra.mxu0 %vm386_vm2, %v7448_v0 }
0x1787   :  { %12706 = vmatpush3.msra.mxu1 %v5896_v49  ;;  %12908 = vmatprep.mubr.msk.f32.mxu0 %vm13883_vm1, %v17920_v19 }
0x1788   :  { %12731 = vmatprep.subr.mxu1 %v17920_v19 }
0x178a   :  { %12909 = vmatmul.mubr.msk.f32.gmra.mxu0 %vm386_vm2, %v7450_v29 }
0x17ee   :  { %v16273_v17 = vpop.f32.mrf.mxu1  ;;  %v16275_v6 = vpop.f32.mrf.mxu0 }
0x17ef   :  { %v5862_v55 = vsel %vm479_vm3, %v16273_v17, -inf  ;;  %v6097_v25 = vsel %vm479_vm3, %v16275_v6, -inf }
0x17f0   :  { %5863 = vmax.xlane.f32.xlu0 %v5862_v55  ;;  %v12694_v59 = vpop.f32.mrf.mxu1  ;;  %v12724_v39 = vpop.f32.mrf.mxu0 }
0x17f2   :  { %v16279_v57 = vpop.f32.mrf.mxu1  ;;  %v16281_v63 = vpop.f32.mrf.mxu0 }
0x17f3   :  { %v5865_v35 = vsel %vm479_vm3, %v16279_v57, -inf  ;;  %v6100_v43 = vsel %vm479_vm3, %v16281_v63, -inf }
0x17f4   :  { %5866 = vmax.xlane.f32.xlu1 %v5865_v35  ;;  %v12697_v27 = vpop.f32.mrf.mxu1  ;;  %6098 = vmax.xlane.f32.xlu0 %v6097_v25  ;;  %v12727_v18 = vpop.f32.mrf.mxu0 }
0x17f6   :  { %v16287_v30 = vpop.f32.mrf.mxu1  ;;  %v16289_v21 = vpop.f32.mrf.mxu0 }
0x17f7   :  { %v6103_v32 = vsel %vm479_vm3, %v16289_v21, -inf  ;;  %v5868_v22 = vsel %vm479_vm3, %v16287_v30, -inf }
0x17f8   :  { %v12700_v42 = vpop.f32.mrf.mxu1  ;;  %6101 = vmax.xlane.f32.xlu0 %v6100_v43  ;;  %6104 = vmax.xlane.f32.xlu1 %v6103_v32  ;;  %v12730_v11 = vpop.f32.mrf.mxu0 }
0x17fa   :  { %v16295_v33 = vpop.f32.mrf.mxu0 }
0x17fb   :  { %v6332_v47 = vsel %vm479_vm3, %v16295_v33, -inf }
0x17fc   :  { %5869 = vmax.xlane.f32.xlu0 %v5868_v22  ;;  %v12754_v50 = vpop.f32.mrf.mxu0 }
0x17fe   :  { %v16299_v52 = vpop.f32.mrf.mxu0 }
0x17ff   :  { %v6335_v45 = vsel %vm479_vm3, %v16299_v52, -inf }
0x1800   :  { %6333 = vmax.xlane.f32.xlu0 %v6332_v47  ;;  %6336 = vmax.xlane.f32.xlu1 %v6335_v45  ;;  %v12757_v7 = vpop.f32.mrf.mxu0 }
0x1802   :  { %v16305_v20 = vpop.f32.mrf.mxu0 }
0x1803   :  { %v6338_v54 = vsel %vm479_vm3, %v16305_v20, -inf }
0x1804   :  { %6339 = vmax.xlane.f32.xlu0 %v6338_v54  ;;  %v12760_v2 = vpop.f32.mrf.mxu0 }
0x1806   :  { %v16309_v28 = vpop.f32.mrf.mxu0 }
0x1807   :  { %v6567_v61 = vsel %vm479_vm3, %v16309_v28, -inf }
0x1808   :  { %6568 = vmax.xlane.f32.xlu1 %v6567_v61  ;;  %v12784_v23 = vpop.f32.mrf.mxu0 }
0x180a   :  { %v16313_v53 = vpop.f32.mrf.mxu0 }
0x180b   :  { %v6570_v56 = vsel %vm479_vm3, %v16313_v53, -inf }
0x180c   :  { %6571 = vmax.xlane.f32.xlu0 %v6570_v56  ;;  %v12787_v26 = vpop.f32.mrf.mxu0  ;;  %v16361_v56 = vpop.permute.xlu0 %6134 }
0x180e   :  { %v16317_v40 = vpop.f32.mrf.mxu0 }
0x180f   :  { %v6573_v10 = vsel %vm479_vm3, %v16317_v40, -inf }
0x1810   :  { %6574 = vmax.xlane.f32.xlu1 %v6573_v10  ;;  %v12790_v51 = vpop.f32.mrf.mxu0  ;;  %v16363_v10 = vpop.permute.xlu0 %6130 }
0x181e   :  { %v16321_v41 = vpop.f32.mrf.mxu0 }
0x181f   :  { %v6844_v5 = vsel %vm479_vm3, %v16321_v41, -inf }
0x1820   :  { %6845 = vmax.xlane.f32.xlu0 %v6844_v5  ;;  %v12814_v36 = vpop.f32.mrf.mxu0  ;;  %v16367_v5 = vpop.permute.xlu0 %6369 }
0x1822   :  { %v16325_v0 = vpop.f32.mrf.mxu0 }
0x1823   :  { %v6847_v48 = vsel %vm479_vm3, %v16325_v0, -inf }
0x1824   :  { %6848 = vmax.xlane.f32.xlu1 %v6847_v48  ;;  %v12817_v15 = vpop.f32.mrf.mxu0  ;;  %v16371_v48 = vpop.permute.xlu1 %6132 }
0x1826   :  { %v16329_v16 = vpop.f32.mrf.mxu0 }
0x1827   :  { %v6850_v51 = vsel %vm479_vm3, %v16329_v16, -inf }
0x1828   :  { %v12820_v29 = vpop.f32.mrf.mxu0 }
0x1829   :  { %v16375_v29 = vpop.permute.xlu0 %6604 }
0x182a   :  { %v16331_v60 = vpop.f32.mrf.mxu0 }
0x182b   :  { %v7079_v49 = vsel %vm479_vm3, %v16331_v60, -inf }
0x182c   :  { %7080 = vmax.xlane.f32.xlu1 %v7079_v49  ;;  %v12844_v55 = vpop.f32.mrf.mxu0 }
0x182d   :  { %v16379_v55 = vpop.permute.xlu1 %6367 }
0x182e   :  { %v16335_v59 = vpop.f32.mrf.mxu0 }
0x182f   :  { %v7082_v36 = vsel %vm479_vm3, %v16335_v59, -inf }
0x1830   :  { %v12847_v39 = vpop.f32.mrf.mxu0 }
0x1831   :  { %v16381_v39 = vpop.permute.xlu0 %6600 }
0x1832   :  { %v16337_v35 = vpop.f32.mrf.mxu0 }
0x1833   :  { %v7085_v25 = vsel %vm479_vm3, %v16337_v35, -inf }
0x1834   :  { %7086 = vmax.xlane.f32.xlu1 %v7085_v25  ;;  %v12850_v27 = vpop.f32.mrf.mxu0 }
0x1835   :  { %v16385_v27 = vpop.permute.xlu1 %6365 }
0x1836   :  { %7112 = vrot.lane.b32.xlu0 %v16071_v46, %s13891_s23  ;;  %v16343_v18 = vpop.f32.mrf.mxu0 }
0x1837   :  { %v7314_v15 = vsel %vm479_vm3, %v16343_v18, -inf }
0x1838   :  { %v12874_v43 = vpop.f32.mrf.mxu0 }
0x1839   :  { %v16387_v43 = vpop.permute.xlu0 %6881 }
0x183a   :  { %v16345_v32 = vpop.f32.mrf.mxu0 }
0x183b   :  { %v7317_v42 = vsel %vm479_vm3, %v16345_v32, -inf }
0x183c   :  { %7318 = vmax.xlane.f32.xlu1 %v7317_v42  ;;  %v12877_v11 = vpop.f32.mrf.mxu0  ;;  %v16389_v42 = vpop.permute.xlu1 %6602 }
0x183d   :  { %v16391_v11 = vpop.permute.xlu0 %6877 }
0x183e   :  { %v16349_v22 = vpop.f32.mrf.mxu0 }
0x183f   :  { %v7320_v49 = vsel %vm479_vm3, %v16349_v22, -inf }
0x1840   :  { %v12880_v50 = vpop.f32.mrf.mxu0 }
0x1841   :  { %v16393_v50 = vpop.permute.xlu1 %6879 }
0x1842   :  { %v16351_v47 = vpop.f32.mrf.mxu0 }
0x1843   :  { %v7549_v45 = vsel %vm479_vm3, %v16351_v47, -inf }
0x1844   :  { %7550 = vmax.xlane.f32.xlu1 %v7549_v45  ;;  %v12904_v7 = vpop.f32.mrf.mxu0  ;;  %v16395_v45 = vpop.permute.xlu0 %7116 }
0x1845   :  { %v16397_v7 = vpop.permute.xlu1 %7114 }
0x1846   :  { %v16355_v54 = vpop.f32.mrf.mxu0 }
0x1847   :  { %v7552_v2 = vsel %vm479_vm3, %v16355_v54, -inf }
0x1848   :  { %7553 = vmax.xlane.f32.xlu1 %v7552_v2  ;;  %v12907_v61 = vpop.f32.mrf.mxu0 }
0x184a   :  { %v16359_v23 = vpop.f32.mrf.mxu0 }
0x184b   :  { %v7555_v25 = vsel %vm479_vm3, %v16359_v23, -inf }
0x184c   :  { %v12910_v26 = vpop.f32.mrf.mxu0 }
0x1855   :  { %6851 = vmax.xlane.f32.xlu0 %v6850_v51 }
0x1859   :  { %7083 = vmax.xlane.f32.xlu0 %v7082_v36 }
0x185d   :  { %7315 = vmax.xlane.f32.xlu0 %v7314_v15 }
0x1861   :  { %7321 = vmax.xlane.f32.xlu0 %v7320_v49 }
0x1865   :  { %7556 = vmax.xlane.f32.xlu0 %v7555_v25 }
0x1879   :  { %v5864_v2 = vpop.xlane.xlu0 %5863 }
0x187a   :  { %v5871_v61 = vsub.f32 %v16273_v17, %v5864_v2 }
0x187c   :  { %v5874_v26 = vmul.f32 1.442695, %v5871_v61 }
0x187d   :  { %v5867_v51 = vpop.xlane.xlu1 %5866  ;;  %v6099_v36 = vpop.xlane.xlu0 %6098 }
0x187e   :  { %13625 = vpow2.f32 %v5874_v26  ;;  %v5872_v15 = vsub.f32 %v16279_v57, %v5867_v51  ;;  %v6106_v49 = vsub.f32 %v16275_v6, %v6099_v36 }
0x1880   :  { %v6109_v25 = vmul.f32 1.442695, %v6106_v49  ;;  %v5876_v31 = vmul.f32 1.442695, %v5872_v15 }
0x1881   :  { %v6105_v4 = vpop.xlane.xlu1 %6104  ;;  %v6102_v8 = vpop.xlane.xlu0 %6101 }
0x1882   :  { %v6108_v34 = vsub.f32 %v16289_v21, %v6105_v4  ;;  %v6107_v3 = vsub.f32 %v16281_v63, %v6102_v8  ;;  %13627 = vpow2.f32 %v6109_v25 }
0x1883   :  { %13629 = vpow2.f32 %v5876_v31 }
0x1884   :  { %v6111_v38 = vmul.f32 1.442695, %v6107_v3  ;;  %v6113_v17 = vmul.f32 1.442695, %v6108_v34 }
0x1885   :  { %v5870_v2 = vpop.xlane.xlu0 %5869 }
0x1886   :  { %v5873_v61 = vsub.f32 %v16287_v30, %v5870_v2  ;;  %13631 = vpow2.f32 %v6111_v38 }
0x1887   :  { %13633 = vpow2.f32 %v6113_v17 }
0x1888   :  { %v5878_v26 = vmul.f32 1.442695, %v5873_v61 }
0x1889   :  { %v6337_v57 = vpop.xlane.xlu1 %6336  ;;  %v6334_v6 = vpop.xlane.xlu0 %6333 }
0x188a   :  { %13635 = vpow2.f32 %v5878_v26  ;;  %v6342_v51 = vsub.f32 %v16299_v52, %v6337_v57  ;;  %v6341_v36 = vsub.f32 %v16295_v33, %v6334_v6 }
0x188b   :  { %v16407_v4 = vpop.eup %13625 }
0x188c   :  { %v6346_v8 = vmul.f32 1.442695, %v6342_v51  ;;  %v6344_v63 = vmul.f32 1.442695, %v6341_v36  ;;  %v5880_v3 = vsel %vm479_vm3, %v16407_v4, 0.0 }
0x188d   :  { %5881 = vadd.xlane.f32.xlu0 %v5880_v3  ;;  %v6340_v34 = vpop.xlane.xlu0 %6339 }
0x188e   :  { %13637 = vpow2.f32 %v6346_v8  ;;  %v6343_v38 = vsub.f32 %v16305_v20, %v6340_v34 }
0x188f   :  { %13639 = vpow2.f32 %v6344_v63  ;;  %v16412_v31 = vpop.eup %13627 }
0x1890   :  { %v6348_v30 = vmul.f32 1.442695, %v6343_v38  ;;  %v6115_v33 = vsel %vm479_vm3, %v16412_v31, 0.0  ;;  %v16416_v52 = vpop.eup %13629 }
0x1891   :  { %v6569_v21 = vpop.xlane.xlu1 %6568  ;;  %6116 = vadd.xlane.f32.xlu1 %v6115_v33  ;;  %v5883_v20 = vsel %vm479_vm3, %v16416_v52, 0.0 }
0x1892   :  { %13641 = vpow2.f32 %v6348_v30  ;;  %v6576_v15 = vsub.f32 %v16309_v28, %v6569_v21 }
0x1893   :  { %v16419_v49 = vpop.eup %13631 }
0x1894   :  { %v6579_v25 = vmul.f32 1.442695, %v6576_v15  ;;  %v6118_v17 = vsel %vm479_vm3, %v16419_v49, 0.0  ;;  %v16425_v61 = vpop.eup %13633 }
0x1895   :  { %v6572_v2 = vpop.xlane.xlu0 %6571  ;;  %5884 = vadd.xlane.f32.xlu1 %v5883_v20  ;;  %6119 = vadd.xlane.f32.xlu0 %v6118_v17  ;;  %v6121_v36 = vsel %vm479_vm3, %v16425_v61, 0.0 }
0x1896   :  { %13643 = vpow2.f32 %v6579_v25  ;;  %v6577_v26 = vsub.f32 %v16313_v53, %v6572_v2 }
0x1897   :  { %v16428_v57 = vpop.eup %13635 }
0x1898   :  { %v6581_v28 = vmul.f32 1.442695, %v6577_v26  ;;  %v5886_v6 = vsel %vm479_vm3, %v16428_v57, 0.0 }
0x1899   :  { %v6575_v51 = vpop.xlane.xlu1 %6574  ;;  %6122 = vadd.xlane.f32.xlu1 %v6121_v36  ;;  %5887 = vadd.xlane.f32.xlu0 %v5886_v6 }
0x189a   :  { %13645 = vpow2.f32 %v6581_v28  ;;  %v6578_v8 = vsub.f32 %v16317_v40, %v6575_v51 }
0x189b   :  { %v16435_v63 = vpop.eup %13637 }
0x189c   :  { %v16437_v3 = vpop.eup %13639  ;;  %v6583_v53 = vmul.f32 1.442695, %v6578_v8  ;;  %v6353_v34 = vsel %vm479_vm3, %v16435_v63, 0.0 }
0x189d   :  { %v6350_v38 = vsel %vm479_vm3, %v16437_v3, 0.0  ;;  %6354 = vadd.xlane.f32.xlu0 %v6353_v34 }
0x189e   :  { %13647 = vpow2.f32 %v6583_v53  ;;  %6351 = vadd.xlane.f32.xlu1 %v6350_v38 }
0x189f   :  { %v16443_v30 = vpop.eup %13641 }
0x18a0   :  { %v6356_v40 = vsel %vm479_vm3, %v16443_v30, 0.0 }
0x18a2   :  { %6357 = vadd.xlane.f32.xlu1 %v6356_v40 }
0x18a3   :  { %v16447_v21 = vpop.eup %13643 }
0x18a4   :  { %v6585_v33 = vsel %vm479_vm3, %v16447_v21, 0.0 }
0x18a6   :  { %6586 = vadd.xlane.f32.xlu1 %v6585_v33 }
0x18a7   :  { %v16451_v15 = vpop.eup %13645 }
0x18a8   :  { %v6588_v25 = vsel %vm479_vm3, %v16451_v15, 0.0 }
0x18a9   :  { %6589 = vadd.xlane.f32.xlu0 %v6588_v25  ;;  %v6846_v20 = vpop.xlane.xlu0 %6845 }
0x18aa   :  { %v6853_v17 = vsub.f32 %v16321_v41, %v6846_v20 }
0x18ab   :  { %v16456_v2 = vpop.eup %13647 }
0x18ac   :  { %v6856_v26 = vmul.f32 1.442695, %v6853_v17  ;;  %v6591_v28 = vsel %vm479_vm3, %v16456_v2, 0.0 }
0x18ad   :  { %v6849_v6 = vpop.xlane.xlu1 %6848  ;;  %6592 = vadd.xlane.f32.xlu0 %v6591_v28 }
0x18ae   :  { %13649 = vpow2.f32 %v6856_v26  ;;  %v6854_v51 = vsub.f32 %v16325_v0, %v6849_v6  ;;  %v16473_v0 = vpop.permute.xlu0 %7112 }
0x18b0   :  { %v6858_v36 = vmul.f32 1.442695, %v6854_v51 }
0x18b2   :  { %13651 = vpow2.f32 %v6858_v36 }
0x18b5   :  { %v7081_v38 = vpop.xlane.xlu1 %7080 }
0x18b6   :  { %v7088_v33 = vsub.f32 %v16331_v60, %v7081_v38 }
0x18b8   :  { %v7091_v28 = vmul.f32 1.442695, %v7088_v33 }
0x18bb   :  { %v16461_v8 = vpop.eup %13649 }
0x18bc   :  { %v6862_v53 = vsel %vm479_vm3, %v16461_v8, 0.0 }
0x18bd   :  { %6863 = vadd.xlane.f32.xlu1 %v6862_v53  ;;  %v7087_v40 = vpop.xlane.xlu1 %7086 }
0x18be   :  { %v7090_v26 = vsub.f32 %v16337_v35, %v7087_v40 }
0x18bf   :  { %v16465_v41 = vpop.eup %13651 }
0x18c0   :  { %v6865_v34 = vsel %vm479_vm3, %v16465_v41, 0.0 }
0x18c1   :  { %6866 = vadd.xlane.f32.xlu0 %v6865_v34  ;;  %v7095_v34 = vmul.f32 1.442695, %v7090_v26 }
0x18c5   :  { %v7319_v25 = vpop.xlane.xlu1 %7318 }
0x18c6   :  { %v7324_v6 = vsub.f32 %v16345_v32, %v7319_v25 }
0x18c8   :  { %v7328_v44 = vmul.f32 1.442695, %v7324_v6 }
0x18cd   :  { %v7551_v26 = vpop.xlane.xlu1 %7550 }
0x18ce   :  { %7349 = vrot.lane.b32.xlu1 %v16073_v13, %s13892_s24 }
0x18d1   :  { %v7554_v6 = vpop.xlane.xlu1 %7553 }
0x18d7   :  { %7351 = vrot.lane.b32.xlu0 %v16065_v14, %s13892_s24 }
0x18de   :  { %v6852_v20 = vpop.xlane.xlu0 %6851 }
0x18df   :  { %v6855_v17 = vsub.f32 %v16329_v16, %v6852_v20 }
0x18e1   :  { %v6860_v51 = vmul.f32 1.442695, %v6855_v17 }
0x18e2   :  { %v7084_v36 = vpop.xlane.xlu0 %7083 }
0x18e3   :  { %13653 = vpow2.f32 %v6860_v51  ;;  %v7089_v53 = vsub.f32 %v16335_v59, %v7084_v36  ;;  %v7559_v36 = vsub.f32 %v16355_v54, %v7554_v6 }
0x18e4   :  { %13655 = vpow2.f32 %v7091_v28 }
0x18e5   :  { %v7093_v9 = vmul.f32 1.442695, %v7089_v53 }
0x18e6   :  { %v7316_v62 = vpop.xlane.xlu0 %7315 }
0x18e7   :  { %13657 = vpow2.f32 %v7093_v9  ;;  %v7323_v60 = vsub.f32 %v16343_v18, %v7316_v62 }
0x18e8   :  { %13659 = vpow2.f32 %v7095_v34 }
0x18e9   :  { %13661 = vpow2.f32 %v7328_v44  ;;  %v7326_v16 = vmul.f32 1.442695, %v7323_v60  ;;  %v7563_v60 = vmul.f32 1.442695, %v7559_v36 }
0x18ea   :  { %v7322_v17 = vpop.xlane.xlu0 %7321 }
0x18eb   :  { %13663 = vpow2.f32 %v7326_v16  ;;  %v7325_v53 = vsub.f32 %v16349_v22, %v7322_v17 }
0x18ed   :  { %v7330_v16 = vmul.f32 1.442695, %v7325_v53 }
0x18ee   :  { %v16509_v28 = vpop.xlane.xlu0 %7556 }
0x18f0   :  { %v16481_v35 = vpop.eup %13653 }
0x18f1   :  { %v6868_v32 = vsel %vm479_vm3, %v16481_v35, 0.0  ;;  %v16485_v38 = vpop.eup %13655 }
0x18f2   :  { %6869 = vadd.xlane.f32.xlu1 %v6868_v32  ;;  %v7097_v9 = vsel %vm479_vm3, %v16485_v38, 0.0 }
0x18f4   :  { %v16487_v59 = vpop.eup %13657 }
0x18f5   :  { %v16489_v40 = vpop.eup %13659  ;;  %v7100_v44 = vsel %vm479_vm3, %v16487_v59, 0.0 }
0x18f6   :  { %v16495_v62 = vpop.eup %13661  ;;  %7098 = vadd.xlane.f32.xlu1 %v7097_v9  ;;  %7101 = vadd.xlane.f32.xlu0 %v7100_v44  ;;  %v7103_v18 = vsel %vm479_vm3, %v16489_v40, 0.0 }
0x18f7   :  { %v7335_v33 = vsel %vm479_vm3, %v16495_v62, 0.0 }
0x18f8   :  { %v16501_v25 = vpop.eup %13663 }
0x18f9   :  { %v7332_v20 = vsel %vm479_vm3, %v16501_v25, 0.0 }
0x18fa   :  { %7104 = vadd.xlane.f32.xlu1 %v7103_v18  ;;  %7336 = vadd.xlane.f32.xlu0 %v7335_v33 }
0x18fe   :  { %7333 = vadd.xlane.f32.xlu1 %v7332_v20 }
0x190f   :  { %7586 = vrot.lane.b32.xlu1 %v16065_v14, %s13893_s25  ;;  %v7558_v14 = vsub.f32 %v16351_v47, %v7551_v26 }
0x1910   :  { %7347 = vrot.lane.b32.xlu0 %v16071_v46, %s13892_s24 }
0x1911   :  { %v7561_v44 = vmul.f32 1.442695, %v7558_v14 }
0x1914   :  { %7584 = vrot.lane.b32.xlu0 %v16073_v13, %s13893_s25 }
0x1916   :  { %v5882_v51 = vpop.xlane.xlu0 %5881 }
0x1917   :  { %13665 = vrcp.f32 %v5882_v51 }
0x191a   :  { %v6117_v34 = vpop.xlane.xlu1 %6116 }
0x191e   :  { %v5885_v32 = vpop.xlane.xlu1 %5884  ;;  %v6120_v9 = vpop.xlane.xlu0 %6119 }
0x191f   :  { %13667 = vrcp.f32 %v5885_v32 }
0x1920   :  { %13669 = vpow2.f32 %v7563_v60 }
0x1921   :  { %13671 = vpow2.f32 %v7330_v16 }
0x1922   :  { %v5888_v18 = vpop.xlane.xlu0 %5887  ;;  %v6123_v22 = vpop.xlane.xlu1 %6122 }
0x1923   :  { %13673 = vrcp.f32 %v5888_v18 }
0x1924   :  { %v13666_v13 = vpop.eup %13665  ;;  %13675 = vpow2.f32 %v7561_v44 }
0x1925   :  { %v5892_v33 = vmul.f32 %v13666_v13, %v16407_v4  ;;  %13677 = vrcp.f32 %v6117_v34 }
0x1926   :  { %13679 = vrcp.f32 %v6120_v9  ;;  %v6355_v51 = vpop.xlane.xlu0 %6354 }
0x1927   :  { %12708 = vmatmul.mubr.msk.f32.vlgmr.msra.gmra.mxu1 %vm479_vm3, %v5892_v33  ;;  %13681 = vrcp.f32 %v6123_v22  ;;  %v6352_v20 = vpop.xlane.xlu1 %6351 }
0x1928   :  { %12732 = vmatpush3.msra.mxu1 %v16361_v56  ;;  %12710 = vmatprep.mubr.msk.f32.mxu1 %vm13883_vm1, %v17920_v19  ;;  %13683 = vrcp.f32 %v6352_v20 }
0x1929   :  { %12733 = vmatprep.subr.mxu1 %v17920_v19  ;;  %13685 = vrcp.f32 %v6355_v51 }
0x192a   :  { %12734 = vmatpush3.msra.mxu1 %v16371_v48 }
0x192b   :  { %12735 = vmatprep.subr.mxu1 %v17920_v19  ;;  %v6358_v36 = vpop.xlane.xlu1 %6357 }
0x192c   :  { %12736 = vmatpush3.msra.mxu1 %v16363_v10  ;;  %v13668_v47 = vpop.eup %13667  ;;  %13687 = vrcp.f32 %v6358_v36 }
0x192d   :  { %12761 = vmatprep.subr.mxu1 %v17920_v19  ;;  %v16526_v54 = vpop.eup %13669  ;;  %v5893_v56 = vmul.f32 %v13668_v47, %v16416_v52 }
0x192e   :  { %v16529_v4 = vpop.eup %13671  ;;  %v7570_v10 = vsel %vm479_vm3, %v16526_v54, 0.0 }
0x192f   :  { %12711 = vmatmul.mubr.msk.f32.gmra.mxu1 %vm479_vm3, %v5893_v56  ;;  %v7338_v17 = vsel %vm479_vm3, %v16529_v4, 0.0  ;;  %v6587_v16 = vpop.xlane.xlu1 %6586 }
0x1930   :  { %12713 = vmatprep.mubr.msk.f32.mxu1 %vm13883_vm1, %v17920_v19  ;;  %v13674_v48 = vpop.eup %13673  ;;  %13689 = vrcp.f32 %v6587_v16 }
0x1931   :  { %v16538_v26 = vpop.eup %13675  ;;  %v5894_v52 = vmul.f32 %v13674_v48, %v16428_v57 }
0x1932   :  { %v13678_v6 = vpop.eup %13677  ;;  %v7567_v53 = vsel %vm479_vm3, %v16538_v26, 0.0 }
0x1933   :  { %7571 = vadd.xlane.f32.xlu0 %v7570_v10  ;;  %7339 = vadd.xlane.f32.xlu1 %v7338_v17  ;;  %v6127_v34 = vmul.f32 %v13678_v6, %v16412_v31  ;;  %v13680_v60 = vpop.eup %13679  ;;  %v6590_v31 = vpop.xlane.xlu0 %6589 }
0x1934   :  { %12714 = vmatmul.mubr.msk.f32.gmra.mxu1 %vm479_vm3, %v5894_v52  ;;  %v6128_v57 = vmul.f32 %v13680_v60, %v16419_v49  ;;  %v13682_v14 = vpop.eup %13681  ;;  %13691 = vrcp.f32 %v6590_v31 }
0x1935   :  { %12737 = vmatprep.mubr.msk.f32.mxu1 %vm13883_vm1, %v17920_v19  ;;  %v13684_v49 = vpop.eup %13683 }
0x1936   :  { %v13686_v32 = vpop.eup %13685 }
0x1937   :  { %7568 = vadd.xlane.f32.xlu1 %v7567_v53  ;;  %v6593_v9 = vpop.xlane.xlu0 %6592 }
0x1938   :  { %12738 = vmatmul.mubr.msk.f32.vlgmr.msra.gmra.mxu1 %vm479_vm3, %v6127_v34  ;;  %13693 = vrcp.f32 %v6593_v9 }
0x1939   :  { %12762 = vmatpush3.msra.mxu1 %v16367_v5  ;;  %12740 = vmatprep.mubr.msk.f32.mxu1 %vm13883_vm1, %v17920_v19  ;;  %v6129_v5 = vmul.f32 %v13682_v14, %v16425_v61  ;;  %v13688_v61 = vpop.eup %13687 }
0x193a   :  { %12763 = vmatprep.subr.mxu1 %v17920_v19 }
0x193b   :  { %12764 = vmatpush3.msra.mxu1 %v16379_v55  ;;  %v6362_v55 = vmul.f32 %v13684_v49, %v16437_v3 }
0x193c   :  { %12765 = vmatprep.subr.mxu1 %v17920_v19  ;;  %12741 = vmatmul.mubr.msk.f32.gmra.mxu1 %vm479_vm3, %v6128_v57 }
0x193d   :  { %12766 = vmatpush3.msra.mxu1 %v16385_v27  ;;  %12743 = vmatprep.mubr.msk.f32.mxu1 %vm13883_vm1, %v17920_v19  ;;  %v6363_v27 = vmul.f32 %v13686_v32, %v16435_v63  ;;  %v13690_v63 = vpop.eup %13689 }
0x193e   :  { %12791 = vmatprep.subr.mxu1 %v17920_v19 }
0x1940   :  { %12744 = vmatmul.mubr.msk.f32.gmra.mxu1 %vm479_vm3, %v6129_v5 }
0x1941   :  { %12767 = vmatprep.mubr.msk.f32.mxu1 %vm13883_vm1, %v17920_v19  ;;  %v13692_v3 = vpop.eup %13691 }
0x1944   :  { %12768 = vmatmul.mubr.msk.f32.vlgmr.msra.gmra.mxu1 %vm479_vm3, %v6362_v55 }
0x1945   :  { %12792 = vmatpush3.msra.mxu1 %v16375_v29  ;;  %12770 = vmatprep.mubr.msk.f32.mxu1 %vm13883_vm1, %v17920_v19  ;;  %v6364_v29 = vmul.f32 %v13688_v61, %v16443_v30  ;;  %v6598_v30 = vmul.f32 %v13692_v3, %v16451_v15  ;;  %v13694_v18 = vpop.eup %13693  ;;  %v11233_v3 = vld [vmem:[%s17891_s4 + $0x50] sm:$0xff] }
0x1946   :  { %12793 = vmatprep.subr.mxu1 %v17920_v19  ;;  %v6864_v44 = vpop.xlane.xlu1 %6863 }
0x1947   :  { %12794 = vmatpush3.msra.mxu1 %v16389_v42  ;;  %13695 = vrcp.f32 %v6864_v44 }
0x1948   :  { %7582 = vrot.lane.b32.xlu1 %v16071_v46, %s13893_s25  ;;  %12795 = vmatprep.subr.mxu1 %v17920_v19  ;;  %v6597_v46 = vmul.f32 %v13690_v63, %v16447_v21  ;;  %v6599_v21 = vmul.f32 %v13694_v18, %v16456_v2 }
0x1949   :  { %12771 = vmatmul.mubr.msk.f32.gmra.mxu1 %vm479_vm3, %v6363_v27 }
0x194a   :  { %12796 = vmatpush3.msra.mxu1 %v16381_v39  ;;  %12773 = vmatprep.mubr.msk.f32.mxu1 %vm13883_vm1, %v17920_v19  ;;  %v6867_v42 = vpop.xlane.xlu0 %6866  ;;  %v7560_v39 = vsub.f32 %v16359_v23, %v16509_v28 }
0x194b   :  { %12821 = vmatprep.subr.mxu1 %v17920_v19  ;;  %13697 = vrcp.f32 %v6867_v42 }
0x194d   :  { %12774 = vmatmul.mubr.msk.f32.gmra.mxu1 %vm479_vm3, %v6364_v29 }
0x194e   :  { %12797 = vmatprep.mubr.msk.f32.mxu1 %vm13883_vm1, %v17920_v19 }
0x1951   :  { %12798 = vmatmul.mubr.msk.f32.vlgmr.msra.gmra.mxu1 %vm479_vm3, %v6597_v46  ;;  %v11234_v46 = vld [vmem:[%s17891_s4 + $0x58] sm:$0xff] }
0x1952   :  { %12822 = vmatpush3.msra.mxu1 %v16387_v43  ;;  %12800 = vmatprep.mubr.msk.f32.mxu1 %vm13883_vm1, %v17920_v19  ;;  %v7565_v43 = vmul.f32 1.442695, %v7560_v39 }
0x1953   :  { %12823 = vmatprep.subr.mxu1 %v17920_v19  ;;  %12926 = vmatprep.subr.mxu0 %v11234_v46 }
0x1954   :  { %12824 = vmatpush3.msra.mxu1 %v16393_v50  ;;  %v13696_v23 = vpop.eup %13695  ;;  %13699 = vpow2.f32 %v7565_v43  ;;  %12927 = vmatpush3.msra.mxu0 %v11234_v46 }
0x1955   :  { %12825 = vmatprep.subr.mxu1 %v17920_v19  ;;  %12801 = vmatmul.mubr.msk.f32.gmra.mxu1 %vm479_vm3, %v6598_v30  ;;  %v6874_v50 = vmul.f32 %v13696_v23, %v16461_v8  ;;  %v7350_v8 = vpop.permute.xlu1 %7349  ;;  %v11231_v23 = vld [vmem:[%s17891_s4 + $0x40] sm:$0xff] }
0x1956   :  { %12826 = vmatpush3.msra.mxu1 %v16391_v11  ;;  %12803 = vmatprep.mubr.msk.f32.mxu1 %vm13883_vm1, %v17920_v19 }
0x1957   :  { %12851 = vmatprep.subr.mxu1 %v17920_v19  ;;  %12928 = vmatprep.subr.mxu0 %v11233_v3 }
0x1958   :  { %v13698_v15 = vpop.eup %13697  ;;  %12929 = vmatpush3.msra.mxu0 %v11233_v3 }
0x1959   :  { %12804 = vmatmul.mubr.msk.f32.gmra.mxu1 %vm479_vm3, %v6599_v21  ;;  %v6875_v11 = vmul.f32 %v13698_v15, %v16465_v41  ;;  %v7352_v41 = vpop.permute.xlu0 %7351  ;;  %v11232_v21 = vld [vmem:[%s17891_s4 + $0x48] sm:$0xff] }
0x195a   :  { %12827 = vmatprep.mubr.msk.f32.mxu1 %vm13883_vm1, %v17920_v19  ;;  %12930 = vmatprep.subr.mxu0 %v11232_v21 }
0x195b   :  { %12931 = vmatpush3.msra.mxu0 %v11232_v21 }
0x195c   :  { %12932 = vmatprep.subr.mxu0 %v11231_v23 }
0x195d   :  { %12828 = vmatmul.mubr.msk.f32.vlgmr.msra.gmra.mxu1 %vm479_vm3, %v6874_v50  ;;  %12933 = vmatpush3.msra.mxu0 %v11231_v23 }
0x195e   :  { %12852 = vmatpush3.msra.mxu1 %v16395_v45  ;;  %12830 = vmatprep.mubr.msk.f32.mxu1 %vm13883_vm1, %v17920_v19 }
0x195f   :  { %12853 = vmatprep.subr.mxu1 %v17920_v19 }
0x1960   :  { %12854 = vmatpush3.msra.mxu1 %v16397_v7 }
0x1961   :  { %12855 = vmatprep.subr.mxu1 %v17920_v19  ;;  %12831 = vmatmul.mubr.msk.f32.gmra.mxu1 %vm479_vm3, %v6875_v11  ;;  %v16618_v45 = vpop.eup %13699 }
0x1962   :  { %12856 = vmatpush3.msra.mxu1 %v16473_v0  ;;  %12833 = vmatprep.mubr.msk.f32.mxu1 %vm13883_vm1, %v17920_v19  ;;  %v7573_v2 = vsel %vm479_vm3, %v16618_v45, 0.0 }
0x1963   :  { %12881 = vmatprep.subr.mxu1 %v17920_v19 }
0x196c   :  { %7574 = vadd.xlane.f32.xlu1 %v7573_v2 }
0x197b   :  { %v6870_v7 = vpop.xlane.xlu1 %6869 }
0x197c   :  { %13701 = vrcp.f32 %v6870_v7 }
0x197f   :  { %v7099_v28 = vpop.xlane.xlu1 %7098  ;;  %v7102_v13 = vpop.xlane.xlu0 %7101 }
0x1980   :  { %13703 = vrcp.f32 %v7099_v28 }
0x1981   :  { %13705 = vrcp.f32 %v7102_v13 }
0x1983   :  { %v7105_v0 = vpop.xlane.xlu1 %7104  ;;  %v7337_v56 = vpop.xlane.xlu0 %7336 }
0x1984   :  { %13707 = vrcp.f32 %v7105_v0 }
0x1987   :  { %v7334_v33 = vpop.xlane.xlu1 %7333  ;;  %v7348_v52 = vpop.permute.xlu0 %7347 }
0x1988   :  { %13709 = vrcp.f32 %v7334_v33 }
0x1989   :  { %v13702_v22 = vpop.eup %13701  ;;  %13711 = vrcp.f32 %v7337_v56 }
0x198a   :  { %v6876_v47 = vmul.f32 %v13702_v22, %v16481_v35 }
0x198b   :  { %v7587_v36 = vpop.permute.xlu1 %7586  ;;  %v7585_v53 = vpop.permute.xlu0 %7584 }
0x198c   :  { %12834 = vmatmul.mubr.msk.f32.gmra.mxu1 %vm479_vm3, %v6876_v47 }
0x198d   :  { %v13704_v20 = vpop.eup %13703  ;;  %12857 = vmatprep.mubr.msk.f32.mxu1 %vm13883_vm1, %v17920_v19 }
0x198e   :  { %v7109_v48 = vmul.f32 %v13704_v20, %v16485_v38  ;;  %v13706_v10 = vpop.eup %13705 }
0x198f   :  { %v7110_v35 = vmul.f32 %v13706_v10, %v16487_v59 }
0x1990   :  { %12858 = vmatmul.mubr.msk.f32.vlgmr.msra.gmra.mxu1 %vm479_vm3, %v7109_v48 }
0x1991   :  { %12882 = vmatpush3.msra.mxu1 %v7352_v41  ;;  %12860 = vmatprep.mubr.msk.f32.mxu1 %vm13883_vm1, %v17920_v19  ;;  %v13708_v17 = vpop.eup %13707 }
0x1992   :  { %12883 = vmatprep.subr.mxu1 %v17920_v19  ;;  %v7111_v38 = vmul.f32 %v13708_v17, %v16489_v40 }
0x1993   :  { %12884 = vmatpush3.msra.mxu1 %v7350_v8 }
0x1994   :  { %12885 = vmatprep.subr.mxu1 %v17920_v19  ;;  %12861 = vmatmul.mubr.msk.f32.gmra.mxu1 %vm479_vm3, %v7110_v35 }
0x1995   :  { %12886 = vmatpush3.msra.mxu1 %v7348_v52  ;;  %12863 = vmatprep.mubr.msk.f32.mxu1 %vm13883_vm1, %v17920_v19  ;;  %v13710_v6 = vpop.eup %13709 }
0x1996   :  { %12911 = vmatprep.subr.mxu1 %v17920_v19  ;;  %v7344_v59 = vmul.f32 %v13710_v6, %v16501_v25  ;;  %v13712_v51 = vpop.eup %13711 }
0x1997   :  { %v7345_v40 = vmul.f32 %v13712_v51, %v16495_v62 }
0x1998   :  { %12864 = vmatmul.mubr.msk.f32.gmra.mxu1 %vm479_vm3, %v7111_v38 }
0x1999   :  { %12887 = vmatprep.mubr.msk.f32.mxu1 %vm13883_vm1, %v17920_v19 }
0x199c   :  { %12888 = vmatmul.mubr.msk.f32.vlgmr.msra.gmra.mxu1 %vm479_vm3, %v7344_v59 }
0x199d   :  { %12912 = vmatpush3.msra.mxu1 %v7587_v36  ;;  %12890 = vmatprep.mubr.msk.f32.mxu1 %vm13883_vm1, %v17920_v19 }
0x199e   :  { %12913 = vmatprep.subr.mxu1 %v17920_v19 }
0x199f   :  { %12914 = vmatpush3.msra.mxu1 %v7585_v53 }
0x19a0   :  { %12891 = vmatmul.mubr.msk.f32.gmra.mxu1 %vm479_vm3, %v7345_v40  ;;  %12915 = vmatprep.subr.mxu1 %v17920_v19 }
0x19a1   :  { %12893 = vmatprep.mubr.msk.f32.mxu1 %vm13883_vm1, %v17920_v19 }
0x19bc   :  { %v7340_v25 = vpop.xlane.xlu1 %7339  ;;  %v7572_v34 = vpop.xlane.xlu0 %7571 }
0x19bd   :  { %13713 = vrcp.f32 %v7340_v25 }
0x19c0   :  { %v7569_v60 = vpop.xlane.xlu1 %7568 }
0x19c1   :  { %13715 = vrcp.f32 %v7569_v60 }
0x19c2   :  { %13717 = vrcp.f32 %v7572_v34 }
0x19c4   :  { %v7583_v57 = vpop.permute.xlu1 %7582 }
0x19c5   :  { %12916 = vmatpush3.msra.mxu1 %v7583_v57 }
0x19ca   :  { %v13714_v14 = vpop.eup %13713 }
0x19cb   :  { %v7346_v16 = vmul.f32 %v13714_v14, %v16529_v4 }
0x19cd   :  { %12894 = vmatmul.mubr.msk.f32.gmra.mxu1 %vm479_vm3, %v7346_v16 }
0x19ce   :  { %v13716_v62 = vpop.eup %13715  ;;  %12917 = vmatprep.mubr.msk.f32.mxu1 %vm13883_vm1, %v17920_v19 }
0x19cf   :  { %v7579_v31 = vmul.f32 %v13716_v62, %v16538_v26  ;;  %v13718_v5 = vpop.eup %13717 }
0x19d0   :  { %v7580_v49 = vmul.f32 %v13718_v5, %v16526_v54 }
0x19d1   :  { %12918 = vmatmul.mubr.msk.f32.vlgmr.msra.gmra.mxu1 %vm479_vm3, %v7579_v31 }
0x19d2   :  { %12920 = vmatprep.mubr.msk.f32.mxu1 %vm13883_vm1, %v17920_v19 }
0x19d5   :  { %12921 = vmatmul.mubr.msk.f32.gmra.mxu1 %vm479_vm3, %v7580_v49 }
0x19d6   :  { %12923 = vmatprep.mubr.msk.f32.mxu1 %vm13883_vm1, %v17920_v19 }
0x19e7   :  { %v16663_v4 = vpop.f32.mrf.mxu1 }
0x19e9   :  { %v12709_v55 = vpop.f32.mrf.mxu1 }
0x19ef   :  { %v16665_v32 = vpop.f32.mrf.mxu1 }
0x19f1   :  { %v12712_v9 = vpop.f32.mrf.mxu1 }
0x19f4   :  { %v16667_v26 = vpop.f32.mrf.mxu1 }
0x19f5   :  { %v7575_v27 = vpop.xlane.xlu1 %7574 }
0x19f6   :  { %13719 = vrcp.f32 %v7575_v27  ;;  %v12715_v61 = vpop.f32.mrf.mxu1 }
0x19f8   :  { %v6214_v44 = vpop.f32.mrf.mxu1 }
0x19f9   :  { %6701 = vrot.lane.b32.xlu0 %v6214_v44, %s13894_s26 }
0x19fa   :  { %v12739_v54 = vpop.f32.mrf.mxu1 }
0x19fc   :  { %v6219_v29 = vpop.f32.mrf.mxu1 }
0x19fd   :  { %6703 = vrot.lane.b32.xlu1 %v6219_v29, %s13894_s26 }
0x19fe   :  { %v12742_v63 = vpop.f32.mrf.mxu1 }
0x1a00   :  { %v6224_v42 = vpop.f32.mrf.mxu1 }
0x1a01   :  { %6705 = vrot.lane.b32.xlu0 %v6224_v42, %s13894_s26 }
0x1a02   :  { %v12745_v30 = vpop.f32.mrf.mxu1 }
0x1a03   :  { %v13720_v39 = vpop.eup %13719 }
0x1a04   :  { %v7581_v18 = vmul.f32 %v13720_v39, %v16618_v45  ;;  %v6449_v43 = vpop.f32.mrf.mxu1 }
0x1a05   :  { %6713 = vrot.lane.b32.xlu0 %v6449_v43, %s13895_s9 }
0x1a06   :  { %12924 = vmatmul.mubr.msk.f32.gmra.mxu1 %vm479_vm3, %v7581_v18  ;;  %v12769_v50 = vpop.f32.mrf.mxu1 }
0x1a09   :  { %v6454_v15 = vpop.f32.mrf.mxu1 }
0x1a0a   :  { %6715 = vrot.lane.b32.xlu1 %v6454_v15, %s13895_s9 }
0x1a0b   :  { %v12772_v11 = vpop.f32.mrf.mxu1 }
0x1a0d   :  { %v6459_v45 = vpop.f32.mrf.mxu1 }
0x1a0e   :  { %6717 = vrot.lane.b32.xlu1 %v6459_v45, %s13895_s9 }
0x1a0f   :  { %v12775_v2 = vpop.f32.mrf.mxu1 }
0x1a11   :  { %v6684_v8 = vpop.f32.mrf.mxu1 }
0x1a12   :  { %6725 = vrot.lane.b32.xlu0 %v6684_v8, %s13896_s12 }
0x1a13   :  { %v12799_v41 = vpop.f32.mrf.mxu1 }
0x1a15   :  { %v6689_v7 = vpop.f32.mrf.mxu1 }
0x1a16   :  { %6727 = vrot.lane.b32.xlu1 %v6689_v7, %s13896_s12 }
0x1a17   :  { %v12802_v28 = vpop.f32.mrf.mxu1 }
0x1a19   :  { %v6694_v13 = vpop.f32.mrf.mxu1 }
0x1a1a   :  { %6729 = vrot.lane.b32.xlu1 %v6694_v13, %s13896_s12 }
0x1a1b   :  { %v12805_v0 = vpop.f32.mrf.mxu1 }
0x1a1d   :  { %v6961_v33 = vpop.f32.mrf.mxu1 }
0x1a1f   :  { %v12829_v22 = vpop.f32.mrf.mxu1 }
0x1a21   :  { %v6966_v47 = vpop.f32.mrf.mxu1 }
0x1a23   :  { %v12832_v56 = vpop.f32.mrf.mxu1 }
0x1a4c   :  { %v16692_v20 = vpop.f32.mrf.mxu1 }
0x1a4e   :  { %v12835_v48 = vpop.f32.mrf.mxu1 }
0x1a50   :  { %v7196_v10 = vpop.f32.mrf.mxu1 }
0x1a51   :  { %7683 = vrot.lane.b32.xlu0 %v7196_v10, %s13894_s26 }
0x1a52   :  { %v12859_v35 = vpop.f32.mrf.mxu1 }
0x1a54   :  { %v7201_v17 = vpop.f32.mrf.mxu1 }
0x1a56   :  { %v12862_v52 = vpop.f32.mrf.mxu1 }
0x1a58   :  { %v7206_v38 = vpop.f32.mrf.mxu1 }
0x1a5a   :  { %v12865_v6 = vpop.f32.mrf.mxu1 }
0x1a5c   :  { %v7431_v59 = vpop.f32.mrf.mxu1 }
0x1a5d   :  { %7695 = vrot.lane.b32.xlu0 %v7431_v59, %s13895_s9 }
0x1a5e   :  { %v12889_v51 = vpop.f32.mrf.mxu1 }
0x1a60   :  { %v7436_v36 = vpop.f32.mrf.mxu1 }
0x1a61   :  { %7685 = vrot.lane.b32.xlu0 %v7201_v17, %s13894_s26 }
0x1a62   :  { %v12892_v53 = vpop.f32.mrf.mxu1 }
0x1a65   :  { %7697 = vrot.lane.b32.xlu0 %v7436_v36, %s13895_s9 }
0x1a6b   :  { %v6702_v40 = vpop.permute.xlu0 %6701 }
0x1a6c   :  { %v6734_v14 = vsel %vm386_vm2, %v16663_v4, %v6702_v40 }
0x1a6f   :  { %v6704_v25 = vpop.permute.xlu1 %6703 }
0x1a70   :  { %v6735_v49 = vsel %vm386_vm2, %v16665_v32, %v6704_v25 }
0x1a73   :  { %v6706_v34 = vpop.permute.xlu0 %6705 }
0x1a74   :  { %v6736_v4 = vsel %vm386_vm2, %v16667_v26, %v6706_v34 }
0x1a77   :  { %v6714_v57 = vpop.permute.xlu0 %6713 }
0x1a78   :  { %v6737_v16 = vsel %vm1355_vm4, %v6734_v14, %v6714_v57 }
0x1a7c   :  { %v6716_v60 = vpop.permute.xlu1 %6715 }
0x1a7d   :  { %v6738_v55 = vsel %vm1355_vm4, %v6735_v49, %v6716_v60 }
0x1a80   :  { %v6718_v62 = vpop.permute.xlu1 %6717 }
0x1a81   :  { %v6739_v61 = vsel %vm1355_vm4, %v6736_v4, %v6718_v62 }
0x1a84   :  { %v6726_v31 = vpop.permute.xlu0 %6725 }
0x1a85   :  { %v6740_v5 = vsel %vm479_vm3, %v6737_v16, %v6726_v31 }
0x1a86   :  { %12934 = vmatprep.mubr.msk.f32.mxu0 %vm42_vm0, %v6740_v5  ;;  %v17942_v5 = vld [vmem:[#allocation9_spill] sm:$0xff] }
0x1a88   :  { %v6728_v9 = vpop.permute.xlu1 %6727 }
0x1a89   :  { %v6741_v27 = vsel %vm479_vm3, %v6738_v55, %v6728_v9  ;;  %v17943_v9 = vld [vmem:[#allocation10_spill] sm:$0xff] }
0x1a8a   :  { %12935 = vmatmul.mubr.msk.f32.vlgmr.msra.gmra.mxu0 %vm42_vm0, %v6741_v27 }
0x1a8c   :  { %v6730_v44 = vpop.permute.xlu1 %6729 }
0x1a8d   :  { %v6742_v54 = vsel %vm479_vm3, %v6739_v61, %v6730_v44  ;;  %v7441_v29 = vpop.f32.mrf.mxu1 }
0x1a8e   :  { %12937 = vmatprep.mubr.msk.f32.mxu0 %vm42_vm0, %v6742_v54 }
0x1a8f   :  { %v12895_v63 = vpop.f32.mrf.mxu1 }
0x1a91   :  { %v7666_v32 = vpop.f32.mrf.mxu1 }
0x1a92   :  { %7707 = vrot.lane.b32.xlu1 %v7666_v32, %s13896_s12  ;;  %v11244_v32 = vld [vmem:[%s17892_s5 + $0x58] sm:$0xff] }
0x1a93   :  { %v12919_v42 = vpop.f32.mrf.mxu1  ;;  %12943 = vmatprep.subr.mxu1 %v11244_v32 }
0x1a94   :  { %v11243_v42 = vld [vmem:[%s17892_s5 + $0x50] sm:$0xff]  ;;  %12944 = vmatpush3.msra.mxu1 %v11244_v32  ;;  %v11259_v32 = vld [vmem:[%s17893_s6 + $0x140] sm:$0xff] }
0x1a95   :  { %v7671_v46 = vpop.f32.mrf.mxu1  ;;  %12945 = vmatprep.subr.mxu1 %v11243_v42 }
0x1a96   :  { %7687 = vrot.lane.b32.xlu1 %v7206_v38, %s13894_s26  ;;  %7709 = vrot.lane.b32.xlu0 %v7671_v46, %s13896_s12  ;;  %v11242_v46 = vld [vmem:[%s17892_s5 + $0x48] sm:$0xff] }
0x1a97   :  { %v12922_v3 = vpop.f32.mrf.mxu1  ;;  %12946 = vmatpush3.msra.mxu1 %v11243_v42  ;;  %v11258_v42 = vld [vmem:[%s17893_s6 + $0x138] sm:$0xff] }
0x1a98   :  { %v11241_v3 = vld [vmem:[%s17892_s5 + $0x40] sm:$0xff]  ;;  %12947 = vmatprep.subr.mxu1 %v11242_v46 }
0x1a99   :  { %12948 = vmatpush3.msra.mxu1 %v11242_v46  ;;  %v11257_v46 = vld [vmem:[%s17893_s6 + $0x130] sm:$0xff] }
0x1a9a   :  { %7699 = vrot.lane.b32.xlu1 %v7441_v29, %s13895_s9  ;;  %12949 = vmatprep.subr.mxu1 %v11241_v3 }
0x1a9b   :  { %12950 = vmatpush3.msra.mxu1 %v11241_v3 }
0x1ac3   :  { %v7684_v30 = vpop.permute.xlu0 %7683 }
0x1ac4   :  { %v7716_v21 = vsel %vm386_vm2, %v6961_v33, %v7684_v30 }
0x1ac6   :  { %v7676_v26 = vpop.f32.mrf.mxu1 }
0x1ac7   :  { %7711 = vrot.lane.b32.xlu1 %v7676_v26, %s13896_s12 }
0x1ac8   :  { %v12925_v39 = vpop.f32.mrf.mxu1 }
0x1acf   :  { %v7696_v18 = vpop.permute.xlu0 %7695 }
0x1ad0   :  { %v7719_v23 = vsel %vm1355_vm4, %v7716_v21, %v7696_v18 }
0x1ad3   :  { %v7686_v43 = vpop.permute.xlu0 %7685 }
0x1ad4   :  { %v7717_v45 = vsel %vm386_vm2, %v6966_v47, %v7686_v43  ;;  %v16734_v47 = vld [vmem:[%s17890_s7 + $0x10] sm:$0xff] }
0x1ad5   :  { %v7733_v56 = vrot.slane %v16734_v47, %v14812_v12 }
0x1ad7   :  { %v7698_v50 = vpop.permute.xlu0 %7697 }
0x1ad8   :  { %v7720_v2 = vsel %vm1355_vm4, %v7717_v45, %v7698_v50 }
0x1b04   :  { %v7708_v15 = vpop.permute.xlu1 %7707 }
0x1b05   :  { %v7722_v11 = vsel %vm479_vm3, %v7719_v23, %v7708_v15 }
0x1b06   :  { %12938 = vmatmul.mubr.msk.f32.gmra.mxu0 %vm42_vm0, %v7722_v11 }
0x1b08   :  { %v7710_v8 = vpop.permute.xlu0 %7709  ;;  %v7688_v7 = vpop.permute.xlu1 %7687 }
0x1b09   :  { %v7723_v41 = vsel %vm479_vm3, %v7720_v2, %v7710_v8  ;;  %v7718_v13 = vsel %vm386_vm2, %v16692_v20, %v7688_v7 }
0x1b0a   :  { %12940 = vmatprep.mubr.msk.f32.mxu0 %vm42_vm0, %v7723_v41 }
0x1b0c   :  { %v7700_v28 = vpop.permute.xlu1 %7699 }
0x1b0d   :  { %v7721_v0 = vsel %vm1355_vm4, %v7718_v13, %v7700_v28 }
0x1b39   :  { %v7712_v33 = vpop.permute.xlu1 %7711 }
0x1b3a   :  { %v7724_v22 = vsel %vm479_vm3, %v7721_v0, %v7712_v33 }
0x1b3b   :  { %12941 = vmatmul.mubr.msk.f32.gmra.mxu0 %vm42_vm0, %v7724_v22 }
0x1b4a   :  { %v12936_v48 = vpop.f32.mrf.mxu0 }
0x1b4b   :  { %v7824_v10 = vadd.f32 %v12936_v48, %v7733_v56 }
0x1b4c   :  { %v7818_v35 = vpop.f32.mrf.mxu0 }
0x1b4d   :  { %v16739_v20 = vadd.f32 %v7824_v10, %v15949_v24  ;;  %v7819_v17 = vadd.f32 %v7818_v35, %v7733_v56 }
0x1b4f   :  { %v16742_v52 = vadd.f32 %v7819_v17, %v15952_v58  ;;  %v7856_v38 = vsel %vm42_vm0, %v16739_v20, 0.0 }
0x1b50   :  { %7857 = vadd.xlane.f32.xlu1 %v7856_v38 }
0x1b51   :  { %v7853_v6 = vsel %vm42_vm0, %v16742_v52, 0.0 }
0x1b52   :  { %7854 = vadd.xlane.f32.xlu0 %v7853_v6 }
0x1bc6   :  { %v12939_v59 = vpop.f32.mrf.mxu0 }
0x1bc7   :  { %v7834_v36 = vadd.f32 %v12939_v59, %v7733_v56  ;;  %v17944_v59 = vld [vmem:[#allocation2_spill] sm:$0xff] }
0x1bc8   :  { %v7828_v51 = vpop.f32.mrf.mxu0 }
0x1bc9   :  { %v7829_v53 = vadd.f32 %v7828_v51, %v7733_v56  ;;  %v16752_v24 = vadd.f32 %v7834_v36, %v15959_v1  ;;  %v16814_v51 = vrot.slane %v16734_v47, %v17944_v59 }
0x1bcb   :  { %v16749_v40 = vadd.f32 %v7829_v53, %v15962_v37  ;;  %v7862_v25 = vsel %vm42_vm0, %v16752_v24, 0.0 }
0x1bcd   :  { %v7859_v58 = vsel %vm42_vm0, %v16749_v40, 0.0 }
0x1bce   :  { %7860 = vadd.xlane.f32.xlu0 %v7859_v58 }
0x1bd2   :  { %7863 = vadd.xlane.f32.xlu0 %v7862_v25  ;;  %v17945_v25 = vld [vmem:[#allocation6_spill] sm:$0xff] }
0x1bd9   :  { %v7858_v34 = vpop.xlane.xlu1 %7857 }
0x1bda   :  { %v7872_v57 = vmul.f32 0.03125, %v7858_v34  ;;  %v16819_v34 = vrot.slane %v16734_v47, %v17945_v25 }
0x1bdb   :  { %v7855_v60 = vpop.xlane.xlu0 %7854 }
0x1bdc   :  { %v7871_v14 = vmul.f32 0.03125, %v7855_v60  ;;  %v16759_v62 = vsub.f32 %v16739_v20, %v7872_v57 }
0x1bde   :  { %v7877_v1 = vsub.f32 %v16742_v52, %v7871_v14  ;;  %v7884_v61 = vmul.f32 %v16759_v62, %v16759_v62 }
0x1be0   :  { %v7883_v54 = vmul.f32 %v7877_v1, %v7877_v1  ;;  %v7892_v29 = vsel %vm42_vm0, %v7884_v61, 0.0 }
0x1be2   :  { %v7889_v63 = vsel %vm42_vm0, %v7883_v54, 0.0 }
0x1bfb   :  { %v12942_v16 = vpop.f32.mrf.mxu0 }
0x1bfc   :  { %v7844_v37 = vadd.f32 %v12942_v16, %v7733_v56 }
0x1bfd   :  { %v7838_v31 = vpop.f32.mrf.mxu0 }
0x1bfe   :  { %v16763_v49 = vadd.f32 %v7844_v37, %v17942_v5  ;;  %v7839_v55 = vadd.f32 %v7838_v31, %v7733_v56  ;;  %v11265_v37 = vld [vmem:[%s17893_s6 + $0x170] sm:$0xff]  ;;  %v11264_v31 = vld [vmem:[%s17893_s6 + $0x168] sm:$0xff] }
0x1c00   :  { %v16766_v27 = vadd.f32 %v7839_v55, %v17943_v9  ;;  %v7868_v4 = vsel %vm42_vm0, %v16763_v49, 0.0 }
0x1c01   :  { %7869 = vadd.xlane.f32.xlu1 %v7868_v4  ;;  %v11263_v4 = vld [vmem:[%s17893_s6 + $0x160] sm:$0xff] }
0x1c02   :  { %v7865_v44 = vsel %vm42_vm0, %v16766_v27, 0.0 }
0x1c03   :  { %7866 = vadd.xlane.f32.xlu0 %v7865_v44  ;;  %v11262_v44 = vld [vmem:[%s17893_s6 + $0x158] sm:$0xff] }
0x1c05   :  { %7893 = vadd.xlane.f32.xlu1 %v7892_v29  ;;  %v11261_v29 = vld [vmem:[%s17893_s6 + $0x150] sm:$0xff] }
0x1c07   :  { %7890 = vadd.xlane.f32.xlu0 %v7889_v63  ;;  %v11260_v63 = vld [vmem:[%s17893_s6 + $0x148] sm:$0xff] }
0x1c57   :  { %v7861_v26 = vpop.xlane.xlu0 %7860 }
0x1c58   :  { %v7873_v39 = vmul.f32 0.03125, %v7861_v26  ;;  %v11256_v26 = vld [vmem:[%s17893_s6 + $0x128] sm:$0xff] }
0x1c5a   :  { %v16789_v30 = vsub.f32 %v16749_v40, %v7873_v39 }
0x1c5b   :  { %v7864_v18 = vpop.xlane.xlu0 %7863 }
0x1c5c   :  { %v7874_v43 = vmul.f32 0.03125, %v7864_v18  ;;  %v7885_v21 = vmul.f32 %v16789_v30, %v16789_v30  ;;  %v11255_v18 = vld [vmem:[%s17893_s6 + $0x120] sm:$0xff] }
0x1c5e   :  { %v16794_v23 = vsub.f32 %v16752_v24, %v7874_v43  ;;  %v7895_v50 = vsel %vm42_vm0, %v7885_v21, 0.0 }
0x1c5f   :  { %7896 = vadd.xlane.f32.xlu0 %v7895_v50  ;;  %v11254_v50 = vld [vmem:[%s17893_s6 + $0x118] sm:$0xff] }
0x1c60   :  { %v7886_v15 = vmul.f32 %v16794_v23, %v16794_v23 }
0x1c62   :  { %v7898_v11 = vsel %vm42_vm0, %v7886_v15, 0.0 }
0x1c63   :  { %7899 = vadd.xlane.f32.xlu1 %v7898_v11 }
0x1c8a   :  { %v7870_v45 = vpop.xlane.xlu1 %7869 }
0x1c8b   :  { %v7876_v2 = vmul.f32 0.03125, %v7870_v45  ;;  %v11252_v45 = vld [vmem:[%s17893_s6 + $0x108] sm:$0xff] }
0x1c8c   :  { %v7867_v8 = vpop.xlane.xlu0 %7866 }
0x1c8d   :  { %v16801_v41 = vsub.f32 %v16763_v49, %v7876_v2  ;;  %v7875_v7 = vmul.f32 0.03125, %v7867_v8 }
0x1c8e   :  { %v7894_v28 = vpop.xlane.xlu1 %7893 }
0x1c8f   :  { %v16804_v13 = vsub.f32 %v16766_v27, %v7875_v7  ;;  %v7908_v0 = vmul.f32 0.03125, %v7894_v28  ;;  %v7888_v33 = vmul.f32 %v16801_v41, %v16801_v41 }
0x1c90   :  { %v7891_v22 = vpop.xlane.xlu0 %7890 }
0x1c91   :  { %v7914_v56 = vadd.f32 1e-05, %v7908_v0  ;;  %v7907_v48 = vmul.f32 0.03125, %v7891_v22  ;;  %v7904_v10 = vsel %vm42_vm0, %v7888_v33, 0.0  ;;  %v7887_v35 = vmul.f32 %v16804_v13, %v16804_v13 }
0x1c92   :  { %7905 = vadd.xlane.f32.xlu1 %v7904_v10 }
0x1c93   :  { %13721 = vrsqrt.f32 %v7914_v56  ;;  %v7913_v17 = vadd.f32 1e-05, %v7907_v48  ;;  %v7901_v38 = vsel %vm42_vm0, %v7887_v35, 0.0 }
0x1c94   :  { %7902 = vadd.xlane.f32.xlu0 %v7901_v38 }
0x1c95   :  { %13723 = vrsqrt.f32 %v7913_v17 }
0x1ca0   :  { %v13722_v6 = vpop.eup %13721 }
0x1ca1   :  { %v7926_v36 = vmul.f32 %v13722_v6, %v16759_v62  ;;  %v11266_v62 = vld [vmem:[%s17893_s6 + $0x178] sm:$0xff] }
0x1ca2   :  { %v13724_v53 = vpop.eup %13723  ;;  %12960 = vmatprep.subr.mxu0 %v11266_v62 }
0x1ca3   :  { %v7925_v58 = vmul.f32 %v13724_v53, %v7877_v1  ;;  %v7936_v60 = vmul.f32 %v16814_v51, %v7926_v36  ;;  %12961 = vmatpush3.msra.mxu0 %v11266_v62 }
0x1ca4   :  { %12962 = vmatprep.subr.mxu0 %v11265_v37 }
0x1ca5   :  { %v7935_v57 = vmul.f32 %v16814_v51, %v7925_v58  ;;  %v7946_v16 = vadd.f32 %v16819_v34, %v7936_v60  ;;  %12963 = vmatpush3.msra.mxu0 %v11265_v37  ;;  %v17946_v58 = vld [vmem:[#allocation7_spill] sm:$0xff] }
0x1ca6   :  { %12964 = vmatprep.subr.mxu0 %v11264_v31  ;;  %v7959_v60 = vrot.slane %v16734_v47, %v17946_v58 }
0x1ca7   :  { %v7945_v14 = vadd.f32 %v16819_v34, %v7935_v57  ;;  %12965 = vmatpush3.msra.mxu0 %v11264_v31 }
0x1ca8   :  { %12966 = vmatprep.subr.mxu0 %v11263_v4 }
0x1ca9   :  { %12951 = vmatprep.mubr.msk.f32.mxu1 %vm42_vm0, %v7945_v14  ;;  %12967 = vmatpush3.msra.mxu0 %v11263_v4 }
0x1caa   :  { %12952 = vmatmul.mubr.msk.f32.vlgmr.msra.gmra.mxu1 %vm42_vm0, %v7946_v16  ;;  %12968 = vmatprep.subr.mxu0 %v11262_v44 }
0x1cab   :  { %12969 = vmatpush3.msra.mxu0 %v11262_v44 }
0x1cac   :  { %12970 = vmatprep.subr.mxu0 %v11261_v29 }
0x1cad   :  { %12971 = vmatpush3.msra.mxu0 %v11261_v29 }
0x1cae   :  { %12972 = vmatprep.subr.mxu0 %v11260_v63 }
0x1caf   :  { %12973 = vmatpush3.msra.mxu0 %v11260_v63 }
0x1cb0   :  { %12974 = vmatprep.subr.mxu0 %v11259_v32 }
0x1cb1   :  { %12975 = vmatpush3.msra.mxu0 %v11259_v32 }
0x1cb2   :  { %12976 = vmatprep.subr.mxu0 %v11258_v42 }
0x1cb3   :  { %12977 = vmatpush3.msra.mxu0 %v11258_v42 }
0x1cb4   :  { %12978 = vmatprep.subr.mxu0 %v11257_v46 }
0x1cb5   :  { %12979 = vmatpush3.msra.mxu0 %v11257_v46 }
0x1cb6   :  { %12980 = vmatprep.subr.mxu0 %v11256_v26 }
0x1cb7   :  { %12981 = vmatpush3.msra.mxu0 %v11256_v26 }
0x1cb8   :  { %12982 = vmatprep.subr.mxu0 %v11255_v18 }
0x1cb9   :  { %12983 = vmatpush3.msra.mxu0 %v11255_v18 }
0x1cba   :  { %12984 = vmatprep.subr.mxu0 %v11254_v50 }
0x1cbb   :  { %12985 = vmatpush3.msra.mxu0 %v11254_v50 }
0x1ce8   :  { %v7897_v1 = vpop.xlane.xlu0 %7896 }
0x1ce9   :  { %v7909_v5 = vmul.f32 0.03125, %v7897_v1 }
0x1ceb   :  { %v7915_v55 = vadd.f32 1e-05, %v7909_v5 }
0x1cec   :  { %v7900_v9 = vpop.xlane.xlu1 %7899 }
0x1ced   :  { %13725 = vrsqrt.f32 %v7915_v55  ;;  %v7910_v61 = vmul.f32 0.03125, %v7900_v9 }
0x1cef   :  { %v7916_v54 = vadd.f32 1e-05, %v7910_v61 }
0x1cf1   :  { %13727 = vrsqrt.f32 %v7916_v54 }
0x1cfa   :  { %v13726_v3 = vpop.eup %13725 }
0x1cfb   :  { %v7927_v39 = vmul.f32 %v13726_v3, %v16789_v30  ;;  %v11253_v30 = vld [vmem:[%s17893_s6 + $0x110] sm:$0xff] }
0x1cfc   :  { %12986 = vmatprep.subr.mxu0 %v11253_v30 }
0x1cfd   :  { %v7937_v43 = vmul.f32 %v16814_v51, %v7927_v39  ;;  %12987 = vmatpush3.msra.mxu0 %v11253_v30 }
0x1cfe   :  { %v13728_v21 = vpop.eup %13727  ;;  %12988 = vmatprep.subr.mxu0 %v11252_v45 }
0x1cff   :  { %v7947_v15 = vadd.f32 %v16819_v34, %v7937_v43  ;;  %v7928_v11 = vmul.f32 %v13728_v21, %v16794_v23  ;;  %v11251_v23 = vld [vmem:[%s17893_s6 + $0x100] sm:$0xff]  ;;  %12989 = vmatpush3.msra.mxu0 %v11252_v45 }
0x1d00   :  { %12990 = vmatprep.subr.mxu0 %v11251_v23 }
0x1d01   :  { %12954 = vmatprep.mubr.msk.f32.mxu1 %vm42_vm0, %v7947_v15  ;;  %v7938_v2 = vmul.f32 %v16814_v51, %v7928_v11  ;;  %12991 = vmatpush3.msra.mxu0 %v11251_v23 }
0x1d02   :  { %13033 = vmatprep.subr.mxu0 %v17920_v19 }
0x1d03   :  { %v7948_v8 = vadd.f32 %v16819_v34, %v7938_v2 }
0x1d05   :  { %12955 = vmatmul.mubr.msk.f32.gmra.mxu1 %vm42_vm0, %v7948_v8 }
0x1d1b   :  { %v7906_v7 = vpop.xlane.xlu1 %7905 }
0x1d1c   :  { %v7912_v28 = vmul.f32 0.03125, %v7906_v7 }
0x1d1d   :  { %v7903_v0 = vpop.xlane.xlu0 %7902 }
0x1d1e   :  { %v7918_v33 = vadd.f32 1e-05, %v7912_v28  ;;  %v7911_v22 = vmul.f32 0.03125, %v7903_v0 }
0x1d20   :  { %13729 = vrsqrt.f32 %v7918_v33  ;;  %v7917_v56 = vadd.f32 1e-05, %v7911_v22 }
0x1d22   :  { %13731 = vrsqrt.f32 %v7917_v56  ;;  %v17947_v56 = vld [vmem:[#allocation8_spill] sm:$0xff] }
0x1d2d   :  { %v13730_v48 = vpop.eup %13729 }
0x1d2e   :  { %v7930_v10 = vmul.f32 %v13730_v48, %v16801_v41  ;;  %v8224_v48 = vrot.slane %v16734_v47, %v17947_v56 }
0x1d2f   :  { %v13732_v35 = vpop.eup %13731 }
0x1d30   :  { %v7929_v17 = vmul.f32 %v13732_v35, %v16804_v13  ;;  %v7940_v38 = vmul.f32 %v16814_v51, %v7930_v10 }
0x1d32   :  { %v7939_v6 = vmul.f32 %v16814_v51, %v7929_v17  ;;  %v7950_v53 = vadd.f32 %v16819_v34, %v7940_v38 }
0x1d34   :  { %v7949_v36 = vadd.f32 %v16819_v34, %v7939_v6 }
0x1d36   :  { %12957 = vmatprep.mubr.msk.f32.mxu1 %vm42_vm0, %v7949_v36 }
0x1d37   :  { %12958 = vmatmul.mubr.msk.f32.gmra.mxu1 %vm42_vm0, %v7950_v53 }
0x1d6a   :  { %v12953_v57 = vpop.f32.mrf.mxu1 }
0x1d6b   :  { %v8050_v41 = vadd.f32 %v12953_v57, %v7959_v60 }
0x1d6c   :  { %v8044_v14 = vpop.f32.mrf.mxu1 }
0x1d6d   :  { %v8080_v16 = vmul.f32 0.70710677, %v8050_v41  ;;  %v8045_v13 = vadd.f32 %v8044_v14, %v7959_v60  ;;  %v8074_v5 = vmul.f32 0.5, %v8050_v41 }
0x1d6f   :  { %13733 = verf.f32 %v8080_v16  ;;  %v8079_v62 = vmul.f32 0.70710677, %v8045_v13  ;;  %v8073_v1 = vmul.f32 0.5, %v8045_v13 }
0x1d71   :  { %13735 = verf.f32 %v8079_v62 }
0x1d7c   :  { %v13734_v51 = vpop.eup %13733 }
0x1d7d   :  { %v8092_v31 = vadd.f32 1.0, %v13734_v51 }
0x1d7e   :  { %v13736_v37 = vpop.eup %13735 }
0x1d7f   :  { %v8091_v34 = vadd.f32 1.0, %v13736_v37  ;;  %v8098_v9 = vmul.f32 %v8092_v31, %v8074_v5 }
0x1d81   :  { %v8097_v55 = vmul.f32 %v8091_v34, %v8073_v1 }
0x1d83   :  { %12992 = vmatprep.mubr.f32.mxu0 %v8097_v55 }
0x1d84   :  { %12993 = vmatmul.mubr.f32.vlgmr.msra.gmra.mxu0 %v8098_v9 }
0x1dc5   :  { %v12956_v4 = vpop.f32.mrf.mxu1 }
0x1dc6   :  { %v8060_v61 = vadd.f32 %v12956_v4, %v7959_v60 }
0x1dc7   :  { %v8054_v44 = vpop.f32.mrf.mxu1 }
0x1dc8   :  { %v8082_v54 = vmul.f32 0.70710677, %v8060_v61  ;;  %v8055_v29 = vadd.f32 %v8054_v44, %v7959_v60  ;;  %v8076_v39 = vmul.f32 0.5, %v8060_v61 }
0x1dca   :  { %13737 = verf.f32 %v8082_v54  ;;  %v8081_v63 = vmul.f32 0.70710677, %v8055_v29  ;;  %v8075_v3 = vmul.f32 0.5, %v8055_v29 }
0x1dcc   :  { %13739 = verf.f32 %v8081_v63  ;;  %v11271_v63 = vld [vmem:[%s17889_s3 + $0x78] sm:$0xff] }
0x1dcd   :  { %13001 = vmatprep.subr.mxu1 %v11271_v63 }
0x1dce   :  { %13002 = vmatpush3.msra.mxu1 %v11271_v63 }
0x1dd7   :  { %v13738_v32 = vpop.eup %13737 }
0x1dd8   :  { %v8094_v46 = vadd.f32 1.0, %v13738_v32  ;;  %v11270_v32 = vld [vmem:[%s17889_s3 + $0x70] sm:$0xff] }
0x1dd9   :  { %v13740_v42 = vpop.eup %13739  ;;  %13003 = vmatprep.subr.mxu1 %v11270_v32 }
0x1dda   :  { %v8093_v26 = vadd.f32 1.0, %v13740_v42  ;;  %v8100_v43 = vmul.f32 %v8094_v46, %v8076_v39  ;;  %v11269_v42 = vld [vmem:[%s17889_s3 + $0x68] sm:$0xff]  ;;  %13004 = vmatpush3.msra.mxu1 %v11270_v32  ;;  %v11268_v46 = vld [vmem:[%s17889_s3 + $0x60] sm:$0xff] }
0x1ddb   :  { %13005 = vmatprep.subr.mxu1 %v11269_v42 }
0x1ddc   :  { %v8099_v18 = vmul.f32 %v8093_v26, %v8075_v3  ;;  %13006 = vmatpush3.msra.mxu1 %v11269_v42 }
0x1ddd   :  { %13007 = vmatprep.subr.mxu1 %v11268_v46 }
0x1dde   :  { %12995 = vmatprep.mubr.f32.mxu0 %v8099_v18  ;;  %13008 = vmatpush3.msra.mxu1 %v11268_v46 }
0x1ddf   :  { %12996 = vmatmul.mubr.f32.gmra.mxu0 %v8100_v43  ;;  %13018 = vmatprep.subr.mxu1 %v17920_v19 }
0x1df7   :  { %v12959_v21 = vpop.f32.mrf.mxu1 }
0x1df8   :  { %v8070_v50 = vadd.f32 %v12959_v21, %v7959_v60 }
0x1df9   :  { %v8064_v15 = vpop.f32.mrf.mxu1 }
0x1dfa   :  { %v8084_v11 = vmul.f32 0.70710677, %v8070_v50  ;;  %v8065_v30 = vadd.f32 %v8064_v15, %v7959_v60  ;;  %v8078_v0 = vmul.f32 0.5, %v8070_v50 }
0x1dfc   :  { %13741 = verf.f32 %v8084_v11  ;;  %v8083_v45 = vmul.f32 0.70710677, %v8065_v30  ;;  %v8077_v7 = vmul.f32 0.5, %v8065_v30 }
0x1dfe   :  { %13743 = verf.f32 %v8083_v45 }
0x1e09   :  { %v13742_v2 = vpop.eup %13741 }
0x1e0a   :  { %v8096_v8 = vadd.f32 1.0, %v13742_v2 }
0x1e0b   :  { %v13744_v23 = vpop.eup %13743 }
0x1e0c   :  { %v8095_v28 = vadd.f32 1.0, %v13744_v23  ;;  %v8102_v22 = vmul.f32 %v8096_v8, %v8078_v0 }
0x1e0e   :  { %v8101_v33 = vmul.f32 %v8095_v28, %v8077_v7 }
0x1e10   :  { %12998 = vmatprep.mubr.f32.mxu0 %v8101_v33 }
0x1e11   :  { %12999 = vmatmul.mubr.f32.gmra.mxu0 %v8102_v22 }
0x1e12   :  { %13039 = vmatprep.mubr.msk.f32.mxu0 %vm13883_vm1, %v17920_v19 }
0x1e44   :  { %v12994_v10 = vpop.f32.mrf.mxu0 }
0x1e45   :  { %v8216_v35 = vadd.f32 %v12994_v10, %v16739_v20 }
0x1e46   :  { %v8186_v17 = vpop.f32.mrf.mxu0 }
0x1e47   :  { %v16899_v38 = vadd.f32 %v8224_v48, %v8216_v35  ;;  %v8215_v6 = vadd.f32 %v8186_v17, %v16742_v52 }
0x1e49   :  { %v16902_v36 = vadd.f32 %v8224_v48, %v8215_v6  ;;  %v8236_v53 = vsel %vm42_vm0, %v16899_v38, 0.0 }
0x1e4a   :  { %8237 = vadd.xlane.f32.xlu1 %v8236_v53 }
0x1e4b   :  { %v8233_v60 = vsel %vm42_vm0, %v16902_v36, 0.0 }
0x1e4c   :  { %8234 = vadd.xlane.f32.xlu0 %v8233_v60 }
0x1e9f   :  { %v12997_v57 = vpop.f32.mrf.mxu0 }
0x1ea0   :  { %v8218_v47 = vadd.f32 %v12997_v57, %v16752_v24  ;;  %v11267_v57 = vld [vmem:[%s17890_s7 + $0x18] sm:$0xff] }
0x1ea1   :  { %v8196_v41 = vpop.f32.mrf.mxu0 }
0x1ea2   :  { %v16909_v20 = vadd.f32 %v8224_v48, %v8218_v47  ;;  %v8217_v14 = vadd.f32 %v8196_v41, %v16749_v40  ;;  %v17948_v41 = vld [vmem:[#allocation3_spill] sm:$0xff] }
0x1ea4   :  { %v16912_v16 = vadd.f32 %v8224_v48, %v8217_v14  ;;  %v8242_v52 = vsel %vm42_vm0, %v16909_v20, 0.0  ;;  %v8314_v14 = vrot.slane %v11267_v57, %v17948_v41 }
0x1ea5   :  { %8243 = vadd.xlane.f32.xlu1 %v8242_v52 }
0x1ea6   :  { %v8239_v13 = vsel %vm42_vm0, %v16912_v16, 0.0 }
0x1ea7   :  { %8240 = vadd.xlane.f32.xlu0 %v8239_v13 }
0x1ed1   :  { %v13000_v62 = vpop.f32.mrf.mxu0 }
0x1ed2   :  { %v8220_v51 = vadd.f32 %v13000_v62, %v16763_v49 }
0x1ed3   :  { %v8238_v37 = vpop.xlane.xlu1 %8237  ;;  %v8206_v24 = vpop.f32.mrf.mxu0 }
0x1ed4   :  { %v16919_v31 = vadd.f32 %v8224_v48, %v8220_v51  ;;  %v8252_v1 = vmul.f32 0.03125, %v8238_v37  ;;  %v8219_v40 = vadd.f32 %v8206_v24, %v16766_v27  ;;  %v17949_v51 = vld [vmem:[#allocation4_spill] sm:$0xff] }
0x1ed5   :  { %v8235_v34 = vpop.xlane.xlu0 %8234  ;;  %v8324_v37 = vrot.slane %v11267_v57, %v17949_v51 }
0x1ed6   :  { %v8258_v5 = vsub.f32 %v16899_v38, %v8252_v1  ;;  %v16923_v55 = vadd.f32 %v8224_v48, %v8219_v40  ;;  %v8251_v9 = vmul.f32 0.03125, %v8235_v34  ;;  %v8248_v4 = vsel %vm42_vm0, %v16919_v31, 0.0 }
0x1ed7   :  { %8249 = vadd.xlane.f32.xlu1 %v8248_v4 }
0x1ed8   :  { %v8257_v61 = vsub.f32 %v16902_v36, %v8251_v9  ;;  %v8245_v49 = vsel %vm42_vm0, %v16923_v55, 0.0  ;;  %v8264_v44 = vmul.f32 %v8258_v5, %v8258_v5 }
0x1ed9   :  { %8246 = vadd.xlane.f32.xlu0 %v8245_v49 }
0x1eda   :  { %v8272_v54 = vsel %vm42_vm0, %v8264_v44, 0.0  ;;  %v8263_v27 = vmul.f32 %v8257_v61, %v8257_v61 }
0x1edb   :  { %8273 = vadd.xlane.f32.xlu1 %v8272_v54 }
0x1edc   :  { %v8269_v29 = vsel %vm42_vm0, %v8263_v27, 0.0 }
0x1edd   :  { %8270 = vadd.xlane.f32.xlu0 %v8269_v29 }
0x1f2e   :  { %v8244_v3 = vpop.xlane.xlu1 %8243 }
0x1f2f   :  { %v8254_v26 = vmul.f32 0.03125, %v8244_v3 }
0x1f30   :  { %v8241_v39 = vpop.xlane.xlu0 %8240 }
0x1f31   :  { %v8260_v18 = vsub.f32 %v16909_v20, %v8254_v26  ;;  %v8253_v43 = vmul.f32 0.03125, %v8241_v39 }
0x1f33   :  { %v8259_v21 = vsub.f32 %v16912_v16, %v8253_v43  ;;  %v8266_v50 = vmul.f32 %v8260_v18, %v8260_v18 }
0x1f35   :  { %v8278_v15 = vsel %vm42_vm0, %v8266_v50, 0.0  ;;  %v8265_v11 = vmul.f32 %v8259_v21, %v8259_v21 }
0x1f36   :  { %8279 = vadd.xlane.f32.xlu1 %v8278_v15 }
0x1f37   :  { %v8275_v30 = vsel %vm42_vm0, %v8265_v11, 0.0 }
0x1f38   :  { %8276 = vadd.xlane.f32.xlu0 %v8275_v30 }
0x1f60   :  { %v8250_v45 = vpop.xlane.xlu1 %8249 }
0x1f61   :  { %v8256_v2 = vmul.f32 0.03125, %v8250_v45 }
0x1f62   :  { %v8247_v23 = vpop.xlane.xlu0 %8246 }
0x1f63   :  { %v8262_v8 = vsub.f32 %v16919_v31, %v8256_v2  ;;  %v8255_v7 = vmul.f32 0.03125, %v8247_v23 }
0x1f64   :  { %v8274_v28 = vpop.xlane.xlu1 %8273 }
0x1f65   :  { %v8261_v0 = vsub.f32 %v16923_v55, %v8255_v7  ;;  %v8288_v33 = vmul.f32 0.03125, %v8274_v28  ;;  %v8268_v22 = vmul.f32 %v8262_v8, %v8262_v8 }
0x1f66   :  { %v8271_v48 = vpop.xlane.xlu0 %8270 }
0x1f67   :  { %v8294_v10 = vadd.f32 1e-05, %v8288_v33  ;;  %v8287_v35 = vmul.f32 0.03125, %v8271_v48  ;;  %v8284_v17 = vsel %vm42_vm0, %v8268_v22, 0.0  ;;  %v8267_v6 = vmul.f32 %v8261_v0, %v8261_v0  ;;  %v17950_v33 = vld [vmem:[#allocation5_spill] sm:$0xff] }
0x1f68   :  { %8285 = vadd.xlane.f32.xlu1 %v8284_v17  ;;  %v8339_v22 = vrot.slane %v11267_v57, %v17950_v33 }
0x1f69   :  { %13745 = vrsqrt.f32 %v8294_v10  ;;  %v8293_v53 = vadd.f32 1e-05, %v8287_v35  ;;  %v8281_v60 = vsel %vm42_vm0, %v8267_v6, 0.0 }
0x1f6a   :  { %8282 = vadd.xlane.f32.xlu0 %v8281_v60 }
0x1f6b   :  { %13747 = vrsqrt.f32 %v8293_v53 }
0x1f76   :  { %v13746_v47 = vpop.eup %13745 }
0x1f77   :  { %v8306_v52 = vmul.f32 %v13746_v47, %v8258_v5 }
0x1f78   :  { %v13748_v13 = vpop.eup %13747 }
0x1f79   :  { %v8305_v62 = vmul.f32 %v13748_v13, %v8257_v61  ;;  %v8316_v24 = vmul.f32 %v8314_v14, %v8306_v52 }
0x1f7b   :  { %v8315_v1 = vmul.f32 %v8314_v14, %v8305_v62  ;;  %v8326_v34 = vadd.f32 %v8324_v37, %v8316_v24 }
0x1f7d   :  { %v8325_v40 = vadd.f32 %v8324_v37, %v8315_v1 }
0x1f7f   :  { %13009 = vmatprep.mubr.msk.f32.mxu1 %vm42_vm0, %v8325_v40 }
0x1f80   :  { %13010 = vmatmul.mubr.msk.f32.vlgmr.msra.gmra.mxu1 %vm42_vm0, %v8326_v34 }
0x1fbf   :  { %v8280_v9 = vpop.xlane.xlu1 %8279 }
0x1fc0   :  { %v8290_v4 = vmul.f32 0.03125, %v8280_v9 }
0x1fc1   :  { %v8277_v49 = vpop.xlane.xlu0 %8276 }
0x1fc2   :  { %v8296_v44 = vadd.f32 1e-05, %v8290_v4  ;;  %v8289_v54 = vmul.f32 0.03125, %v8277_v49 }
0x1fc4   :  { %13749 = vrsqrt.f32 %v8296_v44  ;;  %v8295_v27 = vadd.f32 1e-05, %v8289_v54 }
0x1fc6   :  { %13751 = vrsqrt.f32 %v8295_v27 }
0x1fd1   :  { %v13750_v5 = vpop.eup %13749 }
0x1fd2   :  { %v8308_v61 = vmul.f32 %v13750_v5, %v8260_v18 }
0x1fd3   :  { %v13752_v29 = vpop.eup %13751 }
0x1fd4   :  { %v8307_v63 = vmul.f32 %v13752_v29, %v8259_v21  ;;  %v8318_v32 = vmul.f32 %v8314_v14, %v8308_v61 }
0x1fd6   :  { %v8317_v42 = vmul.f32 %v8314_v14, %v8307_v63  ;;  %v8328_v3 = vadd.f32 %v8324_v37, %v8318_v32 }
0x1fd8   :  { %v8327_v46 = vadd.f32 %v8324_v37, %v8317_v42 }
0x1fda   :  { %13012 = vmatprep.mubr.msk.f32.mxu1 %vm42_vm0, %v8327_v46 }
0x1fdb   :  { %13013 = vmatmul.mubr.msk.f32.gmra.mxu1 %vm42_vm0, %v8328_v3 }
0x1ff1   :  { %v8286_v26 = vpop.xlane.xlu1 %8285 }
0x1ff2   :  { %v8292_v39 = vmul.f32 0.03125, %v8286_v26 }
0x1ff3   :  { %v8283_v43 = vpop.xlane.xlu0 %8282 }
0x1ff4   :  { %v8298_v50 = vadd.f32 1e-05, %v8292_v39  ;;  %v8291_v15 = vmul.f32 0.03125, %v8283_v43 }
0x1ff6   :  { %13753 = vrsqrt.f32 %v8298_v50  ;;  %v8297_v11 = vadd.f32 1e-05, %v8291_v15 }
0x1ff8   :  { %13755 = vrsqrt.f32 %v8297_v11 }
0x2003   :  { %v13754_v30 = vpop.eup %13753 }
0x2004   :  { %v8310_v18 = vmul.f32 %v13754_v30, %v8262_v8 }
0x2005   :  { %v13756_v45 = vpop.eup %13755 }
0x2006   :  { %v8309_v21 = vmul.f32 %v13756_v45, %v8261_v0  ;;  %v8320_v2 = vmul.f32 %v8314_v14, %v8310_v18 }
0x2008   :  { %v8319_v23 = vmul.f32 %v8314_v14, %v8309_v21  ;;  %v8330_v28 = vadd.f32 %v8324_v37, %v8320_v2 }
0x200a   :  { %v8329_v7 = vadd.f32 %v8324_v37, %v8319_v23 }
0x200c   :  { %13015 = vmatprep.mubr.msk.f32.mxu1 %vm42_vm0, %v8329_v7 }
0x200d   :  { %13016 = vmatmul.mubr.msk.f32.gmra.mxu1 %vm42_vm0, %v8330_v28 }
0x200e   :  { %13024 = vmatprep.mubr.msk.f32.mxu1 %vm13883_vm1, %v17920_v19 }
0x2040   :  { %v13011_v48 = vpop.f32.mrf.mxu1 }
0x2041   :  { %v16967_v10 = vadd.f32 %v13011_v48, %v8339_v22 }
0x2042   :  { %v8424_v35 = vpop.f32.mrf.mxu1 }
0x2043   :  { %8458 = vrot.lane.b32.xlu1 %v16967_v10, %s13882_s16  ;;  %v16971_v8 = vadd.f32 %v8424_v35, %v8339_v22 }
0x2047   :  { %8456 = vrot.lane.b32.xlu1 %v16971_v8, %s13882_s16 }
0x209b   :  { %v13014_v0 = vpop.f32.mrf.mxu1 }
0x209c   :  { %v17021_v47 = vadd.f32 %v13014_v0, %v8339_v22 }
0x209d   :  { %v8434_v17 = vpop.f32.mrf.mxu1 }
0x209e   :  { %v16975_v6 = vadd.f32 %v8434_v17, %v8339_v22 }
0x20a0   :  { %8695 = vrot.lane.b32.xlu1 %v16975_v6, %s13884_s17  ;;  %8460 = vrot.lane.b32.xlu0 %v16975_v6, %s13882_s16 }
0x20a4   :  { %8691 = vrot.lane.b32.xlu1 %v16971_v8, %s13884_s17  ;;  %8693 = vrot.lane.b32.xlu0 %v16967_v10, %s13884_s17 }
0x20a8   :  { %8930 = vrot.lane.b32.xlu1 %v16975_v6, %s13886_s19  ;;  %8685 = vrot.lane.b32.xlu0 %v16971_v8, %s13885_s18 }
0x20ac   :  { %8928 = vrot.lane.b32.xlu1 %v16967_v10, %s13886_s19  ;;  %8687 = vrot.lane.b32.xlu0 %v16967_v10, %s13885_s18 }
0x20b0   :  { %8926 = vrot.lane.b32.xlu1 %v16971_v8, %s13886_s19  ;;  %8689 = vrot.lane.b32.xlu0 %v16975_v6, %s13885_s18 }
0x20b4   :  { %9165 = vrot.lane.b32.xlu1 %v16975_v6, %s13888_s1  ;;  %8920 = vrot.lane.b32.xlu0 %v16971_v8, %s13887_s20 }
0x20b5   :  { %v8459_v14 = vpop.permute.xlu1 %8458 }
0x20b8   :  { %9163 = vrot.lane.b32.xlu1 %v16967_v10, %s13888_s1  ;;  %8922 = vrot.lane.b32.xlu0 %v16967_v10, %s13887_s20 }
0x20b9   :  { %v8457_v52 = vpop.permute.xlu1 %8456 }
0x20bc   :  { %9161 = vrot.lane.b32.xlu1 %v16971_v8, %s13888_s1  ;;  %8924 = vrot.lane.b32.xlu0 %v16975_v6, %s13887_s20 }
0x20c0   :  { %9155 = vrot.lane.b32.xlu0 %v16971_v8, %s13889_s21 }
0x20c4   :  { %9157 = vrot.lane.b32.xlu0 %v16967_v10, %s13889_s21 }
0x20c8   :  { %9159 = vrot.lane.b32.xlu0 %v16975_v6, %s13889_s21 }
0x20cd   :  { %v13017_v53 = vpop.f32.mrf.mxu1 }
0x20ce   :  { %v17015_v60 = vadd.f32 %v13017_v53, %v8339_v22 }
0x20cf   :  { %v8444_v57 = vpop.f32.mrf.mxu1 }
0x20d0   :  { %9677 = vrot.lane.b32.xlu0 %v17015_v60, %s13884_s17  ;;  %9442 = vrot.lane.b32.xlu1 %v17015_v60, %s13882_s16  ;;  %v17023_v41 = vadd.f32 %v8444_v57, %v8339_v22 }
0x20d4   :  { %9673 = vrot.lane.b32.xlu0 %v17021_v47, %s13884_s17  ;;  %9440 = vrot.lane.b32.xlu1 %v17023_v41, %s13882_s16 }
0x20d8   :  { %9912 = vrot.lane.b32.xlu0 %v17015_v60, %s13886_s19  ;;  %9438 = vrot.lane.b32.xlu1 %v17021_v47, %s13882_s16 }
0x20dc   :  { %9910 = vrot.lane.b32.xlu0 %v17023_v41, %s13886_s19  ;;  %9675 = vrot.lane.b32.xlu1 %v17023_v41, %s13884_s17 }
0x20e0   :  { %9908 = vrot.lane.b32.xlu0 %v17021_v47, %s13886_s19  ;;  %9667 = vrot.lane.b32.xlu1 %v17021_v47, %s13885_s18 }
0x20e4   :  { %10147 = vrot.lane.b32.xlu0 %v17015_v60, %s13888_s1  ;;  %9669 = vrot.lane.b32.xlu1 %v17023_v41, %s13885_s18 }
0x20e8   :  { %10145 = vrot.lane.b32.xlu0 %v17023_v41, %s13888_s1  ;;  %9671 = vrot.lane.b32.xlu1 %v17015_v60, %s13885_s18 }
0x20ec   :  { %10143 = vrot.lane.b32.xlu0 %v17021_v47, %s13888_s1  ;;  %9902 = vrot.lane.b32.xlu1 %v17021_v47, %s13887_s20 }
0x20f0   :  { %10139 = vrot.lane.b32.xlu0 %v17023_v41, %s13889_s21  ;;  %9904 = vrot.lane.b32.xlu1 %v17023_v41, %s13887_s20 }
0x20f4   :  { %8591 = vrot.lane.b32.xlu0 %v16975_v6, %s13890_s22  ;;  %9906 = vrot.lane.b32.xlu1 %v17015_v60, %s13887_s20 }
0x20f8   :  { %8826 = vrot.lane.b32.xlu0 %v16975_v6, %s13891_s23  ;;  %10137 = vrot.lane.b32.xlu1 %v17021_v47, %s13889_s21 }
0x20fc   :  { %8822 = vrot.lane.b32.xlu0 %v16971_v8, %s13891_s23  ;;  %10141 = vrot.lane.b32.xlu1 %v17015_v60, %s13889_s21 }
0x2100   :  { %9061 = vrot.lane.b32.xlu0 %v16975_v6, %s13892_s24  ;;  %8589 = vrot.lane.b32.xlu1 %v16967_v10, %s13890_s22 }
0x2104   :  { %9057 = vrot.lane.b32.xlu0 %v16971_v8, %s13892_s24  ;;  %8587 = vrot.lane.b32.xlu1 %v16971_v8, %s13890_s22 }
0x2108   :  { %9296 = vrot.lane.b32.xlu0 %v16975_v6, %s13893_s25  ;;  %8824 = vrot.lane.b32.xlu1 %v16967_v10, %s13891_s23 }
0x210c   :  { %9292 = vrot.lane.b32.xlu0 %v16971_v8, %s13893_s25  ;;  %9059 = vrot.lane.b32.xlu1 %v16967_v10, %s13892_s24 }
0x2110   :  { %9573 = vrot.lane.b32.xlu0 %v17015_v60, %s13890_s22  ;;  %9294 = vrot.lane.b32.xlu1 %v16967_v10, %s13893_s25 }
0x2112   :  { %v8461_v13 = vpop.permute.xlu0 %8460  ;;  %v8696_v62 = vpop.permute.xlu1 %8695 }
0x2113   :  { %13019 = vmatpush3.xpose.msk.msra.mxu1 %vm386_vm2, %v8461_v13 }
0x2114   :  { %9569 = vrot.lane.b32.xlu0 %v17021_v47, %s13890_s22  ;;  %9571 = vrot.lane.b32.xlu1 %v17023_v41, %s13890_s22 }
0x2115   :  { %13020 = vmatprep.subr.mxu1 %v17920_v19 }
0x2116   :  { %v8694_v51 = vpop.permute.xlu0 %8693  ;;  %v8692_v37 = vpop.permute.xlu1 %8691 }
0x2117   :  { %13021 = vmatpush3.xpose.msk.msra.mxu1 %vm386_vm2, %v8459_v14 }
0x2118   :  { %9808 = vrot.lane.b32.xlu0 %v17015_v60, %s13891_s23  ;;  %9806 = vrot.lane.b32.xlu1 %v17023_v41, %s13891_s23 }
0x2119   :  { %13022 = vmatprep.subr.mxu1 %v17920_v19 }
0x211a   :  { %v8686_v24 = vpop.permute.xlu0 %8685  ;;  %v8931_v40 = vpop.permute.xlu1 %8930 }
0x211b   :  { %13023 = vmatpush3.xpose.msk.msra.mxu1 %vm386_vm2, %v8457_v52 }
0x211c   :  { %9804 = vrot.lane.b32.xlu0 %v17021_v47, %s13891_s23  ;;  %13048 = vmatprep.subr.mxu1 %v17920_v19 }
0x211e   :  { %13025 = vmatmul.mubr.msk.f32.vlgmr.msra.gmra.mxu1 %vm386_vm2, %v16971_v8  ;;  %v8688_v1 = vpop.permute.xlu0 %8687  ;;  %v8929_v9 = vpop.permute.xlu1 %8928 }
0x211f   :  { %13049 = vmatpush3.xpose.msk.msra.mxu1 %vm386_vm2, %v8696_v62  ;;  %13027 = vmatprep.mubr.msk.f32.mxu1 %vm13883_vm1, %v17920_v19 }
0x2120   :  { %13050 = vmatprep.subr.mxu1 %v17920_v19 }
0x2122   :  { %13028 = vmatmul.mubr.msk.f32.gmra.mxu1 %vm386_vm2, %v16967_v10  ;;  %v8690_v34 = vpop.permute.xlu0 %8689  ;;  %v8927_v44 = vpop.permute.xlu1 %8926 }
0x2123   :  { %13051 = vmatpush3.xpose.msk.msra.mxu1 %vm386_vm2, %v8694_v51  ;;  %13030 = vmatprep.mubr.msk.f32.mxu1 %vm13883_vm1, %v17920_v19 }
0x2124   :  { %13052 = vmatprep.subr.mxu1 %v17920_v19 }
0x2126   :  { %13031 = vmatmul.mubr.msk.f32.gmra.mxu1 %vm386_vm2, %v16975_v6  ;;  %v8921_v4 = vpop.permute.xlu0 %8920  ;;  %v9166_v27 = vpop.permute.xlu1 %9165 }
0x2127   :  { %13053 = vmatpush3.xpose.msk.msra.mxu1 %vm386_vm2, %v8692_v37  ;;  %13054 = vmatprep.mubr.msk.f32.mxu1 %vm13883_vm1, %v17920_v19 }
0x2128   :  { %13078 = vmatprep.subr.mxu1 %v17920_v19 }
0x212a   :  { %13055 = vmatmul.mubr.msk.f32.vlgmr.msra.gmra.mxu1 %vm386_vm2, %v8686_v24  ;;  %v8923_v49 = vpop.permute.xlu0 %8922  ;;  %v9164_v61 = vpop.permute.xlu1 %9163 }
0x212b   :  { %13079 = vmatpush3.xpose.msk.msra.mxu1 %vm386_vm2, %v8931_v40  ;;  %13057 = vmatprep.mubr.msk.f32.mxu1 %vm13883_vm1, %v17920_v19 }
0x212c   :  { %13080 = vmatprep.subr.mxu1 %v17920_v19 }
0x212e   :  { %13058 = vmatmul.mubr.msk.f32.gmra.mxu1 %vm386_vm2, %v8688_v1  ;;  %v8925_v54 = vpop.permute.xlu0 %8924  ;;  %v9162_v63 = vpop.permute.xlu1 %9161 }
0x212f   :  { %13081 = vmatpush3.xpose.msk.msra.mxu1 %vm386_vm2, %v8929_v9  ;;  %13060 = vmatprep.mubr.msk.f32.mxu1 %vm13883_vm1, %v17920_v19 }
0x2130   :  { %13082 = vmatprep.subr.mxu1 %v17920_v19 }
0x2132   :  { %13061 = vmatmul.mubr.msk.f32.gmra.mxu1 %vm386_vm2, %v8690_v34  ;;  %v9156_v5 = vpop.permute.xlu0 %9155 }
0x2133   :  { %13083 = vmatpush3.xpose.msk.msra.mxu1 %vm386_vm2, %v8927_v44  ;;  %13084 = vmatprep.mubr.msk.f32.mxu1 %vm13883_vm1, %v17920_v19 }
0x2134   :  { %13108 = vmatprep.subr.mxu1 %v17920_v19 }
0x2136   :  { %13085 = vmatmul.mubr.msk.f32.vlgmr.msra.gmra.mxu1 %vm386_vm2, %v8921_v4  ;;  %v9158_v29 = vpop.permute.xlu0 %9157 }
0x2137   :  { %13109 = vmatpush3.xpose.msk.msra.mxu1 %vm386_vm2, %v9166_v27  ;;  %13087 = vmatprep.mubr.msk.f32.mxu1 %vm13883_vm1, %v17920_v19 }
0x2138   :  { %13110 = vmatprep.subr.mxu1 %v17920_v19 }
0x213a   :  { %13088 = vmatmul.mubr.msk.f32.gmra.mxu1 %vm386_vm2, %v8923_v49  ;;  %v9160_v32 = vpop.permute.xlu0 %9159 }
0x213b   :  { %13111 = vmatpush3.xpose.msk.msra.mxu1 %vm386_vm2, %v9164_v61  ;;  %13090 = vmatprep.mubr.msk.f32.mxu1 %vm13883_vm1, %v17920_v19 }
0x213c   :  { %13112 = vmatprep.subr.mxu1 %v17920_v19 }
0x213e   :  { %13091 = vmatmul.mubr.msk.f32.gmra.mxu1 %vm386_vm2, %v8925_v54 }
0x213f   :  { %13113 = vmatpush3.xpose.msk.msra.mxu1 %vm386_vm2, %v9162_v63  ;;  %13114 = vmatprep.mubr.msk.f32.mxu1 %vm13883_vm1, %v17920_v19 }
0x2140   :  { %13138 = vmatprep.subr.mxu1 %v17920_v19 }
0x2142   :  { %v9443_v42 = vpop.permute.xlu1 %9442  ;;  %13115 = vmatmul.mubr.msk.f32.vlgmr.msra.gmra.mxu1 %vm386_vm2, %v9156_v5  ;;  %v9678_v46 = vpop.permute.xlu0 %9677 }
0x2143   :  { %13139 = vmatpush3.xpose.msk.msra.mxu1 %vm386_vm2, %v9443_v42  ;;  %13117 = vmatprep.mubr.msk.f32.mxu1 %vm13883_vm1, %v17920_v19 }
0x2144   :  { %13140 = vmatprep.subr.mxu1 %v17920_v19 }
0x2146   :  { %v9441_v3 = vpop.permute.xlu1 %9440  ;;  %13118 = vmatmul.mubr.msk.f32.gmra.mxu1 %vm386_vm2, %v9158_v29  ;;  %v9674_v26 = vpop.permute.xlu0 %9673 }
0x2147   :  { %13141 = vmatpush3.xpose.msk.msra.mxu1 %vm386_vm2, %v9441_v3  ;;  %13120 = vmatprep.mubr.msk.f32.mxu1 %vm13883_vm1, %v17920_v19 }
0x2148   :  { %13142 = vmatprep.subr.mxu1 %v17920_v19 }
0x214a   :  { %v9439_v39 = vpop.permute.xlu1 %9438  ;;  %13121 = vmatmul.mubr.msk.f32.gmra.mxu1 %vm386_vm2, %v9160_v32  ;;  %v9913_v43 = vpop.permute.xlu0 %9912 }
0x214b   :  { %13143 = vmatpush3.xpose.msk.msra.mxu1 %vm386_vm2, %v9439_v39  ;;  %13144 = vmatprep.mubr.msk.f32.mxu1 %vm13883_vm1, %v17920_v19 }
0x214c   :  { %13168 = vmatprep.subr.mxu1 %v17920_v19 }
0x214e   :  { %v9676_v50 = vpop.permute.xlu1 %9675  ;;  %13145 = vmatmul.mubr.msk.f32.vlgmr.msra.gmra.mxu1 %vm386_vm2, %v17021_v47  ;;  %v9911_v15 = vpop.permute.xlu0 %9910 }
0x214f   :  { %13169 = vmatpush3.xpose.msk.msra.mxu1 %vm386_vm2, %v9678_v46  ;;  %13147 = vmatprep.mubr.msk.f32.mxu1 %vm13883_vm1, %v17920_v19 }
0x2150   :  { %13170 = vmatprep.subr.mxu1 %v17920_v19 }
0x2152   :  { %v9668_v11 = vpop.permute.xlu1 %9667  ;;  %13148 = vmatmul.mubr.msk.f32.gmra.mxu1 %vm386_vm2, %v17023_v41  ;;  %v9909_v30 = vpop.permute.xlu0 %9908 }
0x2153   :  { %13171 = vmatpush3.xpose.msk.msra.mxu1 %vm386_vm2, %v9676_v50  ;;  %13150 = vmatprep.mubr.msk.f32.mxu1 %vm13883_vm1, %v17920_v19 }
0x2154   :  { %13172 = vmatprep.subr.mxu1 %v17920_v19 }
0x2156   :  { %v9670_v18 = vpop.permute.xlu1 %9669  ;;  %13151 = vmatmul.mubr.msk.f32.gmra.mxu1 %vm386_vm2, %v17015_v60  ;;  %v10148_v45 = vpop.permute.xlu0 %10147 }
0x2157   :  { %13173 = vmatpush3.xpose.msk.msra.mxu1 %vm386_vm2, %v9674_v26  ;;  %13174 = vmatprep.mubr.msk.f32.mxu1 %vm13883_vm1, %v17920_v19 }
0x2158   :  { %13198 = vmatprep.subr.mxu1 %v17920_v19 }
0x215a   :  { %v9672_v21 = vpop.permute.xlu1 %9671  ;;  %13175 = vmatmul.mubr.msk.f32.vlgmr.msra.gmra.mxu1 %vm386_vm2, %v9668_v11  ;;  %v10146_v2 = vpop.permute.xlu0 %10145 }
0x215b   :  { %13199 = vmatpush3.xpose.msk.msra.mxu1 %vm386_vm2, %v9913_v43  ;;  %13177 = vmatprep.mubr.msk.f32.mxu1 %vm13883_vm1, %v17920_v19 }
0x215c   :  { %13200 = vmatprep.subr.mxu1 %v17920_v19 }
0x215e   :  { %v9903_v23 = vpop.permute.xlu1 %9902  ;;  %13178 = vmatmul.mubr.msk.f32.gmra.mxu1 %vm386_vm2, %v9670_v18  ;;  %v10144_v7 = vpop.permute.xlu0 %10143 }
0x215f   :  { %13201 = vmatpush3.xpose.msk.msra.mxu1 %vm386_vm2, %v9911_v15  ;;  %13180 = vmatprep.mubr.msk.f32.mxu1 %vm13883_vm1, %v17920_v19 }
0x2160   :  { %13202 = vmatprep.subr.mxu1 %v17920_v19 }
0x2162   :  { %v9905_v28 = vpop.permute.xlu1 %9904  ;;  %13181 = vmatmul.mubr.msk.f32.gmra.mxu1 %vm386_vm2, %v9672_v21  ;;  %v10140_v33 = vpop.permute.xlu0 %10139 }
0x2163   :  { %13203 = vmatpush3.xpose.msk.msra.mxu1 %vm386_vm2, %v9909_v30  ;;  %13204 = vmatprep.mubr.msk.f32.mxu1 %vm13883_vm1, %v17920_v19 }
0x2164   :  { %13228 = vmatprep.subr.mxu1 %v17920_v19 }
0x2166   :  { %v9907_v22 = vpop.permute.xlu1 %9906  ;;  %13205 = vmatmul.mubr.msk.f32.vlgmr.msra.gmra.mxu1 %vm386_vm2, %v9903_v23  ;;  %v8592_v48 = vpop.permute.xlu0 %8591 }
0x2167   :  { %13034 = vmatpush3.msra.mxu0 %v8592_v48  ;;  %13229 = vmatpush3.xpose.msk.msra.mxu1 %vm386_vm2, %v10148_v45 }
0x2168   :  { %13207 = vmatprep.mubr.msk.f32.mxu1 %vm13883_vm1, %v17920_v19  ;;  %13230 = vmatprep.subr.mxu1 %v17920_v19 }
0x2169   :  { %13035 = vmatprep.subr.mxu0 %v17920_v19 }
0x216a   :  { %v10138_v10 = vpop.permute.xlu1 %10137  ;;  %13208 = vmatmul.mubr.msk.f32.gmra.mxu1 %vm386_vm2, %v9905_v28 }
0x216b   :  { %13231 = vmatpush3.xpose.msk.msra.mxu1 %vm386_vm2, %v10146_v2  ;;  %13210 = vmatprep.mubr.msk.f32.mxu1 %vm13883_vm1, %v17920_v19 }
0x216c   :  { %13232 = vmatprep.subr.mxu1 %v17920_v19 }
0x216e   :  { %v10142_v35 = vpop.permute.xlu1 %10141  ;;  %13211 = vmatmul.mubr.msk.f32.gmra.mxu1 %vm386_vm2, %v9907_v22 }
0x216f   :  { %13233 = vmatpush3.xpose.msk.msra.mxu1 %vm386_vm2, %v10144_v7  ;;  %13234 = vmatprep.mubr.msk.f32.mxu1 %vm13883_vm1, %v17920_v19 }
0x2172   :  { %v8590_v8 = vpop.permute.xlu1 %8589  ;;  %13235 = vmatmul.mubr.msk.f32.vlgmr.msra.gmra.mxu1 %vm386_vm2, %v10138_v10 }
0x2173   :  { %13036 = vmatpush3.msra.mxu0 %v8590_v8  ;;  %13237 = vmatprep.mubr.msk.f32.mxu1 %vm13883_vm1, %v17920_v19 }
0x2174   :  { %13037 = vmatprep.subr.mxu0 %v17920_v19 }
0x2176   :  { %v8588_v0 = vpop.permute.xlu1 %8587  ;;  %13238 = vmatmul.mubr.msk.f32.gmra.mxu1 %vm386_vm2, %v10140_v33 }
0x2177   :  { %13038 = vmatpush3.msra.mxu0 %v8588_v0  ;;  %13240 = vmatprep.mubr.msk.f32.mxu1 %vm13883_vm1, %v17920_v19 }
0x2178   :  { %13063 = vmatprep.subr.mxu0 %v17920_v19 }
0x217a   :  { %13241 = vmatmul.mubr.msk.f32.gmra.mxu1 %vm386_vm2, %v10142_v35 }
0x21de   :  { %v17225_v17 = vpop.f32.mrf.mxu1 }
0x21df   :  { %v8554_v6 = vsel %vm479_vm3, %v17225_v17, -inf }
0x21e0   :  { %8555 = vmax.xlane.f32.xlu0 %v8554_v6  ;;  %v13026_v53 = vpop.f32.mrf.mxu1 }
0x21e2   :  { %v17229_v57 = vpop.f32.mrf.mxu1 }
0x21e3   :  { %v8557_v14 = vsel %vm479_vm3, %v17229_v57, -inf }
0x21e4   :  { %8558 = vmax.xlane.f32.xlu1 %v8557_v14  ;;  %v13029_v52 = vpop.f32.mrf.mxu1 }
0x21e6   :  { %v17233_v13 = vpop.f32.mrf.mxu1 }
0x21e7   :  { %v8560_v62 = vsel %vm479_vm3, %v17233_v13, -inf }
0x21e8   :  { %8561 = vmax.xlane.f32.xlu0 %v8560_v62  ;;  %v13032_v51 = vpop.f32.mrf.mxu1 }
0x21ea   :  { %v17237_v37 = vpop.f32.mrf.mxu1 }
0x21eb   :  { %v8789_v24 = vsel %vm479_vm3, %v17237_v37, -inf }
0x21ec   :  { %8790 = vmax.xlane.f32.xlu0 %v8789_v24  ;;  %v13056_v1 = vpop.f32.mrf.mxu1 }
0x21ee   :  { %v17241_v40 = vpop.f32.mrf.mxu1 }
0x21ef   :  { %v8792_v34 = vsel %vm479_vm3, %v17241_v40, -inf }
0x21f0   :  { %8793 = vmax.xlane.f32.xlu0 %v8792_v34  ;;  %v13059_v9 = vpop.f32.mrf.mxu1 }
0x21f2   :  { %v17245_v4 = vpop.f32.mrf.mxu1 }
0x21f3   :  { %v8795_v49 = vsel %vm479_vm3, %v17245_v4, -inf }
0x21f4   :  { %8796 = vmax.xlane.f32.xlu1 %v8795_v49  ;;  %v13062_v44 = vpop.f32.mrf.mxu1 }
0x21f5   :  { %v17305_v44 = vpop.permute.xlu0 %8826 }
0x21f6   :  { %v17249_v54 = vpop.f32.mrf.mxu1 }
0x21f7   :  { %v9024_v27 = vsel %vm479_vm3, %v17249_v54, -inf }
0x21f8   :  { %9025 = vmax.xlane.f32.xlu0 %v9024_v27  ;;  %v13086_v5 = vpop.f32.mrf.mxu1 }
0x21fa   :  { %v17253_v61 = vpop.f32.mrf.mxu1 }
0x21fb   :  { %v9027_v29 = vsel %vm479_vm3, %v17253_v61, -inf }
0x21fc   :  { %9028 = vmax.xlane.f32.xlu1 %v9027_v29  ;;  %v13089_v63 = vpop.f32.mrf.mxu1 }
0x21fd   :  { %v17309_v63 = vpop.permute.xlu0 %8822 }
0x21fe   :  { %v17257_v32 = vpop.f32.mrf.mxu1 }
0x21ff   :  { %v9030_v42 = vsel %vm479_vm3, %v17257_v32, -inf }
0x2200   :  { %9031 = vmax.xlane.f32.xlu0 %v9030_v42  ;;  %v13092_v46 = vpop.f32.mrf.mxu1 }
0x2202   :  { %v17261_v3 = vpop.f32.mrf.mxu1 }
0x2203   :  { %v9259_v26 = vsel %vm479_vm3, %v17261_v3, -inf }
0x2204   :  { %9260 = vmax.xlane.f32.xlu1 %v9259_v26  ;;  %v13116_v39 = vpop.f32.mrf.mxu1 }
0x2205   :  { %v17317_v39 = vpop.permute.xlu0 %9061 }
0x2206   :  { %v17265_v43 = vpop.f32.mrf.mxu1 }
0x2207   :  { %v9262_v50 = vsel %vm479_vm3, %v17265_v43, -inf }
0x2208   :  { %9263 = vmax.xlane.f32.xlu0 %v9262_v50  ;;  %v13119_v15 = vpop.f32.mrf.mxu1 }
0x2209   :  { %v17321_v15 = vpop.permute.xlu0 %9057 }
0x220a   :  { %v17269_v11 = vpop.f32.mrf.mxu1 }
0x220b   :  { %v9265_v30 = vsel %vm479_vm3, %v17269_v11, -inf }
0x220c   :  { %9266 = vmax.xlane.f32.xlu1 %v9265_v30  ;;  %v13122_v18 = vpop.f32.mrf.mxu1 }
0x220d   :  { %v17323_v30 = vpop.permute.xlu0 %9296 }
0x220e   :  { %v17273_v45 = vpop.f32.mrf.mxu1 }
0x220f   :  { %v9536_v21 = vsel %vm479_vm3, %v17273_v45, -inf }
0x2210   :  { %9537 = vmax.xlane.f32.xlu0 %v9536_v21  ;;  %v13146_v2 = vpop.f32.mrf.mxu1  ;;  %v17327_v21 = vpop.permute.xlu1 %8824 }
0x2211   :  { %v17325_v18 = vpop.permute.xlu0 %9292 }
0x2212   :  { %v17277_v23 = vpop.f32.mrf.mxu1 }
0x2213   :  { %v9539_v7 = vsel %vm479_vm3, %v17277_v23, -inf }
0x2214   :  { %9540 = vmax.xlane.f32.xlu1 %v9539_v7  ;;  %v13149_v28 = vpop.f32.mrf.mxu1  ;;  %v17331_v7 = vpop.permute.xlu1 %9059 }
0x2215   :  { %v17329_v2 = vpop.permute.xlu0 %9573 }
0x2216   :  { %v17281_v33 = vpop.f32.mrf.mxu1 }
0x2217   :  { %v9542_v22 = vsel %vm479_vm3, %v17281_v33, -inf }
0x2218   :  { %9543 = vmax.xlane.f32.xlu0 %v9542_v22  ;;  %v13152_v48 = vpop.f32.mrf.mxu1 }
0x2219   :  { %v17335_v22 = vpop.permute.xlu0 %9569 }
0x221a   :  { %v17285_v10 = vpop.f32.mrf.mxu1 }
0x221b   :  { %v9771_v35 = vsel %vm479_vm3, %v17285_v10, -inf }
0x221c   :  { %9772 = vmax.xlane.f32.xlu1 %v9771_v35  ;;  %v13176_v8 = vpop.f32.mrf.mxu1 }
0x221d   :  { %v17341_v8 = vpop.permute.xlu1 %9294 }
0x221e   :  { %v17289_v0 = vpop.f32.mrf.mxu1 }
0x221f   :  { %v9774_v6 = vsel %vm479_vm3, %v17289_v0, -inf }
0x2220   :  { %9775 = vmax.xlane.f32.xlu0 %v9774_v6  ;;  %v13179_v53 = vpop.f32.mrf.mxu1  ;;  %v17343_v6 = vpop.permute.xlu0 %9808 }
0x2222   :  { %v17293_v14 = vpop.f32.mrf.mxu1 }
0x2223   :  { %v9777_v52 = vsel %vm479_vm3, %v17293_v14, -inf }
0x2224   :  { %9778 = vmax.xlane.f32.xlu1 %v9777_v52  ;;  %v13182_v62 = vpop.f32.mrf.mxu1  ;;  %v17347_v52 = vpop.permute.xlu1 %9571 }
0x2226   :  { %v17297_v51 = vpop.f32.mrf.mxu1 }
0x2227   :  { %v10006_v24 = vsel %vm479_vm3, %v17297_v51, -inf }
0x2228   :  { %10007 = vmax.xlane.f32.xlu0 %v10006_v24  ;;  %v13206_v1 = vpop.f32.mrf.mxu1  ;;  %v17351_v24 = vpop.permute.xlu0 %9804 }
0x2229   :  { %v17353_v1 = vpop.permute.xlu1 %9806 }
0x222a   :  { %v17301_v34 = vpop.f32.mrf.mxu1 }
0x222b   :  { %v10009_v28 = vsel %vm479_vm3, %v17301_v34, -inf }
0x222c   :  { %v13209_v9 = vpop.f32.mrf.mxu1 }
0x222e   :  { %v17303_v49 = vpop.f32.mrf.mxu1 }
0x222f   :  { %v10012_v48 = vsel %vm479_vm3, %v17303_v49, -inf }
0x2230   :  { %v13212_v27 = vpop.f32.mrf.mxu1 }
0x2232   :  { %v17307_v5 = vpop.f32.mrf.mxu1 }
0x2233   :  { %v10241_v35 = vsel %vm479_vm3, %v17307_v5, -inf }
0x2234   :  { %v13236_v29 = vpop.f32.mrf.mxu1 }
0x2235   :  { %10041 = vrot.lane.b32.xlu1 %v17023_v41, %s13892_s24 }
0x2236   :  { %v17313_v42 = vpop.f32.mrf.mxu1 }
0x2237   :  { %v10244_v53 = vsel %vm479_vm3, %v17313_v42, -inf }
0x2238   :  { %v13239_v46 = vpop.f32.mrf.mxu1 }
0x223a   :  { %v17315_v26 = vpop.f32.mrf.mxu1 }
0x223b   :  { %v10247_v62 = vsel %vm479_vm3, %v17315_v26, -inf }
0x223c   :  { %v13242_v50 = vpop.f32.mrf.mxu1 }
0x223e   :  { %10043 = vrot.lane.b32.xlu0 %v17015_v60, %s13892_s24 }
0x2259   :  { %10010 = vmax.xlane.f32.xlu1 %v10009_v28 }
0x225d   :  { %10013 = vmax.xlane.f32.xlu0 %v10012_v48  ;;  %10242 = vmax.xlane.f32.xlu1 %v10241_v35 }
0x2261   :  { %10245 = vmax.xlane.f32.xlu0 %v10244_v53 }
0x2265   :  { %10248 = vmax.xlane.f32.xlu0 %v10247_v62 }
0x2269   :  { %v8556_v9 = vpop.xlane.xlu0 %8555 }
0x226a   :  { %v8563_v27 = vsub.f32 %v17225_v17, %v8556_v9 }
0x226c   :  { %v8566_v29 = vmul.f32 1.442695, %v8563_v27 }
0x226d   :  { %v8559_v46 = vpop.xlane.xlu1 %8558 }
0x226e   :  { %13757 = vpow2.f32 %v8566_v29  ;;  %v8564_v50 = vsub.f32 %v17229_v57, %v8559_v46 }
0x2270   :  { %v8568_v28 = vmul.f32 1.442695, %v8564_v50 }
0x2271   :  { %v8562_v48 = vpop.xlane.xlu0 %8561 }
0x2272   :  { %13759 = vpow2.f32 %v8568_v28  ;;  %v8565_v35 = vsub.f32 %v17233_v13, %v8562_v48 }
0x2274   :  { %v8570_v53 = vmul.f32 1.442695, %v8565_v35 }
0x2275   :  { %v8791_v56 = vpop.xlane.xlu0 %8790 }
0x2276   :  { %13761 = vpow2.f32 %v8570_v53  ;;  %v8798_v62 = vsub.f32 %v17237_v37, %v8791_v56 }
0x2278   :  { %v8801_v58 = vmul.f32 1.442695, %v8798_v62 }
0x2279   :  { %v8794_v25 = vpop.xlane.xlu0 %8793 }
0x227a   :  { %13763 = vpow2.f32 %v8801_v58  ;;  %v8799_v17 = vsub.f32 %v17241_v40, %v8794_v25 }
0x227b   :  { %v17360_v9 = vpop.eup %13757 }
0x227c   :  { %v8803_v27 = vmul.f32 1.442695, %v8799_v17  ;;  %v8572_v57 = vsel %vm479_vm3, %v17360_v9, 0.0 }
0x227d   :  { %v8797_v29 = vpop.xlane.xlu1 %8796  ;;  %8573 = vadd.xlane.f32.xlu1 %v8572_v57 }
0x227e   :  { %13765 = vpow2.f32 %v8803_v27  ;;  %v8800_v13 = vsub.f32 %v17245_v4, %v8797_v29 }
0x227f   :  { %v17365_v46 = vpop.eup %13759 }
0x2280   :  { %v8805_v50 = vmul.f32 1.442695, %v8800_v13  ;;  %v8575_v56 = vsel %vm479_vm3, %v17365_v46, 0.0 }
0x2281   :  { %8576 = vadd.xlane.f32.xlu1 %v8575_v56  ;;  %v9026_v58 = vpop.xlane.xlu0 %9025 }
0x2282   :  { %13767 = vpow2.f32 %v8805_v50  ;;  %v9033_v25 = vsub.f32 %v17249_v54, %v9026_v58 }
0x2283   :  { %v17370_v37 = vpop.eup %13761 }
0x2284   :  { %v9036_v40 = vmul.f32 1.442695, %v9033_v25  ;;  %v8578_v28 = vsel %vm479_vm3, %v17370_v37, 0.0 }
0x2285   :  { %v9029_v48 = vpop.xlane.xlu1 %9028  ;;  %8579 = vadd.xlane.f32.xlu0 %v8578_v28 }
0x2286   :  { %13769 = vpow2.f32 %v9036_v40  ;;  %v9034_v4 = vsub.f32 %v17253_v61, %v9029_v48 }
0x2287   :  { %v17375_v35 = vpop.eup %13763 }
0x2288   :  { %v9038_v53 = vmul.f32 1.442695, %v9034_v4  ;;  %v8807_v62 = vsel %vm479_vm3, %v17375_v35, 0.0 }
0x2289   :  { %8808 = vadd.xlane.f32.xlu1 %v8807_v62  ;;  %v9032_v17 = vpop.xlane.xlu0 %9031 }
0x228a   :  { %13771 = vpow2.f32 %v9038_v53  ;;  %v9035_v54 = vsub.f32 %v17257_v32, %v9032_v17 }
0x228b   :  { %v17380_v27 = vpop.eup %13765 }
0x228c   :  { %v9040_v57 = vmul.f32 1.442695, %v9035_v54  ;;  %v8810_v29 = vsel %vm479_vm3, %v17380_v27, 0.0 }
0x228d   :  { %v9261_v13 = vpop.xlane.xlu1 %9260  ;;  %8811 = vadd.xlane.f32.xlu0 %v8810_v29 }
0x228e   :  { %13773 = vpow2.f32 %v9040_v57  ;;  %v9268_v61 = vsub.f32 %v17261_v3, %v9261_v13 }
0x228f   :  { %v17385_v50 = vpop.eup %13767 }
0x2290   :  { %v9271_v56 = vmul.f32 1.442695, %v9268_v61  ;;  %v8813_v58 = vsel %vm479_vm3, %v17385_v50, 0.0 }
0x2291   :  { %8814 = vadd.xlane.f32.xlu1 %v8813_v58  ;;  %v9264_v25 = vpop.xlane.xlu0 %9263 }
0x2292   :  { %13775 = vpow2.f32 %v9271_v56  ;;  %v9269_v32 = vsub.f32 %v17265_v43, %v9264_v25 }
0x2293   :  { %v17390_v40 = vpop.eup %13769 }
0x2294   :  { %v9273_v28 = vmul.f32 1.442695, %v9269_v32  ;;  %v9042_v48 = vsel %vm479_vm3, %v17390_v40, 0.0 }
0x2295   :  { %v9267_v4 = vpop.xlane.xlu1 %9266  ;;  %9043 = vadd.xlane.f32.xlu1 %v9042_v48 }
0x2296   :  { %13777 = vpow2.f32 %v9273_v28  ;;  %v9270_v3 = vsub.f32 %v17269_v11, %v9267_v4 }
0x2297   :  { %v17395_v53 = vpop.eup %13771 }
0x2298   :  { %v9275_v62 = vmul.f32 1.442695, %v9270_v3  ;;  %v9045_v17 = vsel %vm479_vm3, %v17395_v53, 0.0 }
0x2299   :  { %9046 = vadd.xlane.f32.xlu0 %v9045_v17  ;;  %v9538_v54 = vpop.xlane.xlu0 %9537 }
0x229a   :  { %13779 = vpow2.f32 %v9275_v62  ;;  %v9545_v43 = vsub.f32 %v17273_v45, %v9538_v54 }
0x229b   :  { %v17400_v57 = vpop.eup %13773 }
0x229c   :  { %v9548_v29 = vmul.f32 1.442695, %v9545_v43  ;;  %v9048_v13 = vsel %vm479_vm3, %v17400_v57, 0.0 }
0x229d   :  { %v9541_v61 = vpop.xlane.xlu1 %9540  ;;  %9049 = vadd.xlane.f32.xlu1 %v9048_v13 }
0x229e   :  { %13781 = vpow2.f32 %v9548_v29  ;;  %v9546_v11 = vsub.f32 %v17277_v23, %v9541_v61 }
0x229f   :  { %v17405_v56 = vpop.eup %13775 }
0x22a0   :  { %v9550_v58 = vmul.f32 1.442695, %v9546_v11  ;;  %v9277_v25 = vsel %vm479_vm3, %v17405_v56, 0.0 }
0x22a1   :  { %9278 = vadd.xlane.f32.xlu1 %v9277_v25  ;;  %v9544_v32 = vpop.xlane.xlu0 %9543 }
0x22a2   :  { %13783 = vpow2.f32 %v9550_v58  ;;  %v9547_v45 = vsub.f32 %v17281_v33, %v9544_v32 }
0x22a3   :  { %v17410_v28 = vpop.eup %13777 }
0x22a4   :  { %v9552_v48 = vmul.f32 1.442695, %v9547_v45  ;;  %v9280_v4 = vsel %vm479_vm3, %v17410_v28, 0.0 }
0x22a5   :  { %v9773_v3 = vpop.xlane.xlu1 %9772  ;;  %9281 = vadd.xlane.f32.xlu0 %v9280_v4 }
0x22a6   :  { %13785 = vpow2.f32 %v9552_v48  ;;  %v9780_v23 = vsub.f32 %v17285_v10, %v9773_v3 }
0x22a7   :  { %v17415_v62 = vpop.eup %13779 }
0x22a8   :  { %v9783_v17 = vmul.f32 1.442695, %v9780_v23  ;;  %v9283_v54 = vsel %vm479_vm3, %v17415_v62, 0.0 }
0x22a9   :  { %9284 = vadd.xlane.f32.xlu1 %v9283_v54  ;;  %v9776_v43 = vpop.xlane.xlu0 %9775 }
0x22aa   :  { %13787 = vpow2.f32 %v9783_v17  ;;  %v9781_v33 = vsub.f32 %v17289_v0, %v9776_v43 }
0x22ab   :  { %v17420_v29 = vpop.eup %13781 }
0x22ac   :  { %v9785_v13 = vmul.f32 1.442695, %v9781_v33  ;;  %v9554_v61 = vsel %vm479_vm3, %v17420_v29, 0.0 }
0x22ad   :  { %9555 = vadd.xlane.f32.xlu1 %v9554_v61  ;;  %v9779_v4 = vpop.xlane.xlu1 %9778 }
0x22ae   :  { %13789 = vpow2.f32 %v9785_v13  ;;  %v9782_v3 = vsub.f32 %v17293_v14, %v9779_v4 }
0x22af   :  { %v17424_v10 = vpop.eup %13783 }
0x22b0   :  { %v9557_v11 = vsel %vm479_vm3, %v17424_v10, 0.0  ;;  %v9787_v17 = vmul.f32 1.442695, %v9782_v3 }
0x22b1   :  { %9558 = vadd.xlane.f32.xlu0 %v9557_v11  ;;  %v10008_v23 = vpop.xlane.xlu0 %10007  ;;  %v17446_v33 = vpop.permute.xlu1 %10041 }
0x22b2   :  { %v10015_v54 = vsub.f32 %v17297_v51, %v10008_v23  ;;  %13791 = vpow2.f32 %v9787_v17 }
0x22b3   :  { %v17428_v58 = vpop.eup %13785 }
0x22b4   :  { %v9560_v25 = vsel %vm479_vm3, %v17428_v58, 0.0  ;;  %v10018_v43 = vmul.f32 1.442695, %v10015_v54 }
0x22b5   :  { %9561 = vadd.xlane.f32.xlu1 %v9560_v25  ;;  %v17448_v13 = vpop.permute.xlu0 %10043 }
0x22b6   :  { %13793 = vpow2.f32 %v10018_v43 }
0x22b7   :  { %v17432_v0 = vpop.eup %13787 }
0x22b8   :  { %v9789_v32 = vsel %vm479_vm3, %v17432_v0, 0.0 }
0x22b9   :  { %9790 = vadd.xlane.f32.xlu1 %v9789_v32 }
0x22bb   :  { %v17436_v45 = vpop.eup %13789 }
0x22bc   :  { %v9792_v48 = vsel %vm479_vm3, %v17436_v45, 0.0 }
0x22bd   :  { %9793 = vadd.xlane.f32.xlu0 %v9792_v48 }
0x22bf   :  { %v17453_v51 = vpop.eup %13791 }
0x22c3   :  { %v17458_v43 = vpop.eup %13793 }
0x22ca   :  { %10278 = vrot.lane.b32.xlu1 %v17015_v60, %s13893_s25 }
0x22d3   :  { %10039 = vrot.lane.b32.xlu0 %v17021_v47, %s13892_s24 }
0x22e2   :  { %v10011_v61 = vpop.xlane.xlu1 %10010 }
0x22e3   :  { %v10016_v60 = vsub.f32 %v17301_v34, %v10011_v61  ;;  %v9795_v34 = vsel %vm479_vm3, %v17453_v51, 0.0 }
0x22e5   :  { %v10020_v11 = vmul.f32 1.442695, %v10016_v60  ;;  %v10024_v60 = vsel %vm479_vm3, %v17458_v43, 0.0 }
0x22e6   :  { %v10243_v25 = vpop.xlane.xlu1 %10242  ;;  %v10014_v32 = vpop.xlane.xlu0 %10013 }
0x22e7   :  { %13795 = vpow2.f32 %v10020_v11  ;;  %v10250_v14 = vsub.f32 %v17307_v5, %v10243_v25  ;;  %v10017_v48 = vsub.f32 %v17303_v49, %v10014_v32 }
0x22e9   :  { %v10022_v4 = vmul.f32 1.442695, %v10017_v48  ;;  %v10253_v3 = vmul.f32 1.442695, %v10250_v14 }
0x22ea   :  { %v10246_v23 = vpop.xlane.xlu0 %10245 }
0x22eb   :  { %v10251_v17 = vsub.f32 %v17313_v42, %v10246_v23  ;;  %13797 = vpow2.f32 %v10022_v4 }
0x22ec   :  { %13799 = vpow2.f32 %v10253_v3 }
0x22ed   :  { %v10255_v54 = vmul.f32 1.442695, %v10251_v17 }
0x22ee   :  { %9796 = vadd.xlane.f32.xlu1 %v9795_v34  ;;  %v10249_v61 = vpop.xlane.xlu0 %10248 }
0x22ef   :  { %13801 = vpow2.f32 %v10255_v54  ;;  %v10252_v49 = vsub.f32 %v17315_v26, %v10249_v61 }
0x22f1   :  { %v10257_v5 = vmul.f32 1.442695, %v10252_v49 }
0x22f2   :  { %10025 = vadd.xlane.f32.xlu1 %v10024_v60 }
0x22f3   :  { %13803 = vpow2.f32 %v10257_v5 }
0x22f4   :  { %v17463_v42 = vpop.eup %13795 }
0x22f5   :  { %v10027_v11 = vsel %vm479_vm3, %v17463_v42, 0.0 }
0x22f6   :  { %10028 = vadd.xlane.f32.xlu0 %v10027_v11 }
0x22f8   :  { %v17467_v25 = vpop.eup %13797 }
0x22f9   :  { %v10030_v32 = vsel %vm479_vm3, %v17467_v25, 0.0  ;;  %v17471_v14 = vpop.eup %13799 }
0x22fa   :  { %10031 = vadd.xlane.f32.xlu1 %v10030_v32  ;;  %v10259_v4 = vsel %vm479_vm3, %v17471_v14, 0.0 }
0x22fc   :  { %v17473_v26 = vpop.eup %13801 }
0x22fd   :  { %v10262_v48 = vsel %vm479_vm3, %v17473_v26, 0.0 }
0x22fe   :  { %10263 = vadd.xlane.f32.xlu0 %v10262_v48  ;;  %10260 = vadd.xlane.f32.xlu1 %v10259_v4 }
0x2300   :  { %v17479_v3 = vpop.eup %13803 }
0x2301   :  { %v10265_v23 = vsel %vm479_vm3, %v17479_v3, 0.0 }
0x2302   :  { %10266 = vadd.xlane.f32.xlu1 %v10265_v23 }
0x2306   :  { %v8574_v17 = vpop.xlane.xlu1 %8573 }
0x2307   :  { %13805 = vrcp.f32 %v8574_v17 }
0x230a   :  { %v8577_v54 = vpop.xlane.xlu1 %8576 }
0x230b   :  { %13807 = vrcp.f32 %v8577_v54 }
0x230e   :  { %v8580_v34 = vpop.xlane.xlu0 %8579 }
0x230f   :  { %13809 = vrcp.f32 %v8580_v34 }
0x2312   :  { %v8809_v61 = vpop.xlane.xlu1 %8808 }
0x2313   :  { %13811 = vrcp.f32 %v8809_v61  ;;  %10274 = vrot.lane.b32.xlu1 %v17021_v47, %s13893_s25 }
0x2314   :  { %v13806_v49 = vpop.eup %13805  ;;  %10276 = vrot.lane.b32.xlu0 %v17023_v41, %s13893_s25 }
0x2315   :  { %v8584_v5 = vmul.f32 %v13806_v49, %v17360_v9 }
0x2316   :  { %v8812_v60 = vpop.xlane.xlu0 %8811 }
0x2317   :  { %13813 = vrcp.f32 %v8812_v60  ;;  %13040 = vmatmul.mubr.msk.f32.vlgmr.msra.gmra.mxu0 %vm479_vm3, %v8584_v5 }
0x2318   :  { %v13808_v11 = vpop.eup %13807  ;;  %13064 = vmatpush3.msra.mxu0 %v17305_v44  ;;  %13042 = vmatprep.mubr.msk.f32.mxu0 %vm13883_vm1, %v17920_v19 }
0x2319   :  { %13065 = vmatprep.subr.mxu0 %v17920_v19  ;;  %v8585_v32 = vmul.f32 %v13808_v11, %v17365_v46 }
0x231a   :  { %13066 = vmatpush3.msra.mxu0 %v17327_v21  ;;  %v8815_v47 = vpop.xlane.xlu1 %8814 }
0x231b   :  { %13067 = vmatprep.subr.mxu0 %v17920_v19  ;;  %13815 = vrcp.f32 %v8815_v47  ;;  %13043 = vmatmul.mubr.msk.f32.gmra.mxu0 %vm479_vm3, %v8585_v32 }
0x231c   :  { %v13810_v41 = vpop.eup %13809  ;;  %13068 = vmatpush3.msra.mxu0 %v17309_v63  ;;  %13045 = vmatprep.mubr.msk.f32.mxu0 %vm13883_vm1, %v17920_v19 }
0x231d   :  { %v8586_v44 = vmul.f32 %v13810_v41, %v17370_v37  ;;  %13093 = vmatprep.subr.mxu0 %v17920_v19 }
0x231e   :  { %v9044_v9 = vpop.xlane.xlu1 %9043 }
0x231f   :  { %13817 = vrcp.f32 %v9044_v9  ;;  %13046 = vmatmul.mubr.msk.f32.gmra.mxu0 %vm479_vm3, %v8586_v44 }
0x2320   :  { %v13812_v21 = vpop.eup %13811  ;;  %13069 = vmatprep.mubr.msk.f32.mxu0 %vm13883_vm1, %v17920_v19 }
0x2321   :  { %v8819_v46 = vmul.f32 %v13812_v21, %v17375_v35 }
0x2322   :  { %v9047_v48 = vpop.xlane.xlu0 %9046 }
0x2323   :  { %13819 = vrcp.f32 %v9047_v48  ;;  %13070 = vmatmul.mubr.msk.f32.vlgmr.msra.gmra.mxu0 %vm479_vm3, %v8819_v46 }
0x2324   :  { %v13814_v63 = vpop.eup %13813  ;;  %13094 = vmatpush3.msra.mxu0 %v17317_v39  ;;  %13072 = vmatprep.mubr.msk.f32.mxu0 %vm13883_vm1, %v17920_v19 }
0x2325   :  { %13095 = vmatprep.subr.mxu0 %v17920_v19  ;;  %v8820_v37 = vmul.f32 %v13814_v63, %v17380_v27 }
0x2326   :  { %13096 = vmatpush3.msra.mxu0 %v17331_v7  ;;  %v9050_v4 = vpop.xlane.xlu1 %9049 }
0x2327   :  { %13821 = vrcp.f32 %v9050_v4  ;;  %13097 = vmatprep.subr.mxu0 %v17920_v19  ;;  %13073 = vmatmul.mubr.msk.f32.gmra.mxu0 %vm479_vm3, %v8820_v37 }
0x2328   :  { %v13816_v35 = vpop.eup %13815  ;;  %13098 = vmatpush3.msra.mxu0 %v17321_v15  ;;  %13075 = vmatprep.mubr.msk.f32.mxu0 %vm13883_vm1, %v17920_v19 }
0x2329   :  { %v8821_v39 = vmul.f32 %v13816_v35, %v17385_v50  ;;  %13123 = vmatprep.subr.mxu0 %v17920_v19 }
0x232a   :  { %v9279_v23 = vpop.xlane.xlu1 %9278 }
0x232b   :  { %13823 = vrcp.f32 %v9279_v23  ;;  %13076 = vmatmul.mubr.msk.f32.gmra.mxu0 %vm479_vm3, %v8821_v39 }
0x232c   :  { %v13818_v7 = vpop.eup %13817  ;;  %13099 = vmatprep.mubr.msk.f32.mxu0 %vm13883_vm1, %v17920_v19 }
0x232d   :  { %v9054_v27 = vmul.f32 %v13818_v7, %v17390_v40 }
0x232e   :  { %v9282_v17 = vpop.xlane.xlu0 %9281 }
0x232f   :  { %13825 = vrcp.f32 %v9282_v17  ;;  %13100 = vmatmul.mubr.msk.f32.vlgmr.msra.gmra.mxu0 %vm479_vm3, %v9054_v27 }
0x2330   :  { %v13820_v15 = vpop.eup %13819  ;;  %13124 = vmatpush3.msra.mxu0 %v17323_v30  ;;  %13102 = vmatprep.mubr.msk.f32.mxu0 %vm13883_vm1, %v17920_v19 }
0x2331   :  { %13125 = vmatprep.subr.mxu0 %v17920_v19  ;;  %v9055_v50 = vmul.f32 %v13820_v15, %v17395_v53 }
0x2332   :  { %13126 = vmatpush3.msra.mxu0 %v17341_v8  ;;  %v9285_v54 = vpop.xlane.xlu1 %9284 }
0x2333   :  { %13827 = vrcp.f32 %v9285_v54  ;;  %13127 = vmatprep.subr.mxu0 %v17920_v19  ;;  %13103 = vmatmul.mubr.msk.f32.gmra.mxu0 %vm479_vm3, %v9055_v50 }
0x2334   :  { %v13822_v40 = vpop.eup %13821  ;;  %13128 = vmatpush3.msra.mxu0 %v17325_v18  ;;  %13105 = vmatprep.mubr.msk.f32.mxu0 %vm13883_vm1, %v17920_v19 }
0x2335   :  { %v9056_v30 = vmul.f32 %v13822_v40, %v17400_v57  ;;  %13153 = vmatprep.subr.mxu0 %v17920_v19 }
0x2336   :  { %v9556_v34 = vpop.xlane.xlu1 %9555 }
0x2337   :  { %13829 = vrcp.f32 %v9556_v34  ;;  %13106 = vmatmul.mubr.msk.f32.gmra.mxu0 %vm479_vm3, %v9056_v30 }
0x2338   :  { %v13824_v8 = vpop.eup %13823  ;;  %13129 = vmatprep.mubr.msk.f32.mxu0 %vm13883_vm1, %v17920_v19 }
0x2339   :  { %v9289_v53 = vmul.f32 %v13824_v8, %v17405_v56  ;;  %v11353_v8 = vld [vmem:[%s17891_s4 + $0x78] sm:$0xff] }
0x233a   :  { %v9559_v61 = vpop.xlane.xlu0 %9558  ;;  %13258 = vmatprep.subr.mxu1 %v11353_v8 }
0x233b   :  { %13831 = vrcp.f32 %v9559_v61  ;;  %13130 = vmatmul.mubr.msk.f32.vlgmr.msra.gmra.mxu0 %vm479_vm3, %v9289_v53  ;;  %v11352_v53 = vld [vmem:[%s17891_s4 + $0x70] sm:$0xff]  ;;  %13259 = vmatpush3.msra.mxu1 %v11353_v8 }
0x233c   :  { %v13826_v18 = vpop.eup %13825  ;;  %13154 = vmatpush3.msra.mxu0 %v17329_v2  ;;  %13132 = vmatprep.mubr.msk.f32.mxu0 %vm13883_vm1, %v17920_v19 }
0x233d   :  { %13155 = vmatprep.subr.mxu0 %v17920_v19  ;;  %v9290_v57 = vmul.f32 %v13826_v18, %v17410_v28  ;;  %13260 = vmatprep.subr.mxu1 %v11352_v53 }
0x233e   :  { %13156 = vmatpush3.msra.mxu0 %v17347_v52  ;;  %v9562_v49 = vpop.xlane.xlu1 %9561  ;;  %13261 = vmatpush3.msra.mxu1 %v11352_v53 }
0x233f   :  { %13833 = vrcp.f32 %v9562_v49  ;;  %13157 = vmatprep.subr.mxu0 %v17920_v19  ;;  %13133 = vmatmul.mubr.msk.f32.gmra.mxu0 %vm479_vm3, %v9290_v57  ;;  %v11351_v57 = vld [vmem:[%s17891_s4 + $0x68] sm:$0xff]  ;;  %v11350_v49 = vld [vmem:[%s17891_s4 + $0x60] sm:$0xff] }
0x2340   :  { %v13828_v56 = vpop.eup %13827  ;;  %13158 = vmatpush3.msra.mxu0 %v17335_v22  ;;  %13135 = vmatprep.mubr.msk.f32.mxu0 %vm13883_vm1, %v17920_v19 }
0x2341   :  { %v9291_v2 = vmul.f32 %v13828_v56, %v17415_v62  ;;  %13183 = vmatprep.subr.mxu0 %v17920_v19  ;;  %13262 = vmatprep.subr.mxu1 %v11351_v57 }
0x2342   :  { %v9791_v5 = vpop.xlane.xlu1 %9790  ;;  %13263 = vmatpush3.msra.mxu1 %v11351_v57 }
0x2343   :  { %13835 = vrcp.f32 %v9791_v5  ;;  %13136 = vmatmul.mubr.msk.f32.gmra.mxu0 %vm479_vm3, %v9291_v2  ;;  %13264 = vmatprep.subr.mxu1 %v11350_v49 }
0x2344   :  { %v13830_v52 = vpop.eup %13829  ;;  %13159 = vmatprep.mubr.msk.f32.mxu0 %vm13883_vm1, %v17920_v19  ;;  %13265 = vmatpush3.msra.mxu1 %v11350_v49 }
0x2345   :  { %v9566_v28 = vmul.f32 %v13830_v52, %v17420_v29 }
0x2346   :  { %v9794_v60 = vpop.xlane.xlu0 %9793 }
0x2347   :  { %13837 = vrcp.f32 %v9794_v60  ;;  %13160 = vmatmul.mubr.msk.f32.vlgmr.msra.gmra.mxu0 %vm479_vm3, %v9566_v28 }
0x2348   :  { %v13832_v22 = vpop.eup %13831  ;;  %13184 = vmatpush3.msra.mxu0 %v17343_v6  ;;  %13162 = vmatprep.mubr.msk.f32.mxu0 %vm13883_vm1, %v17920_v19 }
0x2349   :  { %13185 = vmatprep.subr.mxu0 %v17920_v19  ;;  %v9567_v62 = vmul.f32 %v13832_v22, %v17424_v10 }
0x234a   :  { %13186 = vmatpush3.msra.mxu0 %v17353_v1 }
0x234b   :  { %13187 = vmatprep.subr.mxu0 %v17920_v19  ;;  %13163 = vmatmul.mubr.msk.f32.gmra.mxu0 %vm479_vm3, %v9567_v62 }
0x234c   :  { %v13834_v29 = vpop.eup %13833  ;;  %13188 = vmatpush3.msra.mxu0 %v17351_v24  ;;  %13165 = vmatprep.mubr.msk.f32.mxu0 %vm13883_vm1, %v17920_v19 }
0x234d   :  { %v9568_v6 = vmul.f32 %v13834_v29, %v17428_v58  ;;  %13213 = vmatprep.subr.mxu0 %v17920_v19  ;;  %v10040_v58 = vpop.permute.xlu0 %10039 }
0x234f   :  { %13166 = vmatmul.mubr.msk.f32.gmra.mxu0 %vm479_vm3, %v9568_v6 }
0x2350   :  { %v13836_v11 = vpop.eup %13835  ;;  %13189 = vmatprep.mubr.msk.f32.mxu0 %vm13883_vm1, %v17920_v19 }
0x2351   :  { %v9801_v1 = vmul.f32 %v13836_v11, %v17432_v0  ;;  %v10279_v0 = vpop.permute.xlu1 %10278 }
0x2353   :  { %13190 = vmatmul.mubr.msk.f32.vlgmr.msra.gmra.mxu0 %vm479_vm3, %v9801_v1 }
0x2354   :  { %v13838_v10 = vpop.eup %13837  ;;  %13214 = vmatpush3.msra.mxu0 %v17448_v13  ;;  %13192 = vmatprep.mubr.msk.f32.mxu0 %vm13883_vm1, %v17920_v19 }
0x2355   :  { %13215 = vmatprep.subr.mxu0 %v17920_v19  ;;  %v9802_v24 = vmul.f32 %v13838_v10, %v17436_v45 }
0x2356   :  { %13216 = vmatpush3.msra.mxu0 %v17446_v33 }
0x2357   :  { %13217 = vmatprep.subr.mxu0 %v17920_v19  ;;  %13193 = vmatmul.mubr.msk.f32.gmra.mxu0 %vm479_vm3, %v9802_v24 }
0x2358   :  { %13218 = vmatpush3.msra.mxu0 %v10040_v58  ;;  %13195 = vmatprep.mubr.msk.f32.mxu0 %vm13883_vm1, %v17920_v19 }
0x2359   :  { %13243 = vmatprep.subr.mxu0 %v17920_v19 }
0x2377   :  { %v9797_v13 = vpop.xlane.xlu1 %9796 }
0x2378   :  { %13839 = vrcp.f32 %v9797_v13 }
0x237b   :  { %v10026_v32 = vpop.xlane.xlu1 %10025 }
0x237c   :  { %13841 = vrcp.f32 %v10026_v32 }
0x237f   :  { %v10029_v47 = vpop.xlane.xlu0 %10028 }
0x2380   :  { %13843 = vrcp.f32 %v10029_v47 }
0x2383   :  { %v10032_v45 = vpop.xlane.xlu1 %10031 }
0x2384   :  { %13845 = vrcp.f32 %v10032_v45 }
0x2385   :  { %v13840_v33 = vpop.eup %13839 }
0x2386   :  { %v9803_v41 = vmul.f32 %v13840_v33, %v17453_v51 }
0x2387   :  { %v10261_v44 = vpop.xlane.xlu1 %10260  ;;  %v10264_v9 = vpop.xlane.xlu0 %10263 }
0x2388   :  { %13196 = vmatmul.mubr.msk.f32.gmra.mxu0 %vm479_vm3, %v9803_v41  ;;  %13847 = vrcp.f32 %v10261_v44 }
0x2389   :  { %v13842_v21 = vpop.eup %13841  ;;  %13219 = vmatprep.mubr.msk.f32.mxu0 %vm13883_vm1, %v17920_v19  ;;  %13849 = vrcp.f32 %v10264_v9 }
0x238a   :  { %v10036_v46 = vmul.f32 %v13842_v21, %v17458_v43 }
0x238b   :  { %v10267_v48 = vpop.xlane.xlu1 %10266  ;;  %v10277_v51 = vpop.permute.xlu0 %10276 }
0x238c   :  { %13220 = vmatmul.mubr.msk.f32.vlgmr.msra.gmra.mxu0 %vm479_vm3, %v10036_v46  ;;  %13851 = vrcp.f32 %v10267_v48 }
0x238d   :  { %v13844_v63 = vpop.eup %13843  ;;  %13244 = vmatpush3.msra.mxu0 %v10279_v0  ;;  %13222 = vmatprep.mubr.msk.f32.mxu0 %vm13883_vm1, %v17920_v19 }
0x238e   :  { %13245 = vmatprep.subr.mxu0 %v17920_v19  ;;  %v10037_v37 = vmul.f32 %v13844_v63, %v17463_v42 }
0x238f   :  { %13246 = vmatpush3.msra.mxu0 %v10277_v51  ;;  %v10275_v4 = vpop.permute.xlu1 %10274 }
0x2390   :  { %13247 = vmatprep.subr.mxu0 %v17920_v19  ;;  %13223 = vmatmul.mubr.msk.f32.gmra.mxu0 %vm479_vm3, %v10037_v37 }
0x2391   :  { %13248 = vmatpush3.msra.mxu0 %v10275_v4  ;;  %13225 = vmatprep.mubr.msk.f32.mxu0 %vm13883_vm1, %v17920_v19  ;;  %v13846_v43 = vpop.eup %13845 }
0x2392   :  { %v10038_v35 = vmul.f32 %v13846_v43, %v17467_v25 }
0x2394   :  { %13226 = vmatmul.mubr.msk.f32.gmra.mxu0 %vm479_vm3, %v10038_v35 }
0x2395   :  { %v13848_v39 = vpop.eup %13847  ;;  %13249 = vmatprep.mubr.msk.f32.mxu0 %vm13883_vm1, %v17920_v19 }
0x2396   :  { %v10271_v42 = vmul.f32 %v13848_v39, %v17471_v14  ;;  %v13850_v23 = vpop.eup %13849 }
0x2397   :  { %v10272_v7 = vmul.f32 %v13850_v23, %v17473_v26 }
0x2398   :  { %13250 = vmatmul.mubr.msk.f32.vlgmr.msra.gmra.mxu0 %vm479_vm3, %v10271_v42 }
0x2399   :  { %13252 = vmatprep.mubr.msk.f32.mxu0 %vm13883_vm1, %v17920_v19  ;;  %v13852_v27 = vpop.eup %13851 }
0x239a   :  { %v10273_v25 = vmul.f32 %v13852_v27, %v17479_v3 }
0x239c   :  { %13253 = vmatmul.mubr.msk.f32.gmra.mxu0 %vm479_vm3, %v10272_v7 }
0x239d   :  { %13255 = vmatprep.mubr.msk.f32.mxu0 %vm13883_vm1, %v17920_v19 }
0x23a0   :  { %13256 = vmatmul.mubr.msk.f32.gmra.mxu0 %vm479_vm3, %v10273_v25 }
0x23d7   :  { %v17618_v17 = vpop.f32.mrf.mxu0 }
0x23d9   :  { %v13041_v14 = vpop.f32.mrf.mxu0 }
0x23db   :  { %v17620_v15 = vpop.f32.mrf.mxu0 }
0x23dd   :  { %v13044_v50 = vpop.f32.mrf.mxu0 }
0x23df   :  { %v17622_v54 = vpop.f32.mrf.mxu0 }
0x23e1   :  { %v13047_v40 = vpop.f32.mrf.mxu0 }
0x23e3   :  { %v8906_v26 = vpop.f32.mrf.mxu0 }
0x23e4   :  { %9393 = vrot.lane.b32.xlu0 %v8906_v26, %s13894_s26 }
0x23e5   :  { %v13071_v30 = vpop.f32.mrf.mxu0 }
0x23e7   :  { %v8911_v34 = vpop.f32.mrf.mxu0 }
0x23e8   :  { %9395 = vrot.lane.b32.xlu1 %v8911_v34, %s13894_s26 }
0x23e9   :  { %v13074_v19 = vpop.f32.mrf.mxu0 }
0x23eb   :  { %v8916_v3 = vpop.f32.mrf.mxu0 }
0x23ec   :  { %9397 = vrot.lane.b32.xlu0 %v8916_v3, %s13894_s26 }
0x23ed   :  { %v13077_v61 = vpop.f32.mrf.mxu0 }
0x23ef   :  { %v9141_v18 = vpop.f32.mrf.mxu0 }
0x23f0   :  { %9405 = vrot.lane.b32.xlu0 %v9141_v18, %s13895_s9 }
0x23f1   :  { %v13101_v56 = vpop.f32.mrf.mxu0 }
0x23f3   :  { %v9146_v2 = vpop.f32.mrf.mxu0 }
0x23f4   :  { %9407 = vrot.lane.b32.xlu1 %v9146_v2, %s13895_s9 }
0x23f5   :  { %v13104_v5 = vpop.f32.mrf.mxu0 }
0x23f7   :  { %v9151_v52 = vpop.f32.mrf.mxu0 }
0x23f8   :  { %9409 = vrot.lane.b32.xlu1 %v9151_v52, %s13895_s9 }
0x23f9   :  { %v13107_v28 = vpop.f32.mrf.mxu0 }
0x23fb   :  { %v9376_v60 = vpop.f32.mrf.mxu0 }
0x23fc   :  { %9417 = vrot.lane.b32.xlu0 %v9376_v60, %s13896_s12 }
0x23fd   :  { %v13131_v22 = vpop.f32.mrf.mxu0 }
0x23ff   :  { %v9381_v62 = vpop.f32.mrf.mxu0 }
0x2400   :  { %9419 = vrot.lane.b32.xlu1 %v9381_v62, %s13896_s12 }
0x2401   :  { %v13134_v29 = vpop.f32.mrf.mxu0 }
0x2403   :  { %v9386_v6 = vpop.f32.mrf.mxu0 }
0x2404   :  { %9421 = vrot.lane.b32.xlu1 %v9386_v6, %s13896_s12 }
0x2405   :  { %v13137_v11 = vpop.f32.mrf.mxu0 }
0x2407   :  { %v9653_v1 = vpop.f32.mrf.mxu0 }
0x2409   :  { %v13161_v10 = vpop.f32.mrf.mxu0 }
0x240b   :  { %v17645_v24 = vpop.f32.mrf.mxu0 }
0x240d   :  { %v13164_v58 = vpop.f32.mrf.mxu0 }
0x240f   :  { %v17647_v0 = vpop.f32.mrf.mxu0 }
0x2411   :  { %v13167_v13 = vpop.f32.mrf.mxu0 }
0x2413   :  { %v9888_v32 = vpop.f32.mrf.mxu0 }
0x2414   :  { %10375 = vrot.lane.b32.xlu0 %v9888_v32, %s13894_s26 }
0x2415   :  { %v13191_v47 = vpop.f32.mrf.mxu0 }
0x2417   :  { %v9893_v45 = vpop.f32.mrf.mxu0 }
0x2418   :  { %10377 = vrot.lane.b32.xlu0 %v9893_v45, %s13894_s26 }
0x2419   :  { %v13194_v33 = vpop.f32.mrf.mxu0 }
0x2448   :  { %v9898_v41 = vpop.f32.mrf.mxu0 }
0x2449   :  { %10379 = vrot.lane.b32.xlu1 %v9898_v41, %s13894_s26 }
0x244a   :  { %v13197_v44 = vpop.f32.mrf.mxu0 }
0x244c   :  { %v10123_v9 = vpop.f32.mrf.mxu0 }
0x244d   :  { %10387 = vrot.lane.b32.xlu0 %v10123_v9, %s13895_s9 }
0x244e   :  { %v13221_v21 = vpop.f32.mrf.mxu0 }
0x2450   :  { %v10128_v46 = vpop.f32.mrf.mxu0 }
0x2451   :  { %10389 = vrot.lane.b32.xlu0 %v10128_v46, %s13895_s9 }
0x2452   :  { %v13224_v48 = vpop.f32.mrf.mxu0 }
0x2454   :  { %v10133_v63 = vpop.f32.mrf.mxu0 }
0x2455   :  { %10391 = vrot.lane.b32.xlu1 %v10133_v63, %s13895_s9 }
0x2456   :  { %v13227_v51 = vpop.f32.mrf.mxu0  ;;  %v9394_v39 = vpop.permute.xlu0 %9393 }
0x2457   :  { %v9426_v50 = vsel %vm386_vm2, %v17618_v17, %v9394_v39 }
0x2458   :  { %v10358_v37 = vpop.f32.mrf.mxu0 }
0x2459   :  { %10399 = vrot.lane.b32.xlu1 %v10358_v37, %s13896_s12 }
0x245a   :  { %v13251_v4 = vpop.f32.mrf.mxu0  ;;  %v9396_v7 = vpop.permute.xlu1 %9395 }
0x245b   :  { %v9427_v19 = vsel %vm386_vm2, %v17620_v15, %v9396_v7 }
0x245c   :  { %v10363_v43 = vpop.f32.mrf.mxu0 }
0x245d   :  { %10401 = vrot.lane.b32.xlu0 %v10363_v43, %s13896_s12 }
0x245e   :  { %v13254_v35 = vpop.f32.mrf.mxu0  ;;  %v9398_v27 = vpop.permute.xlu0 %9397 }
0x245f   :  { %v9428_v17 = vsel %vm386_vm2, %v17622_v54, %v9398_v27 }
0x2460   :  { %v10368_v42 = vpop.f32.mrf.mxu0 }
0x2461   :  { %10403 = vrot.lane.b32.xlu1 %v10368_v42, %s13896_s12 }
0x2462   :  { %v13257_v23 = vpop.f32.mrf.mxu0  ;;  %v9406_v14 = vpop.permute.xlu0 %9405 }
0x2463   :  { %v9429_v40 = vsel %vm1355_vm4, %v9426_v50, %v9406_v14 }
0x2466   :  { %v9408_v25 = vpop.permute.xlu1 %9407 }
0x2467   :  { %v9430_v3 = vsel %vm1355_vm4, %v9427_v19, %v9408_v25  ;;  %v11362_v19 = vld [vmem:[%s17892_s5 + $0x70] sm:$0xff] }
0x246a   :  { %v9410_v26 = vpop.permute.xlu1 %9409 }
0x246b   :  { %v9431_v61 = vsel %vm1355_vm4, %v9428_v17, %v9410_v26 }
0x246e   :  { %v9418_v30 = vpop.permute.xlu0 %9417 }
0x246f   :  { %v9432_v34 = vsel %vm479_vm3, %v9429_v40, %v9418_v30 }
0x2470   :  { %13266 = vmatprep.mubr.msk.f32.mxu1 %vm42_vm0, %v9432_v34  ;;  %v11363_v34 = vld [vmem:[%s17892_s5 + $0x78] sm:$0xff] }
0x2471   :  { %13275 = vmatprep.subr.mxu0 %v11363_v34 }
0x2472   :  { %v9420_v8 = vpop.permute.xlu1 %9419  ;;  %13276 = vmatpush3.msra.mxu0 %v11363_v34 }
0x2473   :  { %v9433_v53 = vsel %vm479_vm3, %v9430_v3, %v9420_v8  ;;  %v11361_v3 = vld [vmem:[%s17892_s5 + $0x68] sm:$0xff]  ;;  %13277 = vmatprep.subr.mxu0 %v11362_v19  ;;  %v11360_v8 = vld [vmem:[%s17892_s5 + $0x60] sm:$0xff] }
0x2474   :  { %13267 = vmatmul.mubr.msk.f32.vlgmr.msra.gmra.mxu1 %vm42_vm0, %v9433_v53  ;;  %13278 = vmatpush3.msra.mxu0 %v11362_v19 }
0x2475   :  { %13279 = vmatprep.subr.mxu0 %v11361_v3 }
0x2476   :  { %v9422_v18 = vpop.permute.xlu1 %9421  ;;  %13280 = vmatpush3.msra.mxu0 %v11361_v3  ;;  %v11378_v3 = vld [vmem:[%s17893_s6 + $0x1c0] sm:$0xff] }
0x2477   :  { %v9434_v57 = vsel %vm479_vm3, %v9431_v61, %v9422_v18  ;;  %13281 = vmatprep.subr.mxu0 %v11360_v8 }
0x2478   :  { %13269 = vmatprep.mubr.msk.f32.mxu1 %vm42_vm0, %v9434_v57  ;;  %13282 = vmatpush3.msra.mxu0 %v11360_v8 }
0x2486   :  { %v10376_v49 = vpop.permute.xlu0 %10375 }
0x2487   :  { %v10408_v52 = vsel %vm386_vm2, %v9653_v1, %v10376_v49 }
0x248a   :  { %v10378_v56 = vpop.permute.xlu0 %10377 }
0x248b   :  { %v10409_v62 = vsel %vm386_vm2, %v17645_v24, %v10378_v56  ;;  %v17690_v24 = vld [vmem:[%s17890_s7 + $0x18] sm:$0xff] }
0x248c   :  { %v10425_v32 = vrot.slane %v17690_v24, %v14812_v12 }
0x24bb   :  { %v10380_v15 = vpop.permute.xlu1 %10379 }
0x24bc   :  { %v10410_v1 = vsel %vm386_vm2, %v17647_v0, %v10380_v15 }
0x24bf   :  { %v10388_v2 = vpop.permute.xlu0 %10387 }
0x24c0   :  { %v10411_v28 = vsel %vm1355_vm4, %v10408_v52, %v10388_v2 }
0x24c3   :  { %v10390_v60 = vpop.permute.xlu0 %10389 }
0x24c4   :  { %v10412_v29 = vsel %vm1355_vm4, %v10409_v62, %v10390_v60 }
0x24c7   :  { %v10392_v5 = vpop.permute.xlu1 %10391 }
0x24c8   :  { %v10413_v10 = vsel %vm1355_vm4, %v10410_v1, %v10392_v5 }
0x24cb   :  { %v10400_v22 = vpop.permute.xlu1 %10399 }
0x24cc   :  { %v10414_v54 = vsel %vm479_vm3, %v10411_v28, %v10400_v22 }
0x24cd   :  { %13270 = vmatmul.mubr.msk.f32.gmra.mxu1 %vm42_vm0, %v10414_v54 }
0x24cf   :  { %v10402_v6 = vpop.permute.xlu0 %10401 }
0x24d0   :  { %v10415_v11 = vsel %vm479_vm3, %v10412_v29, %v10402_v6 }
0x24d1   :  { %13272 = vmatprep.mubr.msk.f32.mxu1 %vm42_vm0, %v10415_v11 }
0x24d3   :  { %v10404_v58 = vpop.permute.xlu1 %10403 }
0x24d4   :  { %v10416_v13 = vsel %vm479_vm3, %v10413_v10, %v10404_v58  ;;  %v11385_v10 = vld [vmem:[%s17893_s6 + $0x1f8] sm:$0xff]  ;;  %v11384_v58 = vld [vmem:[%s17893_s6 + $0x1f0] sm:$0xff] }
0x24d5   :  { %13273 = vmatmul.mubr.msk.f32.gmra.mxu1 %vm42_vm0, %v10416_v13  ;;  %13292 = vmatprep.subr.mxu1 %v11385_v10 }
0x24d6   :  { %13293 = vmatpush3.msra.mxu1 %v11385_v10 }
0x24d7   :  { %13294 = vmatprep.subr.mxu1 %v11384_v58 }
0x24d8   :  { %13295 = vmatpush3.msra.mxu1 %v11384_v58 }
0x2534   :  { %v13268_v47 = vpop.f32.mrf.mxu1 }
0x2535   :  { %v10516_v45 = vadd.f32 %v13268_v47, %v10425_v32 }
0x2536   :  { %v10510_v33 = vpop.f32.mrf.mxu1 }
0x2537   :  { %v17695_v0 = vadd.f32 %v10516_v45, %v16899_v38  ;;  %v10511_v41 = vadd.f32 %v10510_v33, %v10425_v32 }
0x2539   :  { %v17698_v44 = vadd.f32 %v10511_v41, %v16902_v36  ;;  %v10548_v9 = vsel %vm42_vm0, %v17695_v0, 0.0 }
0x253a   :  { %10549 = vadd.xlane.f32.xlu1 %v10548_v9 }
0x253b   :  { %v10545_v21 = vsel %vm42_vm0, %v17698_v44, 0.0 }
0x253c   :  { %10546 = vadd.xlane.f32.xlu0 %v10545_v21 }
0x258d   :  { %v13271_v46 = vpop.f32.mrf.mxu1 }
0x258e   :  { %v10526_v12 = vadd.f32 %v13271_v46, %v10425_v32  ;;  %v17783_v46 = vrot.slane %v17690_v24, %v17944_v59 }
0x258f   :  { %v10520_v48 = vpop.f32.mrf.mxu1 }
0x2590   :  { %v17705_v63 = vadd.f32 %v10526_v12, %v16909_v20  ;;  %v10521_v38 = vadd.f32 %v10520_v48, %v10425_v32 }
0x2592   :  { %v17708_v51 = vadd.f32 %v10521_v38, %v16912_v16  ;;  %v10554_v36 = vsel %vm42_vm0, %v17705_v63, 0.0 }
0x2593   :  { %10555 = vadd.xlane.f32.xlu0 %v10554_v36  ;;  %v17951_v36 = vld [vmem:[#allocation6_spill] sm:$0xff] }
0x2594   :  { %v10551_v43 = vsel %vm42_vm0, %v17708_v51, 0.0 }
0x2595   :  { %v13274_v37 = vpop.f32.mrf.mxu1 }
0x2596   :  { %v10536_v4 = vadd.f32 %v13274_v37, %v10425_v32  ;;  %v17789_v37 = vrot.slane %v17690_v24, %v17951_v36 }
0x2597   :  { %10552 = vadd.xlane.f32.xlu0 %v10551_v43  ;;  %v10530_v35 = vpop.f32.mrf.mxu1 }
0x2598   :  { %v17715_v39 = vadd.f32 %v10536_v4, %v16919_v31  ;;  %v10531_v20 = vadd.f32 %v10530_v35, %v10425_v32  ;;  %v11383_v32 = vld [vmem:[%s17893_s6 + $0x1e8] sm:$0xff] }
0x2599   :  { %13296 = vmatprep.subr.mxu1 %v11383_v32 }
0x259a   :  { %v17718_v42 = vadd.f32 %v10531_v20, %v16923_v55  ;;  %v10560_v16 = vsel %vm42_vm0, %v17715_v39, 0.0  ;;  %13297 = vmatpush3.msra.mxu1 %v11383_v32 }
0x259b   :  { %10561 = vadd.xlane.f32.xlu1 %v10560_v16 }
0x259c   :  { %v10557_v23 = vsel %vm42_vm0, %v17718_v42, 0.0 }
0x259d   :  { %10558 = vadd.xlane.f32.xlu0 %v10557_v23 }
0x25c3   :  { %v10550_v7 = vpop.xlane.xlu1 %10549 }
0x25c4   :  { %v10564_v27 = vmul.f32 0.03125, %v10550_v7 }
0x25c5   :  { %v10547_v25 = vpop.xlane.xlu0 %10546 }
0x25c6   :  { %v17725_v14 = vsub.f32 %v17695_v0, %v10564_v27  ;;  %v10563_v31 = vmul.f32 0.03125, %v10547_v25  ;;  %v11382_v27 = vld [vmem:[%s17893_s6 + $0x1e0] sm:$0xff] }
0x25c7   :  { %13298 = vmatprep.subr.mxu1 %v11382_v27 }
0x25c8   :  { %v17728_v50 = vsub.f32 %v17698_v44, %v10563_v31  ;;  %v10576_v55 = vmul.f32 %v17725_v14, %v17725_v14  ;;  %13299 = vmatpush3.msra.mxu1 %v11382_v27 }
0x25ca   :  { %v10584_v40 = vsel %vm42_vm0, %v10576_v55, 0.0  ;;  %v10575_v26 = vmul.f32 %v17728_v50, %v17728_v50  ;;  %v11380_v55 = vld [vmem:[%s17893_s6 + $0x1d0] sm:$0xff] }
0x25cb   :  { %10585 = vadd.xlane.f32.xlu1 %v10584_v40 }
0x25cc   :  { %v10581_v30 = vsel %vm42_vm0, %v10575_v26, 0.0 }
0x25cd   :  { %10582 = vadd.xlane.f32.xlu0 %v10581_v30  ;;  %v11379_v30 = vld [vmem:[%s17893_s6 + $0x1c8] sm:$0xff] }
0x261c   :  { %v10556_v53 = vpop.xlane.xlu0 %10555 }
0x261d   :  { %v10566_v17 = vmul.f32 0.03125, %v10556_v53  ;;  %v11377_v53 = vld [vmem:[%s17893_s6 + $0x1b8] sm:$0xff] }
0x261f   :  { %v17749_v61 = vsub.f32 %v17705_v63, %v10566_v17  ;;  %v11376_v17 = vld [vmem:[%s17893_s6 + $0x1b0] sm:$0xff] }
0x2620   :  { %v10553_v18 = vpop.xlane.xlu0 %10552 }
0x2621   :  { %v10565_v57 = vmul.f32 0.03125, %v10553_v18  ;;  %v10578_v49 = vmul.f32 %v17749_v61, %v17749_v61 }
0x2623   :  { %v17754_v56 = vsub.f32 %v17708_v51, %v10565_v57  ;;  %v10590_v15 = vsel %vm42_vm0, %v10578_v49, 0.0  ;;  %v11375_v57 = vld [vmem:[%s17893_s6 + $0x1a8] sm:$0xff] }
0x2624   :  { %v10562_v2 = vpop.xlane.xlu1 %10561  ;;  %10591 = vadd.xlane.f32.xlu1 %v10590_v15  ;;  %v11374_v15 = vld [vmem:[%s17893_s6 + $0x1a0] sm:$0xff] }
0x2625   :  { %v10568_v5 = vmul.f32 0.03125, %v10562_v2  ;;  %v10577_v52 = vmul.f32 %v17754_v56, %v17754_v56 }
0x2626   :  { %v10559_v28 = vpop.xlane.xlu0 %10558 }
0x2627   :  { %v17760_v60 = vsub.f32 %v17715_v39, %v10568_v5  ;;  %v10567_v22 = vmul.f32 0.03125, %v10559_v28  ;;  %v10587_v54 = vsel %vm42_vm0, %v10577_v52, 0.0  ;;  %v11373_v5 = vld [vmem:[%s17893_s6 + $0x198] sm:$0xff]  ;;  %v11372_v28 = vld [vmem:[%s17893_s6 + $0x190] sm:$0xff] }
0x2628   :  { %10588 = vadd.xlane.f32.xlu0 %v10587_v54 }
0x2629   :  { %v17764_v62 = vsub.f32 %v17718_v42, %v10567_v22  ;;  %v10580_v29 = vmul.f32 %v17760_v60, %v17760_v60  ;;  %v11371_v22 = vld [vmem:[%s17893_s6 + $0x188] sm:$0xff] }
0x262b   :  { %v10596_v6 = vsel %vm42_vm0, %v10580_v29, 0.0  ;;  %v10579_v11 = vmul.f32 %v17764_v62, %v17764_v62 }
0x262c   :  { %10597 = vadd.xlane.f32.xlu1 %v10596_v6 }
0x262d   :  { %v10593_v1 = vsel %vm42_vm0, %v10579_v11, 0.0 }
0x262e   :  { %10594 = vadd.xlane.f32.xlu0 %v10593_v1 }
0x2654   :  { %v10586_v13 = vpop.xlane.xlu1 %10585 }
0x2655   :  { %v10600_v47 = vmul.f32 0.03125, %v10586_v13 }
0x2656   :  { %v10583_v45 = vpop.xlane.xlu0 %10582 }
0x2657   :  { %v10606_v33 = vadd.f32 1e-05, %v10600_v47  ;;  %v10599_v41 = vmul.f32 0.03125, %v10583_v45  ;;  %v17952_v45 = vld [vmem:[#allocation7_spill] sm:$0xff] }
0x2659   :  { %13853 = vrsqrt.f32 %v10606_v33  ;;  %v10605_v9 = vadd.f32 1e-05, %v10599_v41  ;;  %v10651_v33 = vrot.slane %v17690_v24, %v17952_v45 }
0x265b   :  { %13855 = vrsqrt.f32 %v10605_v9 }
0x2666   :  { %v13854_v21 = vpop.eup %13853 }
0x2667   :  { %v10618_v12 = vmul.f32 %v13854_v21, %v17725_v14  ;;  %v11381_v14 = vld [vmem:[%s17893_s6 + $0x1d8] sm:$0xff] }
0x2668   :  { %v13856_v48 = vpop.eup %13855  ;;  %13300 = vmatprep.subr.mxu1 %v11381_v14 }
0x2669   :  { %v10617_v38 = vmul.f32 %v13856_v48, %v17728_v50  ;;  %v10628_v4 = vmul.f32 %v17783_v46, %v10618_v12  ;;  %13301 = vmatpush3.msra.mxu1 %v11381_v14 }
0x266a   :  { %13302 = vmatprep.subr.mxu1 %v11380_v55 }
0x266b   :  { %v10627_v43 = vmul.f32 %v17783_v46, %v10617_v38  ;;  %v10638_v20 = vadd.f32 %v17789_v37, %v10628_v4  ;;  %13303 = vmatpush3.msra.mxu1 %v11380_v55 }
0x266c   :  { %13304 = vmatprep.subr.mxu1 %v11379_v30 }
0x266d   :  { %v10637_v35 = vadd.f32 %v17789_v37, %v10627_v43  ;;  %13305 = vmatpush3.msra.mxu1 %v11379_v30 }
0x266e   :  { %13306 = vmatprep.subr.mxu1 %v11378_v3 }
0x266f   :  { %13283 = vmatprep.mubr.msk.f32.mxu0 %vm42_vm0, %v10637_v35  ;;  %13307 = vmatpush3.msra.mxu1 %v11378_v3 }
0x2670   :  { %13284 = vmatmul.mubr.msk.f32.vlgmr.msra.gmra.mxu0 %vm42_vm0, %v10638_v20  ;;  %13308 = vmatprep.subr.mxu1 %v11377_v53 }
0x2671   :  { %13309 = vmatpush3.msra.mxu1 %v11377_v53 }
0x2672   :  { %13310 = vmatprep.subr.mxu1 %v11376_v17 }
0x2673   :  { %13311 = vmatpush3.msra.mxu1 %v11376_v17 }
0x2674   :  { %13312 = vmatprep.subr.mxu1 %v11375_v57 }
0x2675   :  { %13313 = vmatpush3.msra.mxu1 %v11375_v57 }
0x2676   :  { %13314 = vmatprep.subr.mxu1 %v11374_v15 }
0x2677   :  { %13315 = vmatpush3.msra.mxu1 %v11374_v15 }
0x2678   :  { %13316 = vmatprep.subr.mxu1 %v11373_v5 }
0x2679   :  { %13317 = vmatpush3.msra.mxu1 %v11373_v5 }
0x267a   :  { %13318 = vmatprep.subr.mxu1 %v11372_v28 }
0x267b   :  { %13319 = vmatpush3.msra.mxu1 %v11372_v28 }
0x267c   :  { %13320 = vmatprep.subr.mxu1 %v11371_v22 }
0x267d   :  { %13321 = vmatpush3.msra.mxu1 %v11371_v22  ;;  %v17953_v22 = vld [vmem:[#allocation8_spill] sm:$0xff] }
0x26ad   :  { %v10592_v59 = vpop.xlane.xlu1 %10591 }
0x26ae   :  { %v10602_v16 = vmul.f32 0.03125, %v10592_v59 }
0x26b0   :  { %v10608_v23 = vadd.f32 1e-05, %v10602_v16 }
0x26b1   :  { %v10589_v7 = vpop.xlane.xlu0 %10588 }
0x26b2   :  { %13857 = vrsqrt.f32 %v10608_v23  ;;  %v10601_v25 = vmul.f32 0.03125, %v10589_v7 }
0x26b4   :  { %v10607_v31 = vadd.f32 1e-05, %v10601_v25 }
0x26b5   :  { %v10598_v50 = vpop.xlane.xlu1 %10597 }
0x26b6   :  { %13859 = vrsqrt.f32 %v10607_v31  ;;  %v10604_v40 = vmul.f32 0.03125, %v10598_v50 }
0x26b7   :  { %v10595_v26 = vpop.xlane.xlu0 %10594 }
0x26b8   :  { %v10610_v34 = vadd.f32 1e-05, %v10604_v40  ;;  %v10603_v19 = vmul.f32 0.03125, %v10595_v26 }
0x26ba   :  { %13861 = vrsqrt.f32 %v10610_v34  ;;  %v10609_v8 = vadd.f32 1e-05, %v10603_v19 }
0x26bc   :  { %13863 = vrsqrt.f32 %v10609_v8 }
0x26bf   :  { %v13858_v18 = vpop.eup %13857 }
0x26c0   :  { %v10620_v49 = vmul.f32 %v13858_v18, %v17749_v61 }
0x26c2   :  { %v10630_v61 = vmul.f32 %v17783_v46, %v10620_v49 }
0x26c3   :  { %v13860_v2 = vpop.eup %13859 }
0x26c4   :  { %v10619_v52 = vmul.f32 %v13860_v2, %v17754_v56  ;;  %v11370_v56 = vld [vmem:[%s17893_s6 + $0x180] sm:$0xff]  ;;  %v10640_v10 = vadd.f32 %v17789_v37, %v10630_v61 }
0x26c5   :  { %13322 = vmatprep.subr.mxu1 %v11370_v56 }
0x26c6   :  { %v10629_v54 = vmul.f32 %v17783_v46, %v10619_v52  ;;  %13323 = vmatpush3.msra.mxu1 %v11370_v56 }
0x26c7   :  { %v13862_v29 = vpop.eup %13861 }
0x26c8   :  { %v10622_v6 = vmul.f32 %v13862_v29, %v17760_v60  ;;  %v10639_v11 = vadd.f32 %v17789_v37, %v10629_v54  ;;  %v10916_v54 = vrot.slane %v17690_v24, %v17953_v22 }
0x26c9   :  { %v13864_v1 = vpop.eup %13863 }
0x26ca   :  { %13286 = vmatprep.mubr.msk.f32.mxu0 %vm42_vm0, %v10639_v11  ;;  %v10621_v58 = vmul.f32 %v13864_v1, %v17764_v62  ;;  %v10632_v13 = vmul.f32 %v17783_v46, %v10622_v6 }
0x26cb   :  { %13287 = vmatmul.mubr.msk.f32.gmra.mxu0 %vm42_vm0, %v10640_v10 }
0x26cc   :  { %v10631_v32 = vmul.f32 %v17783_v46, %v10621_v58  ;;  %v10642_v47 = vadd.f32 %v17789_v37, %v10632_v13 }
0x26ce   :  { %v10641_v60 = vadd.f32 %v17789_v37, %v10631_v32 }
0x26d0   :  { %13289 = vmatprep.mubr.msk.f32.mxu0 %vm42_vm0, %v10641_v60 }
0x26d1   :  { %13290 = vmatmul.mubr.msk.f32.gmra.mxu0 %vm42_vm0, %v10642_v47 }
0x2730   :  { %v13285_v62 = vpop.f32.mrf.mxu0 }
0x2731   :  { %v10742_v41 = vadd.f32 %v13285_v62, %v10651_v33 }
0x2732   :  { %v10736_v9 = vpop.f32.mrf.mxu0 }
0x2733   :  { %v10772_v21 = vmul.f32 0.70710677, %v10742_v41  ;;  %v10737_v12 = vadd.f32 %v10736_v9, %v10651_v33  ;;  %v10766_v43 = vmul.f32 0.5, %v10742_v41 }
0x2735   :  { %13865 = verf.f32 %v10772_v21  ;;  %v10771_v48 = vmul.f32 0.70710677, %v10737_v12  ;;  %v10765_v4 = vmul.f32 0.5, %v10737_v12 }
0x2737   :  { %13867 = verf.f32 %v10771_v48 }
0x2742   :  { %v13866_v46 = vpop.eup %13865 }
0x2743   :  { %v10784_v36 = vadd.f32 1.0, %v13866_v46 }
0x2744   :  { %v13868_v38 = vpop.eup %13867 }
0x2745   :  { %v10783_v37 = vadd.f32 1.0, %v13868_v38  ;;  %v10790_v20 = vmul.f32 %v10784_v36, %v10766_v43 }
0x2747   :  { %v10789_v35 = vmul.f32 %v10783_v37, %v10765_v4 }
0x2749   :  { %13324 = vmatprep.mubr.f32.mxu1 %v10789_v35 }
0x274a   :  { %13325 = vmatmul.mubr.f32.vlgmr.msra.gmra.mxu1 %v10790_v20 }
0x278b   :  { %v13288_v59 = vpop.f32.mrf.mxu0 }
0x278c   :  { %v10752_v16 = vadd.f32 %v13288_v59, %v10651_v33 }
0x278d   :  { %v10746_v23 = vpop.f32.mrf.mxu0 }
0x278e   :  { %v10774_v7 = vmul.f32 0.70710677, %v10752_v16  ;;  %v10747_v27 = vadd.f32 %v10746_v23, %v10651_v33  ;;  %v10768_v53 = vmul.f32 0.5, %v10752_v16 }
0x2790   :  { %13869 = verf.f32 %v10774_v7  ;;  %v10773_v25 = vmul.f32 0.70710677, %v10747_v27  ;;  %v10767_v3 = vmul.f32 0.5, %v10747_v27 }
0x2791   :  { %v13291_v14 = vpop.f32.mrf.mxu0 }
0x2792   :  { %13871 = verf.f32 %v10773_v25  ;;  %v10762_v31 = vadd.f32 %v13291_v14, %v10651_v33 }
0x2793   :  { %v10756_v50 = vpop.f32.mrf.mxu0 }
0x2794   :  { %v10776_v55 = vmul.f32 0.70710677, %v10762_v31  ;;  %v10757_v40 = vadd.f32 %v10756_v50, %v10651_v33  ;;  %v10770_v52 = vmul.f32 0.5, %v10762_v31 }
0x2796   :  { %13873 = verf.f32 %v10776_v55  ;;  %v10775_v26 = vmul.f32 0.70710677, %v10757_v40  ;;  %v10769_v2 = vmul.f32 0.5, %v10757_v40 }
0x2798   :  { %13875 = verf.f32 %v10775_v26 }
0x279d   :  { %v13870_v30 = vpop.eup %13869 }
0x279e   :  { %v10786_v19 = vadd.f32 1.0, %v13870_v30 }
0x279f   :  { %v13872_v34 = vpop.eup %13871 }
0x27a0   :  { %v10785_v8 = vadd.f32 1.0, %v13872_v34  ;;  %v10792_v57 = vmul.f32 %v10786_v19, %v10768_v53 }
0x27a2   :  { %v10791_v17 = vmul.f32 %v10785_v8, %v10767_v3 }
0x27a3   :  { %v13874_v18 = vpop.eup %13873 }
0x27a4   :  { %13327 = vmatprep.mubr.f32.mxu1 %v10791_v17  ;;  %v10788_v15 = vadd.f32 1.0, %v13874_v18 }
0x27a5   :  { %v13876_v49 = vpop.eup %13875  ;;  %13328 = vmatmul.mubr.f32.gmra.mxu1 %v10792_v57 }
0x27a6   :  { %v10787_v5 = vadd.f32 1.0, %v13876_v49  ;;  %v10794_v61 = vmul.f32 %v10788_v15, %v10770_v52 }
0x27a8   :  { %v10793_v28 = vmul.f32 %v10787_v5, %v10769_v2 }
0x27aa   :  { %13330 = vmatprep.mubr.f32.mxu1 %v10793_v28 }
0x27ab   :  { %13331 = vmatmul.mubr.f32.gmra.mxu1 %v10794_v61 }
0x280a   :  { %v13326_v29 = vpop.f32.mrf.mxu1 }
0x280b   :  { %v10908_v56 = vadd.f32 %v13326_v29, %v17695_v0 }
0x280c   :  { %v10878_v6 = vpop.f32.mrf.mxu1 }
0x280d   :  { %v10918_v11 = vadd.f32 %v10916_v54, %v10908_v56  ;;  %v10907_v1 = vadd.f32 %v10878_v6, %v17698_v44 }
0x280f   :  { %10924 = vst.msk [vmem:[%s17894_s8 + $0x8] sm:$0xff] %vm42_vm0, %v10918_v11  ;;  %v10917_v10 = vadd.f32 %v10916_v54, %v10907_v1 }
0x2811   :  { %10923 = vst.msk [vmem:[%s17894_s8] sm:$0xff] %vm42_vm0, %v10917_v10 }
0x2865   :  { %v13329_v58 = vpop.f32.mrf.mxu1 }
0x2866   :  { %v10910_v24 = vadd.f32 %v13329_v58, %v17705_v63 }
0x2867   :  { %v10888_v13 = vpop.f32.mrf.mxu1 }
0x2868   :  { %v10920_v0 = vadd.f32 %v10916_v54, %v10910_v24  ;;  %v10909_v32 = vadd.f32 %v10888_v13, %v17708_v51 }
0x286a   :  { %10926 = vst.msk [vmem:[%s17894_s8 + $0x18] sm:$0xff] %vm42_vm0, %v10920_v0  ;;  %v10919_v44 = vadd.f32 %v10916_v54, %v10909_v32 }
0x286b   :  { %v13332_v60 = vpop.f32.mrf.mxu1 }
0x286c   :  { %10925 = vst.msk [vmem:[%s17894_s8 + $0x10] sm:$0xff] %vm42_vm0, %v10919_v44  ;;  %v10912_v47 = vadd.f32 %v13332_v60, %v17715_v39 }
0x286d   :  { %v10898_v45 = vpop.f32.mrf.mxu1 }
0x286e   :  { %v10922_v63 = vadd.f32 %v10916_v54, %v10912_v47  ;;  %v10911_v33 = vadd.f32 %v10898_v45, %v17718_v42 }
0x2870   :  { %10928 = vst.msk [vmem:[%s17894_s8 + $0x28] sm:$0xff] %vm42_vm0, %v10922_v63  ;;  %v10921_v51 = vadd.f32 %v10916_v54, %v10911_v33 }
0x2872   :  { %10927 = vst.msk [vmem:[%s17894_s8 + $0x20] sm:$0xff] %vm42_vm0, %v10921_v51 }

</bundles_post_ra>
